<compile_context>
chip_gen: v6e
topology: v6e:2x2x1
jax: 0.10.0
libtpu: 0.0.40
codegen_flags: <defaults>
</compile_context>

<pallas_src>
import jax
import jax.numpy as jnp
from jax import lax
from jax.experimental import pallas as pl
from jax.experimental.pallas import tpu as pltpu

KSIZE = 5
C1 = 32
C2 = 64


# ----------------------------------------------------------------------------
# In-kernel helpers
# ----------------------------------------------------------------------------
def _shift_next(x, axis):
    """y[..., i, ...] = x[..., i+1, ...]; the last position duplicates itself
    (it only ever lands on positions that are discarded downstream)."""
    n = x.shape[axis]
    return jnp.concatenate(
        [lax.slice_in_dim(x, 1, n, axis=axis),
         lax.slice_in_dim(x, n - 1, n, axis=axis)],
        axis=axis)


def _stem_kernel(x_ref, t1_ref, b1_ref, t2_ref, b2_ref, o_ref):
    B, H, W = x_ref.shape
    KH = t1_ref.shape[0]
    C1W1 = t1_ref.shape[2]          # lane layout: c1 * W1 + w1
    C2W2 = t2_ref.shape[2]          # lane layout: c2 * W2 + w2
    H1 = H - KH + 1                 # conv1 output height
    Hp1 = H1 // 2                   # pool1 output height
    H2 = Hp1 - KH + 1               # conv2 output height
    Hp2 = H2 // 2                   # pool2 output height
    M2 = 2 * H2                     # conv2 rows processed per kh (uncompacted)

    x = x_ref[...]                                              # (B, H, W)

    # ---- conv1: 5 banded-Toeplitz MXU matmuls (K = W, N = C1*W1) -----------
    acc1 = None
    for kh in range(KH):
        lhs = x[:, kh:kh + H1, :].reshape(B * H1, W)            # trivial merge
        c = jnp.dot(lhs, t1_ref[kh], preferred_element_type=jnp.float32)
        acc1 = c if acc1 is None else acc1 + c
    c1 = (acc1 + b1_ref[...]).reshape(B, H1, C1W1)              # (B, H1, 768)

    # ---- pool1 (2x2, keep-width): valid data at even rows / even lanes -----
    th = jnp.maximum(c1, _shift_next(c1, axis=1))               # pool H pairs
    p1u = jnp.maximum(th, _shift_next(th, axis=2))              # pool W pairs

    # ---- conv2: 5 matmuls (K = C1*W1, N = C2*W2); the odd (junk) lanes of
    #      p1u are killed by zero rows of the Toeplitz matrix ----------------
    acc2 = None
    for kh in range(KH):
        lhs = p1u[:, 2 * kh:2 * kh + M2, :].reshape(B * M2, C1W1)
        c = jnp.dot(lhs, t2_ref[kh], preferred_element_type=jnp.float32)
        acc2 = c if acc2 is None else acc2 + c
    c2 = (acc2 + b2_ref[...]).reshape(B, M2, C2W2)              # valid: even rows

    # ---- pool2 + lane-dense store -------------------------------------------
    # H pairs (h2=2i, 2i+1) live at rows 4i and 4i+2 of the uncompacted c2.
    tv = jnp.maximum(c2[:, 0:M2 - 2, :], c2[:, 2:M2, :])        # valid at rows 4i
    p2u = jnp.maximum(tv, _shift_next(tv, axis=2))              # valid at even lanes
    rows = [p2u[:, 4 * i:4 * i + 1, :] for i in range(Hp2)]     # compact the rows
    o_ref[...] = jnp.concatenate(rows, axis=1).astype(o_ref.dtype)


# ----------------------------------------------------------------------------
# Wrapper-side weight preparation (tiny, one-time XLA work)
# ----------------------------------------------------------------------------
def _conv1_toeplitz(w1, w_in):
    """T1[kh, w, c*W1 + w1col] = w1[c, 0, kh, w - w1col] on the valid band."""
    c1, _, kh_, kw_ = w1.shape
    w1_out = w_in - kw_ + 1
    kw = jnp.arange(w_in)[:, None] - jnp.arange(w1_out)[None, :]
    valid = (kw >= 0) & (kw < kw_)
    kwc = jnp.clip(kw, 0, kw_ - 1)
    w1_k = jnp.transpose(w1[:, 0], (1, 2, 0))                       # (KH, KW, C1)
    g = jnp.where(valid[None, :, :, None], w1_k[:, kwc, :], 0.0)    # (KH, W, W1, C1)
    return jnp.transpose(g, (0, 1, 3, 2)).reshape(kh_, w_in, c1 * w1_out)


def _conv2_toeplitz(w2, w1_out, wp1):
    """T2[kh, ci*W1 + 2*wp, co*W2 + w2col] = w2[co, ci, kh, wp - w2col] on the
    band; all other rows (the junk lanes of the keep-width pooled p1u) are 0."""
    c2, c1, kh_, kw_ = w2.shape
    w2_out = wp1 - kw_ + 1
    kw = jnp.arange(wp1)[:, None] - jnp.arange(w2_out)[None, :]
    valid = (kw >= 0) & (kw < kw_)
    kwc = jnp.clip(kw, 0, kw_ - 1)
    w2_k = jnp.transpose(w2, (2, 3, 1, 0))                          # (KH, KW, C1, C2)
    g = jnp.where(valid[None, :, :, None, None], w2_k[:, kwc, :, :], 0.0)
    d = jnp.transpose(g, (0, 3, 1, 4, 2))                           # (KH,C1,Wp1,C2,W2)
    dz = jnp.stack([d, jnp.zeros_like(d)], axis=3)                  # interleave zeros
    dz = dz.reshape(kh_, c1, 2 * wp1, c2, w2_out)
    if w1_out > 2 * wp1:                                            # odd W1: dead row
        pad = jnp.zeros((kh_, c1, w1_out - 2 * wp1, c2, w2_out), dz.dtype)
        dz = jnp.concatenate([dz, pad], axis=2)
    return dz.reshape(kh_, c1 * w1_out, c2 * w2_out)


# ----------------------------------------------------------------------------
# Forward
# ----------------------------------------------------------------------------
def m_2_stem_forward(x_nchw, params, *, block_n=8):
    """x_nchw: (N, 1, H, W) float32 -> (N, 64, Hout, Wout) float32 (NCHW)."""
    w1, b1, w2, b2 = params            # PyTorch OIHW weights, (C,) biases
    N, Cin, H, W = x_nchw.shape
    assert Cin == 1
    KH = KSIZE
    H1, W1 = H - KH + 1, W - KH + 1
    Hp1, Wp1 = H1 // 2, W1 // 2
    H2, W2 = Hp1 - KH + 1, Wp1 - KH + 1
    Hp2, Wp2 = H2 // 2, W2 // 2
    assert min(H1, W1, H2, W2, Hp2, Wp2) >= 1, "input too small for this stem"

    t1 = _conv1_toeplitz(w1, W)                          # (KH, W, C1*W1)
    t2 = _conv2_toeplitz(w2, W1, Wp1)                    # (KH, C1*W1, C2*W2)
    b1f = jnp.repeat(b1, W1).reshape(1, C1 * W1)
    b2f = jnp.repeat(b2, W2).reshape(1, C2 * W2)

    # --- batch blocking: B images per grid step, grid kept >= 2 for v7x -----
    B = max(1, min(block_n, N))
    if N >= 2:
        B = min(B, (N + 1) // 2)
    Npad = pl.cdiv(N, B) * B
    x3 = x_nchw[:, 0]                                    # (N, H, W), W on lanes
    if Npad != N:
        x3 = jnp.concatenate(
            [x3, jnp.zeros((Npad - N, H, W), x3.dtype)], axis=0)

    out = pl.pallas_call(
        _stem_kernel,
        out_shape=jax.ShapeDtypeStruct((Npad, Hp2, C2 * W2), jnp.float32),
        grid=(Npad // B,),
        in_specs=[
            pl.BlockSpec((B, H, W), lambda n: (n, 0, 0)),
            pl.BlockSpec((KH, W, C1 * W1), lambda n: (0, 0, 0)),
            pl.BlockSpec((1, C1 * W1), lambda n: (0, 0)),
            pl.BlockSpec((KH, C1 * W1, C2 * W2), lambda n: (0, 0, 0)),
            pl.BlockSpec((1, C2 * W2), lambda n: (0, 0)),
        ],
        out_specs=pl.BlockSpec((B, Hp2, C2 * W2), lambda n: (n, 0, 0)),
        compiler_params=pltpu.CompilerParams(
            dimension_semantics=("parallel",)),
    )(x3, t1, b1f, t2, b2f)

    out = out[:N]
    # kernel lanes are (co, w2col) with the pooled value at even w2col;
    # select + transpose to NCHW in the wrapper (cheap XLA on a tiny array).
    y = out.reshape(N, Hp2, C2, W2)[:, :, :, 0:2 * Wp2:2]
    return jnp.transpose(y, (0, 2, 1, 3))                # (N, C2, Hp2, Wp2)


# ----------------------------------------------------------------------------
# Params / reference / test
# ----------------------------------------------------------------------------
def init_params(key):
    """PyTorch Conv2d-like init: U[-1/sqrt(fan_in), +1/sqrt(fan_in)], OIHW."""
    k1, k2, k3, k4 = jax.random.split(key, 4)
    fan1 = 1 * KSIZE * KSIZE
    fan2 = C1 * KSIZE * KSIZE
    bnd1 = 1.0 / (fan1 ** 0.5)
    bnd2 = 1.0 / (fan2 ** 0.5)
    w1 = jax.random.uniform(k1, (C1, 1, KSIZE, KSIZE), jnp.float32, -bnd1, bnd1)
    b1 = jax.random.uniform(k2, (C1,), jnp.float32, -bnd1, bnd1)
    w2 = jax.random.uniform(k3, (C2, C1, KSIZE, KSIZE), jnp.float32, -bnd2, bnd2)
    b2 = jax.random.uniform(k4, (C2,), jnp.float32, -bnd2, bnd2)
    return (w1, b1, w2, b2)


def _reference(x_nchw, params):
    """Plain-JAX reference (conv -> pool -> conv -> pool, VALID, floor pool)."""
    w1, b1, w2, b2 = params

    def conv(x, w, b):
        y = lax.conv_general_dilated(
            x, w, window_strides=(1, 1), padding="VALID",
            dimension_numbers=("NCHW", "OIHW", "NCHW"),
            precision=lax.Precision.HIGHEST)
        return y + b.reshape(1, -1, 1, 1)

    def pool(x):
        return lax.reduce_window(
            x, -jnp.inf, lax.max, (1, 1, 2, 2), (1, 1, 2, 2), "VALID")

    return pool(conv(pool(conv(x_nchw, w1, b1)), w2, b2))


if __name__ == "__main__":
    key = jax.random.PRNGKey(0)
    kx, kp = jax.random.split(key)
    # MNIST-like stem input: batch=2, 1 channel, 28x28 -> output (2, 64, 4, 4)
    x = jax.random.normal(kx, (2, 1, 28, 28), jnp.float32)
    params = init_params(kp)

    fwd = jax.jit(m_2_stem_forward)
    out = jax.block_until_ready(fwd(x, params))
    ref = jax.block_until_ready(_reference(x, params))

    assert out.shape == (2, 64, 4, 4), out.shape
    max_err = float(jnp.max(jnp.abs(out - ref)))
    assert jnp.allclose(out, ref, atol=2e-4, rtol=2e-4), max_err

    print("KERNEL_OK")
</pallas_src>

<mosaic_0001>
module attributes {stable_mosaic.version = 11 : i64} {
  func.func @_stem_kernel(%arg0: i32, %arg1: memref<1x28x28xf32, #tpu.memory_space<vmem>>, %arg2: memref<5x28x768xf32, #tpu.memory_space<vmem>>, %arg3: memref<1x768xf32, #tpu.memory_space<vmem>>, %arg4: memref<5x768x512xf32, #tpu.memory_space<vmem>>, %arg5: memref<1x512xf32, #tpu.memory_space<vmem>>, %arg6: memref<1x4x512xf32, #tpu.memory_space<vmem>>) attributes {dimension_semantics = [#tpu.dimension_semantics<parallel>], iteration_bounds = array<i64: 2>, scalar_prefetch = 0 : i64, scratch_operands = 0 : i64, tpu.core_type = #tpu.core_type<tc>, window_params = [{transform_indices = @transform_0, window_bounds = array<i64: 1, 28, 28>}, {pipeline_mode = #tpu.pipeline_mode<synchronous>, transform_indices = @transform_1, window_bounds = array<i64: 5, 28, 768>}, {pipeline_mode = #tpu.pipeline_mode<synchronous>, transform_indices = @transform_2, window_bounds = array<i64: 1, 768>}, {pipeline_mode = #tpu.pipeline_mode<synchronous>, transform_indices = @transform_3, window_bounds = array<i64: 5, 768, 512>}, {pipeline_mode = #tpu.pipeline_mode<synchronous>, transform_indices = @transform_4, window_bounds = array<i64: 1, 512>}, {transform_indices = @transform_5, window_bounds = array<i64: 1, 4, 512>}]} {
    %c0 = arith.constant 0 : index
    %c0_0 = arith.constant 0 : index
    %c0_1 = arith.constant 0 : index
    %0 = vector.load %arg1[%c0, %c0_0, %c0_1] : memref<1x28x28xf32, #tpu.memory_space<vmem>>, vector<1x28x28xf32>
    %1 = vector.extract_strided_slice %0 {offsets = [0, 0, 0], sizes = [1, 24, 28], strides = [1, 1, 1]} : vector<1x28x28xf32> to vector<1x24x28xf32>
    %2 = vector.shape_cast %1 : vector<1x24x28xf32> to vector<24x28xf32>
    %c0_2 = arith.constant 0 : index
    %c0_3 = arith.constant 0 : index
    %c0_4 = arith.constant 0 : index
    %3 = vector.load %arg2[%c0_2, %c0_3, %c0_4] : memref<5x28x768xf32, #tpu.memory_space<vmem>>, vector<1x28x768xf32>
    %4 = vector.shape_cast %3 : vector<1x28x768xf32> to vector<28x768xf32>
    %cst = arith.constant dense<0.000000e+00> : vector<24x768xf32>
    %5 = tpu.matmul %2, %4, %cst {dimension_numbers = #tpu.dot_dimension_numbers<[1], [0], [0], [1], [0, 0, 1, 1], [], []>} : vector<24x28xf32>, vector<28x768xf32>, vector<24x768xf32> -> vector<24x768xf32>
    %6 = vector.extract_strided_slice %0 {offsets = [0, 1, 0], sizes = [1, 24, 28], strides = [1, 1, 1]} : vector<1x28x28xf32> to vector<1x24x28xf32>
    %7 = vector.shape_cast %6 : vector<1x24x28xf32> to vector<24x28xf32>
    %c1 = arith.constant 1 : index
    %c0_5 = arith.constant 0 : index
    %c0_6 = arith.constant 0 : index
    %8 = vector.load %arg2[%c1, %c0_5, %c0_6] : memref<5x28x768xf32, #tpu.memory_space<vmem>>, vector<1x28x768xf32>
    %9 = vector.shape_cast %8 : vector<1x28x768xf32> to vector<28x768xf32>
    %cst_7 = arith.constant dense<0.000000e+00> : vector<24x768xf32>
    %10 = tpu.matmul %7, %9, %cst_7 {dimension_numbers = #tpu.dot_dimension_numbers<[1], [0], [0], [1], [0, 0, 1, 1], [], []>} : vector<24x28xf32>, vector<28x768xf32>, vector<24x768xf32> -> vector<24x768xf32>
    %11 = arith.addf %5, %10 : vector<24x768xf32>
    %12 = vector.extract_strided_slice %0 {offsets = [0, 2, 0], sizes = [1, 24, 28], strides = [1, 1, 1]} : vector<1x28x28xf32> to vector<1x24x28xf32>
    %13 = vector.shape_cast %12 : vector<1x24x28xf32> to vector<24x28xf32>
    %c2 = arith.constant 2 : index
    %c0_8 = arith.constant 0 : index
    %c0_9 = arith.constant 0 : index
    %14 = vector.load %arg2[%c2, %c0_8, %c0_9] : memref<5x28x768xf32, #tpu.memory_space<vmem>>, vector<1x28x768xf32>
    %15 = vector.shape_cast %14 : vector<1x28x768xf32> to vector<28x768xf32>
    %cst_10 = arith.constant dense<0.000000e+00> : vector<24x768xf32>
    %16 = tpu.matmul %13, %15, %cst_10 {dimension_numbers = #tpu.dot_dimension_numbers<[1], [0], [0], [1], [0, 0, 1, 1], [], []>} : vector<24x28xf32>, vector<28x768xf32>, vector<24x768xf32> -> vector<24x768xf32>
    %17 = arith.addf %11, %16 : vector<24x768xf32>
    %18 = vector.extract_strided_slice %0 {offsets = [0, 3, 0], sizes = [1, 24, 28], strides = [1, 1, 1]} : vector<1x28x28xf32> to vector<1x24x28xf32>
    %19 = vector.shape_cast %18 : vector<1x24x28xf32> to vector<24x28xf32>
    %c3 = arith.constant 3 : index
    %c0_11 = arith.constant 0 : index
    %c0_12 = arith.constant 0 : index
    %20 = vector.load %arg2[%c3, %c0_11, %c0_12] : memref<5x28x768xf32, #tpu.memory_space<vmem>>, vector<1x28x768xf32>
    %21 = vector.shape_cast %20 : vector<1x28x768xf32> to vector<28x768xf32>
    %cst_13 = arith.constant dense<0.000000e+00> : vector<24x768xf32>
    %22 = tpu.matmul %19, %21, %cst_13 {dimension_numbers = #tpu.dot_dimension_numbers<[1], [0], [0], [1], [0, 0, 1, 1], [], []>} : vector<24x28xf32>, vector<28x768xf32>, vector<24x768xf32> -> vector<24x768xf32>
    %23 = arith.addf %17, %22 : vector<24x768xf32>
    %24 = vector.extract_strided_slice %0 {offsets = [0, 4, 0], sizes = [1, 24, 28], strides = [1, 1, 1]} : vector<1x28x28xf32> to vector<1x24x28xf32>
    %25 = vector.shape_cast %24 : vector<1x24x28xf32> to vector<24x28xf32>
    %c4 = arith.constant 4 : index
    %c0_14 = arith.constant 0 : index
    %c0_15 = arith.constant 0 : index
    %26 = vector.load %arg2[%c4, %c0_14, %c0_15] : memref<5x28x768xf32, #tpu.memory_space<vmem>>, vector<1x28x768xf32>
    %27 = vector.shape_cast %26 : vector<1x28x768xf32> to vector<28x768xf32>
    %cst_16 = arith.constant dense<0.000000e+00> : vector<24x768xf32>
    %28 = tpu.matmul %25, %27, %cst_16 {dimension_numbers = #tpu.dot_dimension_numbers<[1], [0], [0], [1], [0, 0, 1, 1], [], []>} : vector<24x28xf32>, vector<28x768xf32>, vector<24x768xf32> -> vector<24x768xf32>
    %29 = arith.addf %23, %28 : vector<24x768xf32>
    %c0_17 = arith.constant 0 : index
    %c0_18 = arith.constant 0 : index
    %30 = vector.load %arg3[%c0_17, %c0_18] : memref<1x768xf32, #tpu.memory_space<vmem>>, vector<1x768xf32>
    %31 = vector.broadcast %30 : vector<1x768xf32> to vector<24x768xf32>
    %32 = arith.addf %29, %31 : vector<24x768xf32>
    %33 = vector.shape_cast %32 : vector<24x768xf32> to vector<1x24x768xf32>
    %34 = vector.extract_strided_slice %33 {offsets = [0, 1, 0], sizes = [1, 23, 768], strides = [1, 1, 1]} : vector<1x24x768xf32> to vector<1x23x768xf32>
    %35 = vector.extract_strided_slice %33 {offsets = [0, 23, 0], sizes = [1, 1, 768], strides = [1, 1, 1]} : vector<1x24x768xf32> to vector<1x1x768xf32>
    %36 = tpu.concatenate %34, %35 in 1 : vector<1x23x768xf32>, vector<1x1x768xf32> -> vector<1x24x768xf32>
    %37 = arith.maximumf %33, %36 : vector<1x24x768xf32>
    %38 = vector.extract_strided_slice %37 {offsets = [0, 0, 1], sizes = [1, 24, 767], strides = [1, 1, 1]} : vector<1x24x768xf32> to vector<1x24x767xf32>
    %39 = vector.extract_strided_slice %37 {offsets = [0, 0, 767], sizes = [1, 24, 1], strides = [1, 1, 1]} : vector<1x24x768xf32> to vector<1x24x1xf32>
    %40 = tpu.concatenate %38, %39 in 2 : vector<1x24x767xf32>, vector<1x24x1xf32> -> vector<1x24x768xf32>
    %41 = arith.maximumf %37, %40 : vector<1x24x768xf32>
    %42 = vector.extract_strided_slice %41 {offsets = [0, 0, 0], sizes = [1, 16, 768], strides = [1, 1, 1]} : vector<1x24x768xf32> to vector<1x16x768xf32>
    %43 = vector.shape_cast %42 : vector<1x16x768xf32> to vector<16x768xf32>
    %c0_19 = arith.constant 0 : index
    %c0_20 = arith.constant 0 : index
    %c0_21 = arith.constant 0 : index
    %44 = vector.load %arg4[%c0_19, %c0_20, %c0_21] : memref<5x768x512xf32, #tpu.memory_space<vmem>>, vector<1x768x512xf32>
    %45 = vector.shape_cast %44 : vector<1x768x512xf32> to vector<768x512xf32>
    %cst_22 = arith.constant dense<0.000000e+00> : vector<16x512xf32>
    %46 = tpu.matmul %43, %45, %cst_22 {dimension_numbers = #tpu.dot_dimension_numbers<[1], [0], [0], [1], [0, 0, 1, 1], [], []>} : vector<16x768xf32>, vector<768x512xf32>, vector<16x512xf32> -> vector<16x512xf32>
    %47 = vector.extract_strided_slice %41 {offsets = [0, 2, 0], sizes = [1, 16, 768], strides = [1, 1, 1]} : vector<1x24x768xf32> to vector<1x16x768xf32>
    %48 = vector.shape_cast %47 : vector<1x16x768xf32> to vector<16x768xf32>
    %c1_23 = arith.constant 1 : index
    %c0_24 = arith.constant 0 : index
    %c0_25 = arith.constant 0 : index
    %49 = vector.load %arg4[%c1_23, %c0_24, %c0_25] : memref<5x768x512xf32, #tpu.memory_space<vmem>>, vector<1x768x512xf32>
    %50 = vector.shape_cast %49 : vector<1x768x512xf32> to vector<768x512xf32>
    %cst_26 = arith.constant dense<0.000000e+00> : vector<16x512xf32>
    %51 = tpu.matmul %48, %50, %cst_26 {dimension_numbers = #tpu.dot_dimension_numbers<[1], [0], [0], [1], [0, 0, 1, 1], [], []>} : vector<16x768xf32>, vector<768x512xf32>, vector<16x512xf32> -> vector<16x512xf32>
    %52 = arith.addf %46, %51 : vector<16x512xf32>
    %53 = vector.extract_strided_slice %41 {offsets = [0, 4, 0], sizes = [1, 16, 768], strides = [1, 1, 1]} : vector<1x24x768xf32> to vector<1x16x768xf32>
    %54 = vector.shape_cast %53 : vector<1x16x768xf32> to vector<16x768xf32>
    %c2_27 = arith.constant 2 : index
    %c0_28 = arith.constant 0 : index
    %c0_29 = arith.constant 0 : index
    %55 = vector.load %arg4[%c2_27, %c0_28, %c0_29] : memref<5x768x512xf32, #tpu.memory_space<vmem>>, vector<1x768x512xf32>
    %56 = vector.shape_cast %55 : vector<1x768x512xf32> to vector<768x512xf32>
    %cst_30 = arith.constant dense<0.000000e+00> : vector<16x512xf32>
    %57 = tpu.matmul %54, %56, %cst_30 {dimension_numbers = #tpu.dot_dimension_numbers<[1], [0], [0], [1], [0, 0, 1, 1], [], []>} : vector<16x768xf32>, vector<768x512xf32>, vector<16x512xf32> -> vector<16x512xf32>
    %58 = arith.addf %52, %57 : vector<16x512xf32>
    %59 = vector.extract_strided_slice %41 {offsets = [0, 6, 0], sizes = [1, 16, 768], strides = [1, 1, 1]} : vector<1x24x768xf32> to vector<1x16x768xf32>
    %60 = vector.shape_cast %59 : vector<1x16x768xf32> to vector<16x768xf32>
    %c3_31 = arith.constant 3 : index
    %c0_32 = arith.constant 0 : index
    %c0_33 = arith.constant 0 : index
    %61 = vector.load %arg4[%c3_31, %c0_32, %c0_33] : memref<5x768x512xf32, #tpu.memory_space<vmem>>, vector<1x768x512xf32>
    %62 = vector.shape_cast %61 : vector<1x768x512xf32> to vector<768x512xf32>
    %cst_34 = arith.constant dense<0.000000e+00> : vector<16x512xf32>
    %63 = tpu.matmul %60, %62, %cst_34 {dimension_numbers = #tpu.dot_dimension_numbers<[1], [0], [0], [1], [0, 0, 1, 1], [], []>} : vector<16x768xf32>, vector<768x512xf32>, vector<16x512xf32> -> vector<16x512xf32>
    %64 = arith.addf %58, %63 : vector<16x512xf32>
    %65 = vector.extract_strided_slice %41 {offsets = [0, 8, 0], sizes = [1, 16, 768], strides = [1, 1, 1]} : vector<1x24x768xf32> to vector<1x16x768xf32>
    %66 = vector.shape_cast %65 : vector<1x16x768xf32> to vector<16x768xf32>
    %c4_35 = arith.constant 4 : index
    %c0_36 = arith.constant 0 : index
    %c0_37 = arith.constant 0 : index
    %67 = vector.load %arg4[%c4_35, %c0_36, %c0_37] : memref<5x768x512xf32, #tpu.memory_space<vmem>>, vector<1x768x512xf32>
    %68 = vector.shape_cast %67 : vector<1x768x512xf32> to vector<768x512xf32>
    %cst_38 = arith.constant dense<0.000000e+00> : vector<16x512xf32>
    %69 = tpu.matmul %66, %68, %cst_38 {dimension_numbers = #tpu.dot_dimension_numbers<[1], [0], [0], [1], [0, 0, 1, 1], [], []>} : vector<16x768xf32>, vector<768x512xf32>, vector<16x512xf32> -> vector<16x512xf32>
    %70 = arith.addf %64, %69 : vector<16x512xf32>
    %c0_39 = arith.constant 0 : index
    %c0_40 = arith.constant 0 : index
    %71 = vector.load %arg5[%c0_39, %c0_40] : memref<1x512xf32, #tpu.memory_space<vmem>>, vector<1x512xf32>
    %72 = vector.broadcast %71 : vector<1x512xf32> to vector<16x512xf32>
    %73 = arith.addf %70, %72 : vector<16x512xf32>
    %74 = vector.shape_cast %73 : vector<16x512xf32> to vector<1x16x512xf32>
    %75 = vector.extract_strided_slice %74 {offsets = [0, 0, 0], sizes = [1, 14, 512], strides = [1, 1, 1]} : vector<1x16x512xf32> to vector<1x14x512xf32>
    %76 = vector.extract_strided_slice %74 {offsets = [0, 2, 0], sizes = [1, 14, 512], strides = [1, 1, 1]} : vector<1x16x512xf32> to vector<1x14x512xf32>
    %77 = arith.maximumf %75, %76 : vector<1x14x512xf32>
    %78 = vector.extract_strided_slice %77 {offsets = [0, 0, 1], sizes = [1, 14, 511], strides = [1, 1, 1]} : vector<1x14x512xf32> to vector<1x14x511xf32>
    %79 = vector.extract_strided_slice %77 {offsets = [0, 0, 511], sizes = [1, 14, 1], strides = [1, 1, 1]} : vector<1x14x512xf32> to vector<1x14x1xf32>
    %80 = tpu.concatenate %78, %79 in 2 : vector<1x14x511xf32>, vector<1x14x1xf32> -> vector<1x14x512xf32>
    %81 = arith.maximumf %77, %80 : vector<1x14x512xf32>
    %82 = vector.extract_strided_slice %81 {offsets = [0, 0, 0], sizes = [1, 1, 512], strides = [1, 1, 1]} : vector<1x14x512xf32> to vector<1x1x512xf32>
    %83 = vector.extract_strided_slice %81 {offsets = [0, 4, 0], sizes = [1, 1, 512], strides = [1, 1, 1]} : vector<1x14x512xf32> to vector<1x1x512xf32>
    %84 = vector.extract_strided_slice %81 {offsets = [0, 8, 0], sizes = [1, 1, 512], strides = [1, 1, 1]} : vector<1x14x512xf32> to vector<1x1x512xf32>
    %85 = vector.extract_strided_slice %81 {offsets = [0, 12, 0], sizes = [1, 1, 512], strides = [1, 1, 1]} : vector<1x14x512xf32> to vector<1x1x512xf32>
    %86 = tpu.concatenate %82, %83, %84, %85 in 1 : vector<1x1x512xf32>, vector<1x1x512xf32>, vector<1x1x512xf32>, vector<1x1x512xf32> -> vector<1x4x512xf32>
    %c0_41 = arith.constant 0 : index
    %c0_42 = arith.constant 0 : index
    %c0_43 = arith.constant 0 : index
    %87 = vector.load %arg6[%c0_41, %c0_42, %c0_43] : memref<1x4x512xf32, #tpu.memory_space<vmem>>, vector<1x4x512xf32>
    tpu.vector_store %arg6[%c0_41, %c0_42, %c0_43], %86 {strides = array<i32>} : memref<1x4x512xf32, #tpu.memory_space<vmem>>, vector<1x4x512xf32>,
    return
  }
  func.func @transform_0(%arg0: i32) -> (i32, i32, i32) {
    %c0_i32 = arith.constant 0 : i32
    %c0_i32_0 = arith.constant 0 : i32
    %c0_i32_1 = arith.constant 0 : i32
    return %arg0, %c0_i32, %c0_i32_0 : i32, i32, i32
  }
  func.func @transform_1(%arg0: i32) -> (i32, i32, i32) {
    %c0_i32 = arith.constant 0 : i32
    %c0_i32_0 = arith.constant 0 : i32
    %c0_i32_1 = arith.constant 0 : i32
    %c0_i32_2 = arith.constant 0 : i32
    return %c0_i32, %c0_i32_0, %c0_i32_1 : i32, i32, i32
  }
  func.func @transform_2(%arg0: i32) -> (i32, i32) {
    %c0_i32 = arith.constant 0 : i32
    %c0_i32_0 = arith.constant 0 : i32
    %c0_i32_1 = arith.constant 0 : i32
    return %c0_i32, %c0_i32_0 : i32, i32
  }
  func.func @transform_3(%arg0: i32) -> (i32, i32, i32) {
    %c0_i32 = arith.constant 0 : i32
    %c0_i32_0 = arith.constant 0 : i32
    %c0_i32_1 = arith.constant 0 : i32
    %c0_i32_2 = arith.constant 0 : i32
    return %c0_i32, %c0_i32_0, %c0_i32_1 : i32, i32, i32
  }
  func.func @transform_4(%arg0: i32) -> (i32, i32) {
    %c0_i32 = arith.constant 0 : i32
    %c0_i32_0 = arith.constant 0 : i32
    %c0_i32_1 = arith.constant 0 : i32
    return %c0_i32, %c0_i32_0 : i32, i32
  }
  func.func @transform_5(%arg0: i32) -> (i32, i32, i32) {
    %c0_i32 = arith.constant 0 : i32
    %c0_i32_0 = arith.constant 0 : i32
    %c0_i32_1 = arith.constant 0 : i32
    return %arg0, %c0_i32, %c0_i32_0 : i32, i32, i32
  }
}

</mosaic_0001>

<bundles_post_ra>
// kernel: m_2_stem_forward.1
= control target key start
LH: loop header
LB: loop body
LE: loop exit
PB: predicated region body
PF: predicated region fallthrough
CT: control target
= control target key end

     0   :  { %s8504_s18 = smov 0   ;;  %s15919_s0 = inlined_call_operand.vmem [shape: f32[2,28,28], index: 0, kind: input, shape index: {}]   ;;  %s15920_s1 = inlined_call_operand.vmem [shape: f32[5,28,768], index: 1, kind: input, shape index: {}]   ;;  %s15921_s2 = inlined_call_operand.vmem [shape: f32[1,768], index: 2, kind: input, shape index: {}]   ;;  %s15922_s3 = inlined_call_operand.vmem [shape: f32[5,768,512], index: 3, kind: input, shape index: {}]   ;;  %s15923_s4 = inlined_call_operand.vmem [shape: f32[1,512], index: 4, kind: input, shape index: {}]   ;;  %s15924_s5 = inlined_call_operand.vmem [shape: f32[2,4,512], index: 5, kind: output, shape index: {}]  }
   0x1 LB: > { %s6686_s19 = sadd.s32 4294967295, %s8470_s18   ;;  %p6690_p0 = scmp.ge.s32.totalorder %s8470_s18, 1  ;;  %s8470_s18 = sphi %s8504_s18, %s15_s18  }
   0x2   : > { %p187_p1 = scmp.lt.s32.totalorder %s8470_s18, 3 }
   0x4   : > { %p188_p2 = pnand %p6690_p0, %p187_p1 }
   0x6   : > { %191 = sbr.rel (%p188_p2) target bundleno = 1748 (0x6d4), region = 40 }
   0xb   : > { %v6714_v0 = vld [vmem:[%s15920_s1 + $0x158] sm:$0xf]  ;;  %vm297_vm0 = vcmask 1043456   ;;  %v6713_v1 = vld [vmem:[%s15920_s1 + $0x150] sm:$0xf]  ;;  %v6708_v2 = vld [vmem:[%s15920_s1 + $0x128] sm:$0xff] }
   0xc   : > { %8406 = vmatprep.subr.msk.mxu1 %vm297_vm0, %v6714_v0  ;;  %6719 = vmatprep.subr.msk.mxu0 %vm297_vm0, %v6714_v0  ;;  %v6707_v3 = vld [vmem:[%s15920_s1 + $0x120] sm:$0xff]  ;;  %p215_p3 = scmp.lt.s32.totalorder %s6686_s19, 1  ;;  %v6702_v4 = vld [vmem:[%s15920_s1 + $0xf8] sm:$0xff]  ;;  %v6701_v5 = vld [vmem:[%s15920_s1 + $0xf0] sm:$0xff]  ;;  %vm282_vm1 = vcmask 1046528   ;;  %vm290_vm2 = vcmask 228352  }
   0xd   : > { %8410 = vmatpush1.msk.msra.mxu1 %vm297_vm0, %v6713_v1  ;;  %6720 = vmatpush1.msk.msra.mxu0 %vm297_vm0, %v6713_v1  ;;  %v6696_v6 = vld [vmem:[%s15920_s1 + $0xc8] sm:$0xff]  ;;  %v6695_v7 = vld [vmem:[%s15920_s1 + $0xc0] sm:$0xff]  ;;  %v6718_v9 = vld [vmem:[%s15920_s1 + $0x178] sm:$0xf]  ;;  %v8472_v17 = vmov 0.0   ;;  %vm1187_vm3 = vcmask 1044480  }
   0xe   : > { %8407 = vmatprep.subr.mxu1 %v6708_v2  ;;  %342 = vmatprep.subr.mxu0 %v6708_v2  ;;  %s15967_s19 = smov (!%p215_p3, %s6686_s19), 1  ;;  %v6716_v8 = vld [vmem:[%s15920_s1 + $0x168] sm:$0xf]  ;;  %v6717_v19 = vld [vmem:[%s15920_s1 + $0x170] sm:$0xf]  ;;  %v6710_v24 = vld [vmem:[%s15920_s1 + $0x138] sm:$0xff] }
   0xf   : > { %8411 = vmatpush1.msra.mxu1 %v6707_v3  ;;  %343 = vmatpush1.msra.mxu0 %v6707_v3  ;;  %s8404_s11 = sshll.u32 %s15967_s19, 5  ;;  %v6715_v21 = vld [vmem:[%s15920_s1 + $0x160] sm:$0xf]  ;;  %v6712_v22 = vld [vmem:[%s15920_s1 + $0x148] sm:$0xff]  ;;  %v6709_v25 = vld [vmem:[%s15920_s1 + $0x130] sm:$0xff]  ;;  %vm863_vm4 = vcmask 1045504  }
  0x10   : > { %8408 = vmatprep.subr.mxu1 %v6702_v4  ;;  %344 = vmatprep.subr.mxu0 %v6702_v4  ;;  %s219_s16 = scalar_lea.vmem %s15919_s0, %s8404_s11  ;;  %v6711_v26 = vld [vmem:[%s15920_s1 + $0x140] sm:$0xff]  ;;  %v6704_v29 = vld [vmem:[%s15920_s1 + $0x108] sm:$0xff]  ;;  %v6706_v35 = vld [vmem:[%s15920_s1 + $0x118] sm:$0xff]  ;;  %vm2003_vm5 = vcmask 1039360   ;;  %vm5093_vm6 = vcmask 1041408   ;;  %vm6607_vm7 = vcmask 1040384  }
  0x11   : > { %8412 = vmatpush1.msra.mxu1 %v6701_v5  ;;  %345 = vmatpush1.msra.mxu0 %v6701_v5  ;;  %v8552_v10 = vld [vmem:[%s219_s16] sm:$0xff]  ;;  %v8554_v11 = vld [vmem:[%s219_s16 + $0x8] sm:$0xff]  ;;  %v8556_v12 = vld [vmem:[%s219_s16 + $0x10] sm:$0xff]  ;;  %vm6616_vm8 = vcmask 1042432  }
  0x12   : > { %8409 = vmatprep.subr.mxu1 %v6696_v6  ;;  %346 = vmatprep.subr.mxu0 %v6696_v6  ;;  %v283_v13 = vrot.slane %v8552_v10, 1  ;;  %v284_v14 = vrot.slane %v8554_v11, 1  ;;  %v8560_v15 = vld [vmem:[%s219_s16 + $0x18] sm:$0xf]  ;;  %v286_v16 = vrot.slane %v8556_v12, 1  ;;  %v1188_v27 = vrot.slane %v8552_v10, 3 }
  0x13   : > { %8413 = vmatpush1.msra.mxu1 %v6695_v7  ;;  %347 = vmatpush1.msra.mxu0 %v6695_v7  ;;  %v288_v18 = vrot.slane %v8560_v15, 1  ;;  %v1189_v28 = vrot.slane %v8554_v11, 3  ;;  %v1191_v31 = vrot.slane %v8556_v12, 3  ;;  %v1193_v32 = vrot.slane %v8560_v15, 3  ;;  %v6703_v34 = vld [vmem:[%s15920_s1 + $0x100] sm:$0xff]  ;;  %v6698_v40 = vld [vmem:[%s15920_s1 + $0xd8] sm:$0xff] }
  0x14   : > { %380 = vmatprep.mubr.f32.mxu0 %v8472_v17  ;;  %392 = vmatprep.mubr.f32.mxu1 %v8472_v17  ;;  %v285_v20 = vsel %vm282_vm1, %v283_v13, %v284_v14  ;;  %v287_v30 = vsel %vm282_vm1, %v284_v14, %v286_v16  ;;  %v1511_v33 = vrot.slane %v8552_v10, 4  ;;  %v1512_v37 = vrot.slane %v8554_v11, 4  ;;  %v6705_v41 = vld [vmem:[%s15920_s1 + $0x110] sm:$0xff]  ;;  %v6700_v48 = vld [vmem:[%s15920_s1 + $0xe8] sm:$0xff]  ;;  %v6699_v49 = vld [vmem:[%s15920_s1 + $0xe0] sm:$0xff]  ;;  %s8473_s16 = smov 127  }
  0x15   : > { %6724 = vmatprep.subr.msk.mxu1 %vm297_vm0, %v6716_v8  ;;  %6729 = vmatprep.subr.msk.mxu0 %vm297_vm0, %v6718_v9  ;;  %v8580_v23 = vsel %vm282_vm1, %v286_v16, %v288_v18  ;;  %v8612_v36 = vsel %vm1187_vm3, %v1188_v27, %v1189_v28  ;;  %v1514_v38 = vrot.slane %v8556_v12, 4  ;;  %v1516_v39 = vrot.slane %v8560_v15, 4  ;;  %v6697_v44 = vld [vmem:[%s15920_s1 + $0xd0] sm:$0xff]  ;;  %v248_v50 = vld [vmem:[%s15920_s1 + $0x98] sm:$0xf]  ;;  %v242_v52 = vld [vmem:[%s15920_s1 + $0x68] sm:$0xff] }
  0x16   : > { %6721 = vmatmul.mubr.msk.f32.vlgmr.msra.gmra.mxu0 %vm290_vm2, %v285_v20  ;;  %6723 = vmatmul.mubr.msk.f32.vlgmr.msra.gmra.mxu1 %vm290_vm2, %v8580_v23  ;;  %v8624_v42 = vsel %vm1187_vm3, %v1189_v28, %v1191_v31  ;;  %v8627_v43 = vsel %vm1187_vm3, %v1191_v31, %v1193_v32  ;;  %v8634_v45 = vsel %vm297_vm0, %v1511_v33, %v1512_v37  ;;  %v247_v51 = vld [vmem:[%s15920_s1 + $0x90] sm:$0xf]  ;;  %v241_v53 = vld [vmem:[%s15920_s1 + $0x60] sm:$0xff]  ;;  %v250_v54 = vld [vmem:[%s15920_s1 + $0xa8] sm:$0xf]  ;;  %v867_v27 = vrot.slane %v8556_v12, 2 }
  0x17   : > { %6730 = vmatpush1.msk.msra.mxu0 %vm297_vm0, %v6717_v19  ;;  %6725 = vmatpush1.msk.msra.mxu1 %vm297_vm0, %v6715_v21  ;;  %v8637_v46 = vsel %vm297_vm0, %v1512_v37, %v1514_v38  ;;  %v8640_v47 = vsel %vm297_vm0, %v1514_v38, %v1516_v39  ;;  %v249_v55 = vld [vmem:[%s15920_s1 + $0xa0] sm:$0xf]  ;;  %v236_v56 = vld [vmem:[%s15920_s1 + $0x38] sm:$0xff]  ;;  %v235_v57 = vld [vmem:[%s15920_s1 + $0x30] sm:$0xff]  ;;  %v865_v21 = vrot.slane %v8554_v11, 2 }
  0x18   : > { %508 = vmatprep.subr.mxu0 %v6712_v22  ;;  %425 = vmatprep.subr.mxu1 %v6710_v24  ;;  %v244_v58 = vld [vmem:[%s15920_s1 + $0x78] sm:$0xff]  ;;  %v243_v59 = vld [vmem:[%s15920_s1 + $0x70] sm:$0xff]  ;;  %v230_v60 = vld [vmem:[%s15920_s1 + $0x8] sm:$0xff] }
  0x19   : > { %386 = vmatprep.mubr.f32.mxu0 %v8472_v17  ;;  %426 = vmatpush1.msra.mxu1 %v6709_v25  ;;  %v238_v61 = vld [vmem:[%s15920_s1 + $0x48] sm:$0xff]  ;;  %v229_v62 = vld [vmem:[%s15920_s1] sm:$0xff]  ;;  %v232_v0 = vld [vmem:[%s15920_s1 + $0x18] sm:$0xff]  ;;  %v868_v31 = vsel %vm863_vm4, %v865_v21, %v867_v27 }
  0x1a   : > { %509 = vmatpush1.msra.mxu0 %v6711_v26  ;;  %427 = vmatprep.subr.mxu1 %v6704_v29  ;;  %v237_v63 = vld [vmem:[%s15920_s1 + $0x40] sm:$0xff]  ;;  %v231_v1 = vld [vmem:[%s15920_s1 + $0x10] sm:$0xff]  ;;  %v252_v2 = vld [vmem:[%s15920_s1 + $0xb8] sm:$0xf] }
  0x1b   : > { %6722 = vmatmul.mubr.msk.f32.gmra.mxu0 %vm290_vm2, %v287_v30  ;;  %428 = vmatpush1.msra.mxu1 %v6703_v34  ;;  %v251_v3 = vld [vmem:[%s15920_s1 + $0xb0] sm:$0xf]  ;;  %v246_v4 = vld [vmem:[%s15920_s1 + $0x88] sm:$0xff]  ;;  %v245_v5 = vld [vmem:[%s15920_s1 + $0x80] sm:$0xff]  ;;  %v869_v34 = vrot.slane %v8560_v15, 2 }
  0x1c   : > { %510 = vmatprep.subr.mxu0 %v6706_v35  ;;  %429 = vmatprep.subr.mxu1 %v6698_v40  ;;  %v6768_v6 = vld [vmem:[%s15920_s1 + $0x218] sm:$0xf]  ;;  %v6767_v7 = vld [vmem:[%s15920_s1 + $0x210] sm:$0xf]  ;;  %v6762_v13 = vld [vmem:[%s15920_s1 + $0x1e8] sm:$0xff] }
  0x1d   : > { %511 = vmatpush1.msra.mxu0 %v6705_v41  ;;  %430 = vmatpush1.msra.mxu1 %v6697_v44  ;;  %v240_v8 = vld [vmem:[%s15920_s1 + $0x58] sm:$0xff]  ;;  %v239_v9 = vld [vmem:[%s15920_s1 + $0x50] sm:$0xff]  ;;  %v6761_v14 = vld [vmem:[%s15920_s1 + $0x1e0] sm:$0xff]  ;;  %v870_v37 = vsel %vm863_vm4, %v867_v27, %v869_v34 }
  0x1e   : > { %463 = vmatprep.mubr.f32.mxu1 %v8472_v17  ;;  %512 = vmatprep.subr.mxu0 %v6700_v48  ;;  %v234_v16 = vld [vmem:[%s15920_s1 + $0x28] sm:$0xff]  ;;  %v6756_v18 = vld [vmem:[%s15920_s1 + $0x1b8] sm:$0xff]  ;;  %v233_v19 = vld [vmem:[%s15920_s1 + $0x20] sm:$0xff] }
  0x1f   : > { %6726 = vmatmul.mubr.msk.f32.vlgmr.msra.gmra.mxu1 %vm290_vm2, %v285_v20  ;;  %513 = vmatpush1.msra.mxu0 %v6699_v49  ;;  %v6755_v22 = vld [vmem:[%s15920_s1 + $0x1b0] sm:$0xff]  ;;  %v6749_v24 = vld [vmem:[%s15920_s1 + $0x180] sm:$0xff]  ;;  %v6770_v25 = vld [vmem:[%s15920_s1 + $0x228] sm:$0xf] }
  0x20   : > { %546 = vmatprep.mubr.f32.mxu0 %v8472_v17  ;;  %6734 = vmatprep.subr.msk.mxu1 %vm297_vm0, %v248_v50  ;;  %v6769_v28 = vld [vmem:[%s15920_s1 + $0x220] sm:$0xf]  ;;  %v6764_v29 = vld [vmem:[%s15920_s1 + $0x1f8] sm:$0xff]  ;;  %v6771_v32 = vld [vmem:[%s15920_s1 + $0x230] sm:$0xf] }
  0x21   : > { %6731 = vmatmul.mubr.msk.f32.vlgmr.msra.gmra.mxu0 %vm290_vm2, %v285_v20  ;;  %6735 = vmatpush1.msk.msra.mxu1 %vm297_vm0, %v247_v51  ;;  %v864_v20 = vrot.slane %v8552_v10, 2  ;;  %v6758_v33 = vld [vmem:[%s15920_s1 + $0x1c8] sm:$0xff]  ;;  %v6757_v35 = vld [vmem:[%s15920_s1 + $0x1c0] sm:$0xff]  ;;  %v6752_v38 = vld [vmem:[%s15920_s1 + $0x198] sm:$0xff] }
  0x22   : > { %469 = vmatprep.mubr.f32.mxu1 %v8472_v17  ;;  %615 = vmatprep.subr.mxu1 %v242_v52  ;;  %v6765_v15 = vld [vmem:[%s15920_s1 + $0x200] sm:$0xff]  ;;  %v6760_v39 = vld [vmem:[%s15920_s1 + $0x1d8] sm:$0xff]  ;;  %v6751_v40 = vld [vmem:[%s15920_s1 + $0x190] sm:$0xff] }
  0x23   : > { %6727 = vmatmul.mubr.msk.f32.gmra.mxu1 %vm290_vm2, %v287_v30  ;;  %552 = vmatprep.mubr.f32.mxu0 %v8472_v17  ;;  %v866_v26 = vsel %vm863_vm4, %v864_v20, %v865_v21  ;;  %v6759_v41 = vld [vmem:[%s15920_s1 + $0x1d0] sm:$0xff]  ;;  %v6753_v44 = vld [vmem:[%s15920_s1 + $0x1a0] sm:$0xff]  ;;  %v6807_v48 = vld [vmem:[%s15920_s1 + $0x2d8] sm:$0xf] }
  0x24   : > { %616 = vmatpush1.msra.mxu1 %v241_v53  ;;  %6739 = vmatprep.subr.msk.mxu0 %vm297_vm0, %v250_v54  ;;  %v6806_v49 = vld [vmem:[%s15920_s1 + $0x2d0] sm:$0xf]  ;;  %v6801_v50 = vld [vmem:[%s15920_s1 + $0x2a8] sm:$0xff]  ;;  %v6800_v51 = vld [vmem:[%s15920_s1 + $0x2a0] sm:$0xff] }
  0x25   : > { %6732 = vmatmul.mubr.msk.f32.gmra.mxu0 %vm290_vm2, %v287_v30  ;;  %617 = vmatprep.subr.mxu1 %v236_v56  ;;  %v6763_v30 = vld [vmem:[%s15920_s1 + $0x1f0] sm:$0xff]  ;;  %v6809_v52 = vld [vmem:[%s15920_s1 + $0x2e8] sm:$0xf]  ;;  %v6808_v53 = vld [vmem:[%s15920_s1 + $0x2e0] sm:$0xf] }
  0x26   : > { %6740 = vmatpush1.msk.msra.mxu0 %vm297_vm0, %v249_v55  ;;  %475 = vmatprep.mubr.f32.mxu1 %v8472_v17  ;;  %v6795_v54 = vld [vmem:[%s15920_s1 + $0x278] sm:$0xff]  ;;  %v6794_v55 = vld [vmem:[%s15920_s1 + $0x270] sm:$0xff]  ;;  %v6827_v20 = vld [vmem:[%s15920_s1 + $0x300] sm:$0xff] }
  0x27   : > { %618 = vmatpush1.msra.mxu1 %v235_v57  ;;  %698 = vmatprep.subr.mxu0 %v244_v58  ;;  %v6803_v56 = vld [vmem:[%s15920_s1 + $0x2b8] sm:$0xff]  ;;  %v6802_v57 = vld [vmem:[%s15920_s1 + $0x2b0] sm:$0xff]  ;;  %v6789_v58 = vld [vmem:[%s15920_s1 + $0x248] sm:$0xff] }
  0x28   : > { %6728 = vmatmul.mubr.msk.f32.gmra.mxu1 %vm290_vm2, %v8580_v23  ;;  %558 = vmatprep.mubr.f32.mxu0 %v8472_v17  ;;  %v6848_v21 = vld [vmem:[%s15920_s1 + $0x3a8] sm:$0xf]  ;;  %v6835_v27 = vld [vmem:[%s15920_s1 + $0x340] sm:$0xff] }
  0x29   : > { %699 = vmatpush1.msra.mxu0 %v243_v59  ;;  %619 = vmatprep.subr.mxu1 %v230_v60  ;;  %v6797_v59 = vld [vmem:[%s15920_s1 + $0x288] sm:$0xff]  ;;  %v6788_v60 = vld [vmem:[%s15920_s1 + $0x240] sm:$0xff] }
  0x2a   : > { %6733 = vmatmul.mubr.msk.f32.gmra.mxu0 %vm290_vm2, %v8580_v23  ;;  %700 = vmatprep.subr.mxu0 %v238_v61  ;;  %v6750_v23 = vld [vmem:[%s15920_s1 + $0x188] sm:$0xff]  ;;  %v6796_v61 = vld [vmem:[%s15920_s1 + $0x280] sm:$0xff] }
  0x2b   : > { %620 = vmatpush1.msra.mxu1 %v229_v62  ;;  %701 = vmatpush1.msra.mxu0 %v237_v63  ;;  %v6791_v62 = vld [vmem:[%s15920_s1 + $0x258] sm:$0xff]  ;;  %v6790_v63 = vld [vmem:[%s15920_s1 + $0x250] sm:$0xff] }
  0x2c   : > { %653 = vmatprep.mubr.f32.mxu1 %v8472_v17  ;;  %702 = vmatprep.subr.mxu0 %v232_v0  ;;  %v6811_v0 = vld [vmem:[%s15920_s1 + $0x2f8] sm:$0xf] }
  0x2d   : > { %6736 = vmatmul.mubr.msk.f32.vlgmr.msra.gmra.mxu1 %vm290_vm2, %v8552_v10  ;;  %703 = vmatpush1.msra.mxu0 %v231_v1  ;;  %v6810_v1 = vld [vmem:[%s15920_s1 + $0x2f0] sm:$0xf] }
  0x2e   : > { %736 = vmatprep.mubr.f32.mxu0 %v8472_v17  ;;  %6744 = vmatprep.subr.msk.mxu1 %vm297_vm0, %v252_v2  ;;  %v6805_v2 = vld [vmem:[%s15920_s1 + $0x2c8] sm:$0xff] }
  0x2f   : > { %6741 = vmatmul.mubr.msk.f32.vlgmr.msra.gmra.mxu0 %vm290_vm2, %v8552_v10  ;;  %6745 = vmatpush1.msk.msra.mxu1 %vm297_vm0, %v251_v3  ;;  %v6804_v3 = vld [vmem:[%s15920_s1 + $0x2c0] sm:$0xff] }
  0x30   : > { %659 = vmatprep.mubr.f32.mxu1 %v8472_v17  ;;  %781 = vmatprep.subr.mxu1 %v246_v4  ;;  %v6846_v4 = vld [vmem:[%s15920_s1 + $0x398] sm:$0xf] }
  0x31   : > { %6737 = vmatmul.mubr.msk.f32.gmra.mxu1 %vm290_vm2, %v8554_v11  ;;  %742 = vmatprep.mubr.f32.mxu0 %v8472_v17 }
  0x32   : > { %782 = vmatpush1.msra.mxu1 %v245_v5  ;;  %6773 = vmatprep.subr.msk.mxu0 %vm297_vm0, %v6768_v6  ;;  %v6845_v5 = vld [vmem:[%s15920_s1 + $0x390] sm:$0xf]  ;;  %v6799_v6 = vld [vmem:[%s15920_s1 + $0x298] sm:$0xff] }
  0x33   : > { %6742 = vmatmul.mubr.msk.f32.gmra.mxu0 %vm290_vm2, %v8554_v11  ;;  %783 = vmatprep.subr.mxu1 %v240_v8  ;;  %v6840_v8 = vld [vmem:[%s15920_s1 + $0x368] sm:$0xff] }
  0x34   : > { %6774 = vmatpush1.msk.msra.mxu0 %vm297_vm0, %v6767_v7  ;;  %665 = vmatprep.mubr.f32.mxu1 %v8472_v17  ;;  %v6798_v7 = vld [vmem:[%s15920_s1 + $0x290] sm:$0xff] }
  0x35   : > { %784 = vmatpush1.msra.mxu1 %v239_v9  ;;  %921 = vmatprep.subr.mxu0 %v6762_v13  ;;  %v6839_v9 = vld [vmem:[%s15920_s1 + $0x360] sm:$0xff]  ;;  %v6793_v13 = vld [vmem:[%s15920_s1 + $0x268] sm:$0xff] }
  0x36   : > { %6738 = vmatmul.mubr.msk.f32.gmra.mxu1 %vm290_vm2, %v8556_v12  ;;  %748 = vmatprep.mubr.f32.mxu0 %v8472_v17 }
  0x37   : > { %922 = vmatpush1.msra.mxu0 %v6761_v14  ;;  %785 = vmatprep.subr.mxu1 %v234_v16  ;;  %v6834_v14 = vld [vmem:[%s15920_s1 + $0x338] sm:$0xff]  ;;  %v6792_v16 = vld [vmem:[%s15920_s1 + $0x260] sm:$0xff] }
  0x38   : > { %6743 = vmatmul.mubr.msk.f32.gmra.mxu0 %vm290_vm2, %v8556_v12  ;;  %923 = vmatprep.subr.mxu0 %v6756_v18  ;;  %v6833_v18 = vld [vmem:[%s15920_s1 + $0x330] sm:$0xff] }
  0x39   : > { %786 = vmatpush1.msra.mxu1 %v233_v19  ;;  %924 = vmatpush1.msra.mxu0 %v6755_v22  ;;  %v6828_v19 = vld [vmem:[%s15920_s1 + $0x308] sm:$0xff]  ;;  %v6847_v22 = vld [vmem:[%s15920_s1 + $0x3a0] sm:$0xf] }
  0x3a   : > { %819 = vmatprep.mubr.f32.mxu1 %v8472_v17  ;;  %925 = vmatprep.subr.mxu0 %v6750_v23  ;;  %v6842_v23 = vld [vmem:[%s15920_s1 + $0x378] sm:$0xff] }
  0x3b   : > { %6746 = vmatmul.mubr.msk.f32.vlgmr.msra.gmra.mxu1 %vm290_vm2, %v8552_v10  ;;  %926 = vmatpush1.msra.mxu0 %v6749_v24  ;;  %v6772_v10 = vld [vmem:[%s15920_s1 + $0x238] sm:$0xf] }
  0x3c   : > { %959 = vmatprep.mubr.f32.mxu0 %v8472_v17  ;;  %6778 = vmatprep.subr.msk.mxu1 %vm297_vm0, %v6770_v25  ;;  %v6850_v24 = vld [vmem:[%s15920_s1 + $0x3b8] sm:$0xf]  ;;  %v6849_v25 = vld [vmem:[%s15920_s1 + $0x3b0] sm:$0xf] }
  0x3d   : > { %6775 = vmatmul.mubr.msk.f32.vlgmr.msra.gmra.mxu0 %vm290_vm2, %v866_v26  ;;  %6779 = vmatpush1.msk.msra.mxu1 %vm297_vm0, %v6769_v28  ;;  %v6843_v28 = vld [vmem:[%s15920_s1 + $0x380] sm:$0xff] }
  0x3e   : > { %825 = vmatprep.mubr.f32.mxu1 %v8472_v17  ;;  %1004 = vmatprep.subr.mxu1 %v6764_v29  ;;  %v6830_v29 = vld [vmem:[%s15920_s1 + $0x318] sm:$0xff] }
  0x3f   : > { %6747 = vmatmul.mubr.msk.f32.gmra.mxu1 %vm290_vm2, %v8554_v11  ;;  %965 = vmatprep.mubr.f32.mxu0 %v8472_v17  ;;  %v6766_v11 = vld [vmem:[%s15920_s1 + $0x208] sm:$0xff] }
  0x40   : > { %1005 = vmatpush1.msra.mxu1 %v6763_v30  ;;  %6783 = vmatprep.subr.msk.mxu0 %vm297_vm0, %v6772_v10  ;;  %v6838_v30 = vld [vmem:[%s15920_s1 + $0x358] sm:$0xff]  ;;  %v6829_v10 = vld [vmem:[%s15920_s1 + $0x310] sm:$0xff] }
  0x41   : > { %6776 = vmatmul.mubr.msk.f32.gmra.mxu0 %vm290_vm2, %v868_v31  ;;  %1006 = vmatprep.subr.mxu1 %v6758_v33  ;;  %v6926_v33 = vld [vmem:[%s15922_s3 + $0xde0] sm:$0xff] }
  0x42   : > { %6784 = vmatpush1.msk.msra.mxu0 %vm297_vm0, %v6771_v32  ;;  %831 = vmatprep.mubr.f32.mxu1 %v8472_v17  ;;  %v6831_v32 = vld [vmem:[%s15920_s1 + $0x320] sm:$0xff] }
  0x43   : > { %1007 = vmatpush1.msra.mxu1 %v6757_v35  ;;  %1087 = vmatprep.subr.mxu0 %v6766_v11  ;;  %v6919_v35 = vld [vmem:[%s15922_s3 + $0xda8] sm:$0xff]  ;;  %v7054_v11 = vld [vmem:[%s15922_s3 + $0x11e0] sm:$0xff] }
  0x44   : > { %6748 = vmatmul.mubr.msk.f32.gmra.mxu1 %vm290_vm2, %v8556_v12  ;;  %971 = vmatprep.mubr.f32.mxu0 %v8472_v17  ;;  %v6754_v12 = vld [vmem:[%s15920_s1 + $0x1a8] sm:$0xff] }
  0x45   : > { %1088 = vmatpush1.msra.mxu0 %v6765_v15  ;;  %1008 = vmatprep.subr.mxu1 %v6752_v38  ;;  %v7051_v38 = vld [vmem:[%s15922_s3 + $0x11c8] sm:$0xff] }
  0x46   : > { %6777 = vmatmul.mubr.msk.f32.gmra.mxu0 %vm290_vm2, %v870_v37  ;;  %1089 = vmatprep.subr.mxu0 %v6760_v39  ;;  %v7050_v39 = vld [vmem:[%s15922_s3 + $0x11c0] sm:$0xff] }
  0x47   : > { %1009 = vmatpush1.msra.mxu1 %v6751_v40  ;;  %1090 = vmatpush1.msra.mxu0 %v6759_v41  ;;  %v6915_v41 = vld [vmem:[%s15922_s3 + $0xd88] sm:$0xff] }
  0x48   : > { %1042 = vmatprep.mubr.f32.mxu1 %v8472_v17  ;;  %1091 = vmatprep.subr.mxu0 %v6754_v12  ;;  %v7047_v12 = vld [vmem:[%s15922_s3 + $0x11a8] sm:$0xff] }
  0x49   : > { %6780 = vmatmul.mubr.msk.f32.vlgmr.msra.gmra.mxu1 %vm290_vm2, %v866_v26  ;;  %1092 = vmatpush1.msra.mxu0 %v6753_v44  ;;  %v6914_v44 = vld [vmem:[%s15922_s3 + $0xd80] sm:$0xff] }
  0x4a   : > { %1125 = vmatprep.mubr.f32.mxu0 %v8472_v17  ;;  %6812 = vmatprep.subr.msk.mxu1 %vm297_vm0, %v6807_v48  ;;  %v7046_v48 = vld [vmem:[%s15922_s3 + $0x11a0] sm:$0xff] }
  0x4b   : > { %6785 = vmatmul.mubr.msk.f32.vlgmr.msra.gmra.mxu0 %vm290_vm2, %v866_v26  ;;  %6813 = vmatpush1.msk.msra.mxu1 %vm297_vm0, %v6806_v49  ;;  %v6836_v26 = vld [vmem:[%s15920_s1 + $0x348] sm:$0xff] }
  0x4c   : > { %1048 = vmatprep.mubr.f32.mxu1 %v8472_v17  ;;  %1245 = vmatprep.subr.mxu1 %v6801_v50  ;;  %v7043_v49 = vld [vmem:[%s15922_s3 + $0x1188] sm:$0xff] }
  0x4d   : > { %6781 = vmatmul.mubr.msk.f32.gmra.mxu1 %vm290_vm2, %v868_v31  ;;  %1131 = vmatprep.mubr.f32.mxu0 %v8472_v17 }
  0x4e   : > { %1246 = vmatpush1.msra.mxu1 %v6800_v51  ;;  %6817 = vmatprep.subr.msk.mxu0 %vm297_vm0, %v6809_v52  ;;  %v6911_v51 = vld [vmem:[%s15922_s3 + $0xd68] sm:$0xff]  ;;  %v7042_v52 = vld [vmem:[%s15922_s3 + $0x1180] sm:$0xff] }
  0x4f   : > { %6786 = vmatmul.mubr.msk.f32.gmra.mxu0 %vm290_vm2, %v868_v31  ;;  %1247 = vmatprep.subr.mxu1 %v6795_v54  ;;  %v6837_v31 = vld [vmem:[%s15920_s1 + $0x350] sm:$0xff]  ;;  %v7039_v54 = vld [vmem:[%s15922_s3 + $0x1168] sm:$0xff] }
  0x50   : > { %6818 = vmatpush1.msk.msra.mxu0 %vm297_vm0, %v6808_v53  ;;  %1054 = vmatprep.mubr.f32.mxu1 %v8472_v17  ;;  %v6910_v53 = vld [vmem:[%s15922_s3 + $0xd60] sm:$0xff] }
  0x51   : > { %1248 = vmatpush1.msra.mxu1 %v6794_v55  ;;  %1328 = vmatprep.subr.mxu0 %v6803_v56 }
  0x52   : > { %6782 = vmatmul.mubr.msk.f32.gmra.mxu1 %vm290_vm2, %v870_v37  ;;  %1137 = vmatprep.mubr.f32.mxu0 %v8472_v17 }
  0x53   : > { %1329 = vmatpush1.msra.mxu0 %v6802_v57  ;;  %1249 = vmatprep.subr.mxu1 %v6789_v58  ;;  %v6907_v57 = vld [vmem:[%s15922_s3 + $0xd48] sm:$0xff]  ;;  %v7038_v58 = vld [vmem:[%s15922_s3 + $0x1160] sm:$0xff] }
  0x54   : > { %6787 = vmatmul.mubr.msk.f32.gmra.mxu0 %vm290_vm2, %v870_v37  ;;  %1330 = vmatprep.subr.mxu0 %v6797_v59  ;;  %v6918_v37 = vld [vmem:[%s15922_s3 + $0xda0] sm:$0xff] }
  0x55   : > { %1250 = vmatpush1.msra.mxu1 %v6788_v60  ;;  %1331 = vmatpush1.msra.mxu0 %v6796_v61  ;;  %v6906_v59 = vld [vmem:[%s15922_s3 + $0xd40] sm:$0xff]  ;;  %v7035_v60 = vld [vmem:[%s15922_s3 + $0x1148] sm:$0xff] }
  0x56   : > { %1283 = vmatprep.mubr.f32.mxu1 %v8472_v17  ;;  %1332 = vmatprep.subr.mxu0 %v6791_v62  ;;  %v6903_v62 = vld [vmem:[%s15922_s3 + $0xd28] sm:$0xff] }
  0x57   : > { %6814 = vmatmul.mubr.msk.f32.vlgmr.msra.gmra.mxu1 %vm290_vm2, %v8612_v36  ;;  %1333 = vmatpush1.msra.mxu0 %v6790_v63  ;;  %v7034_v63 = vld [vmem:[%s15922_s3 + $0x1140] sm:$0xff] }
  0x58   : > { %1366 = vmatprep.mubr.f32.mxu0 %v8472_v17  ;;  %6822 = vmatprep.subr.msk.mxu1 %vm297_vm0, %v6811_v0  ;;  %v6902_v0 = vld [vmem:[%s15922_s3 + $0xd20] sm:$0xff] }
  0x59   : > { %6819 = vmatmul.mubr.msk.f32.vlgmr.msra.gmra.mxu0 %vm290_vm2, %v8612_v36  ;;  %6823 = vmatpush1.msk.msra.mxu1 %vm297_vm0, %v6810_v1  ;;  %v7031_v1 = vld [vmem:[%s15922_s3 + $0x1128] sm:$0xff] }
  0x5a   : > { %1289 = vmatprep.mubr.f32.mxu1 %v8472_v17  ;;  %1411 = vmatprep.subr.mxu1 %v6805_v2 }
  0x5b   : > { %6815 = vmatmul.mubr.msk.f32.gmra.mxu1 %vm290_vm2, %v8624_v42  ;;  %1372 = vmatprep.mubr.f32.mxu0 %v8472_v17 }
  0x5c   : > { %1412 = vmatpush1.msra.mxu1 %v6804_v3  ;;  %6851 = vmatprep.subr.msk.mxu0 %vm297_vm0, %v6846_v4  ;;  %v6899_v4 = vld [vmem:[%s15922_s3 + $0xd08] sm:$0xff] }
  0x5d   : > { %6820 = vmatmul.mubr.msk.f32.gmra.mxu0 %vm290_vm2, %v8624_v42  ;;  %1413 = vmatprep.subr.mxu1 %v6799_v6  ;;  %v6898_v6 = vld [vmem:[%s15922_s3 + $0xd00] sm:$0xff] }
  0x5e   : > { %6852 = vmatpush1.msk.msra.mxu0 %vm297_vm0, %v6845_v5  ;;  %1295 = vmatprep.mubr.f32.mxu1 %v8472_v17  ;;  %v7030_v5 = vld [vmem:[%s15922_s3 + $0x1120] sm:$0xff] }
  0x5f   : > { %1414 = vmatpush1.msra.mxu1 %v6798_v7  ;;  %1568 = vmatprep.subr.mxu0 %v6840_v8  ;;  %v7027_v7 = vld [vmem:[%s15922_s3 + $0x1108] sm:$0xff] }
  0x60   : > { %6816 = vmatmul.mubr.msk.f32.gmra.mxu1 %vm290_vm2, %v8627_v43  ;;  %1378 = vmatprep.mubr.f32.mxu0 %v8472_v17 }
  0x61   : > { %1569 = vmatpush1.msra.mxu0 %v6839_v9  ;;  %1415 = vmatprep.subr.mxu1 %v6793_v13  ;;  %v6895_v13 = vld [vmem:[%s15922_s3 + $0xce8] sm:$0xff] }
  0x62   : > { %6821 = vmatmul.mubr.msk.f32.gmra.mxu0 %vm290_vm2, %v8627_v43  ;;  %1570 = vmatprep.subr.mxu0 %v6834_v14  ;;  %v7026_v14 = vld [vmem:[%s15922_s3 + $0x1100] sm:$0xff] }
  0x63   : > { %1416 = vmatpush1.msra.mxu1 %v6792_v16  ;;  %1571 = vmatpush1.msra.mxu0 %v6833_v18  ;;  %v6894_v16 = vld [vmem:[%s15922_s3 + $0xce0] sm:$0xff]  ;;  %v7023_v18 = vld [vmem:[%s15922_s3 + $0x10e8] sm:$0xff] }
  0x64   : > { %1449 = vmatprep.mubr.f32.mxu1 %v8472_v17  ;;  %1572 = vmatprep.subr.mxu0 %v6828_v19 }
  0x65   : > { %6824 = vmatmul.mubr.msk.f32.vlgmr.msra.gmra.mxu1 %vm290_vm2, %v8612_v36  ;;  %1573 = vmatpush1.msra.mxu0 %v6827_v20  ;;  %v6841_v36 = vld [vmem:[%s15920_s1 + $0x370] sm:$0xff] }
  0x66   : > { %1606 = vmatprep.mubr.f32.mxu0 %v8472_v17  ;;  %6856 = vmatprep.subr.msk.mxu1 %vm297_vm0, %v6848_v21  ;;  %v6891_v21 = vld [vmem:[%s15922_s3 + $0xcc8] sm:$0xff] }
  0x67   : > { %6853 = vmatmul.mubr.msk.f32.vlgmr.msra.gmra.mxu0 %vm290_vm2, %v8634_v45  ;;  %6857 = vmatpush1.msk.msra.mxu1 %vm297_vm0, %v6847_v22  ;;  %v7022_v22 = vld [vmem:[%s15922_s3 + $0x10e0] sm:$0xff] }
  0x68   : > { %1455 = vmatprep.mubr.f32.mxu1 %v8472_v17  ;;  %1651 = vmatprep.subr.mxu1 %v6842_v23  ;;  %v6890_v23 = vld [vmem:[%s15922_s3 + $0xcc0] sm:$0xff] }
  0x69   : > { %6825 = vmatmul.mubr.msk.f32.gmra.mxu1 %vm290_vm2, %v8624_v42  ;;  %1612 = vmatprep.mubr.f32.mxu0 %v8472_v17  ;;  %v6844_v42 = vld [vmem:[%s15920_s1 + $0x388] sm:$0xff] }
  0x6a   : > { %1652 = vmatpush1.msra.mxu1 %v6841_v36  ;;  %6861 = vmatprep.subr.msk.mxu0 %vm297_vm0, %v6850_v24  ;;  %v7019_v36 = vld [vmem:[%s15922_s3 + $0x10c8] sm:$0xff] }
  0x6b   : > { %6854 = vmatmul.mubr.msk.f32.gmra.mxu0 %vm290_vm2, %v8637_v46  ;;  %1653 = vmatprep.subr.mxu1 %v6836_v26  ;;  %v7018_v26 = vld [vmem:[%s15922_s3 + $0x10c0] sm:$0xff] }
  0x6c   : > { %6862 = vmatpush1.msk.msra.mxu0 %vm297_vm0, %v6849_v25  ;;  %1461 = vmatprep.mubr.f32.mxu1 %v8472_v17  ;;  %v6887_v25 = vld [vmem:[%s15922_s3 + $0xca8] sm:$0xff] }
  0x6d   : > { %1654 = vmatpush1.msra.mxu1 %v6835_v27  ;;  %1734 = vmatprep.subr.mxu0 %v6844_v42  ;;  %v6886_v42 = vld [vmem:[%s15922_s3 + $0xca0] sm:$0xff] }
  0x6e   : > { %6826 = vmatmul.mubr.msk.f32.gmra.mxu1 %vm290_vm2, %v8627_v43  ;;  %1618 = vmatprep.mubr.f32.mxu0 %v8472_v17  ;;  %v6832_v43 = vld [vmem:[%s15920_s1 + $0x328] sm:$0xff] }
  0x6f   : > { %1735 = vmatpush1.msra.mxu0 %v6843_v28  ;;  %1655 = vmatprep.subr.mxu1 %v6830_v29  ;;  %v7015_v28 = vld [vmem:[%s15922_s3 + $0x10a8] sm:$0xff] }
  0x70   : > { %6855 = vmatmul.mubr.msk.f32.gmra.mxu0 %vm290_vm2, %v8640_v47  ;;  %1736 = vmatprep.subr.mxu0 %v6838_v30  ;;  %v6883_v29 = vld [vmem:[%s15922_s3 + $0xc88] sm:$0xff]  ;;  %v7014_v30 = vld [vmem:[%s15922_s3 + $0x10a0] sm:$0xff] }
  0x71   : > { %1656 = vmatpush1.msra.mxu1 %v6829_v10  ;;  %1737 = vmatpush1.msra.mxu0 %v6837_v31 }
  0x72   : > { %1689 = vmatprep.mubr.f32.mxu1 %v8472_v17  ;;  %1738 = vmatprep.subr.mxu0 %v6832_v43  ;;  %v6882_v43 = vld [vmem:[%s15922_s3 + $0xc80] sm:$0xff] }
  0x73   : > { %6858 = vmatmul.mubr.msk.f32.vlgmr.msra.gmra.mxu1 %vm290_vm2, %v8634_v45  ;;  %1739 = vmatpush1.msra.mxu0 %v6831_v32  ;;  %v7011_v32 = vld [vmem:[%s15922_s3 + $0x1088] sm:$0xff] }
  0x74   : > { %1772 = vmatprep.mubr.f32.mxu0 %v8472_v17  ;;  %1695 = vmatprep.mubr.f32.mxu1 %v8472_v17 }
  0x75   : > { %6863 = vmatmul.mubr.msk.f32.vlgmr.msra.gmra.mxu0 %vm290_vm2, %v8634_v45  ;;  %v6927_v45 = vld [vmem:[%s15922_s3 + $0xde8] sm:$0xff] }
  0x76   : > { %1778 = vmatprep.mubr.f32.mxu0 %v8472_v17  ;;  %2887 = vmatprep.subr.mxu1 %v6927_v45  ;;  %v6879_v45 = vld [vmem:[%s15922_s3 + $0xc68] sm:$0xff] }
  0x77   : > { %6859 = vmatmul.mubr.msk.f32.gmra.mxu1 %vm290_vm2, %v8637_v46 }
  0x78   : > { %1701 = vmatprep.mubr.f32.mxu1 %v8472_v17  ;;  %2888 = vmatpush1.msra.mxu1 %v6926_v33  ;;  %v7010_v33 = vld [vmem:[%s15922_s3 + $0x1080] sm:$0xff] }
  0x79   : > { %6864 = vmatmul.mubr.msk.f32.gmra.mxu0 %vm290_vm2, %v8637_v46  ;;  %v6923_v46 = vld [vmem:[%s15922_s3 + $0xdc8] sm:$0xff] }
  0x7a   : > { %1784 = vmatprep.mubr.f32.mxu0 %v8472_v17  ;;  %v6922_v17 = vld [vmem:[%s15922_s3 + $0xdc0] sm:$0xff]  ;;  %2889 = vmatprep.subr.mxu1 %v6923_v46 }
  0x7b   : > { %6860 = vmatmul.mubr.msk.f32.gmra.mxu1 %vm290_vm2, %v8640_v47 }
  0x7c   : > { %2890 = vmatpush1.msra.mxu1 %v6922_v17  ;;  %v6878_v17 = vld [vmem:[%s15922_s3 + $0xc60] sm:$0xff] }
  0x7d   : > { %6865 = vmatmul.mubr.msk.f32.gmra.mxu0 %vm290_vm2, %v8640_v47  ;;  %v7055_v47 = vld [vmem:[%s15922_s3 + $0x11e8] sm:$0xff]  ;;  %2891 = vmatprep.subr.mxu1 %v6919_v35 }
  0x7e   : > { %2964 = vmatprep.subr.mxu0 %v7055_v47  ;;  %2892 = vmatpush1.msra.mxu1 %v6918_v37  ;;  %v7007_v47 = vld [vmem:[%s15922_s3 + $0x1068] sm:$0xff]  ;;  %v7006_v37 = vld [vmem:[%s15922_s3 + $0x1060] sm:$0xff] }
  0x7f   : > { %2965 = vmatpush1.msra.mxu0 %v7054_v11  ;;  %2893 = vmatprep.subr.mxu1 %v6915_v41  ;;  %v6875_v11 = vld [vmem:[%s15922_s3 + $0xc48] sm:$0xff] }
  0x80   : > { %2966 = vmatprep.subr.mxu0 %v7051_v38  ;;  %2894 = vmatpush1.msra.mxu1 %v6914_v44  ;;  %v6874_v38 = vld [vmem:[%s15922_s3 + $0xc40] sm:$0xff]  ;;  %v6871_v44 = vld [vmem:[%s15922_s3 + $0xc28] sm:$0xff] }
  0x81   : > { %2967 = vmatpush1.msra.mxu0 %v7050_v39  ;;  %2895 = vmatprep.subr.mxu1 %v6911_v51  ;;  %v7003_v39 = vld [vmem:[%s15922_s3 + $0x1048] sm:$0xff] }
  0x82   : > { %2968 = vmatprep.subr.mxu0 %v7047_v12  ;;  %2896 = vmatpush1.msra.mxu1 %v6910_v53  ;;  %v6999_v51 = vld [vmem:[%s15922_s3 + $0x1028] sm:$0xff] }
  0x83   : > { %2969 = vmatpush1.msra.mxu0 %v7046_v48  ;;  %2897 = vmatprep.subr.mxu1 %v6907_v57  ;;  %v7002_v48 = vld [vmem:[%s15922_s3 + $0x1040] sm:$0xff] }
  0x84   : > { %2970 = vmatprep.subr.mxu0 %v7043_v49  ;;  %2898 = vmatpush1.msra.mxu1 %v6906_v59  ;;  %v6870_v49 = vld [vmem:[%s15922_s3 + $0xc20] sm:$0xff]  ;;  %v6995_v59 = vld [vmem:[%s15922_s3 + $0x1008] sm:$0xff] }
  0x85   : > { %2971 = vmatpush1.msra.mxu0 %v7042_v52  ;;  %2899 = vmatprep.subr.mxu1 %v6903_v62  ;;  %v6998_v57 = vld [vmem:[%s15922_s3 + $0x1020] sm:$0xff] }
  0x86   : > { %2972 = vmatprep.subr.mxu0 %v7039_v54  ;;  %2900 = vmatpush1.msra.mxu1 %v6902_v0  ;;  %v6867_v54 = vld [vmem:[%s15922_s3 + $0xc08] sm:$0xff]  ;;  %v6994_v0 = vld [vmem:[%s15922_s3 + $0x1000] sm:$0xff] }
  0x87   : > { %2973 = vmatpush1.msra.mxu0 %v7038_v58  ;;  %2901 = vmatprep.subr.mxu1 %v6899_v4  ;;  %v6866_v58 = vld [vmem:[%s15922_s3 + $0xc00] sm:$0xff]  ;;  %v7119_v4 = vld [vmem:[%s15922_s3 + $0x13e8] sm:$0xff] }
  0x88   : > { %2974 = vmatprep.subr.mxu0 %v7035_v60  ;;  %2902 = vmatpush1.msra.mxu1 %v6898_v6  ;;  %v6987_v6 = vld [vmem:[%s15922_s3 + $0xfc8] sm:$0xff] }
  0x89   : > { %2975 = vmatpush1.msra.mxu0 %v7034_v63  ;;  %2903 = vmatprep.subr.mxu1 %v6895_v13  ;;  %v6991_v63 = vld [vmem:[%s15922_s3 + $0xfe8] sm:$0xff] }
  0x8a   : > { %2976 = vmatprep.subr.mxu0 %v7031_v1  ;;  %2904 = vmatpush1.msra.mxu1 %v6894_v16  ;;  %v6990_v1 = vld [vmem:[%s15922_s3 + $0xfe0] sm:$0xff]  ;;  %v7115_v16 = vld [vmem:[%s15922_s3 + $0x13c8] sm:$0xff] }
  0x8b   : > { %2977 = vmatpush1.msra.mxu0 %v7030_v5  ;;  %2905 = vmatprep.subr.mxu1 %v6891_v21  ;;  %v7114_v21 = vld [vmem:[%s15922_s3 + $0x13c0] sm:$0xff] }
  0x8c   : > { %2978 = vmatprep.subr.mxu0 %v7027_v7  ;;  %2906 = vmatpush1.msra.mxu1 %v6890_v23  ;;  %v7118_v7 = vld [vmem:[%s15922_s3 + $0x13e0] sm:$0xff] }
  0x8d   : > { %2979 = vmatpush1.msra.mxu0 %v7026_v14  ;;  %2907 = vmatprep.subr.mxu1 %v6887_v25  ;;  %v6986_v14 = vld [vmem:[%s15922_s3 + $0xfc0] sm:$0xff]  ;;  %v7111_v25 = vld [vmem:[%s15922_s3 + $0x13a8] sm:$0xff] }
  0x8e   : > { %2980 = vmatprep.subr.mxu0 %v7023_v18  ;;  %2908 = vmatpush1.msra.mxu1 %v6886_v42  ;;  %v6983_v18 = vld [vmem:[%s15922_s3 + $0xfa8] sm:$0xff]  ;;  %v7110_v42 = vld [vmem:[%s15922_s3 + $0x13a0] sm:$0xff] }
  0x8f   : > { %2981 = vmatpush1.msra.mxu0 %v7022_v22  ;;  %2909 = vmatprep.subr.mxu1 %v6883_v29  ;;  %v6978_v29 = vld [vmem:[%s15922_s3 + $0xf80] sm:$0xff] }
  0x90   : > { %2982 = vmatprep.subr.mxu0 %v7019_v36  ;;  %2910 = vmatpush1.msra.mxu1 %v6882_v43  ;;  %v6982_v36 = vld [vmem:[%s15922_s3 + $0xfa0] sm:$0xff] }
  0x91   : > { %2983 = vmatpush1.msra.mxu0 %v7018_v26  ;;  %2911 = vmatprep.subr.mxu1 %v6879_v45  ;;  %v6979_v26 = vld [vmem:[%s15922_s3 + $0xf88] sm:$0xff]  ;;  %v7106_v45 = vld [vmem:[%s15922_s3 + $0x1380] sm:$0xff] }
  0x92   : > { %2984 = vmatprep.subr.mxu0 %v7015_v28  ;;  %2912 = vmatpush1.msra.mxu1 %v6878_v17  ;;  %v7103_v17 = vld [vmem:[%s15922_s3 + $0x1368] sm:$0xff] }
  0x93   : > { %2985 = vmatpush1.msra.mxu0 %v7014_v30  ;;  %2913 = vmatprep.subr.mxu1 %v6875_v11  ;;  %v7107_v30 = vld [vmem:[%s15922_s3 + $0x1388] sm:$0xff] }
  0x94   : > { %2986 = vmatprep.subr.mxu0 %v7011_v32  ;;  %2914 = vmatpush1.msra.mxu1 %v6874_v38  ;;  %v6975_v32 = vld [vmem:[%s15922_s3 + $0xf68] sm:$0xff]  ;;  %v6970_v38 = vld [vmem:[%s15922_s3 + $0xf40] sm:$0xff] }
  0x95   : > { %2987 = vmatpush1.msra.mxu0 %v7010_v33  ;;  %2915 = vmatprep.subr.mxu1 %v6871_v44  ;;  %v6974_v33 = vld [vmem:[%s15922_s3 + $0xf60] sm:$0xff] }
  0x96   : > { %2988 = vmatprep.subr.mxu0 %v7007_v47  ;;  %2916 = vmatpush1.msra.mxu1 %v6870_v49 }
  0x97   : > { %2989 = vmatpush1.msra.mxu0 %v7006_v37  ;;  %2917 = vmatprep.subr.mxu1 %v6867_v54  ;;  %v6971_v37 = vld [vmem:[%s15922_s3 + $0xf48] sm:$0xff] }
  0x98   : > { %2990 = vmatprep.subr.mxu0 %v7003_v39  ;;  %2918 = vmatpush1.msra.mxu1 %v6866_v58 }
  0x99   : > { %2991 = vmatpush1.msra.mxu0 %v7002_v48  ;;  %2919 = vmatprep.subr.mxu1 %v6991_v63  ;;  %v6967_v48 = vld [vmem:[%s15922_s3 + $0xf28] sm:$0xff] }
  0x9a   : > { %2992 = vmatprep.subr.mxu0 %v6999_v51  ;;  %2920 = vmatpush2.msra.mxu1 %v6990_v1 }
  0x9b   : > { %2993 = vmatpush1.msra.mxu0 %v6998_v57  ;;  %2921 = vmatprep.subr.mxu1 %v6987_v6 }
  0x9c   : > { %2994 = vmatprep.subr.mxu0 %v6995_v59  ;;  %2922 = vmatpush2.msra.mxu1 %v6986_v14 }
  0x9d   : > { %2995 = vmatpush1.msra.mxu0 %v6994_v0  ;;  %2923 = vmatprep.subr.mxu1 %v6983_v18 }
  0x9e   : > { %2996 = vmatprep.subr.mxu0 %v7119_v4  ;;  %2924 = vmatpush2.msra.mxu1 %v6982_v36 }
  0x9f   : > { %2997 = vmatpush2.msra.mxu0 %v7118_v7  ;;  %2925 = vmatprep.subr.mxu1 %v6979_v26 }
  0xa0   : > { %2998 = vmatprep.subr.mxu0 %v7115_v16  ;;  %2926 = vmatpush2.msra.mxu1 %v6978_v29 }
  0xa1   : > { %2999 = vmatpush2.msra.mxu0 %v7114_v21  ;;  %2927 = vmatprep.subr.mxu1 %v6975_v32 }
  0xa2   : > { %3000 = vmatprep.subr.mxu0 %v7111_v25  ;;  %2928 = vmatpush2.msra.mxu1 %v6974_v33 }
  0xa3   : > { %3001 = vmatpush2.msra.mxu0 %v7110_v42  ;;  %2929 = vmatprep.subr.mxu1 %v6971_v37  ;;  %v1811_v42 = vlaneseq }
  0xa4   : > { %3002 = vmatprep.subr.mxu0 %v7107_v30  ;;  %2930 = vmatpush2.msra.mxu1 %v6970_v38 }
  0xa5   : > { %3003 = vmatpush2.msra.mxu0 %v7106_v45  ;;  %2931 = vmatprep.subr.mxu1 %v6967_v48  ;;  %v9448_v45 = vshrl.u32 %v1811_v42, 7 }
  0xa6   : > { %3004 = vmatprep.subr.mxu0 %v7103_v17 }
  0xa7   : > { %v1829_v42 = vsub.s32 4, %v9448_v45 }
  0xd6   : > { %v9089_v34 = vpop.f32.mrf.mxu0  ;;  %v9114_v40 = vpop.f32.mrf.mxu1 }
  0xd8   : > { %v9103_v15 = vpop.f32.mrf.mxu0  ;;  %v9145_v55 = vpop.f32.mrf.mxu1 }
  0xdb   : > { %v9131_v50 = vpop.f32.mrf.mxu0 }
  0xdd   : > { %v9147_v56 = vpop.f32.mrf.mxu0 }
  0xdf   : > { %v9161_v61 = vpop.f32.mrf.mxu1 }
  0xe1   : > { %v9175_v2 = vpop.f32.mrf.mxu0  ;;  %v9177_v3 = vpop.f32.mrf.mxu1 }
  0xe3   : > { %v9191_v8 = vpop.f32.mrf.mxu0  ;;  %v9193_v9 = vpop.f32.mrf.mxu1 }
  0xe5   : > { %v9207_v19 = vpop.f32.mrf.mxu0  ;;  %v9209_v20 = vpop.f32.mrf.mxu1 }
  0xe7   : > { %v9223_v24 = vpop.f32.mrf.mxu0 }
  0xe8   : > { %v9231_v27 = vpop.f32.mrf.mxu1 }
  0xea   : > { %v9245_v10 = vpop.f32.mrf.mxu0  ;;  %v9247_v31 = vpop.f32.mrf.mxu1 }
  0xec   : > { %v9261_v46 = vpop.f32.mrf.mxu0 }
  0xed   : > { %v9269_v35 = vpop.f32.mrf.mxu1 }
  0xee   : > { %v656_v48 = vadd.f32 %v9269_v35, %v9089_v34  ;;  %v15945_v35 = vsub.s32 3, %v9448_v45 }
  0xef   : > { %v9283_v41 = vpop.f32.mrf.mxu0  ;;  %v9285_v12 = vpop.f32.mrf.mxu1 }
  0xf1   : > { %v9299_v52 = vpop.f32.mrf.mxu0  ;;  %v9301_v53 = vpop.f32.mrf.mxu1 }
  0xf3   : > { %v9315_v60 = vpop.f32.mrf.mxu0  ;;  %v9317_v62 = vpop.f32.mrf.mxu1 }
  0xf5   : > { %v9331_v5 = vpop.f32.mrf.mxu0 }
  0xf6   : > { %v9339_v13 = vpop.f32.mrf.mxu1 }
  0xf8   : > { %v9353_v22 = vpop.f32.mrf.mxu0  ;;  %v9355_v23 = vpop.f32.mrf.mxu1 }
  0xfa   : > { %v9369_v28 = vpop.f32.mrf.mxu0 }
  0xfb   : > { %v9377_v43 = vpop.f32.mrf.mxu1 }
  0xfd   : > { %v9391_v47 = vpop.f32.mrf.mxu0  ;;  %v9393_v11 = vpop.f32.mrf.mxu1 }
  0xff   : > { %v9401_v39 = vpop.f32.mrf.mxu0  ;;  %v9403_v44 = vpop.f32.mrf.mxu1 }
 0x101   : > { %v9408_v49 = vpop.f32.mrf.mxu0  ;;  %v9410_v51 = vpop.f32.mrf.mxu1 }
 0x103   : > { %v9412_v54 = vpop.f32.mrf.mxu0 }
 0x104   : > { %v9414_v57 = vpop.f32.mrf.mxu1 }
 0x106   : > { %v9416_v58 = vpop.f32.mrf.mxu0  ;;  %v9418_v59 = vpop.f32.mrf.mxu1 }
 0x108   : > { %v9420_v63 = vpop.f32.mrf.mxu0 }
 0x109   : > { %v9422_v0 = vpop.f32.mrf.mxu1 }
 0x10b   : > { %v9424_v1 = vpop.f32.mrf.mxu0  ;;  %v9426_v4 = vpop.f32.mrf.mxu1 }
 0x10d   : > { %v9428_v6 = vpop.f32.mrf.mxu0  ;;  %v9430_v7 = vpop.f32.mrf.mxu1 }
 0x10e   : > { %15926 = vst [vmem:[#allocation2_spill] sm:$0xff] %v9430_v7 }
 0x10f   : > { %v9432_v14 = vpop.f32.mrf.mxu0  ;;  %v9434_v16 = vpop.f32.mrf.mxu1 }
 0x110   : > { %15927 = vst [vmem:[#allocation3_spill] sm:$0xff] %v9432_v14  ;;  %15928 = vst [vmem:[#allocation4_spill] sm:$0xff] %v9434_v16  ;;  %v15942_v16 = vsub.s32 1, %v9448_v45 }
 0x111   : > { %v9436_v18 = vpop.f32.mrf.mxu0 }
 0x112   : > { %15929 = vst [vmem:[#allocation5_spill] sm:$0xff] %v9436_v18  ;;  %v9438_v21 = vpop.f32.mrf.mxu1 }
 0x113   : > { %15930 = vst [vmem:[#allocation6_spill] sm:$0xff] %v9438_v21  ;;  %v1833_v21 = vsub.s32 5, %v9448_v45 }
 0x114   : > { %v9440_v36 = vpop.f32.mrf.mxu0  ;;  %v9442_v25 = vpop.f32.mrf.mxu1 }
 0x115   : > { %15931 = vst [vmem:[#allocation7_spill] sm:$0xff] %v9440_v36  ;;  %15932 = vst [vmem:[#allocation8_spill] sm:$0xff] %v9442_v25 }
 0x116   : > { %v9444_v26 = vpop.f32.mrf.mxu0 }
 0x117   : > { %15933 = vst [vmem:[#allocation9_spill] sm:$0xff] %v9444_v26  ;;  %v1285_v29 = vpop.f32.mrf.mxu1 }
 0x119   : > { %v9446_v30 = vpop.f32.mrf.mxu0  ;;  %v1287_v32 = vpop.f32.mrf.mxu1 }
 0x11a   : > { %15934 = vst [vmem:[#allocation10_spill] sm:$0xff] %v9446_v30  ;;  %v1809_v30 = vld [vmem:[%s15921_s2] sm:$0x3f] }
 0x11b   : > { %v9450_v33 = vpop.f32.mrf.mxu0  ;;  %v1291_v17 = vpop.f32.mrf.mxu1  ;;  %v9479_v14 = vrot.slane %v1809_v30, %v15942_v16  ;;  %v9487_v34 = vrot.slane %v1809_v30, %v1829_v42  ;;  %v741_v16 = vadd.f32 %v9299_v52, %v9177_v3 }
 0x11c   : > { %15935 = vst [vmem:[#allocation11_spill] sm:$0xff] %v9450_v33  ;;  %v15943_v33 = vsub.s32 2, %v9448_v45 }
 0x11d   : > { %v9452_v37 = vpop.f32.mrf.mxu0  ;;  %v1293_v38 = vpop.f32.mrf.mxu1 }
 0x11e   : > { %15936 = vst [vmem:[#allocation12_spill] sm:$0xff] %v9452_v37  ;;  %v9483_v7 = vrot.slane %v1809_v30, %v15943_v33  ;;  %v662_v33 = vadd.f32 %v9301_v53, %v9131_v50  ;;  %v751_v50 = vadd.f32 %v9353_v22, %v9231_v27  ;;  %v828_v53 = vadd.f32 %v9403_v44, %v9207_v19  ;;  %v15946_v44 = vld [vmem:[#allocation2_spill] sm:$0xff] }
 0x11f   : > { %v9457_v26 = vpop.f32.mrf.mxu0  ;;  %v836_v19 = vadd.f32 %v9418_v59, %v9261_v46 }
 0x120   : > { %15937 = vst [vmem:[#allocation13_spill] sm:$0xff] %v9457_v26  ;;  %v9465_v37 = vpop.f32.mrf.mxu1  ;;  %v15941_v26 = vsub.s32 0, %v9448_v45  ;;  %15944 = vst [vmem:[#allocation17_spill] sm:$0xff] %v9483_v7  ;;  %v1144_v7 = vadd.f32 %v9391_v47, %v656_v48  ;;  %v15952_v48 = vld [vmem:[#allocation8_spill] sm:$0xff] }
 0x121   : > { %15938 = vst [vmem:[#allocation14_spill] sm:$0xff] %v9465_v37  ;;  %v739_v37 = vadd.f32 %v9283_v41, %v9161_v61  ;;  %v745_v41 = vadd.f32 %v9315_v60, %v9193_v9 }
 0x122   : > { %v9469_v36 = vpop.f32.mrf.mxu0  ;;  %v9471_v25 = vpop.f32.mrf.mxu1  ;;  %v9475_v18 = vrot.slane %v1809_v30, %v15941_v26  ;;  %v658_v26 = vadd.f32 %v9285_v12, %v9103_v15  ;;  %v668_v15 = vadd.f32 %v9339_v13, %v9114_v40  ;;  %v670_v12 = vadd.f32 %v9355_v23, %v9145_v55 }
 0x123   : > { %15939 = vst [vmem:[#allocation15_spill] sm:$0xff] %v9469_v36  ;;  %15940 = vst [vmem:[#allocation16_spill] sm:$0xff] %v9471_v25  ;;  %v9491_v36 = vrot.slane %v1809_v30, %v15945_v35  ;;  %v9493_v25 = vrot.slane %v1809_v30, %v1833_v21  ;;  %v664_v21 = vadd.f32 %v9317_v62, %v9147_v56 }
 0x124   : > { %v9502_v61 = vpop.f32.mrf.mxu0  ;;  %v747_v30 = vadd.f32 %v9331_v5, %v9209_v20  ;;  %v1145_v52 = vadd.f32 %v9401_v39, %v658_v26  ;;  %v1468_v9 = vadd.f32 %v1285_v29, %v1144_v7  ;;  %v753_v56 = vadd.f32 %v9369_v28, %v9247_v31 }
 0x125   : > { %v9512_v3 = vpop.f32.mrf.mxu1  ;;  %v822_v20 = vadd.f32 %v9377_v43, %v9175_v2  ;;  %v824_v40 = vadd.f32 %v9393_v11, %v9191_v8  ;;  %v1150_v55 = vadd.f32 %v9408_v49, %v662_v33  ;;  %v830_v62 = vadd.f32 %v9410_v51, %v9223_v24  ;;  %v15953_v33 = vld [vmem:[#allocation9_spill] sm:$0xff] }
 0x126   : > { %v1469_v5 = vadd.f32 %v1287_v32, %v1145_v52  ;;  %v1151_v31 = vadd.f32 %v9412_v54, %v664_v21  ;;  %v834_v2 = vadd.f32 %v9414_v57, %v9245_v10  ;;  %v1156_v8 = vadd.f32 %v9416_v58, %v668_v15  ;;  %v15947_v54 = vld [vmem:[#allocation3_spill] sm:$0xff]  ;;  %v15954_v21 = vld [vmem:[#allocation10_spill] sm:$0xff] }
 0x127   : > { %v1608_v60 = vpop.f32.mrf.mxu0  ;;  %v9527_v27 = vpop.f32.mrf.mxu1  ;;  %v1157_v28 = vadd.f32 %v9420_v63, %v670_v12  ;;  %v1146_v43 = vadd.f32 %v9422_v0, %v739_v37  ;;  %v1474_v24 = vadd.f32 %v1291_v17, %v1150_v55  ;;  %v1148_v11 = vadd.f32 %v9424_v1, %v822_v20  ;;  %v15948_v0 = vld [vmem:[#allocation4_spill] sm:$0xff]  ;;  %v15949_v1 = vld [vmem:[#allocation5_spill] sm:$0xff]  ;;  %v15951_v32 = vld [vmem:[#allocation7_spill] sm:$0xff] }
 0x128   : > { %v1791_v13 = vadd.f32 %v1608_v60, %v1468_v9  ;;  %v1147_v39 = vadd.f32 %v9426_v4, %v741_v16  ;;  %v9545_v10 = vadd.f32 %v9428_v6, %v824_v40  ;;  %v1152_v49 = vadd.f32 %v15946_v44, %v745_v41  ;;  %v15950_v4 = vld [vmem:[#allocation6_spill] sm:$0xff]  ;;  %v15955_v15 = vld [vmem:[#allocation11_spill] sm:$0xff]  ;;  %v15957_v9 = vld [vmem:[#allocation12_spill] sm:$0xff] }
 0x129   : > { %v1610_v22 = vpop.f32.mrf.mxu0  ;;  %v9538_v23 = vpop.f32.mrf.mxu1  ;;  %v9551_v57 = vadd.f32 %v15947_v54, %v828_v53  ;;  %v1475_v58 = vadd.f32 %v1293_v38, %v1151_v31  ;;  %v1153_v7 = vadd.f32 %v15948_v0, %v747_v30  ;;  %v9556_v29 = vadd.f32 %v15949_v1, %v830_v62  ;;  %v15956_v12 = vld [vmem:[#allocation14_spill] sm:$0xff]  ;;  %v15958_v31 = vld [vmem:[#allocation13_spill] sm:$0xff] }
 0x12a   : > { %v1792_v47 = vadd.f32 %v1610_v22, %v1469_v5  ;;  %v1841_v59 = vadd.f32 %v9475_v18, %v1791_v13  ;;  %v1158_v6 = vadd.f32 %v15950_v4, %v751_v50  ;;  %v9560_v17 = vadd.f32 %v15951_v32, %v834_v2  ;;  %v6966_v62 = vld [vmem:[%s15922_s3 + $0xf20] sm:$0xff]  ;;  %v6963_v13 = vld [vmem:[%s15922_s3 + $0xf08] sm:$0xff] }
 0x12b   : > { %v1614_v51 = vpop.f32.mrf.mxu0  ;;  %v9548_v46 = vpop.f32.mrf.mxu1  ;;  %v1159_v42 = vadd.f32 %v15952_v48, %v753_v56  ;;  %v9570_v41 = vadd.f32 %v15953_v33, %v836_v19  ;;  %v1470_v30 = vadd.f32 %v15954_v21, %v1146_v43  ;;  %v1471_v50 = vadd.f32 %v15955_v15, %v1147_v39  ;;  %v7102_v5 = vld [vmem:[%s15922_s3 + $0x1360] sm:$0xff]  ;;  %2932 = vmatpush2.msra.mxu1 %v6966_v62  ;;  %v7099_v43 = vld [vmem:[%s15922_s3 + $0x1348] sm:$0xff] }
 0x12c   : > { %v1797_v63 = vadd.f32 %v1614_v51, %v1474_v24  ;;  %v1842_v35 = vadd.f32 %v9479_v14, %v1792_v47  ;;  %v1480_v52 = vadd.f32 %v15956_v12, %v1156_v8  ;;  %v9576_v20 = vadd.f32 %v15957_v9, %v1152_v49  ;;  %v15959_v8 = vld [vmem:[#allocation16_spill] sm:$0xff]  ;;  %3005 = vmatpush2.msra.mxu0 %v7102_v5  ;;  %v6962_v24 = vld [vmem:[%s15922_s3 + $0xf00] sm:$0xff]  ;;  %v15960_v39 = vld [vmem:[#allocation15_spill] sm:$0xff] }
 0x12d   : > { %v1616_v37 = vpop.f32.mrf.mxu0  ;;  %v1877_v56 = vrot.slane %v1841_v59, 1  ;;  %v9594_v2 = vadd.f32 %v15958_v31, %v1153_v7  ;;  %v1481_v19 = vadd.f32 %v15959_v8, %v1157_v28  ;;  %v7098_v47 = vld [vmem:[%s15922_s3 + $0x1340] sm:$0xff]  ;;  %v9607_v44 = vadd.f32 %v15960_v39, %v1158_v6  ;;  %2933 = vmatprep.subr.mxu1 %v6963_v13  ;;  %3006 = vmatprep.subr.mxu0 %v7099_v43  ;;  %v7091_v48 = vld [vmem:[%s15922_s3 + $0x1308] sm:$0xff] }
 0x12e   : > { %v9565_v38 = vadd.f32 %v9475_v18, %v1797_v63  ;;  %v1798_v26 = vadd.f32 %v1616_v37, %v1475_v58  ;;  %v9567_v16 = vpop.f32.mrf.mxu1  ;;  %v1880_v49 = vrot.slane %v1842_v35, 1  ;;  %v6959_v58 = vld [vmem:[%s15922_s3 + $0xee8] sm:$0xff]  ;;  %v6958_v0 = vld [vmem:[%s15922_s3 + $0xee0] sm:$0xff]  ;;  %2934 = vmatpush2.msra.mxu1 %v6962_v24  ;;  %3007 = vmatpush2.msra.mxu0 %v7098_v47  ;;  %v9643_v15 = vadd.f32 %v9502_v61, %v1159_v42 }
 0x12f   : > { %v7095_v63 = vld [vmem:[%s15922_s3 + $0x1328] sm:$0xff]  ;;  %v7094_v32 = vld [vmem:[%s15922_s3 + $0x1320] sm:$0xff]  ;;  %2935 = vmatprep.subr.mxu1 %v6959_v58  ;;  %v1473_v9 = vadd.f32 %v9527_v27, %v9545_v10  ;;  %v1478_v61 = vadd.f32 %v9538_v23, %v9551_v57  ;;  %v1484_v27 = vadd.f32 %v9567_v16, %v9560_v17  ;;  %v15961_v10 = vld [vmem:[#allocation17_spill] sm:$0xff] }
 0x130   : > { %v1878_v40 = vrot.slane %v9565_v38, 1  ;;  %v9580_v53 = vadd.f32 %v9479_v14, %v1798_v26  ;;  %v1620_v60 = vpop.f32.mrf.mxu0  ;;  %v9582_v55 = vpop.f32.mrf.mxu1  ;;  %v6955_v37 = vld [vmem:[%s15922_s3 + $0xec8] sm:$0xff]  ;;  %3008 = vmatprep.subr.mxu0 %v7095_v63  ;;  %v6954_v33 = vld [vmem:[%s15922_s3 + $0xec0] sm:$0xff]  ;;  %2936 = vmatpush2.msra.mxu1 %v6958_v0 }
 0x131   : > { %v1803_v22 = vadd.f32 %v1620_v60, %v1480_v52  ;;  %v7090_v21 = vld [vmem:[%s15922_s3 + $0x1300] sm:$0xff]  ;;  %3009 = vmatpush2.msra.mxu0 %v7094_v32  ;;  %2937 = vmatprep.subr.mxu1 %v6955_v37  ;;  %v1485_v17 = vadd.f32 %v9582_v55, %v9570_v41  ;;  %v7083_v63 = vld [vmem:[%s15922_s3 + $0x12c8] sm:$0xff] }
 0x132   : > { %v1881_v28 = vrot.slane %v9580_v53, 1  ;;  %v1622_v51 = vpop.f32.mrf.mxu0  ;;  %v1879_v54 = vsel %vm282_vm1, %v1877_v56, %v1878_v40  ;;  %3010 = vmatprep.subr.mxu0 %v7091_v48  ;;  %2938 = vmatpush2.msra.mxu1 %v6954_v33  ;;  %v6946_v48 = vld [vmem:[%s15922_s3 + $0xe80] sm:$0xff] }
 0x133   : > { %v9621_v7 = vadd.f32 %v9475_v18, %v1803_v22  ;;  %v1804_v1 = vadd.f32 %v1622_v51, %v1481_v19  ;;  %v1691_v4 = vpop.f32.mrf.mxu1  ;;  %v9623_v6 = vmax.f32 %v1841_v59, %v1879_v54  ;;  %v1472_v18 = vadd.f32 %v9512_v3, %v1148_v11  ;;  %3011 = vmatpush2.msra.mxu0 %v7090_v21 }
 0x134   : > { %v1793_v26 = vadd.f32 %v1691_v4, %v1470_v30  ;;  %v1882_v59 = vsel %vm282_vm1, %v1880_v49, %v1881_v28  ;;  %v6950_v49 = vld [vmem:[%s15922_s3 + $0xea0] sm:$0xff] }
 0x135   : > { %v1895_v12 = vrot.slane %v9621_v7, 1  ;;  %v9647_v3 = vadd.f32 %v9479_v14, %v1804_v1  ;;  %v1774_v11 = vpop.f32.mrf.mxu0  ;;  %v1693_v30 = vpop.f32.mrf.mxu1  ;;  %v9649_v52 = vmax.f32 %v1842_v35, %v1882_v59  ;;  %v1479_v14 = vadd.f32 %v9548_v46, %v9556_v29 }
 0x136   : > { %v1795_v56 = vadd.f32 %v1774_v11, %v1472_v18  ;;  %v1794_v60 = vadd.f32 %v1693_v30, %v1471_v50  ;;  %v9664_v50 = vadd.f32 %v15961_v10, %v1793_v26  ;;  %v7082_v18 = vld [vmem:[%s15922_s3 + $0x12c0] sm:$0xff]  ;;  %v6943_v11 = vld [vmem:[%s15922_s3 + $0xe68] sm:$0xff] }
 0x137   : > { %v1897_v42 = vrot.slane %v9647_v3, 1  ;;  %v1776_v62 = vpop.f32.mrf.mxu0  ;;  %v1697_v35 = vpop.f32.mrf.mxu1  ;;  %v1896_v5 = vsel %vm282_vm1, %v1878_v40, %v1895_v12  ;;  %v7079_v30 = vld [vmem:[%s15922_s3 + $0x12a8] sm:$0xff] }
 0x138   : > { %v9667_v23 = vadd.f32 %v9487_v34, %v1795_v56  ;;  %v1796_v46 = vadd.f32 %v1776_v62, %v1473_v9  ;;  %v9670_v57 = vadd.f32 %v9491_v36, %v1794_v60  ;;  %v1799_v29 = vadd.f32 %v1697_v35, %v9576_v20  ;;  %v6951_v20 = vld [vmem:[%s15922_s3 + $0xea8] sm:$0xff]  ;;  %v7078_v62 = vld [vmem:[%s15922_s3 + $0x12a0] sm:$0xff] }
 0x139   : > { %v1780_v13 = vpop.f32.mrf.mxu0  ;;  %v1699_v31 = vpop.f32.mrf.mxu1  ;;  %v9674_v40 = vmax.f32 %v9565_v38, %v1896_v5  ;;  %v1898_v8 = vsel %vm282_vm1, %v1881_v28, %v1897_v42  ;;  %v9684_v22 = vsel %vm282_vm1, %v1897_v42, %v9647_v3  ;;  %v7087_v38 = vld [vmem:[%s15922_s3 + $0x12e8] sm:$0xff]  ;;  %2939 = vmatprep.subr.mxu1 %v6951_v20  ;;  %v7086_v28 = vld [vmem:[%s15922_s3 + $0x12e0] sm:$0xff]  ;;  %v1883_v51 = vrot.slane %v9664_v50, 1 }
 0x13a   : > { %v9680_v16 = vadd.f32 %v9493_v25, %v1796_v46  ;;  %v1801_v19 = vadd.f32 %v1780_v13, %v1478_v61  ;;  %v9693_v43 = vadd.f32 %v15961_v10, %v1799_v29  ;;  %v1800_v41 = vadd.f32 %v1699_v31, %v9594_v2  ;;  %3012 = vmatprep.subr.mxu0 %v7087_v38  ;;  %v6942_v42 = vld [vmem:[%s15922_s3 + $0xe60] sm:$0xff]  ;;  %v7075_v46 = vld [vmem:[%s15922_s3 + $0x1288] sm:$0xff] }
 0x13b   : > { %v1782_v55 = vpop.f32.mrf.mxu0  ;;  %v1703_v24 = vpop.f32.mrf.mxu1  ;;  %v8424_v47 = vpack.i.bf16 %v9674_v40, %v9623_v6  ;;  %v9699_v39 = vmax.f32 %v9580_v53, %v1898_v8  ;;  %2940 = vmatpush2.msra.mxu1 %v6950_v49  ;;  %v6947_v53 = vld [vmem:[%s15922_s3 + $0xe88] sm:$0xff]  ;;  %v1889_v0 = vrot.slane %v9667_v23, 1  ;;  %v1886_v1 = vrot.slane %v9670_v57, 1  ;;  %3013 = vmatpush2.msra.mxu0 %v7086_v28  ;;  %v6938_v8 = vld [vmem:[%s15922_s3 + $0xe40] sm:$0xff] }
 0x13c   : > { %v9709_v2 = vadd.f32 %v9487_v34, %v1801_v19  ;;  %v1802_v54 = vadd.f32 %v1782_v55, %v1479_v14  ;;  %v1805_v58 = vadd.f32 %v1703_v24, %v9607_v44  ;;  %v1884_v4 = vrot.slane %v9693_v43, 1  ;;  %2941 = vmatprep.subr.mxu1 %v6947_v53  ;;  %3014 = vmatprep.subr.mxu0 %v7083_v63  ;;  %v6935_v38 = vld [vmem:[%s15922_s3 + $0xe28] sm:$0xff] }
 0x13d   : > { %v9722_v32 = vadd.f32 %v9491_v36, %v1800_v41  ;;  %8425 = vrot.lane.b32.xlu1 %v8424_v47, %s8473_s16  ;;  %v1786_v44 = vpop.f32.mrf.mxu0  ;;  %v1705_v37 = vpop.f32.mrf.mxu1  ;;  %v1892_v9 = vrot.slane %v9680_v16, 1  ;;  %2942 = vmatpush2.msra.mxu1 %v6946_v48 }
 0x13e   : > { %v1890_v26 = vrot.slane %v9709_v2, 1  ;;  %v9733_v59 = vadd.f32 %v9493_v25, %v1802_v54  ;;  %v1855_v33 = vadd.f32 %v15961_v10, %v1805_v58  ;;  %v1807_v21 = vadd.f32 %v1786_v44, %v1484_v27  ;;  %3015 = vmatpush2.msra.mxu0 %v7082_v18  ;;  %2943 = vmatprep.subr.mxu1 %v6943_v11  ;;  %v6930_v18 = vld [vmem:[%s15922_s3 + $0xe00] sm:$0xff] }
 0x13f   : > { %v1887_v56 = vrot.slane %v9722_v32, 1  ;;  %v1806_v60 = vadd.f32 %v1705_v37, %v9643_v15  ;;  %v1788_v61 = vpop.f32.mrf.mxu0  ;;  %v1885_v14 = vsel %vm282_vm1, %v1883_v51, %v1884_v4  ;;  %3016 = vmatprep.subr.mxu0 %v7079_v30  ;;  %v6939_v15 = vld [vmem:[%s15922_s3 + $0xe48] sm:$0xff]  ;;  %2944 = vmatpush2.msra.mxu1 %v6942_v42  ;;  %v9824_v44 = vmax.f32 %v9647_v3, %v9684_v22 }
 0x140   : > { %v1893_v35 = vrot.slane %v9733_v59, 1  ;;  %v1899_v5 = vrot.slane %v1855_v33, 1  ;;  %v1857_v27 = vadd.f32 %v9487_v34, %v1807_v21  ;;  %v1808_v10 = vadd.f32 %v1788_v61, %v1485_v17  ;;  %v7074_v17 = vld [vmem:[%s15922_s3 + $0x1280] sm:$0xff]  ;;  %3017 = vmatpush2.msra.mxu0 %v7078_v62  ;;  %2945 = vmatprep.subr.mxu1 %v6939_v15  ;;  %v7183_v21 = vld [vmem:[%s15922_s3 + $0x15e8] sm:$0xff]  ;;  %v6929_v62 = vld [vmem:[%s15922_s3 + $0xdf8] sm:$0xff] }
 0x141   : > { %v1856_v29 = vadd.f32 %v9491_v36, %v1806_v60  ;;  %v9762_v13 = vmax.f32 %v9664_v50, %v1885_v14  ;;  %v1888_v31 = vsel %vm282_vm1, %v1886_v1, %v1887_v56  ;;  %v1891_v34 = vsel %vm282_vm1, %v1889_v0, %v1890_v26  ;;  %3018 = vmatprep.subr.mxu0 %v7075_v46  ;;  %v7058_v14 = vld [vmem:[%s15922_s3 + $0x1200] sm:$0xff] }
 0x142   : > { %v1894_v19 = vsel %vm282_vm1, %v1892_v9, %v1893_v35  ;;  %v1903_v20 = vrot.slane %v1857_v27, 1  ;;  %v9774_v36 = vadd.f32 %v9493_v25, %v1808_v10  ;;  %v9777_v50 = vmax.f32 %v9670_v57, %v1888_v31  ;;  %2946 = vmatpush2.msra.mxu1 %v6938_v8  ;;  %v7071_v25 = vld [vmem:[%s15922_s3 + $0x1268] sm:$0xff]  ;;  %3019 = vmatpush2.msra.mxu0 %v7074_v17 }
 0x143   : > { %v1901_v41 = vrot.slane %v1856_v29, 1  ;;  %v8429_v55 = vpack.i.bf16 %v9762_v13, %v9649_v52  ;;  %v9785_v24 = vmax.f32 %v9667_v23, %v1891_v34  ;;  %v1900_v47 = vsel %vm282_vm1, %v1884_v4, %v1899_v5  ;;  %2947 = vmatprep.subr.mxu1 %v6935_v38  ;;  %3020 = vmatprep.subr.mxu0 %v7071_v25 }
 0x144   : > { %v1905_v57 = vrot.slane %v9774_v36, 1  ;;  %v9793_v49 = vmax.f32 %v9693_v43, %v1900_v47  ;;  %v1927_v28 = vsel %vm282_vm1, %v1899_v5, %v1855_v33  ;;  %v1904_v51 = vsel %vm282_vm1, %v1890_v26, %v1903_v20  ;;  %v6934_v43 = vld [vmem:[%s15922_s3 + $0xe20] sm:$0xff] }
 0x145   : > { %8430 = vrot.lane.b32.xlu0 %v8429_v55, %s8473_s16  ;;  %v8434_v23 = vpack.i.bf16 %v9785_v24, %v9777_v50  ;;  %v9800_v54 = vmax.f32 %v1855_v33, %v1927_v28  ;;  %v1902_v58 = vsel %vm282_vm1, %v1887_v56, %v1901_v41  ;;  %v9804_v53 = vmax.f32 %v9709_v2, %v1904_v51  ;;  %v7070_v2 = vld [vmem:[%s15922_s3 + $0x1260] sm:$0xff] }
 0x146   : > { %v8439_v63 = vpack.i.bf16 %v9793_v49, %v9699_v39  ;;  %v9812_v0 = vmax.f32 %v9722_v32, %v1902_v58  ;;  %v1929_v1 = vsel %vm282_vm1, %v1903_v20, %v1857_v27  ;;  %v9816_v4 = vmax.f32 %v9680_v16, %v1894_v19  ;;  %v6931_v32 = vld [vmem:[%s15922_s3 + $0xe08] sm:$0xff]  ;;  %2948 = vmatpush2.msra.mxu1 %v6934_v43  ;;  %v7066_v33 = vld [vmem:[%s15922_s3 + $0x1240] sm:$0xff] }
 0x147   : > { %8435 = vrot.lane.b32.xlu1 %v8434_v23, %s8473_s16  ;;  %v7067_v16 = vld [vmem:[%s15922_s3 + $0x1248] sm:$0xff]  ;;  %v1928_v37 = vsel %vm282_vm1, %v1901_v41, %v1856_v29  ;;  %v1906_v48 = vsel %vm282_vm1, %v1893_v35, %v1905_v57  ;;  %v8449_v3 = vpack.i.bf16 %v9800_v54, %v9824_v44  ;;  %v9840_v22 = vmax.f32 %v1857_v27, %v1929_v1  ;;  %v7062_v56 = vld [vmem:[%s15922_s3 + $0x1220] sm:$0xff] }
 0x148   : > { %v9843_v26 = vmax.f32 %v9733_v59, %v1906_v48  ;;  %3021 = vmatpush2.msra.mxu0 %v7070_v2  ;;  %v1925_v11 = vsel %vm282_vm1, %v1895_v12, %v9621_v7  ;;  %2949 = vmatprep.subr.mxu1 %v6931_v32  ;;  %v7063_v59 = vld [vmem:[%s15922_s3 + $0x1228] sm:$0xff]  ;;  %v8444_v30 = vpack.i.bf16 %v9804_v53, %v9812_v0 }
 0x149   : > { %8440 = vrot.lane.b32.xlu0 %v8439_v63, %s8473_s16  ;;  %3022 = vmatprep.subr.mxu0 %v7067_v16  ;;  %v9861_v9 = vmax.f32 %v1856_v29, %v1928_v37  ;;  %v7059_v12 = vld [vmem:[%s15922_s3 + $0x1208] sm:$0xff]  ;;  %v8454_v60 = vpack.i.bf16 %v9816_v4, %v9840_v22  ;;  %v9873_v61 = vmax.f32 %v9621_v7, %v1925_v11 }
 0x14a   : > { %2950 = vmatpush2.msra.mxu1 %v6930_v18  ;;  %3023 = vmatpush2.msra.mxu0 %v7066_v33  ;;  %v1930_v42 = vsel %vm282_vm1, %v1905_v57, %v9774_v36 }
 0x14b   : > { %8450 = vrot.lane.b32.xlu1 %v8449_v3, %s8473_s16  ;;  %3041 = vmatprep.subr.mxu1 %v7183_v21  ;;  %v8459_v35 = vpack.i.bf16 %v9861_v9, %v9873_v61  ;;  %v9888_v7 = vmax.f32 %v9774_v36, %v1930_v42 }
 0x14c   : > { %3024 = vmatprep.subr.mxu0 %v7063_v59 }
 0x14d   : > { %8445 = vrot.lane.b32.xlu0 %v8444_v30, %s8473_s16  ;;  %3025 = vmatpush2.msra.mxu0 %v7062_v56  ;;  %v7182_v56 = vld [vmem:[%s15922_s3 + $0x15e0] sm:$0xff] }
 0x14e   : > { %3026 = vmatprep.subr.mxu0 %v7059_v12 }
 0x14f   : > { %8455 = vrot.lane.b32.xlu1 %v8454_v60, %s8473_s16  ;;  %3027 = vmatpush2.msra.mxu0 %v7058_v14 }
 0x150   : > { %3118 = vmatprep.subr.mxu0 %v6929_v62 }
 0x151   : > { %8460 = vrot.lane.b32.xlu0 %v8459_v35, %s8473_s16 }
 0x153   : > { %2001 = vrot.lane.b32.xlu1 %v9888_v7, %s8473_s16 }
 0x155   : > { %1989 = vrot.lane.b32.xlu0 %v9843_v26, %s8473_s16 }
 0x1af   : > { %v8426_v5 = vpop.permute.xlu1 %8425 }
 0x1b0   : > { %v8427_v10 = vunpack.i.l.bf16 %v8426_v5  ;;  %v8428_v20 = vunpack.i.h.bf16 %v8426_v5 }
 0x1b7   : > { %v8431_v27 = vpop.permute.xlu0 %8430 }
 0x1b8   : > { %v8433_v15 = vunpack.i.h.bf16 %v8431_v27  ;;  %v8432_v46 = vunpack.i.l.bf16 %v8431_v27 }
 0x1b9   : > { %v9894_v29 = vpop.permute.xlu1 %8435 }
 0x1ba   : > { %v2004_v31 = vsel %vm2003_vm5, %v8427_v10, %v8432_v46  ;;  %v2005_v34 = vsel %vm2003_vm5, %v8432_v46, %v8433_v15  ;;  %v8438_v8 = vunpack.i.h.bf16 %v9894_v29  ;;  %v8437_v17 = vunpack.i.l.bf16 %v9894_v29  ;;  %v7195_v29 = vld [vmem:[%s15922_s3 + $0x1648] sm:$0xff] }
 0x1bb   : > { %v8441_v19 = vpop.permute.xlu0 %8440  ;;  %v9901_v36 = vmax.f32 %v9649_v52, %v2005_v34  ;;  %v9904_v55 = vmax.f32 %v9623_v6, %v2004_v31 }
 0x1bc   : > { %v8443_v38 = vunpack.i.h.bf16 %v8441_v19  ;;  %v8442_v41 = vunpack.i.l.bf16 %v8441_v19  ;;  %v2006_v23 = vsel %vm2003_vm5, %v8433_v15, %v8437_v17  ;;  %v2007_v58 = vsel %vm2003_vm5, %v8437_v17, %v8438_v8  ;;  %v7175_v15 = vld [vmem:[%s15922_s3 + $0x15a8] sm:$0xff] }
 0x1bd   : > { %v8451_v47 = vpop.permute.xlu1 %8450  ;;  %v2848_v32 = vrot.slane %v9901_v36, 2  ;;  %v9938_v21 = vmax.f32 %v9777_v50, %v2007_v58  ;;  %v9953_v12 = vmax.f32 %v9762_v13, %v2006_v23  ;;  %v7178_v13 = vld [vmem:[%s15922_s3 + $0x15c0] sm:$0xff] }
 0x1be   : > { %v2009_v25 = vsel %vm2003_vm5, %v8428_v20, %v8442_v41  ;;  %v2010_v57 = vsel %vm2003_vm5, %v8442_v41, %v8443_v38  ;;  %v8453_v28 = vunpack.i.h.bf16 %v8451_v47  ;;  %v8452_v51 = vunpack.i.l.bf16 %v8451_v47  ;;  %v7174_v20 = vld [vmem:[%s15922_s3 + $0x15a0] sm:$0xff] }
 0x1bf   : > { %v9913_v52 = vmax.f32 %v9674_v40, %v2009_v25  ;;  %v9916_v43 = vmax.f32 %v9699_v39, %v2010_v57  ;;  %v9918_v6 = vpop.permute.xlu0 %8445  ;;  %v2845_v39 = vrot.slane %v9904_v55, 2  ;;  %v2854_v19 = vrot.slane %v9938_v21, 2  ;;  %v7170_v57 = vld [vmem:[%s15922_s3 + $0x1580] sm:$0xff] }
 0x1c0   : > { %v2015_v63 = vsel %vm2003_vm5, %v8452_v51, %v8453_v28  ;;  %v8448_v1 = vunpack.i.h.bf16 %v9918_v6  ;;  %v8447_v2 = vunpack.i.l.bf16 %v9918_v6  ;;  %v6953_v6 = vld [vmem:[%s15922_s3 + $0xeb8] sm:$0xff] }
 0x1c1   : > { %v9925_v16 = vmax.f32 %v9824_v44, %v2015_v63  ;;  %v9927_v37 = vpop.permute.xlu1 %8455  ;;  %v2849_v40 = vrot.slane %v9916_v43, 2  ;;  %v2846_v48 = vrot.slane %v9913_v52, 2 }
 0x1c2   : > { %v2011_v18 = vsel %vm2003_vm5, %v8443_v38, %v8447_v2  ;;  %v2012_v3 = vsel %vm2003_vm5, %v8447_v2, %v8448_v1  ;;  %v8458_v33 = vunpack.i.h.bf16 %v9927_v37  ;;  %v8457_v50 = vunpack.i.l.bf16 %v9927_v37  ;;  %v6924_v2 = vld [vmem:[%s15922_s3 + $0xdd0] sm:$0xff]  ;;  %v7186_v37 = vld [vmem:[%s15922_s3 + $0x1600] sm:$0xff] }
 0x1c3   : > { %v9941_v44 = vmax.f32 %v9812_v0, %v2012_v3  ;;  %v8461_v11 = vpop.permute.xlu0 %8460  ;;  %v9944_v59 = vsel %vm863_vm4, %v2848_v32, %v2849_v40  ;;  %v9947_v30 = vsel %vm863_vm4, %v2845_v39, %v2846_v48  ;;  %v7179_v0 = vld [vmem:[%s15922_s3 + $0x15c8] sm:$0xff]  ;;  %v9961_v42 = vmax.f32 %v9793_v49, %v2011_v18  ;;  %v6921_v3 = vld [vmem:[%s15922_s3 + $0xdb8] sm:$0xff] }
 0x1c4   : > { %v8463_v60 = vunpack.i.h.bf16 %v8461_v11  ;;  %v8462_v14 = vunpack.i.l.bf16 %v8461_v11  ;;  %2951 = vmatprep.mubr.f32.mxu1 %v9944_v59  ;;  %v2865_v62 = vrot.slane %v9925_v16, 2  ;;  %v2037_v5 = vsel %vm2003_vm5, %v8458_v33, %v9816_v4  ;;  %v7167_v39 = vld [vmem:[%s15922_s3 + $0x1568] sm:$0xff] }
 0x1c5   : > { %2952 = vmatmul.mubr.f32.vlgmr.msra.gmra.mxu1 %v9947_v30  ;;  %v2855_v35 = vrot.slane %v9941_v44, 2  ;;  %v2852_v25 = vrot.slane %v9961_v42, 2 }
 0x1c6   : > { %v2016_v27 = vsel %vm2003_vm5, %v8453_v28, %v8463_v60  ;;  %v2017_v49 = vsel %vm2003_vm5, %v8463_v60, %v8457_v50  ;;  %v2014_v10 = vsel %vm2003_vm5, %v8462_v14, %v8452_v51  ;;  %3042 = vmatpush1.msra.mxu1 %v7182_v56  ;;  %v9997_v38 = vsel %vm863_vm4, %v2849_v40, %v2865_v62  ;;  %v7166_v56 = vld [vmem:[%s15922_s3 + $0x1560] sm:$0xff]  ;;  %v6920_v60 = vld [vmem:[%s15922_s3 + $0xdb0] sm:$0xff]  ;;  %v7163_v14 = vld [vmem:[%s15922_s3 + $0x1548] sm:$0xff] }
 0x1c7   : > { %v9982_v46 = vmax.f32 %v9800_v54, %v2016_v27  ;;  %v9985_v31 = vmax.f32 %v9861_v9, %v2017_v49  ;;  %v9988_v34 = vmax.f32 %v9873_v61, %v2014_v10  ;;  %3043 = vmatprep.subr.mxu1 %v7179_v0  ;;  %v9990_v17 = vpop.permute.xlu0 %1989  ;;  %v2851_v54 = vrot.slane %v9953_v12, 2  ;;  %v7171_v9 = vld [vmem:[%s15922_s3 + $0x1588] sm:$0xff]  ;;  %2957 = vmatprep.mubr.f32.mxu1 %v9997_v38  ;;  %v6917_v62 = vld [vmem:[%s15922_s3 + $0xd98] sm:$0xff]  ;;  %v7158_v49 = vld [vmem:[%s15922_s3 + $0x1520] sm:$0xff] }
 0x1c8   : > { %3044 = vmatpush1.msra.mxu1 %v7178_v13  ;;  %v10004_v61 = vmax.f32 %v9816_v4, %v2037_v5  ;;  %v2038_v41 = vsel %vm2003_vm5, %v9990_v17, %v9843_v26  ;;  %v10011_v47 = vsel %vm863_vm4, %v2854_v19, %v2855_v35  ;;  %v6928_v4 = vld [vmem:[%s15922_s3 + $0xdf0] sm:$0xff]  ;;  %v7162_v13 = vld [vmem:[%s15922_s3 + $0x1540] sm:$0xff]  ;;  %v7159_v5 = vld [vmem:[%s15922_s3 + $0x1528] sm:$0xff] }
 0x1c9   : > { %3045 = vmatprep.subr.mxu1 %v7175_v15  ;;  %v10018_v28 = vmax.f32 %v9843_v26, %v2038_v41  ;;  %3028 = vmatprep.mubr.f32.mxu0 %v10011_v47  ;;  %v2863_v51 = vrot.slane %v9988_v34, 2  ;;  %v2869_v23 = vrot.slane %v9985_v31, 2  ;;  %v2867_v58 = vrot.slane %v9982_v46, 2  ;;  %v6925_v26 = vld [vmem:[%s15922_s3 + $0xdd8] sm:$0xff]  ;;  %v6912_v10 = vld [vmem:[%s15922_s3 + $0xd70] sm:$0xff]  ;;  %v7155_v15 = vld [vmem:[%s15922_s3 + $0x1508] sm:$0xff] }
 0x1ca   : > { %3046 = vmatpush1.msra.mxu1 %v7174_v20  ;;  %v10028_v63 = vsel %vm863_vm4, %v2851_v54, %v2852_v25  ;;  %v6913_v27 = vld [vmem:[%s15922_s3 + $0xd78] sm:$0xff]  ;;  %v6908_v20 = vld [vmem:[%s15922_s3 + $0xd50] sm:$0xff]  ;;  %v7151_v54 = vld [vmem:[%s15922_s3 + $0x14e8] sm:$0xff] }
 0x1cb   : > { %3047 = vmatprep.subr.mxu1 %v7171_v9  ;;  %3029 = vmatmul.mubr.f32.vlgmr.msra.gmra.mxu0 %v10028_v63  ;;  %v10038_v32 = vsel %vm863_vm4, %v2846_v48, %v2863_v51  ;;  %v10041_v40 = vsel %vm863_vm4, %v2855_v35, %v2869_v23  ;;  %v2861_v18 = vrot.slane %v10018_v28, 2  ;;  %v10052_v11 = vsel %vm863_vm4, %v2852_v25, %v2867_v58  ;;  %v6916_v35 = vld [vmem:[%s15922_s3 + $0xd90] sm:$0xff]  ;;  %v6909_v19 = vld [vmem:[%s15922_s3 + $0xd58] sm:$0xff]  ;;  %v7150_v41 = vld [vmem:[%s15922_s3 + $0x14e0] sm:$0xff] }
 0x1cc   : > { %3048 = vmatpush1.msra.mxu1 %v7170_v57  ;;  %3119 = vmatpush1.msra.mxu0 %v6928_v4  ;;  %v2860_v48 = vrot.slane %v10004_v61, 2  ;;  %v6905_v9 = vld [vmem:[%s15922_s3 + $0xd38] sm:$0xff]  ;;  %v6904_v25 = vld [vmem:[%s15922_s3 + $0xd30] sm:$0xff]  ;;  %v7147_v57 = vld [vmem:[%s15922_s3 + $0x14c8] sm:$0xff] }
 0x1cd   : > { %2958 = vmatmul.mubr.f32.gmra.mxu1 %v10038_v32  ;;  %3120 = vmatprep.subr.mxu0 %v6925_v26  ;;  %v6901_v4 = vld [vmem:[%s15922_s3 + $0xd18] sm:$0xff]  ;;  %v7146_v51 = vld [vmem:[%s15922_s3 + $0x14c0] sm:$0xff]  ;;  %v6900_v23 = vld [vmem:[%s15922_s3 + $0xd10] sm:$0xff] }
 0x1ce   : > { %3034 = vmatprep.mubr.f32.mxu0 %v10041_v40  ;;  %3121 = vmatpush1.msra.mxu0 %v6924_v2  ;;  %v10068_v0 = vsel %vm863_vm4, %v2860_v48, %v2861_v18  ;;  %v7143_v58 = vld [vmem:[%s15922_s3 + $0x14a8] sm:$0xff]  ;;  %v6897_v26 = vld [vmem:[%s15922_s3 + $0xcf8] sm:$0xff]  ;;  %v7142_v2 = vld [vmem:[%s15922_s3 + $0x14a0] sm:$0xff] }
 0x1cf   : > { %3049 = vmatprep.subr.mxu1 %v7167_v39  ;;  %3122 = vmatprep.subr.mxu0 %v6921_v3  ;;  %v6896_v39 = vld [vmem:[%s15922_s3 + $0xcf0] sm:$0xff]  ;;  %v7139_v3 = vld [vmem:[%s15922_s3 + $0x1488] sm:$0xff]  ;;  %v6893_v48 = vld [vmem:[%s15922_s3 + $0xcd8] sm:$0xff] }
 0x1d0   : > { %3035 = vmatmul.mubr.f32.gmra.mxu0 %v10052_v11  ;;  %3050 = vmatpush1.msra.mxu1 %v7166_v56  ;;  %v7138_v56 = vld [vmem:[%s15922_s3 + $0x1480] sm:$0xff] }
 0x1d1   : > { %3123 = vmatpush1.msra.mxu0 %v6920_v60  ;;  %3051 = vmatprep.subr.mxu1 %v7163_v14  ;;  %v6892_v60 = vld [vmem:[%s15922_s3 + $0xcd0] sm:$0xff]  ;;  %v7135_v14 = vld [vmem:[%s15922_s3 + $0x1468] sm:$0xff] }
 0x1d2   : > { %3105 = vmatprep.mubr.f32.mxu1 %v10068_v0  ;;  %3124 = vmatprep.subr.mxu0 %v6917_v62  ;;  %v6889_v62 = vld [vmem:[%s15922_s3 + $0xcb8] sm:$0xff] }
 0x1d3   : > { %3182 = vmatprep.mubr.f32.mxu0 %v9944_v59  ;;  %3052 = vmatpush1.msra.mxu1 %v7162_v13  ;;  %v7154_v59 = vld [vmem:[%s15922_s3 + $0x1500] sm:$0xff] }
 0x1d4   : > { %3125 = vmatpush1.msra.mxu0 %v6916_v35  ;;  %3053 = vmatprep.subr.mxu1 %v7159_v5  ;;  %v7134_v13 = vld [vmem:[%s15922_s3 + $0x1460] sm:$0xff]  ;;  %v6888_v35 = vld [vmem:[%s15922_s3 + $0xcb0] sm:$0xff]  ;;  %v7131_v5 = vld [vmem:[%s15922_s3 + $0x1448] sm:$0xff] }
 0x1d5   : > { %3126 = vmatprep.subr.mxu0 %v6913_v27  ;;  %3054 = vmatpush1.msra.mxu1 %v7158_v49  ;;  %v6885_v27 = vld [vmem:[%s15922_s3 + $0xc98] sm:$0xff]  ;;  %v7130_v49 = vld [vmem:[%s15922_s3 + $0x1440] sm:$0xff] }
 0x1d6   : > { %3127 = vmatpush1.msra.mxu0 %v6912_v10  ;;  %3055 = vmatprep.subr.mxu1 %v7155_v15  ;;  %v6884_v10 = vld [vmem:[%s15922_s3 + $0xc90] sm:$0xff]  ;;  %v7127_v15 = vld [vmem:[%s15922_s3 + $0x1428] sm:$0xff] }
 0x1d7   : > { %3128 = vmatprep.subr.mxu0 %v6909_v19  ;;  %3056 = vmatpush1.msra.mxu1 %v7154_v59  ;;  %v6881_v19 = vld [vmem:[%s15922_s3 + $0xc78] sm:$0xff]  ;;  %v7126_v59 = vld [vmem:[%s15922_s3 + $0x1420] sm:$0xff] }
 0x1d8   : > { %3129 = vmatpush1.msra.mxu0 %v6908_v20  ;;  %3057 = vmatprep.subr.mxu1 %v7151_v54  ;;  %v6880_v20 = vld [vmem:[%s15922_s3 + $0xc70] sm:$0xff]  ;;  %v7123_v54 = vld [vmem:[%s15922_s3 + $0x1408] sm:$0xff] }
 0x1d9   : > { %3130 = vmatprep.subr.mxu0 %v6905_v9  ;;  %3058 = vmatpush1.msra.mxu1 %v7150_v41  ;;  %v6877_v9 = vld [vmem:[%s15922_s3 + $0xc58] sm:$0xff]  ;;  %v7122_v41 = vld [vmem:[%s15922_s3 + $0x1400] sm:$0xff] }
 0x1da   : > { %3131 = vmatpush1.msra.mxu0 %v6904_v25  ;;  %3059 = vmatprep.subr.mxu1 %v7147_v57  ;;  %v6876_v25 = vld [vmem:[%s15922_s3 + $0xc50] sm:$0xff]  ;;  %v7247_v57 = vld [vmem:[%s15922_s3 + $0x17e8] sm:$0xff] }
 0x1db   : > { %3132 = vmatprep.subr.mxu0 %v6901_v4  ;;  %3060 = vmatpush1.msra.mxu1 %v7146_v51  ;;  %v6873_v4 = vld [vmem:[%s15922_s3 + $0xc38] sm:$0xff]  ;;  %v7246_v51 = vld [vmem:[%s15922_s3 + $0x17e0] sm:$0xff] }
 0x1dc   : > { %3133 = vmatpush1.msra.mxu0 %v6900_v23  ;;  %3061 = vmatprep.subr.mxu1 %v7143_v58  ;;  %v6872_v23 = vld [vmem:[%s15922_s3 + $0xc30] sm:$0xff]  ;;  %v7243_v58 = vld [vmem:[%s15922_s3 + $0x17c8] sm:$0xff] }
 0x1dd   : > { %3134 = vmatprep.subr.mxu0 %v6897_v26  ;;  %3062 = vmatpush1.msra.mxu1 %v7142_v2  ;;  %v6869_v26 = vld [vmem:[%s15922_s3 + $0xc18] sm:$0xff]  ;;  %v7242_v2 = vld [vmem:[%s15922_s3 + $0x17c0] sm:$0xff] }
 0x1de   : > { %3135 = vmatpush1.msra.mxu0 %v6896_v39  ;;  %3063 = vmatprep.subr.mxu1 %v7139_v3  ;;  %v6868_v39 = vld [vmem:[%s15922_s3 + $0xc10] sm:$0xff]  ;;  %v7239_v3 = vld [vmem:[%s15922_s3 + $0x17a8] sm:$0xff] }
 0x1df   : > { %3136 = vmatprep.subr.mxu0 %v6893_v48  ;;  %3064 = vmatpush1.msra.mxu1 %v7138_v56  ;;  %v6993_v48 = vld [vmem:[%s15922_s3 + $0xff8] sm:$0xff]  ;;  %v7238_v56 = vld [vmem:[%s15922_s3 + $0x17a0] sm:$0xff] }
 0x1e0   : > { %3137 = vmatpush1.msra.mxu0 %v6892_v60  ;;  %3065 = vmatprep.subr.mxu1 %v7135_v14  ;;  %v6992_v60 = vld [vmem:[%s15922_s3 + $0xff0] sm:$0xff]  ;;  %v7235_v14 = vld [vmem:[%s15922_s3 + $0x1788] sm:$0xff] }
 0x1e1   : > { %3138 = vmatprep.subr.mxu0 %v6889_v62  ;;  %3066 = vmatpush1.msra.mxu1 %v7134_v13  ;;  %v6989_v62 = vld [vmem:[%s15922_s3 + $0xfd8] sm:$0xff]  ;;  %v7234_v13 = vld [vmem:[%s15922_s3 + $0x1780] sm:$0xff] }
 0x1e2   : > { %3139 = vmatpush1.msra.mxu0 %v6888_v35  ;;  %3067 = vmatprep.subr.mxu1 %v7131_v5  ;;  %v6988_v35 = vld [vmem:[%s15922_s3 + $0xfd0] sm:$0xff]  ;;  %v7231_v5 = vld [vmem:[%s15922_s3 + $0x1768] sm:$0xff] }
 0x1e3   : > { %3140 = vmatprep.subr.mxu0 %v6885_v27  ;;  %3068 = vmatpush1.msra.mxu1 %v7130_v49  ;;  %v6985_v27 = vld [vmem:[%s15922_s3 + $0xfb8] sm:$0xff]  ;;  %v7230_v49 = vld [vmem:[%s15922_s3 + $0x1760] sm:$0xff] }
 0x1e4   : > { %3141 = vmatpush1.msra.mxu0 %v6884_v10  ;;  %3069 = vmatprep.subr.mxu1 %v7127_v15  ;;  %v6984_v10 = vld [vmem:[%s15922_s3 + $0xfb0] sm:$0xff]  ;;  %v7227_v15 = vld [vmem:[%s15922_s3 + $0x1748] sm:$0xff] }
 0x1e5   : > { %3142 = vmatprep.subr.mxu0 %v6881_v19  ;;  %3070 = vmatpush1.msra.mxu1 %v7126_v59  ;;  %v6981_v19 = vld [vmem:[%s15922_s3 + $0xf98] sm:$0xff]  ;;  %v7226_v59 = vld [vmem:[%s15922_s3 + $0x1740] sm:$0xff] }
 0x1e6   : > { %3143 = vmatpush1.msra.mxu0 %v6880_v20  ;;  %3071 = vmatprep.subr.mxu1 %v7123_v54  ;;  %v6980_v20 = vld [vmem:[%s15922_s3 + $0xf90] sm:$0xff]  ;;  %v7223_v54 = vld [vmem:[%s15922_s3 + $0x1728] sm:$0xff] }
 0x1e7   : > { %3144 = vmatprep.subr.mxu0 %v6877_v9  ;;  %3072 = vmatpush1.msra.mxu1 %v7122_v41  ;;  %v6977_v9 = vld [vmem:[%s15922_s3 + $0xf78] sm:$0xff]  ;;  %v7222_v41 = vld [vmem:[%s15922_s3 + $0x1720] sm:$0xff] }
 0x1e8   : > { %3145 = vmatpush1.msra.mxu0 %v6876_v25  ;;  %3073 = vmatprep.subr.mxu1 %v7247_v57  ;;  %v6976_v25 = vld [vmem:[%s15922_s3 + $0xf70] sm:$0xff]  ;;  %v7219_v57 = vld [vmem:[%s15922_s3 + $0x1708] sm:$0xff] }
 0x1e9   : > { %3146 = vmatprep.subr.mxu0 %v6873_v4  ;;  %3074 = vmatpush2.msra.mxu1 %v7246_v51  ;;  %v6973_v4 = vld [vmem:[%s15922_s3 + $0xf58] sm:$0xff]  ;;  %v7218_v51 = vld [vmem:[%s15922_s3 + $0x1700] sm:$0xff] }
 0x1ea   : > { %3147 = vmatpush1.msra.mxu0 %v6872_v23  ;;  %3075 = vmatprep.subr.mxu1 %v7243_v58  ;;  %v6972_v23 = vld [vmem:[%s15922_s3 + $0xf50] sm:$0xff]  ;;  %v7215_v58 = vld [vmem:[%s15922_s3 + $0x16e8] sm:$0xff] }
 0x1eb   : > { %3148 = vmatprep.subr.mxu0 %v6869_v26  ;;  %3076 = vmatpush2.msra.mxu1 %v7242_v2  ;;  %v6969_v26 = vld [vmem:[%s15922_s3 + $0xf38] sm:$0xff]  ;;  %v7214_v2 = vld [vmem:[%s15922_s3 + $0x16e0] sm:$0xff] }
 0x1ec   : > { %3149 = vmatpush1.msra.mxu0 %v6868_v39  ;;  %3077 = vmatprep.subr.mxu1 %v7239_v3  ;;  %v6968_v39 = vld [vmem:[%s15922_s3 + $0xf30] sm:$0xff]  ;;  %v7211_v3 = vld [vmem:[%s15922_s3 + $0x16c8] sm:$0xff] }
 0x1ed   : > { %3150 = vmatprep.subr.mxu0 %v6993_v48  ;;  %3078 = vmatpush2.msra.mxu1 %v7238_v56  ;;  %v6965_v48 = vld [vmem:[%s15922_s3 + $0xf18] sm:$0xff]  ;;  %v7210_v56 = vld [vmem:[%s15922_s3 + $0x16c0] sm:$0xff] }
 0x1ee   : > { %3151 = vmatpush2.msra.mxu0 %v6992_v60  ;;  %3079 = vmatprep.subr.mxu1 %v7235_v14  ;;  %v6964_v60 = vld [vmem:[%s15922_s3 + $0xf10] sm:$0xff]  ;;  %v7207_v14 = vld [vmem:[%s15922_s3 + $0x16a8] sm:$0xff] }
 0x1ef   : > { %3152 = vmatprep.subr.mxu0 %v6989_v62  ;;  %3080 = vmatpush2.msra.mxu1 %v7234_v13  ;;  %v6961_v62 = vld [vmem:[%s15922_s3 + $0xef8] sm:$0xff]  ;;  %v7206_v13 = vld [vmem:[%s15922_s3 + $0x16a0] sm:$0xff] }
 0x1f0   : > { %3153 = vmatpush2.msra.mxu0 %v6988_v35  ;;  %3081 = vmatprep.subr.mxu1 %v7231_v5  ;;  %v6960_v35 = vld [vmem:[%s15922_s3 + $0xef0] sm:$0xff]  ;;  %v7203_v5 = vld [vmem:[%s15922_s3 + $0x1688] sm:$0xff] }
 0x1f1   : > { %3154 = vmatprep.subr.mxu0 %v6985_v27  ;;  %3082 = vmatpush2.msra.mxu1 %v7230_v49  ;;  %v6957_v27 = vld [vmem:[%s15922_s3 + $0xed8] sm:$0xff]  ;;  %v2002_v49 = vpop.permute.xlu1 %2001 }
 0x1f2   : > { %3155 = vmatpush2.msra.mxu0 %v6984_v10  ;;  %3083 = vmatprep.subr.mxu1 %v7227_v15  ;;  %v2013_v10 = vsel %vm2003_vm5, %v8448_v1, %v9990_v17  ;;  %v7202_v15 = vld [vmem:[%s15922_s3 + $0x1680] sm:$0xff]  ;;  %v2008_v1 = vsel %vm2003_vm5, %v8438_v8, %v8458_v33  ;;  %v6949_v8 = vld [vmem:[%s15922_s3 + $0xe98] sm:$0xff] }
 0x1f3   : > { %3156 = vmatprep.subr.mxu0 %v6981_v19  ;;  %3084 = vmatpush2.msra.mxu1 %v7226_v59  ;;  %v6956_v19 = vld [vmem:[%s15922_s3 + $0xed0] sm:$0xff]  ;;  %v7199_v59 = vld [vmem:[%s15922_s3 + $0x1668] sm:$0xff]  ;;  %v7198_v17 = vld [vmem:[%s15922_s3 + $0x1660] sm:$0xff] }
 0x1f4   : > { %3157 = vmatpush2.msra.mxu0 %v6980_v20  ;;  %3085 = vmatprep.subr.mxu1 %v7223_v54  ;;  %v6952_v20 = vld [vmem:[%s15922_s3 + $0xeb0] sm:$0xff]  ;;  %v2039_v54 = vsel %vm2003_vm5, %v2002_v49, %v9888_v7  ;;  %v7194_v33 = vld [vmem:[%s15922_s3 + $0x1640] sm:$0xff] }
 0x1f5   : > { %3158 = vmatprep.subr.mxu0 %v6977_v9  ;;  %3086 = vmatpush2.msra.mxu1 %v7222_v41  ;;  %v10370_v9 = vmax.f32 %v9804_v53, %v2013_v10  ;;  %v6948_v53 = vld [vmem:[%s15922_s3 + $0xe90] sm:$0xff]  ;;  %v10385_v41 = vmax.f32 %v9785_v24, %v2008_v1  ;;  %v7190_v24 = vld [vmem:[%s15922_s3 + $0x1620] sm:$0xff]  ;;  %v7185_v10 = vld [vmem:[%s15922_s3 + $0x15f8] sm:$0xff] }
 0x1f6   : > { %3159 = vmatpush2.msra.mxu0 %v6976_v25  ;;  %3087 = vmatprep.subr.mxu1 %v7219_v57  ;;  %v7191_v25 = vld [vmem:[%s15922_s3 + $0x1628] sm:$0xff]  ;;  %v6945_v57 = vld [vmem:[%s15922_s3 + $0xe78] sm:$0xff] }
 0x1f7   : > { %3160 = vmatprep.subr.mxu0 %v6973_v4  ;;  %3088 = vmatpush2.msra.mxu1 %v7218_v51  ;;  %v10394_v4 = vmax.f32 %v9888_v7, %v2039_v54  ;;  %v6944_v51 = vld [vmem:[%s15922_s3 + $0xe70] sm:$0xff]  ;;  %v7187_v7 = vld [vmem:[%s15922_s3 + $0x1608] sm:$0xff]  ;;  %v7181_v1 = vld [vmem:[%s15922_s3 + $0x15d8] sm:$0xff] }
 0x1f8   : > { %3161 = vmatpush2.msra.mxu0 %v6972_v23  ;;  %3089 = vmatprep.subr.mxu1 %v7215_v58  ;;  %v2018_v23 = vsel %vm2003_vm5, %v8457_v50, %v2002_v49  ;;  %v6941_v58 = vld [vmem:[%s15922_s3 + $0xe58] sm:$0xff]  ;;  %v6940_v50 = vld [vmem:[%s15922_s3 + $0xe50] sm:$0xff] }
 0x1f9   : > { %3162 = vmatprep.subr.mxu0 %v6969_v26  ;;  %3090 = vmatpush2.msra.mxu1 %v7214_v2  ;;  %v2858_v26 = vrot.slane %v10370_v9, 2  ;;  %v2857_v2 = vrot.slane %v10385_v41, 2  ;;  %v7049_v49 = vld [vmem:[%s15922_s3 + $0x11b8] sm:$0xff]  ;;  %v7040_v54 = vld [vmem:[%s15922_s3 + $0x1170] sm:$0xff] }
 0x1fa   : > { %3163 = vmatpush2.msra.mxu0 %v6968_v39  ;;  %3091 = vmatprep.subr.mxu1 %v7211_v3  ;;  %v6937_v39 = vld [vmem:[%s15922_s3 + $0xe38] sm:$0xff]  ;;  %v10423_v3 = vmax.f32 %v9840_v22, %v2018_v23  ;;  %v7056_v22 = vld [vmem:[%s15922_s3 + $0x11f0] sm:$0xff] }
 0x1fb   : > { %3164 = vmatprep.subr.mxu0 %v6965_v48  ;;  %3092 = vmatpush2.msra.mxu1 %v7210_v56  ;;  %v7057_v48 = vld [vmem:[%s15922_s3 + $0x11f8] sm:$0xff]  ;;  %v2873_v56 = vrot.slane %v10394_v4, 2  ;;  %v7028_v23 = vld [vmem:[%s15922_s3 + $0x1110] sm:$0xff] }
 0x1fc   : > { %3165 = vmatpush2.msra.mxu0 %v6964_v60  ;;  %3093 = vmatprep.subr.mxu1 %v7207_v14  ;;  %v10430_v60 = vsel %vm863_vm4, %v2857_v2, %v2858_v26  ;;  %v6936_v14 = vld [vmem:[%s15922_s3 + $0xe30] sm:$0xff]  ;;  %v7021_v2 = vld [vmem:[%s15922_s3 + $0x10d8] sm:$0xff] }
 0x1fd   : > { %3166 = vmatprep.subr.mxu0 %v6961_v62  ;;  %3094 = vmatpush2.msra.mxu1 %v7206_v13  ;;  %v10442_v62 = vsel %vm863_vm4, %v2861_v18, %v2873_v56  ;;  %v6933_v13 = vld [vmem:[%s15922_s3 + $0xe18] sm:$0xff]  ;;  %v7052_v18 = vld [vmem:[%s15922_s3 + $0x11d0] sm:$0xff] }
 0x1fe   : > { %3167 = vmatpush2.msra.mxu0 %v6960_v35  ;;  %3095 = vmatprep.subr.mxu1 %v7203_v5  ;;  %v7053_v35 = vld [vmem:[%s15922_s3 + $0x11d8] sm:$0xff]  ;;  %v6932_v5 = vld [vmem:[%s15922_s3 + $0xe10] sm:$0xff] }
 0x1ff   : > { %3168 = vmatprep.subr.mxu0 %v6957_v27  ;;  %3096 = vmatpush2.msra.mxu1 %v7202_v15  ;;  %v2871_v27 = vrot.slane %v10423_v3, 2  ;;  %v7156_v56 = vld [vmem:[%s15922_s3 + $0x1510] sm:$0xff] }
 0x200   : > { %3169 = vmatpush2.msra.mxu0 %v6956_v19  ;;  %3097 = vmatprep.subr.mxu1 %v7199_v59  ;;  %v7048_v19 = vld [vmem:[%s15922_s3 + $0x11b0] sm:$0xff] }
 0x201   : > { %3170 = vmatprep.subr.mxu0 %v6953_v6  ;;  %3098 = vmatpush2.msra.mxu1 %v7198_v17  ;;  %v10465_v15 = vsel %vm863_vm4, %v2858_v26, %v2871_v27  ;;  %v7184_v59 = vld [vmem:[%s15922_s3 + $0x15f0] sm:$0xff]  ;;  %v7045_v6 = vld [vmem:[%s15922_s3 + $0x1198] sm:$0xff] }
 0x202   : > { %3171 = vmatpush2.msra.mxu0 %v6952_v20  ;;  %3099 = vmatprep.subr.mxu1 %v7195_v29  ;;  %v7180_v17 = vld [vmem:[%s15922_s3 + $0x15d0] sm:$0xff]  ;;  %v7041_v20 = vld [vmem:[%s15922_s3 + $0x1178] sm:$0xff] }
 0x203   : > { %3172 = vmatprep.subr.mxu0 %v6949_v8  ;;  %3100 = vmatpush2.msra.mxu1 %v7194_v33  ;;  %v7037_v29 = vld [vmem:[%s15922_s3 + $0x1158] sm:$0xff]  ;;  %v7036_v33 = vld [vmem:[%s15922_s3 + $0x1150] sm:$0xff] }
 0x204   : > { %3173 = vmatpush2.msra.mxu0 %v6948_v53  ;;  %3101 = vmatprep.subr.mxu1 %v7191_v25  ;;  %v7173_v8 = vld [vmem:[%s15922_s3 + $0x1598] sm:$0xff]  ;;  %v7172_v53 = vld [vmem:[%s15922_s3 + $0x1590] sm:$0xff] }
 0x205   : > { %3174 = vmatprep.subr.mxu0 %v6945_v57  ;;  %3102 = vmatpush2.msra.mxu1 %v7190_v24  ;;  %v7169_v25 = vld [vmem:[%s15922_s3 + $0x1578] sm:$0xff]  ;;  %v7032_v57 = vld [vmem:[%s15922_s3 + $0x1130] sm:$0xff] }
 0x206   : > { %3175 = vmatpush2.msra.mxu0 %v6944_v51  ;;  %3103 = vmatprep.subr.mxu1 %v7187_v7  ;;  %v7168_v24 = vld [vmem:[%s15922_s3 + $0x1570] sm:$0xff]  ;;  %v7165_v51 = vld [vmem:[%s15922_s3 + $0x1558] sm:$0xff] }
 0x207   : > { %3176 = vmatprep.subr.mxu0 %v6941_v58  ;;  %3104 = vmatpush2.msra.mxu1 %v7186_v37  ;;  %v7164_v7 = vld [vmem:[%s15922_s3 + $0x1550] sm:$0xff]  ;;  %v7025_v58 = vld [vmem:[%s15922_s3 + $0x10f8] sm:$0xff] }
 0x208   : > { %3177 = vmatpush2.msra.mxu0 %v6940_v50  ;;  %3106 = vmatmul.mubr.f32.vlgmr.msra.gmra.mxu1 %v10430_v60  ;;  %v7161_v26 = vld [vmem:[%s15922_s3 + $0x1538] sm:$0xff]  ;;  %v7024_v37 = vld [vmem:[%s15922_s3 + $0x10f0] sm:$0xff] }
 0x209   : > { %3178 = vmatprep.subr.mxu0 %v6937_v39  ;;  %3195 = vmatprep.subr.mxu1 %v7057_v48  ;;  %v7160_v50 = vld [vmem:[%s15922_s3 + $0x1530] sm:$0xff]  ;;  %v7157_v39 = vld [vmem:[%s15922_s3 + $0x1518] sm:$0xff] }
 0x20a   : > { %3111 = vmatprep.mubr.f32.mxu1 %v10442_v62  ;;  %3179 = vmatpush2.msra.mxu0 %v6936_v14  ;;  %v7020_v48 = vld [vmem:[%s15922_s3 + $0x10d0] sm:$0xff]  ;;  %v7017_v14 = vld [vmem:[%s15922_s3 + $0x10b8] sm:$0xff] }
 0x20b   : > { %3196 = vmatpush1.msra.mxu1 %v7056_v22  ;;  %3180 = vmatprep.subr.mxu0 %v6933_v13  ;;  %v7153_v22 = vld [vmem:[%s15922_s3 + $0x14f8] sm:$0xff]  ;;  %v7016_v13 = vld [vmem:[%s15922_s3 + $0x10b0] sm:$0xff] }
 0x20c   : > { %3197 = vmatprep.subr.mxu1 %v7053_v35  ;;  %3181 = vmatpush2.msra.mxu0 %v6932_v5  ;;  %v7152_v35 = vld [vmem:[%s15922_s3 + $0x14f0] sm:$0xff]  ;;  %v7013_v5 = vld [vmem:[%s15922_s3 + $0x1098] sm:$0xff] }
 0x20d   : > { %3198 = vmatpush1.msra.mxu1 %v7052_v18  ;;  %3183 = vmatmul.mubr.f32.vlgmr.msra.gmra.mxu0 %v9947_v30  ;;  %v7044_v30 = vld [vmem:[%s15922_s3 + $0x1190] sm:$0xff]  ;;  %v7149_v18 = vld [vmem:[%s15922_s3 + $0x14d8] sm:$0xff] }
 0x20e   : > { %3112 = vmatmul.mubr.f32.gmra.mxu1 %v10465_v15  ;;  %3199 = vmatprep.subr.mxu1 %v7049_v49  ;;  %v7012_v27 = vld [vmem:[%s15922_s3 + $0x1090] sm:$0xff] }
 0x20f   : > { %3272 = vmatprep.subr.mxu0 %v7185_v10  ;;  %3188 = vmatprep.mubr.f32.mxu0 %v9997_v38  ;;  %v7177_v38 = vld [vmem:[%s15922_s3 + $0x15b8] sm:$0xff]  ;;  %v7148_v49 = vld [vmem:[%s15922_s3 + $0x14d0] sm:$0xff] }
 0x210   : > { %3200 = vmatpush1.msra.mxu1 %v7048_v19  ;;  %3259 = vmatprep.mubr.f32.mxu1 %v10011_v47  ;;  %v7176_v47 = vld [vmem:[%s15922_s3 + $0x15b0] sm:$0xff]  ;;  %v7009_v10 = vld [vmem:[%s15922_s3 + $0x1078] sm:$0xff] }
 0x211   : > { %3273 = vmatpush1.msra.mxu0 %v7184_v59  ;;  %3201 = vmatprep.subr.mxu1 %v7045_v6  ;;  %v7145_v19 = vld [vmem:[%s15922_s3 + $0x14b8] sm:$0xff]  ;;  %v7008_v59 = vld [vmem:[%s15922_s3 + $0x1070] sm:$0xff] }
 0x212   : > { %3274 = vmatprep.subr.mxu0 %v7181_v1  ;;  %3202 = vmatpush1.msra.mxu1 %v7044_v30  ;;  %v7144_v6 = vld [vmem:[%s15922_s3 + $0x14b0] sm:$0xff]  ;;  %v7005_v1 = vld [vmem:[%s15922_s3 + $0x1058] sm:$0xff] }
 0x213   : > { %3275 = vmatpush1.msra.mxu0 %v7180_v17  ;;  %3203 = vmatprep.subr.mxu1 %v7041_v20  ;;  %v7141_v30 = vld [vmem:[%s15922_s3 + $0x1498] sm:$0xff]  ;;  %v7004_v17 = vld [vmem:[%s15922_s3 + $0x1050] sm:$0xff] }
 0x214   : > { %3189 = vmatmul.mubr.f32.gmra.mxu0 %v10038_v32  ;;  %3276 = vmatprep.subr.mxu0 %v7177_v38  ;;  %v7033_v32 = vld [vmem:[%s15922_s3 + $0x1138] sm:$0xff]  ;;  %v7140_v20 = vld [vmem:[%s15922_s3 + $0x1490] sm:$0xff] }
 0x215   : > { %3204 = vmatpush1.msra.mxu1 %v7040_v54  ;;  %3277 = vmatpush1.msra.mxu0 %v7176_v47  ;;  %v7001_v38 = vld [vmem:[%s15922_s3 + $0x1038] sm:$0xff]  ;;  %v7000_v47 = vld [vmem:[%s15922_s3 + $0x1030] sm:$0xff] }
 0x216   : > { %3336 = vmatprep.mubr.f32.mxu0 %v10068_v0  ;;  %3205 = vmatprep.subr.mxu1 %v7037_v29  ;;  %v7029_v0 = vld [vmem:[%s15922_s3 + $0x1118] sm:$0xff]  ;;  %v7136_v29 = vld [vmem:[%s15922_s3 + $0x1470] sm:$0xff] }
 0x217   : > { %3278 = vmatprep.subr.mxu0 %v7173_v8  ;;  %3206 = vmatpush1.msra.mxu1 %v7036_v33  ;;  %v7137_v54 = vld [vmem:[%s15922_s3 + $0x1478] sm:$0xff] }
 0x218   : > { %3279 = vmatpush1.msra.mxu0 %v7172_v53  ;;  %3207 = vmatprep.subr.mxu1 %v7033_v32  ;;  %v6997_v8 = vld [vmem:[%s15922_s3 + $0x1018] sm:$0xff]  ;;  %v6996_v53 = vld [vmem:[%s15922_s3 + $0x1010] sm:$0xff] }
 0x219   : > { %3280 = vmatprep.subr.mxu0 %v7169_v25  ;;  %3208 = vmatpush1.msra.mxu1 %v7032_v57  ;;  %v7133_v33 = vld [vmem:[%s15922_s3 + $0x1458] sm:$0xff]  ;;  %v7132_v32 = vld [vmem:[%s15922_s3 + $0x1450] sm:$0xff] }
 0x21a   : > { %3281 = vmatpush1.msra.mxu0 %v7168_v24  ;;  %3209 = vmatprep.subr.mxu1 %v7029_v0  ;;  %v7121_v25 = vld [vmem:[%s15922_s3 + $0x13f8] sm:$0xff]  ;;  %v7120_v24 = vld [vmem:[%s15922_s3 + $0x13f0] sm:$0xff] }
 0x21b   : > { %3282 = vmatprep.subr.mxu0 %v7165_v51  ;;  %3210 = vmatpush1.msra.mxu1 %v7028_v23  ;;  %v7129_v57 = vld [vmem:[%s15922_s3 + $0x1438] sm:$0xff]  ;;  %v7128_v0 = vld [vmem:[%s15922_s3 + $0x1430] sm:$0xff] }
 0x21c   : > { %3283 = vmatpush1.msra.mxu0 %v7164_v7  ;;  %3211 = vmatprep.subr.mxu1 %v7025_v58  ;;  %v7117_v51 = vld [vmem:[%s15922_s3 + $0x13d8] sm:$0xff]  ;;  %v7116_v7 = vld [vmem:[%s15922_s3 + $0x13d0] sm:$0xff] }
 0x21d   : > { %3284 = vmatprep.subr.mxu0 %v7161_v26  ;;  %3212 = vmatpush1.msra.mxu1 %v7024_v37  ;;  %v7125_v23 = vld [vmem:[%s15922_s3 + $0x1418] sm:$0xff]  ;;  %v7124_v58 = vld [vmem:[%s15922_s3 + $0x1410] sm:$0xff] }
 0x21e   : > { %3285 = vmatpush1.msra.mxu0 %v7160_v50  ;;  %3213 = vmatprep.subr.mxu1 %v7021_v2  ;;  %v7113_v26 = vld [vmem:[%s15922_s3 + $0x13b8] sm:$0xff]  ;;  %v7112_v50 = vld [vmem:[%s15922_s3 + $0x13b0] sm:$0xff] }
 0x21f   : > { %3286 = vmatprep.subr.mxu0 %v7157_v39  ;;  %3214 = vmatpush1.msra.mxu1 %v7020_v48  ;;  %v7249_v37 = vld [vmem:[%s15922_s3 + $0x17f8] sm:$0xff]  ;;  %v7248_v2 = vld [vmem:[%s15922_s3 + $0x17f0] sm:$0xff] }
 0x220   : > { %3287 = vmatpush1.msra.mxu0 %v7156_v56  ;;  %3215 = vmatprep.subr.mxu1 %v7017_v14  ;;  %v7109_v39 = vld [vmem:[%s15922_s3 + $0x1398] sm:$0xff]  ;;  %v7108_v56 = vld [vmem:[%s15922_s3 + $0x1390] sm:$0xff] }
 0x221   : > { %3288 = vmatprep.subr.mxu0 %v7153_v22  ;;  %3216 = vmatpush1.msra.mxu1 %v7016_v13  ;;  %v7245_v48 = vld [vmem:[%s15922_s3 + $0x17d8] sm:$0xff]  ;;  %v7244_v14 = vld [vmem:[%s15922_s3 + $0x17d0] sm:$0xff] }
 0x222   : > { %3289 = vmatpush1.msra.mxu0 %v7152_v35  ;;  %3217 = vmatprep.subr.mxu1 %v7013_v5  ;;  %v7105_v22 = vld [vmem:[%s15922_s3 + $0x1378] sm:$0xff]  ;;  %v7104_v35 = vld [vmem:[%s15922_s3 + $0x1370] sm:$0xff] }
 0x223   : > { %3290 = vmatprep.subr.mxu0 %v7149_v18  ;;  %3218 = vmatpush1.msra.mxu1 %v7012_v27  ;;  %v7241_v13 = vld [vmem:[%s15922_s3 + $0x17b8] sm:$0xff]  ;;  %v7240_v5 = vld [vmem:[%s15922_s3 + $0x17b0] sm:$0xff] }
 0x224   : > { %3291 = vmatpush1.msra.mxu0 %v7148_v49  ;;  %3219 = vmatprep.subr.mxu1 %v7009_v10  ;;  %v7101_v18 = vld [vmem:[%s15922_s3 + $0x1358] sm:$0xff]  ;;  %v7100_v49 = vld [vmem:[%s15922_s3 + $0x1350] sm:$0xff] }
 0x225   : > { %3292 = vmatprep.subr.mxu0 %v7145_v19  ;;  %3220 = vmatpush1.msra.mxu1 %v7008_v59  ;;  %v7237_v27 = vld [vmem:[%s15922_s3 + $0x1798] sm:$0xff]  ;;  %v7236_v10 = vld [vmem:[%s15922_s3 + $0x1790] sm:$0xff] }
 0x226   : > { %3293 = vmatpush1.msra.mxu0 %v7144_v6  ;;  %3221 = vmatprep.subr.mxu1 %v7005_v1  ;;  %v7097_v19 = vld [vmem:[%s15922_s3 + $0x1338] sm:$0xff]  ;;  %v7096_v6 = vld [vmem:[%s15922_s3 + $0x1330] sm:$0xff] }
 0x227   : > { %3294 = vmatprep.subr.mxu0 %v7141_v30  ;;  %3222 = vmatpush1.msra.mxu1 %v7004_v17  ;;  %v7233_v59 = vld [vmem:[%s15922_s3 + $0x1778] sm:$0xff]  ;;  %v7232_v1 = vld [vmem:[%s15922_s3 + $0x1770] sm:$0xff] }
 0x228   : > { %3295 = vmatpush1.msra.mxu0 %v7140_v20  ;;  %3223 = vmatprep.subr.mxu1 %v7001_v38  ;;  %v7093_v30 = vld [vmem:[%s15922_s3 + $0x1318] sm:$0xff]  ;;  %v7092_v20 = vld [vmem:[%s15922_s3 + $0x1310] sm:$0xff] }
 0x229   : > { %3296 = vmatprep.subr.mxu0 %v7137_v54  ;;  %3224 = vmatpush1.msra.mxu1 %v7000_v47  ;;  %v7229_v17 = vld [vmem:[%s15922_s3 + $0x1758] sm:$0xff]  ;;  %v7228_v38 = vld [vmem:[%s15922_s3 + $0x1750] sm:$0xff] }
 0x22a   : > { %3297 = vmatpush1.msra.mxu0 %v7136_v29  ;;  %3225 = vmatprep.subr.mxu1 %v6997_v8  ;;  %v7089_v54 = vld [vmem:[%s15922_s3 + $0x12f8] sm:$0xff]  ;;  %v7088_v29 = vld [vmem:[%s15922_s3 + $0x12f0] sm:$0xff] }
 0x22b   : > { %3298 = vmatprep.subr.mxu0 %v7133_v33  ;;  %3226 = vmatpush1.msra.mxu1 %v6996_v53  ;;  %v7225_v47 = vld [vmem:[%s15922_s3 + $0x1738] sm:$0xff]  ;;  %v7224_v8 = vld [vmem:[%s15922_s3 + $0x1730] sm:$0xff] }
 0x22c   : > { %3299 = vmatpush1.msra.mxu0 %v7132_v32  ;;  %3227 = vmatprep.subr.mxu1 %v7121_v25  ;;  %v7085_v33 = vld [vmem:[%s15922_s3 + $0x12d8] sm:$0xff]  ;;  %v7084_v32 = vld [vmem:[%s15922_s3 + $0x12d0] sm:$0xff] }
 0x22d   : > { %3300 = vmatprep.subr.mxu0 %v7129_v57  ;;  %3228 = vmatpush2.msra.mxu1 %v7120_v24  ;;  %v7221_v53 = vld [vmem:[%s15922_s3 + $0x1718] sm:$0xff]  ;;  %v7220_v25 = vld [vmem:[%s15922_s3 + $0x1710] sm:$0xff] }
 0x22e   : > { %3301 = vmatpush1.msra.mxu0 %v7128_v0  ;;  %3229 = vmatprep.subr.mxu1 %v7117_v51  ;;  %v7081_v57 = vld [vmem:[%s15922_s3 + $0x12b8] sm:$0xff]  ;;  %v7080_v0 = vld [vmem:[%s15922_s3 + $0x12b0] sm:$0xff] }
 0x22f   : > { %3302 = vmatprep.subr.mxu0 %v7125_v23  ;;  %3230 = vmatpush2.msra.mxu1 %v7116_v7  ;;  %v7217_v24 = vld [vmem:[%s15922_s3 + $0x16f8] sm:$0xff]  ;;  %v7216_v51 = vld [vmem:[%s15922_s3 + $0x16f0] sm:$0xff] }
 0x230   : > { %3303 = vmatpush1.msra.mxu0 %v7124_v58  ;;  %3231 = vmatprep.subr.mxu1 %v7113_v26  ;;  %v7077_v23 = vld [vmem:[%s15922_s3 + $0x1298] sm:$0xff]  ;;  %v7076_v58 = vld [vmem:[%s15922_s3 + $0x1290] sm:$0xff] }
 0x231   : > { %3304 = vmatprep.subr.mxu0 %v7249_v37  ;;  %3232 = vmatpush2.msra.mxu1 %v7112_v50  ;;  %v7213_v7 = vld [vmem:[%s15922_s3 + $0x16d8] sm:$0xff]  ;;  %v7212_v26 = vld [vmem:[%s15922_s3 + $0x16d0] sm:$0xff] }
 0x232   : > { %3305 = vmatpush2.msra.mxu0 %v7248_v2  ;;  %3233 = vmatprep.subr.mxu1 %v7109_v39  ;;  %v7073_v37 = vld [vmem:[%s15922_s3 + $0x1278] sm:$0xff]  ;;  %v7072_v2 = vld [vmem:[%s15922_s3 + $0x1270] sm:$0xff] }
 0x233   : > { %3306 = vmatprep.subr.mxu0 %v7245_v48  ;;  %3234 = vmatpush2.msra.mxu1 %v7108_v56  ;;  %v7209_v50 = vld [vmem:[%s15922_s3 + $0x16b8] sm:$0xff]  ;;  %v7208_v39 = vld [vmem:[%s15922_s3 + $0x16b0] sm:$0xff] }
 0x234   : > { %3307 = vmatpush2.msra.mxu0 %v7244_v14  ;;  %3235 = vmatprep.subr.mxu1 %v7105_v22  ;;  %v7069_v48 = vld [vmem:[%s15922_s3 + $0x1258] sm:$0xff]  ;;  %v7068_v14 = vld [vmem:[%s15922_s3 + $0x1250] sm:$0xff] }
 0x235   : > { %3308 = vmatprep.subr.mxu0 %v7241_v13  ;;  %3236 = vmatpush2.msra.mxu1 %v7104_v35  ;;  %v7205_v56 = vld [vmem:[%s15922_s3 + $0x1698] sm:$0xff]  ;;  %v7204_v22 = vld [vmem:[%s15922_s3 + $0x1690] sm:$0xff] }
 0x236   : > { %3309 = vmatpush2.msra.mxu0 %v7240_v5  ;;  %3237 = vmatprep.subr.mxu1 %v7101_v18  ;;  %v7065_v13 = vld [vmem:[%s15922_s3 + $0x1238] sm:$0xff]  ;;  %v7064_v5 = vld [vmem:[%s15922_s3 + $0x1230] sm:$0xff] }
 0x237   : > { %3310 = vmatprep.subr.mxu0 %v7237_v27  ;;  %3238 = vmatpush2.msra.mxu1 %v7100_v49  ;;  %v7201_v35 = vld [vmem:[%s15922_s3 + $0x1678] sm:$0xff]  ;;  %v7200_v18 = vld [vmem:[%s15922_s3 + $0x1670] sm:$0xff] }
 0x238   : > { %3311 = vmatpush2.msra.mxu0 %v7236_v10  ;;  %3239 = vmatprep.subr.mxu1 %v7097_v19  ;;  %v7061_v27 = vld [vmem:[%s15922_s3 + $0x1218] sm:$0xff]  ;;  %v7060_v10 = vld [vmem:[%s15922_s3 + $0x1210] sm:$0xff] }
 0x239   : > { %3312 = vmatprep.subr.mxu0 %v7233_v59  ;;  %3240 = vmatpush2.msra.mxu1 %v7096_v6  ;;  %v7197_v49 = vld [vmem:[%s15922_s3 + $0x1658] sm:$0xff]  ;;  %v7196_v19 = vld [vmem:[%s15922_s3 + $0x1650] sm:$0xff]  ;;  %v2119_v6 = vld [vmem:[%s15922_s3 + $0x1e8] sm:$0xff] }
 0x23a   : > { %3313 = vmatpush2.msra.mxu0 %v7232_v1  ;;  %3241 = vmatprep.subr.mxu1 %v7093_v30  ;;  %v7193_v59 = vld [vmem:[%s15922_s3 + $0x1638] sm:$0xff]  ;;  %v7192_v1 = vld [vmem:[%s15922_s3 + $0x1630] sm:$0xff]  ;;  %v2118_v30 = vld [vmem:[%s15922_s3 + $0x1e0] sm:$0xff] }
 0x23b   : > { %3314 = vmatprep.subr.mxu0 %v7229_v17  ;;  %3242 = vmatpush2.msra.mxu1 %v7092_v20  ;;  %v7189_v17 = vld [vmem:[%s15922_s3 + $0x1618] sm:$0xff]  ;;  %v2115_v20 = vld [vmem:[%s15922_s3 + $0x1c8] sm:$0xff] }
 0x23c   : > { %3315 = vmatpush2.msra.mxu0 %v7228_v38  ;;  %3243 = vmatprep.subr.mxu1 %v7089_v54  ;;  %v7188_v38 = vld [vmem:[%s15922_s3 + $0x1610] sm:$0xff]  ;;  %v2111_v54 = vld [vmem:[%s15922_s3 + $0x1a8] sm:$0xff] }
 0x23d   : > { %3316 = vmatprep.subr.mxu0 %v7225_v47  ;;  %3244 = vmatpush2.msra.mxu1 %v7088_v29  ;;  %v2110_v47 = vld [vmem:[%s15922_s3 + $0x1a0] sm:$0xff] }
 0x23e   : > { %3317 = vmatpush2.msra.mxu0 %v7224_v8  ;;  %3245 = vmatprep.subr.mxu1 %v7085_v33  ;;  %v2246_v29 = vld [vmem:[%s15922_s3 + $0x5e0] sm:$0xff]  ;;  %v2107_v8 = vld [vmem:[%s15922_s3 + $0x188] sm:$0xff] }
 0x23f   : > { %3318 = vmatprep.subr.mxu0 %v7221_v53  ;;  %3246 = vmatpush2.msra.mxu1 %v7084_v32  ;;  %v2243_v33 = vld [vmem:[%s15922_s3 + $0x5c8] sm:$0xff]  ;;  %v2102_v32 = vld [vmem:[%s15922_s3 + $0x160] sm:$0xff] }
 0x240   : > { %3319 = vmatpush2.msra.mxu0 %v7220_v25  ;;  %3247 = vmatprep.subr.mxu1 %v7081_v57  ;;  %v2103_v53 = vld [vmem:[%s15922_s3 + $0x168] sm:$0xff]  ;;  %v2238_v25 = vld [vmem:[%s15922_s3 + $0x5a0] sm:$0xff] }
 0x241   : > { %3320 = vmatprep.subr.mxu0 %v7217_v24  ;;  %3248 = vmatpush2.msra.mxu1 %v7080_v0  ;;  %v2099_v57 = vld [vmem:[%s15922_s3 + $0x148] sm:$0xff]  ;;  %v2098_v0 = vld [vmem:[%s15922_s3 + $0x140] sm:$0xff] }
 0x242   : > { %3321 = vmatpush2.msra.mxu0 %v7216_v51  ;;  %3249 = vmatprep.subr.mxu1 %v7077_v23  ;;  %v2235_v24 = vld [vmem:[%s15922_s3 + $0x588] sm:$0xff]  ;;  %v2234_v51 = vld [vmem:[%s15922_s3 + $0x580] sm:$0xff] }
 0x243   : > { %3322 = vmatprep.subr.mxu0 %v7213_v7  ;;  %3250 = vmatpush2.msra.mxu1 %v7076_v58  ;;  %v2231_v23 = vld [vmem:[%s15922_s3 + $0x568] sm:$0xff]  ;;  %v2094_v7 = vld [vmem:[%s15922_s3 + $0x120] sm:$0xff] }
 0x244   : > { %3323 = vmatpush2.msra.mxu0 %v7212_v26  ;;  %3251 = vmatprep.subr.mxu1 %v7073_v37  ;;  %v2230_v58 = vld [vmem:[%s15922_s3 + $0x560] sm:$0xff]  ;;  %v2091_v26 = vld [vmem:[%s15922_s3 + $0x108] sm:$0xff] }
 0x245   : > { %3324 = vmatprep.subr.mxu0 %v7209_v50  ;;  %3252 = vmatpush2.msra.mxu1 %v7072_v2  ;;  %v2227_v37 = vld [vmem:[%s15922_s3 + $0x548] sm:$0xff]  ;;  %v2090_v50 = vld [vmem:[%s15922_s3 + $0x100] sm:$0xff] }
 0x246   : > { %3325 = vmatpush2.msra.mxu0 %v7208_v39  ;;  %3253 = vmatprep.subr.mxu1 %v7069_v48  ;;  %v2226_v2 = vld [vmem:[%s15922_s3 + $0x540] sm:$0xff]  ;;  %v2087_v39 = vld [vmem:[%s15922_s3 + $0xe8] sm:$0xff] }
 0x247   : > { %3326 = vmatprep.subr.mxu0 %v7205_v56  ;;  %3254 = vmatpush2.msra.mxu1 %v7068_v14  ;;  %v2223_v48 = vld [vmem:[%s15922_s3 + $0x528] sm:$0xff]  ;;  %v2086_v56 = vld [vmem:[%s15922_s3 + $0xe0] sm:$0xff] }
 0x248   : > { %3327 = vmatpush2.msra.mxu0 %v7204_v22  ;;  %3255 = vmatprep.subr.mxu1 %v7065_v13  ;;  %v2222_v14 = vld [vmem:[%s15922_s3 + $0x520] sm:$0xff]  ;;  %v2083_v22 = vld [vmem:[%s15922_s3 + $0xc8] sm:$0xff] }
 0x249   : > { %3328 = vmatprep.subr.mxu0 %v7201_v35  ;;  %3256 = vmatpush2.msra.mxu1 %v7064_v5  ;;  %v2219_v13 = vld [vmem:[%s15922_s3 + $0x508] sm:$0xff]  ;;  %v2082_v35 = vld [vmem:[%s15922_s3 + $0xc0] sm:$0xff] }
 0x24a   : > { %3329 = vmatpush2.msra.mxu0 %v7200_v18  ;;  %3257 = vmatprep.subr.mxu1 %v7061_v27  ;;  %v2218_v5 = vld [vmem:[%s15922_s3 + $0x500] sm:$0xff]  ;;  %v2079_v18 = vld [vmem:[%s15922_s3 + $0xa8] sm:$0xff] }
 0x24b   : > { %3330 = vmatprep.subr.mxu0 %v7197_v49  ;;  %3258 = vmatpush2.msra.mxu1 %v7060_v10  ;;  %v2215_v27 = vld [vmem:[%s15922_s3 + $0x4e8] sm:$0xff]  ;;  %v2078_v49 = vld [vmem:[%s15922_s3 + $0xa0] sm:$0xff] }
 0x24c   : > { %3331 = vmatpush2.msra.mxu0 %v7196_v19  ;;  %3260 = vmatmul.mubr.f32.vlgmr.msra.gmra.mxu1 %v10028_v63  ;;  %v2114_v63 = vld [vmem:[%s15922_s3 + $0x1c0] sm:$0xff]  ;;  %v2075_v19 = vld [vmem:[%s15922_s3 + $0x88] sm:$0xff] }
 0x24d   : > { %3332 = vmatprep.subr.mxu0 %v7193_v59  ;;  %3349 = vmatprep.subr.mxu1 %v2119_v6  ;;  %v2214_v10 = vld [vmem:[%s15922_s3 + $0x4e0] sm:$0xff]  ;;  %v2211_v59 = vld [vmem:[%s15922_s3 + $0x4c8] sm:$0xff] }
 0x24e   : > { %3265 = vmatprep.mubr.f32.mxu1 %v10041_v40  ;;  %3333 = vmatpush2.msra.mxu0 %v7192_v1  ;;  %v2247_v40 = vld [vmem:[%s15922_s3 + $0x5e8] sm:$0xff]  ;;  %v2074_v6 = vld [vmem:[%s15922_s3 + $0x80] sm:$0xff] }
 0x24f   : > { %3350 = vmatpush1.msra.mxu1 %v2118_v30  ;;  %3334 = vmatprep.subr.mxu0 %v7189_v17  ;;  %v2210_v1 = vld [vmem:[%s15922_s3 + $0x4c0] sm:$0xff]  ;;  %v2071_v30 = vld [vmem:[%s15922_s3 + $0x68] sm:$0xff] }
 0x250   : > { %3351 = vmatprep.subr.mxu1 %v2115_v20  ;;  %3335 = vmatpush2.msra.mxu0 %v7188_v38  ;;  %v2207_v17 = vld [vmem:[%s15922_s3 + $0x4a8] sm:$0xff]  ;;  %v2070_v20 = vld [vmem:[%s15922_s3 + $0x60] sm:$0xff] }
 0x251   : > { %3352 = vmatpush1.msra.mxu1 %v2114_v63  ;;  %3337 = vmatmul.mubr.f32.vlgmr.msra.gmra.mxu0 %v10430_v60  ;;  %v2242_v60 = vld [vmem:[%s15922_s3 + $0x5c0] sm:$0xff]  ;;  %v2067_v63 = vld [vmem:[%s15922_s3 + $0x48] sm:$0xff] }
 0x252   : > { %3266 = vmatmul.mubr.f32.gmra.mxu1 %v10052_v11  ;;  %3353 = vmatprep.subr.mxu1 %v2111_v54  ;;  %v2106_v11 = vld [vmem:[%s15922_s3 + $0x180] sm:$0xff]  ;;  %v2203_v54 = vld [vmem:[%s15922_s3 + $0x488] sm:$0xff] }
 0x253   : > { %3426 = vmatprep.subr.mxu0 %v2247_v40  ;;  %3342 = vmatprep.mubr.f32.mxu0 %v10442_v62  ;;  %v2239_v62 = vld [vmem:[%s15922_s3 + $0x5a8] sm:$0xff]  ;;  %v2206_v38 = vld [vmem:[%s15922_s3 + $0x4a0] sm:$0xff] }
 0x254   : > { %3354 = vmatpush1.msra.mxu1 %v2110_v47  ;;  %3413 = vmatprep.mubr.f32.mxu1 %v9901_v36  ;;  %v2066_v40 = vld [vmem:[%s15922_s3 + $0x40] sm:$0xff] }
 0x255   : > { %3427 = vmatpush1.msra.mxu0 %v2246_v29  ;;  %3355 = vmatprep.subr.mxu1 %v2107_v8  ;;  %v2202_v47 = vld [vmem:[%s15922_s3 + $0x480] sm:$0xff]  ;;  %v2063_v29 = vld [vmem:[%s15922_s3 + $0x28] sm:$0xff] }
 0x256   : > { %3428 = vmatprep.subr.mxu0 %v2243_v33  ;;  %3356 = vmatpush1.msra.mxu1 %v2106_v11  ;;  %v2199_v8 = vld [vmem:[%s15922_s3 + $0x468] sm:$0xff]  ;;  %v2062_v33 = vld [vmem:[%s15922_s3 + $0x20] sm:$0xff] }
 0x257   : > { %3429 = vmatpush1.msra.mxu0 %v2242_v60  ;;  %3357 = vmatprep.subr.mxu1 %v2103_v53  ;;  %v2198_v11 = vld [vmem:[%s15922_s3 + $0x460] sm:$0xff]  ;;  %v2059_v60 = vld [vmem:[%s15922_s3 + $0x8] sm:$0xff] }
 0x258   : > { %3343 = vmatmul.mubr.f32.gmra.mxu0 %v10465_v15  ;;  %3430 = vmatprep.subr.mxu0 %v2239_v62  ;;  %v2095_v15 = vld [vmem:[%s15922_s3 + $0x128] sm:$0xff]  ;;  %v2058_v62 = vld [vmem:[%s15922_s3] sm:$0xff] }
 0x259   : > { %3358 = vmatpush1.msra.mxu1 %v2102_v32  ;;  %3431 = vmatpush1.msra.mxu0 %v2238_v25  ;;  %v2195_v53 = vld [vmem:[%s15922_s3 + $0x448] sm:$0xff]  ;;  %v2194_v32 = vld [vmem:[%s15922_s3 + $0x440] sm:$0xff] }
 0x25a   : > { %3490 = vmatprep.mubr.f32.mxu0 %v9938_v21  ;;  %3359 = vmatprep.subr.mxu1 %v2099_v57  ;;  %v2183_v25 = vld [vmem:[%s15922_s3 + $0x3e8] sm:$0xff] }
 0x25b   : > { %3432 = vmatprep.subr.mxu0 %v2235_v24  ;;  %3360 = vmatpush1.msra.mxu1 %v2098_v0  ;;  %v2191_v57 = vld [vmem:[%s15922_s3 + $0x428] sm:$0xff]  ;;  %v2182_v24 = vld [vmem:[%s15922_s3 + $0x3e0] sm:$0xff] }
 0x25c   : > { %3433 = vmatpush1.msra.mxu0 %v2234_v51  ;;  %3361 = vmatprep.subr.mxu1 %v2095_v15  ;;  %v2190_v0 = vld [vmem:[%s15922_s3 + $0x420] sm:$0xff]  ;;  %v2179_v51 = vld [vmem:[%s15922_s3 + $0x3c8] sm:$0xff] }
 0x25d   : > { %3434 = vmatprep.subr.mxu0 %v2231_v23  ;;  %3362 = vmatpush1.msra.mxu1 %v2094_v7  ;;  %v2187_v15 = vld [vmem:[%s15922_s3 + $0x408] sm:$0xff]  ;;  %v2178_v23 = vld [vmem:[%s15922_s3 + $0x3c0] sm:$0xff] }
 0x25e   : > { %3435 = vmatpush1.msra.mxu0 %v2230_v58  ;;  %3363 = vmatprep.subr.mxu1 %v2091_v26  ;;  %v2186_v7 = vld [vmem:[%s15922_s3 + $0x400] sm:$0xff]  ;;  %v2175_v58 = vld [vmem:[%s15922_s3 + $0x3a8] sm:$0xff] }
 0x25f   : > { %3436 = vmatprep.subr.mxu0 %v2227_v37  ;;  %3364 = vmatpush1.msra.mxu1 %v2090_v50  ;;  %v2311_v26 = vld [vmem:[%s15922_s3 + $0x7e8] sm:$0xff]  ;;  %v2174_v37 = vld [vmem:[%s15922_s3 + $0x3a0] sm:$0xff] }
 0x260   : > { %3437 = vmatpush1.msra.mxu0 %v2226_v2  ;;  %3365 = vmatprep.subr.mxu1 %v2087_v39  ;;  %v2310_v50 = vld [vmem:[%s15922_s3 + $0x7e0] sm:$0xff]  ;;  %v2171_v2 = vld [vmem:[%s15922_s3 + $0x388] sm:$0xff] }
 0x261   : > { %3438 = vmatprep.subr.mxu0 %v2223_v48  ;;  %3366 = vmatpush1.msra.mxu1 %v2086_v56  ;;  %v2307_v39 = vld [vmem:[%s15922_s3 + $0x7c8] sm:$0xff]  ;;  %v2170_v48 = vld [vmem:[%s15922_s3 + $0x380] sm:$0xff] }
 0x262   : > { %3439 = vmatpush1.msra.mxu0 %v2222_v14  ;;  %3367 = vmatprep.subr.mxu1 %v2083_v22  ;;  %v2306_v56 = vld [vmem:[%s15922_s3 + $0x7c0] sm:$0xff]  ;;  %v2167_v14 = vld [vmem:[%s15922_s3 + $0x368] sm:$0xff] }
 0x263   : > { %3440 = vmatprep.subr.mxu0 %v2219_v13  ;;  %3368 = vmatpush1.msra.mxu1 %v2082_v35  ;;  %v2303_v22 = vld [vmem:[%s15922_s3 + $0x7a8] sm:$0xff]  ;;  %v2166_v13 = vld [vmem:[%s15922_s3 + $0x360] sm:$0xff] }
 0x264   : > { %3441 = vmatpush1.msra.mxu0 %v2218_v5  ;;  %3369 = vmatprep.subr.mxu1 %v2079_v18  ;;  %v2302_v35 = vld [vmem:[%s15922_s3 + $0x7a0] sm:$0xff]  ;;  %v2163_v5 = vld [vmem:[%s15922_s3 + $0x348] sm:$0xff] }
 0x265   : > { %3442 = vmatprep.subr.mxu0 %v2215_v27  ;;  %3370 = vmatpush1.msra.mxu1 %v2078_v49  ;;  %v2299_v18 = vld [vmem:[%s15922_s3 + $0x788] sm:$0xff]  ;;  %v2162_v27 = vld [vmem:[%s15922_s3 + $0x340] sm:$0xff] }
 0x266   : > { %3443 = vmatpush1.msra.mxu0 %v2214_v10  ;;  %3371 = vmatprep.subr.mxu1 %v2075_v19  ;;  %v2298_v49 = vld [vmem:[%s15922_s3 + $0x780] sm:$0xff]  ;;  %v2159_v10 = vld [vmem:[%s15922_s3 + $0x328] sm:$0xff] }
 0x267   : > { %3444 = vmatprep.subr.mxu0 %v2211_v59  ;;  %3372 = vmatpush1.msra.mxu1 %v2074_v6  ;;  %v2295_v19 = vld [vmem:[%s15922_s3 + $0x768] sm:$0xff]  ;;  %v2158_v59 = vld [vmem:[%s15922_s3 + $0x320] sm:$0xff] }
 0x268   : > { %3445 = vmatpush1.msra.mxu0 %v2210_v1  ;;  %3373 = vmatprep.subr.mxu1 %v2071_v30  ;;  %v2294_v6 = vld [vmem:[%s15922_s3 + $0x760] sm:$0xff]  ;;  %v2155_v1 = vld [vmem:[%s15922_s3 + $0x308] sm:$0xff] }
 0x269   : > { %3446 = vmatprep.subr.mxu0 %v2207_v17  ;;  %3374 = vmatpush1.msra.mxu1 %v2070_v20  ;;  %v2291_v30 = vld [vmem:[%s15922_s3 + $0x748] sm:$0xff]  ;;  %v2154_v17 = vld [vmem:[%s15922_s3 + $0x300] sm:$0xff] }
 0x26a   : > { %3447 = vmatpush1.msra.mxu0 %v2206_v38  ;;  %3375 = vmatprep.subr.mxu1 %v2067_v63  ;;  %v2290_v20 = vld [vmem:[%s15922_s3 + $0x740] sm:$0xff]  ;;  %v2151_v38 = vld [vmem:[%s15922_s3 + $0x2e8] sm:$0xff] }
 0x26b   : > { %3448 = vmatprep.subr.mxu0 %v2203_v54  ;;  %3376 = vmatpush1.msra.mxu1 %v2066_v40  ;;  %v2287_v63 = vld [vmem:[%s15922_s3 + $0x728] sm:$0xff]  ;;  %v2150_v54 = vld [vmem:[%s15922_s3 + $0x2e0] sm:$0xff] }
 0x26c   : > { %3449 = vmatpush1.msra.mxu0 %v2202_v47  ;;  %3377 = vmatprep.subr.mxu1 %v2063_v29  ;;  %v2286_v40 = vld [vmem:[%s15922_s3 + $0x720] sm:$0xff]  ;;  %v2147_v47 = vld [vmem:[%s15922_s3 + $0x2c8] sm:$0xff] }
 0x26d   : > { %3450 = vmatprep.subr.mxu0 %v2199_v8  ;;  %3378 = vmatpush1.msra.mxu1 %v2062_v33  ;;  %v2283_v29 = vld [vmem:[%s15922_s3 + $0x708] sm:$0xff]  ;;  %v2146_v8 = vld [vmem:[%s15922_s3 + $0x2c0] sm:$0xff] }
 0x26e   : > { %3451 = vmatpush1.msra.mxu0 %v2198_v11  ;;  %3379 = vmatprep.subr.mxu1 %v2059_v60  ;;  %v2282_v33 = vld [vmem:[%s15922_s3 + $0x700] sm:$0xff]  ;;  %v2143_v11 = vld [vmem:[%s15922_s3 + $0x2a8] sm:$0xff] }
 0x26f   : > { %3452 = vmatprep.subr.mxu0 %v2195_v53  ;;  %3380 = vmatpush1.msra.mxu1 %v2058_v62  ;;  %v2279_v60 = vld [vmem:[%s15922_s3 + $0x6e8] sm:$0xff]  ;;  %v2142_v53 = vld [vmem:[%s15922_s3 + $0x2a0] sm:$0xff] }
 0x270   : > { %3453 = vmatpush1.msra.mxu0 %v2194_v32  ;;  %3381 = vmatprep.subr.mxu1 %v2183_v25  ;;  %v2278_v62 = vld [vmem:[%s15922_s3 + $0x6e0] sm:$0xff]  ;;  %v2139_v32 = vld [vmem:[%s15922_s3 + $0x288] sm:$0xff] }
 0x271   : > { %3454 = vmatprep.subr.mxu0 %v2191_v57  ;;  %3382 = vmatpush2.msra.mxu1 %v2182_v24  ;;  %v2275_v25 = vld [vmem:[%s15922_s3 + $0x6c8] sm:$0xff]  ;;  %v2138_v57 = vld [vmem:[%s15922_s3 + $0x280] sm:$0xff] }
 0x272   : > { %3455 = vmatpush1.msra.mxu0 %v2190_v0  ;;  %3383 = vmatprep.subr.mxu1 %v2179_v51  ;;  %v2274_v24 = vld [vmem:[%s15922_s3 + $0x6c0] sm:$0xff]  ;;  %v2135_v0 = vld [vmem:[%s15922_s3 + $0x268] sm:$0xff] }
 0x273   : > { %3456 = vmatprep.subr.mxu0 %v2187_v15  ;;  %3384 = vmatpush2.msra.mxu1 %v2178_v23  ;;  %v2271_v51 = vld [vmem:[%s15922_s3 + $0x6a8] sm:$0xff]  ;;  %v2134_v15 = vld [vmem:[%s15922_s3 + $0x260] sm:$0xff] }
 0x274   : > { %3457 = vmatpush1.msra.mxu0 %v2186_v7  ;;  %3385 = vmatprep.subr.mxu1 %v2175_v58  ;;  %v2270_v23 = vld [vmem:[%s15922_s3 + $0x6a0] sm:$0xff]  ;;  %v2131_v58 = vld [vmem:[%s15922_s3 + $0x248] sm:$0xff] }
 0x275   : > { %3458 = vmatprep.subr.mxu0 %v2311_v26  ;;  %3386 = vmatpush2.msra.mxu1 %v2174_v37  ;;  %v2267_v26 = vld [vmem:[%s15922_s3 + $0x688] sm:$0xff]  ;;  %v2130_v37 = vld [vmem:[%s15922_s3 + $0x240] sm:$0xff] }
 0x276   : > { %3459 = vmatpush2.msra.mxu0 %v2310_v50  ;;  %3387 = vmatprep.subr.mxu1 %v2171_v2  ;;  %v2266_v50 = vld [vmem:[%s15922_s3 + $0x680] sm:$0xff]  ;;  %v2127_v2 = vld [vmem:[%s15922_s3 + $0x228] sm:$0xff] }
 0x277   : > { %3460 = vmatprep.subr.mxu0 %v2307_v39  ;;  %3388 = vmatpush2.msra.mxu1 %v2170_v48  ;;  %v2263_v39 = vld [vmem:[%s15922_s3 + $0x668] sm:$0xff]  ;;  %v2126_v48 = vld [vmem:[%s15922_s3 + $0x220] sm:$0xff] }
 0x278   : > { %3461 = vmatpush2.msra.mxu0 %v2306_v56  ;;  %3389 = vmatprep.subr.mxu1 %v2167_v14  ;;  %v2262_v56 = vld [vmem:[%s15922_s3 + $0x660] sm:$0xff] }
 0x279   : > { %3462 = vmatprep.subr.mxu0 %v2303_v22  ;;  %3390 = vmatpush2.msra.mxu1 %v2166_v13  ;;  %v2123_v22 = vld [vmem:[%s15922_s3 + $0x208] sm:$0xff] }
 0x27a   : > { %3463 = vmatpush2.msra.mxu0 %v2302_v35  ;;  %3391 = vmatprep.subr.mxu1 %v2163_v5  ;;  %v2259_v13 = vld [vmem:[%s15922_s3 + $0x648] sm:$0xff]  ;;  %v2122_v5 = vld [vmem:[%s15922_s3 + $0x200] sm:$0xff] }
 0x27b   : > { %3464 = vmatprep.subr.mxu0 %v2299_v18  ;;  %3392 = vmatpush2.msra.mxu1 %v2162_v27  ;;  %v2258_v18 = vld [vmem:[%s15922_s3 + $0x640] sm:$0xff] }
 0x27c   : > { %3465 = vmatpush2.msra.mxu0 %v2298_v49  ;;  %3393 = vmatprep.subr.mxu1 %v2159_v10  ;;  %v2255_v10 = vld [vmem:[%s15922_s3 + $0x628] sm:$0xff] }
 0x27d   : > { %3466 = vmatprep.subr.mxu0 %v2295_v19  ;;  %3394 = vmatpush2.msra.mxu1 %v2158_v59  ;;  %v2375_v59 = vld [vmem:[%s15922_s3 + $0x9e8] sm:$0xff] }
 0x27e   : > { %3467 = vmatpush2.msra.mxu0 %v2294_v6  ;;  %3395 = vmatprep.subr.mxu1 %v2155_v1  ;;  %v2254_v1 = vld [vmem:[%s15922_s3 + $0x620] sm:$0xff] }
 0x27f   : > { %3468 = vmatprep.subr.mxu0 %v2291_v30  ;;  %3396 = vmatpush2.msra.mxu1 %v2154_v17  ;;  %v2374_v30 = vld [vmem:[%s15922_s3 + $0x9e0] sm:$0xff] }
 0x280   : > { %3469 = vmatpush2.msra.mxu0 %v2290_v20  ;;  %3397 = vmatprep.subr.mxu1 %v2151_v38  ;;  %v2251_v38 = vld [vmem:[%s15922_s3 + $0x608] sm:$0xff] }
 0x281   : > { %3470 = vmatprep.subr.mxu0 %v2287_v63  ;;  %3398 = vmatpush2.msra.mxu1 %v2150_v54  ;;  %v2371_v63 = vld [vmem:[%s15922_s3 + $0x9c8] sm:$0xff] }
 0x282   : > { %3471 = vmatpush2.msra.mxu0 %v2286_v40  ;;  %3399 = vmatprep.subr.mxu1 %v2147_v47  ;;  %v2250_v40 = vld [vmem:[%s15922_s3 + $0x600] sm:$0xff] }
 0x283   : > { %3472 = vmatprep.subr.mxu0 %v2283_v29  ;;  %3400 = vmatpush2.msra.mxu1 %v2146_v8  ;;  %v2370_v47 = vld [vmem:[%s15922_s3 + $0x9c0] sm:$0xff] }
 0x284   : > { %3473 = vmatpush2.msra.mxu0 %v2282_v33  ;;  %3401 = vmatprep.subr.mxu1 %v2143_v11  ;;  %v2367_v33 = vld [vmem:[%s15922_s3 + $0x9a8] sm:$0xff]  ;;  %v2121_v11 = vld [vmem:[%s15922_s3 + $0x1f8] sm:$0xff] }
 0x285   : > { %3474 = vmatprep.subr.mxu0 %v2279_v60  ;;  %3402 = vmatpush2.msra.mxu1 %v2142_v53  ;;  %v2953_v7 = vpop.f32.mrf.mxu1  ;;  %v2366_v60 = vld [vmem:[%s15922_s3 + $0x9a0] sm:$0xff]  ;;  %v2120_v53 = vld [vmem:[%s15922_s3 + $0x1f0] sm:$0xff] }
 0x286   : > { %3475 = vmatpush2.msra.mxu0 %v2278_v62  ;;  %3403 = vmatprep.subr.mxu1 %v2139_v32  ;;  %v2363_v62 = vld [vmem:[%s15922_s3 + $0x988] sm:$0xff]  ;;  %v2117_v32 = vld [vmem:[%s15922_s3 + $0x1d8] sm:$0xff] }
 0x287   : > { %3476 = vmatprep.subr.mxu0 %v2275_v25  ;;  %3404 = vmatpush2.msra.mxu1 %v2138_v57  ;;  %v2955_v14 = vpop.f32.mrf.mxu1  ;;  %v2362_v25 = vld [vmem:[%s15922_s3 + $0x980] sm:$0xff]  ;;  %v2116_v57 = vld [vmem:[%s15922_s3 + $0x1d0] sm:$0xff] }
 0x288   : > { %3477 = vmatpush2.msra.mxu0 %v2274_v24  ;;  %3405 = vmatprep.subr.mxu1 %v2135_v0  ;;  %v2359_v24 = vld [vmem:[%s15922_s3 + $0x968] sm:$0xff]  ;;  %v2113_v0 = vld [vmem:[%s15922_s3 + $0x1b8] sm:$0xff] }
 0x289   : > { %3478 = vmatprep.subr.mxu0 %v2271_v51  ;;  %3406 = vmatpush2.msra.mxu1 %v2134_v15  ;;  %v2358_v51 = vld [vmem:[%s15922_s3 + $0x960] sm:$0xff]  ;;  %v2112_v15 = vld [vmem:[%s15922_s3 + $0x1b0] sm:$0xff] }
 0x28a   : > { %3479 = vmatpush2.msra.mxu0 %v2270_v23  ;;  %3407 = vmatprep.subr.mxu1 %v2131_v58  ;;  %v2355_v23 = vld [vmem:[%s15922_s3 + $0x948] sm:$0xff]  ;;  %v2354_v58 = vld [vmem:[%s15922_s3 + $0x940] sm:$0xff] }
 0x28b   : > { %3480 = vmatprep.subr.mxu0 %v2267_v26  ;;  %3408 = vmatpush2.msra.mxu1 %v2130_v37  ;;  %v3030_v35 = vpop.f32.mrf.mxu0  ;;  %v2108_v26 = vld [vmem:[%s15922_s3 + $0x190] sm:$0xff]  ;;  %v2351_v37 = vld [vmem:[%s15922_s3 + $0x928] sm:$0xff] }
 0x28c   : > { %3481 = vmatpush2.msra.mxu0 %v2266_v50  ;;  %3409 = vmatprep.subr.mxu1 %v2127_v2  ;;  %v11219_v27 = vadd.f32 %v3030_v35, %v2953_v7  ;;  %v2109_v7 = vld [vmem:[%s15922_s3 + $0x198] sm:$0xff]  ;;  %v2350_v2 = vld [vmem:[%s15922_s3 + $0x920] sm:$0xff] }
 0x28d   : > { %3482 = vmatprep.subr.mxu0 %v2263_v39  ;;  %v2959_v49 = vpop.f32.mrf.mxu1  ;;  %3410 = vmatpush2.msra.mxu1 %v2126_v48  ;;  %v3032_v19 = vpop.f32.mrf.mxu0  ;;  %v2105_v50 = vld [vmem:[%s15922_s3 + $0x178] sm:$0xff]  ;;  %v2104_v39 = vld [vmem:[%s15922_s3 + $0x170] sm:$0xff]  ;;  %v2347_v48 = vld [vmem:[%s15922_s3 + $0x908] sm:$0xff] }
 0x28e   : > { %3483 = vmatpush2.msra.mxu0 %v2262_v56  ;;  %3411 = vmatprep.subr.mxu1 %v2123_v22  ;;  %v11227_v6 = vadd.f32 %v3032_v19, %v2955_v14  ;;  %v2101_v56 = vld [vmem:[%s15922_s3 + $0x158] sm:$0xff]  ;;  %v2346_v14 = vld [vmem:[%s15922_s3 + $0x900] sm:$0xff]  ;;  %v2100_v22 = vld [vmem:[%s15922_s3 + $0x150] sm:$0xff] }
 0x28f   : > { %3484 = vmatprep.subr.mxu0 %v2259_v13  ;;  %3412 = vmatpush2.msra.mxu1 %v2122_v5  ;;  %v2961_v20 = vpop.f32.mrf.mxu1  ;;  %v2343_v13 = vld [vmem:[%s15922_s3 + $0x8e8] sm:$0xff]  ;;  %v2097_v35 = vld [vmem:[%s15922_s3 + $0x138] sm:$0xff]  ;;  %v2342_v5 = vld [vmem:[%s15922_s3 + $0x8e0] sm:$0xff] }
 0x290   : > { %3485 = vmatpush2.msra.mxu0 %v2258_v18  ;;  %v3036_v17 = vpop.f32.mrf.mxu0  ;;  %3414 = vmatmul.mubr.f32.vlgmr.msra.gmra.mxu1 %v9904_v55  ;;  %v2096_v18 = vld [vmem:[%s15922_s3 + $0x130] sm:$0xff]  ;;  %v2338_v19 = vld [vmem:[%s15922_s3 + $0x8c0] sm:$0xff] }
 0x291   : > { %3486 = vmatprep.subr.mxu0 %v2255_v10  ;;  %v11242_v54 = vadd.f32 %v3036_v17, %v2959_v49  ;;  %3503 = vmatprep.subr.mxu1 %v2375_v59  ;;  %v2339_v49 = vld [vmem:[%s15922_s3 + $0x8c8] sm:$0xff]  ;;  %v2093_v10 = vld [vmem:[%s15922_s3 + $0x118] sm:$0xff]  ;;  %v2092_v59 = vld [vmem:[%s15922_s3 + $0x110] sm:$0xff] }
 0x292   : > { %3419 = vmatprep.mubr.f32.mxu1 %v9916_v43  ;;  %v3038_v29 = vpop.f32.mrf.mxu0  ;;  %3487 = vmatpush2.msra.mxu0 %v2254_v1  ;;  %v2335_v1 = vld [vmem:[%s15922_s3 + $0x8a8] sm:$0xff]  ;;  %v2334_v17 = vld [vmem:[%s15922_s3 + $0x8a0] sm:$0xff] }
 0x293   : > { %3504 = vmatpush1.msra.mxu1 %v2374_v30  ;;  %v11251_v8 = vadd.f32 %v3038_v29, %v2961_v20  ;;  %3488 = vmatprep.subr.mxu0 %v2251_v38  ;;  %v2089_v30 = vld [vmem:[%s15922_s3 + $0xf8] sm:$0xff]  ;;  %v2088_v20 = vld [vmem:[%s15922_s3 + $0xf0] sm:$0xff]  ;;  %v2331_v38 = vld [vmem:[%s15922_s3 + $0x888] sm:$0xff] }
 0x294   : > { %3505 = vmatprep.subr.mxu1 %v2371_v63  ;;  %3489 = vmatpush2.msra.mxu0 %v2250_v40  ;;  %v2085_v63 = vld [vmem:[%s15922_s3 + $0xd8] sm:$0xff]  ;;  %v2330_v40 = vld [vmem:[%s15922_s3 + $0x880] sm:$0xff]  ;;  %v2327_v29 = vld [vmem:[%s15922_s3 + $0x868] sm:$0xff] }
 0x295   : > { %3506 = vmatpush1.msra.mxu1 %v2370_v47  ;;  %3491 = vmatmul.mubr.f32.vlgmr.msra.gmra.mxu0 %v9953_v12  ;;  %v2084_v47 = vld [vmem:[%s15922_s3 + $0xd0] sm:$0xff] }
 0x296   : > { %3420 = vmatmul.mubr.f32.gmra.mxu1 %v9913_v52  ;;  %3507 = vmatprep.subr.mxu1 %v2367_v33  ;;  %v2081_v33 = vld [vmem:[%s15922_s3 + $0xb8] sm:$0xff] }
 0x297   : > { %3580 = vmatprep.subr.mxu0 %v2121_v11  ;;  %3496 = vmatprep.mubr.f32.mxu0 %v9941_v44  ;;  %v2326_v11 = vld [vmem:[%s15922_s3 + $0x860] sm:$0xff] }
 0x298   : > { %3508 = vmatpush1.msra.mxu1 %v2366_v60  ;;  %3567 = vmatprep.mubr.f32.mxu1 %v10004_v61  ;;  %v2080_v60 = vld [vmem:[%s15922_s3 + $0xb0] sm:$0xff] }
 0x299   : > { %3581 = vmatpush1.msra.mxu0 %v2120_v53  ;;  %3509 = vmatprep.subr.mxu1 %v2363_v62  ;;  %v2323_v53 = vld [vmem:[%s15922_s3 + $0x848] sm:$0xff]  ;;  %v2077_v62 = vld [vmem:[%s15922_s3 + $0x98] sm:$0xff] }
 0x29a   : > { %3582 = vmatprep.subr.mxu0 %v2117_v32  ;;  %3510 = vmatpush1.msra.mxu1 %v2362_v25  ;;  %v2322_v32 = vld [vmem:[%s15922_s3 + $0x840] sm:$0xff]  ;;  %v2076_v25 = vld [vmem:[%s15922_s3 + $0x90] sm:$0xff] }
 0x29b   : > { %3583 = vmatpush1.msra.mxu0 %v2116_v57  ;;  %3511 = vmatprep.subr.mxu1 %v2359_v24  ;;  %v2319_v57 = vld [vmem:[%s15922_s3 + $0x828] sm:$0xff]  ;;  %v2073_v24 = vld [vmem:[%s15922_s3 + $0x78] sm:$0xff] }
 0x29c   : > { %3497 = vmatmul.mubr.f32.gmra.mxu0 %v9961_v42  ;;  %3584 = vmatprep.subr.mxu0 %v2113_v0  ;;  %v2318_v0 = vld [vmem:[%s15922_s3 + $0x820] sm:$0xff] }
 0x29d   : > { %3512 = vmatpush1.msra.mxu1 %v2358_v51  ;;  %3585 = vmatpush1.msra.mxu0 %v2112_v15  ;;  %v2072_v51 = vld [vmem:[%s15922_s3 + $0x70] sm:$0xff]  ;;  %v2315_v15 = vld [vmem:[%s15922_s3 + $0x808] sm:$0xff] }
 0x29e   : > { %3644 = vmatprep.mubr.f32.mxu0 %v9901_v36  ;;  %3513 = vmatprep.subr.mxu1 %v2355_v23  ;;  %v2069_v23 = vld [vmem:[%s15922_s3 + $0x58] sm:$0xff] }
 0x29f   : > { %3586 = vmatprep.subr.mxu0 %v2109_v7  ;;  %3514 = vmatpush1.msra.mxu1 %v2354_v58  ;;  %v2314_v7 = vld [vmem:[%s15922_s3 + $0x800] sm:$0xff]  ;;  %v2068_v58 = vld [vmem:[%s15922_s3 + $0x50] sm:$0xff] }
 0x2a0   : > { %3587 = vmatpush1.msra.mxu0 %v2108_v26  ;;  %3515 = vmatprep.subr.mxu1 %v2351_v37  ;;  %v2439_v26 = vld [vmem:[%s15922_s3 + $0xbe8] sm:$0xff]  ;;  %v2065_v37 = vld [vmem:[%s15922_s3 + $0x38] sm:$0xff] }
 0x2a1   : > { %3588 = vmatprep.subr.mxu0 %v2105_v50  ;;  %3516 = vmatpush1.msra.mxu1 %v2350_v2  ;;  %v2438_v50 = vld [vmem:[%s15922_s3 + $0xbe0] sm:$0xff]  ;;  %v2064_v2 = vld [vmem:[%s15922_s3 + $0x30] sm:$0xff] }
 0x2a2   : > { %3589 = vmatpush1.msra.mxu0 %v2104_v39  ;;  %3517 = vmatprep.subr.mxu1 %v2347_v48  ;;  %v2435_v39 = vld [vmem:[%s15922_s3 + $0xbc8] sm:$0xff]  ;;  %v2061_v48 = vld [vmem:[%s15922_s3 + $0x18] sm:$0xff] }
 0x2a3   : > { %3590 = vmatprep.subr.mxu0 %v2101_v56  ;;  %3518 = vmatpush1.msra.mxu1 %v2346_v14  ;;  %v2434_v56 = vld [vmem:[%s15922_s3 + $0xbc0] sm:$0xff]  ;;  %v2060_v14 = vld [vmem:[%s15922_s3 + $0x10] sm:$0xff] }
 0x2a4   : > { %3591 = vmatpush1.msra.mxu0 %v2100_v22  ;;  %3519 = vmatprep.subr.mxu1 %v2343_v13  ;;  %v2431_v22 = vld [vmem:[%s15922_s3 + $0xba8] sm:$0xff]  ;;  %v2185_v13 = vld [vmem:[%s15922_s3 + $0x3f8] sm:$0xff] }
 0x2a5   : > { %3592 = vmatprep.subr.mxu0 %v2097_v35  ;;  %3520 = vmatpush1.msra.mxu1 %v2342_v5  ;;  %v2430_v35 = vld [vmem:[%s15922_s3 + $0xba0] sm:$0xff]  ;;  %v2184_v5 = vld [vmem:[%s15922_s3 + $0x3f0] sm:$0xff] }
 0x2a6   : > { %3593 = vmatpush1.msra.mxu0 %v2096_v18  ;;  %3521 = vmatprep.subr.mxu1 %v2339_v49  ;;  %v2427_v18 = vld [vmem:[%s15922_s3 + $0xb88] sm:$0xff]  ;;  %v2181_v49 = vld [vmem:[%s15922_s3 + $0x3d8] sm:$0xff] }
 0x2a7   : > { %3594 = vmatprep.subr.mxu0 %v2093_v10  ;;  %3522 = vmatpush1.msra.mxu1 %v2338_v19  ;;  %v2426_v10 = vld [vmem:[%s15922_s3 + $0xb80] sm:$0xff]  ;;  %v2180_v19 = vld [vmem:[%s15922_s3 + $0x3d0] sm:$0xff] }
 0x2a8   : > { %3595 = vmatpush1.msra.mxu0 %v2092_v59  ;;  %3523 = vmatprep.subr.mxu1 %v2335_v1  ;;  %v2423_v59 = vld [vmem:[%s15922_s3 + $0xb68] sm:$0xff]  ;;  %v2177_v1 = vld [vmem:[%s15922_s3 + $0x3b8] sm:$0xff] }
 0x2a9   : > { %3596 = vmatprep.subr.mxu0 %v2089_v30  ;;  %3524 = vmatpush1.msra.mxu1 %v2334_v17  ;;  %v2422_v30 = vld [vmem:[%s15922_s3 + $0xb60] sm:$0xff]  ;;  %v2176_v17 = vld [vmem:[%s15922_s3 + $0x3b0] sm:$0xff] }
 0x2aa   : > { %3597 = vmatpush1.msra.mxu0 %v2088_v20  ;;  %3525 = vmatprep.subr.mxu1 %v2331_v38  ;;  %v2419_v20 = vld [vmem:[%s15922_s3 + $0xb48] sm:$0xff]  ;;  %v2173_v38 = vld [vmem:[%s15922_s3 + $0x398] sm:$0xff] }
 0x2ab   : > { %3598 = vmatprep.subr.mxu0 %v2085_v63  ;;  %3526 = vmatpush1.msra.mxu1 %v2330_v40  ;;  %v2418_v63 = vld [vmem:[%s15922_s3 + $0xb40] sm:$0xff]  ;;  %v2172_v40 = vld [vmem:[%s15922_s3 + $0x390] sm:$0xff] }
 0x2ac   : > { %3599 = vmatpush1.msra.mxu0 %v2084_v47  ;;  %3527 = vmatprep.subr.mxu1 %v2327_v29  ;;  %v2415_v47 = vld [vmem:[%s15922_s3 + $0xb28] sm:$0xff]  ;;  %v2169_v29 = vld [vmem:[%s15922_s3 + $0x378] sm:$0xff] }
 0x2ad   : > { %3600 = vmatprep.subr.mxu0 %v2081_v33  ;;  %3528 = vmatpush1.msra.mxu1 %v2326_v11  ;;  %v2414_v33 = vld [vmem:[%s15922_s3 + $0xb20] sm:$0xff]  ;;  %v2168_v11 = vld [vmem:[%s15922_s3 + $0x370] sm:$0xff] }
 0x2ae   : > { %3601 = vmatpush1.msra.mxu0 %v2080_v60  ;;  %3529 = vmatprep.subr.mxu1 %v2323_v53  ;;  %v2411_v60 = vld [vmem:[%s15922_s3 + $0xb08] sm:$0xff]  ;;  %v2165_v53 = vld [vmem:[%s15922_s3 + $0x358] sm:$0xff] }
 0x2af   : > { %3602 = vmatprep.subr.mxu0 %v2077_v62  ;;  %3530 = vmatpush1.msra.mxu1 %v2322_v32  ;;  %v2410_v62 = vld [vmem:[%s15922_s3 + $0xb00] sm:$0xff]  ;;  %v2164_v32 = vld [vmem:[%s15922_s3 + $0x350] sm:$0xff] }
 0x2b0   : > { %3603 = vmatpush1.msra.mxu0 %v2076_v25  ;;  %3531 = vmatprep.subr.mxu1 %v2319_v57  ;;  %v2407_v25 = vld [vmem:[%s15922_s3 + $0xae8] sm:$0xff]  ;;  %v2161_v57 = vld [vmem:[%s15922_s3 + $0x338] sm:$0xff] }
 0x2b1   : > { %3604 = vmatprep.subr.mxu0 %v2073_v24  ;;  %3532 = vmatpush1.msra.mxu1 %v2318_v0  ;;  %v2406_v24 = vld [vmem:[%s15922_s3 + $0xae0] sm:$0xff]  ;;  %v2160_v0 = vld [vmem:[%s15922_s3 + $0x330] sm:$0xff] }
 0x2b2   : > { %3605 = vmatpush1.msra.mxu0 %v2072_v51  ;;  %3533 = vmatprep.subr.mxu1 %v2315_v15  ;;  %v2403_v51 = vld [vmem:[%s15922_s3 + $0xac8] sm:$0xff]  ;;  %v2157_v15 = vld [vmem:[%s15922_s3 + $0x318] sm:$0xff] }
 0x2b3   : > { %3606 = vmatprep.subr.mxu0 %v2069_v23  ;;  %3534 = vmatpush1.msra.mxu1 %v2314_v7  ;;  %v2402_v23 = vld [vmem:[%s15922_s3 + $0xac0] sm:$0xff]  ;;  %v2156_v7 = vld [vmem:[%s15922_s3 + $0x310] sm:$0xff] }
 0x2b4   : > { %3607 = vmatpush1.msra.mxu0 %v2068_v58  ;;  %3535 = vmatprep.subr.mxu1 %v2439_v26  ;;  %v2399_v58 = vld [vmem:[%s15922_s3 + $0xaa8] sm:$0xff]  ;;  %v2153_v26 = vld [vmem:[%s15922_s3 + $0x2f8] sm:$0xff] }
 0x2b5   : > { %3608 = vmatprep.subr.mxu0 %v2065_v37  ;;  %3536 = vmatpush2.msra.mxu1 %v2438_v50  ;;  %v2398_v37 = vld [vmem:[%s15922_s3 + $0xaa0] sm:$0xff]  ;;  %v2152_v50 = vld [vmem:[%s15922_s3 + $0x2f0] sm:$0xff] }
 0x2b6   : > { %3609 = vmatpush1.msra.mxu0 %v2064_v2  ;;  %3537 = vmatprep.subr.mxu1 %v2435_v39  ;;  %v2395_v2 = vld [vmem:[%s15922_s3 + $0xa88] sm:$0xff]  ;;  %v2149_v39 = vld [vmem:[%s15922_s3 + $0x2d8] sm:$0xff] }
 0x2b7   : > { %3610 = vmatprep.subr.mxu0 %v2061_v48  ;;  %3538 = vmatpush2.msra.mxu1 %v2434_v56  ;;  %v2394_v48 = vld [vmem:[%s15922_s3 + $0xa80] sm:$0xff]  ;;  %v2148_v56 = vld [vmem:[%s15922_s3 + $0x2d0] sm:$0xff] }
 0x2b8   : > { %3611 = vmatpush1.msra.mxu0 %v2060_v14  ;;  %3539 = vmatprep.subr.mxu1 %v2431_v22  ;;  %v2391_v22 = vld [vmem:[%s15922_s3 + $0xa68] sm:$0xff] }
 0x2b9   : > { %3612 = vmatprep.subr.mxu0 %v2185_v13  ;;  %3540 = vmatpush2.msra.mxu1 %v2430_v35  ;;  %v2145_v13 = vld [vmem:[%s15922_s3 + $0x2b8] sm:$0xff] }
 0x2ba   : > { %3613 = vmatpush2.msra.mxu0 %v2184_v5  ;;  %3541 = vmatprep.subr.mxu1 %v2427_v18  ;;  %v2390_v5 = vld [vmem:[%s15922_s3 + $0xa60] sm:$0xff]  ;;  %v2144_v18 = vld [vmem:[%s15922_s3 + $0x2b0] sm:$0xff] }
 0x2bb   : > { %3614 = vmatprep.subr.mxu0 %v2181_v49  ;;  %3542 = vmatpush2.msra.mxu1 %v2426_v10  ;;  %v2387_v10 = vld [vmem:[%s15922_s3 + $0xa48] sm:$0xff] }
 0x2bc   : > { %3615 = vmatpush2.msra.mxu0 %v2180_v19  ;;  %3543 = vmatprep.subr.mxu1 %v2423_v59  ;;  %v2386_v59 = vld [vmem:[%s15922_s3 + $0xa40] sm:$0xff] }
 0x2bd   : > { %3616 = vmatprep.subr.mxu0 %v2177_v1  ;;  %3544 = vmatpush2.msra.mxu1 %v2422_v30  ;;  %v2140_v1 = vld [vmem:[%s15922_s3 + $0x290] sm:$0xff]  ;;  %v2383_v30 = vld [vmem:[%s15922_s3 + $0xa28] sm:$0xff] }
 0x2be   : > { %3617 = vmatpush2.msra.mxu0 %v2176_v17  ;;  %3545 = vmatprep.subr.mxu1 %v2419_v20  ;;  %v2382_v20 = vld [vmem:[%s15922_s3 + $0xa20] sm:$0xff] }
 0x2bf   : > { %3618 = vmatprep.subr.mxu0 %v2173_v38  ;;  %3546 = vmatpush2.msra.mxu1 %v2418_v63  ;;  %v2136_v38 = vld [vmem:[%s15922_s3 + $0x270] sm:$0xff] }
 0x2c0   : > { %3619 = vmatpush2.msra.mxu0 %v2172_v40  ;;  %3547 = vmatprep.subr.mxu1 %v2415_v47  ;;  %v2379_v40 = vld [vmem:[%s15922_s3 + $0xa08] sm:$0xff]  ;;  %v2133_v47 = vld [vmem:[%s15922_s3 + $0x258] sm:$0xff] }
 0x2c1   : > { %3620 = vmatprep.subr.mxu0 %v2169_v29  ;;  %3548 = vmatpush2.msra.mxu1 %v2414_v33  ;;  %v2378_v33 = vld [vmem:[%s15922_s3 + $0xa00] sm:$0xff] }
 0x2c2   : > { %3621 = vmatpush2.msra.mxu0 %v2168_v11  ;;  %3549 = vmatprep.subr.mxu1 %v2411_v60  ;;  %v2129_v60 = vld [vmem:[%s15922_s3 + $0x238] sm:$0xff] }
 0x2c3   : > { %3622 = vmatprep.subr.mxu0 %v2165_v53  ;;  %3550 = vmatpush2.msra.mxu1 %v2410_v62  ;;  %v2249_v53 = vld [vmem:[%s15922_s3 + $0x5f8] sm:$0xff]  ;;  %v2128_v62 = vld [vmem:[%s15922_s3 + $0x230] sm:$0xff] }
 0x2c4   : > { %3623 = vmatpush2.msra.mxu0 %v2164_v32  ;;  %3551 = vmatprep.subr.mxu1 %v2407_v25  ;;  %v2125_v32 = vld [vmem:[%s15922_s3 + $0x218] sm:$0xff] }
 0x2c5   : > { %3624 = vmatprep.subr.mxu0 %v2161_v57  ;;  %3552 = vmatpush2.msra.mxu1 %v2406_v24  ;;  %v2245_v25 = vld [vmem:[%s15922_s3 + $0x5d8] sm:$0xff]  ;;  %v2124_v57 = vld [vmem:[%s15922_s3 + $0x210] sm:$0xff] }
 0x2c6   : > { %3625 = vmatpush2.msra.mxu0 %v2160_v0  ;;  %3553 = vmatprep.subr.mxu1 %v2403_v51  ;;  %v2244_v24 = vld [vmem:[%s15922_s3 + $0x5d0] sm:$0xff]  ;;  %v2241_v0 = vld [vmem:[%s15922_s3 + $0x5b8] sm:$0xff] }
 0x2c7   : > { %3626 = vmatprep.subr.mxu0 %v2157_v15  ;;  %3554 = vmatpush2.msra.mxu1 %v2402_v23  ;;  %v2377_v51 = vld [vmem:[%s15922_s3 + $0x9f8] sm:$0xff]  ;;  %v2240_v15 = vld [vmem:[%s15922_s3 + $0x5b0] sm:$0xff] }
 0x2c8   : > { %3627 = vmatpush2.msra.mxu0 %v2156_v7  ;;  %3555 = vmatprep.subr.mxu1 %v2399_v58  ;;  %v3107_v14 = vpop.f32.mrf.mxu1  ;;  %v2376_v23 = vld [vmem:[%s15922_s3 + $0x9f0] sm:$0xff]  ;;  %v2237_v7 = vld [vmem:[%s15922_s3 + $0x598] sm:$0xff] }
 0x2c9   : > { %3628 = vmatprep.subr.mxu0 %v2153_v26  ;;  %3556 = vmatpush2.msra.mxu1 %v2398_v37  ;;  %v11578_v35 = vadd.f32 %v3107_v14, %v11219_v27  ;;  %v2141_v27 = vld [vmem:[%s15922_s3 + $0x298] sm:$0xff]  ;;  %v2236_v26 = vld [vmem:[%s15922_s3 + $0x590] sm:$0xff] }
 0x2ca   : > { %3629 = vmatpush2.msra.mxu0 %v2152_v50  ;;  %3557 = vmatprep.subr.mxu1 %v2395_v2  ;;  %v3109_v49 = vpop.f32.mrf.mxu1  ;;  %v2373_v58 = vld [vmem:[%s15922_s3 + $0x9d8] sm:$0xff]  ;;  %v2372_v37 = vld [vmem:[%s15922_s3 + $0x9d0] sm:$0xff] }
 0x2cb   : > { %3630 = vmatprep.subr.mxu0 %v2149_v39  ;;  %3558 = vmatpush2.msra.mxu1 %v2394_v48  ;;  %v11593_v19 = vadd.f32 %v3109_v49, %v11227_v6  ;;  %v2137_v6 = vld [vmem:[%s15922_s3 + $0x278] sm:$0xff]  ;;  %v2232_v39 = vld [vmem:[%s15922_s3 + $0x570] sm:$0xff] }
 0x2cc   : > { %3631 = vmatpush2.msra.mxu0 %v2148_v56  ;;  %3559 = vmatprep.subr.mxu1 %v2391_v22  ;;  %v2233_v50 = vld [vmem:[%s15922_s3 + $0x578] sm:$0xff]  ;;  %v2368_v48 = vld [vmem:[%s15922_s3 + $0x9b0] sm:$0xff] }
 0x2cd   : > { %3632 = vmatprep.subr.mxu0 %v2145_v13  ;;  %3560 = vmatpush2.msra.mxu1 %v2390_v5  ;;  %v2369_v2 = vld [vmem:[%s15922_s3 + $0x9b8] sm:$0xff]  ;;  %v2228_v22 = vld [vmem:[%s15922_s3 + $0x550] sm:$0xff] }
 0x2ce   : > { %3633 = vmatpush2.msra.mxu0 %v2144_v18  ;;  %v3113_v17 = vpop.f32.mrf.mxu1  ;;  %3561 = vmatprep.subr.mxu1 %v2387_v10  ;;  %v2229_v56 = vld [vmem:[%s15922_s3 + $0x558] sm:$0xff]  ;;  %v2364_v13 = vld [vmem:[%s15922_s3 + $0x990] sm:$0xff] }
 0x2cf   : > { %3634 = vmatprep.subr.mxu0 %v2141_v27  ;;  %v11614_v63 = vadd.f32 %v3113_v17, %v11242_v54  ;;  %3562 = vmatpush2.msra.mxu1 %v2386_v59  ;;  %v2132_v54 = vld [vmem:[%s15922_s3 + $0x250] sm:$0xff]  ;;  %v2365_v14 = vld [vmem:[%s15922_s3 + $0x998] sm:$0xff] }
 0x2d0   : > { %3635 = vmatpush2.msra.mxu0 %v2140_v1  ;;  %v3115_v29 = vpop.f32.mrf.mxu1  ;;  %3563 = vmatprep.subr.mxu1 %v2383_v30  ;;  %v2225_v5 = vld [vmem:[%s15922_s3 + $0x538] sm:$0xff]  ;;  %v2224_v49 = vld [vmem:[%s15922_s3 + $0x530] sm:$0xff] }
 0x2d1   : > { %3636 = vmatprep.subr.mxu0 %v2137_v6  ;;  %v11629_v11 = vadd.f32 %v3115_v29, %v11251_v8  ;;  %3564 = vmatpush2.msra.mxu1 %v2382_v20  ;;  %v2248_v8 = vld [vmem:[%s15922_s3 + $0x5f0] sm:$0xff]  ;;  %v2361_v18 = vld [vmem:[%s15922_s3 + $0x978] sm:$0xff] }
 0x2d2   : > { %3637 = vmatpush2.msra.mxu0 %v2136_v38  ;;  %3565 = vmatprep.subr.mxu1 %v2379_v40  ;;  %v2360_v10 = vld [vmem:[%s15922_s3 + $0x970] sm:$0xff]  ;;  %v2221_v27 = vld [vmem:[%s15922_s3 + $0x518] sm:$0xff] }
 0x2d3   : > { %3638 = vmatprep.subr.mxu0 %v2133_v47  ;;  %3566 = vmatpush2.msra.mxu1 %v2378_v33  ;;  %v2357_v59 = vld [vmem:[%s15922_s3 + $0x958] sm:$0xff]  ;;  %v2220_v1 = vld [vmem:[%s15922_s3 + $0x510] sm:$0xff] }
 0x2d4   : > { %3639 = vmatpush2.msra.mxu0 %v2132_v54  ;;  %3568 = vmatmul.mubr.f32.vlgmr.msra.gmra.mxu1 %v10385_v41  ;;  %v2356_v30 = vld [vmem:[%s15922_s3 + $0x950] sm:$0xff]  ;;  %v2217_v6 = vld [vmem:[%s15922_s3 + $0x4f8] sm:$0xff] }
 0x2d5   : > { %3640 = vmatprep.subr.mxu0 %v2129_v60  ;;  %3657 = vmatprep.subr.mxu1 %v2249_v53  ;;  %v2353_v17 = vld [vmem:[%s15922_s3 + $0x938] sm:$0xff]  ;;  %v2216_v20 = vld [vmem:[%s15922_s3 + $0x4f0] sm:$0xff] }
 0x2d6   : > { %3573 = vmatprep.mubr.f32.mxu1 %v10018_v28  ;;  %3641 = vmatpush2.msra.mxu0 %v2128_v62  ;;  %v2352_v38 = vld [vmem:[%s15922_s3 + $0x930] sm:$0xff]  ;;  %v2213_v40 = vld [vmem:[%s15922_s3 + $0x4d8] sm:$0xff] }
 0x2d7   : > { %3658 = vmatpush1.msra.mxu1 %v2248_v8  ;;  %3642 = vmatprep.subr.mxu0 %v2125_v32  ;;  %v2349_v47 = vld [vmem:[%s15922_s3 + $0x918] sm:$0xff]  ;;  %v2212_v29 = vld [vmem:[%s15922_s3 + $0x4d0] sm:$0xff] }
 0x2d8   : > { %3659 = vmatprep.subr.mxu1 %v2245_v25  ;;  %3643 = vmatpush2.msra.mxu0 %v2124_v57  ;;  %v2348_v33 = vld [vmem:[%s15922_s3 + $0x910] sm:$0xff]  ;;  %v2209_v54 = vld [vmem:[%s15922_s3 + $0x4b8] sm:$0xff] }
 0x2d9   : > { %3660 = vmatpush1.msra.mxu1 %v2244_v24  ;;  %3645 = vmatmul.mubr.f32.vlgmr.msra.gmra.mxu0 %v9904_v55  ;;  %v2345_v60 = vld [vmem:[%s15922_s3 + $0x8f8] sm:$0xff]  ;;  %v2208_v53 = vld [vmem:[%s15922_s3 + $0x4b0] sm:$0xff] }
 0x2da   : > { %3574 = vmatmul.mubr.f32.gmra.mxu1 %v10370_v9  ;;  %3661 = vmatprep.subr.mxu1 %v2241_v0  ;;  %v2344_v62 = vld [vmem:[%s15922_s3 + $0x8f0] sm:$0xff]  ;;  %v2205_v8 = vld [vmem:[%s15922_s3 + $0x498] sm:$0xff] }
 0x2db   : > { %3734 = vmatprep.subr.mxu0 %v2377_v51  ;;  %3650 = vmatprep.mubr.f32.mxu0 %v9916_v43  ;;  %v2341_v32 = vld [vmem:[%s15922_s3 + $0x8d8] sm:$0xff]  ;;  %v2204_v25 = vld [vmem:[%s15922_s3 + $0x490] sm:$0xff] }
 0x2dc   : > { %3662 = vmatpush1.msra.mxu1 %v2240_v15  ;;  %3721 = vmatprep.mubr.f32.mxu1 %v9938_v21  ;;  %v2340_v57 = vld [vmem:[%s15922_s3 + $0x8d0] sm:$0xff]  ;;  %v2201_v24 = vld [vmem:[%s15922_s3 + $0x478] sm:$0xff] }
 0x2dd   : > { %3735 = vmatpush1.msra.mxu0 %v2376_v23  ;;  %3663 = vmatprep.subr.mxu1 %v2237_v7  ;;  %v2337_v0 = vld [vmem:[%s15922_s3 + $0x8b8] sm:$0xff]  ;;  %v2200_v51 = vld [vmem:[%s15922_s3 + $0x470] sm:$0xff] }
 0x2de   : > { %3736 = vmatprep.subr.mxu0 %v2373_v58  ;;  %3664 = vmatpush1.msra.mxu1 %v2236_v26  ;;  %v2336_v15 = vld [vmem:[%s15922_s3 + $0x8b0] sm:$0xff]  ;;  %v2197_v23 = vld [vmem:[%s15922_s3 + $0x458] sm:$0xff] }
 0x2df   : > { %3737 = vmatpush1.msra.mxu0 %v2372_v37  ;;  %3665 = vmatprep.subr.mxu1 %v2233_v50  ;;  %v2333_v7 = vld [vmem:[%s15922_s3 + $0x898] sm:$0xff]  ;;  %v2196_v58 = vld [vmem:[%s15922_s3 + $0x450] sm:$0xff] }
 0x2e0   : > { %3651 = vmatmul.mubr.f32.gmra.mxu0 %v9913_v52  ;;  %3738 = vmatprep.subr.mxu0 %v2369_v2  ;;  %v2332_v26 = vld [vmem:[%s15922_s3 + $0x890] sm:$0xff]  ;;  %v2193_v37 = vld [vmem:[%s15922_s3 + $0x438] sm:$0xff] }
 0x2e1   : > { %3666 = vmatpush1.msra.mxu1 %v2232_v39  ;;  %3739 = vmatpush1.msra.mxu0 %v2368_v48  ;;  %v2329_v50 = vld [vmem:[%s15922_s3 + $0x878] sm:$0xff]  ;;  %v2192_v2 = vld [vmem:[%s15922_s3 + $0x430] sm:$0xff] }
 0x2e2   : > { %3798 = vmatprep.mubr.f32.mxu0 %v10004_v61  ;;  %3667 = vmatprep.subr.mxu1 %v2229_v56  ;;  %v2328_v39 = vld [vmem:[%s15922_s3 + $0x870] sm:$0xff]  ;;  %v2189_v48 = vld [vmem:[%s15922_s3 + $0x418] sm:$0xff] }
 0x2e3   : > { %3740 = vmatprep.subr.mxu0 %v2365_v14  ;;  %3668 = vmatpush1.msra.mxu1 %v2228_v22  ;;  %v2325_v56 = vld [vmem:[%s15922_s3 + $0x858] sm:$0xff]  ;;  %v2188_v14 = vld [vmem:[%s15922_s3 + $0x410] sm:$0xff] }
 0x2e4   : > { %3741 = vmatpush1.msra.mxu0 %v2364_v13  ;;  %3669 = vmatprep.subr.mxu1 %v2225_v5  ;;  %v2324_v22 = vld [vmem:[%s15922_s3 + $0x850] sm:$0xff]  ;;  %v2313_v13 = vld [vmem:[%s15922_s3 + $0x7f8] sm:$0xff] }
 0x2e5   : > { %3742 = vmatprep.subr.mxu0 %v2361_v18  ;;  %3670 = vmatpush1.msra.mxu1 %v2224_v49  ;;  %v2321_v5 = vld [vmem:[%s15922_s3 + $0x838] sm:$0xff]  ;;  %v2312_v18 = vld [vmem:[%s15922_s3 + $0x7f0] sm:$0xff] }
 0x2e6   : > { %3743 = vmatpush1.msra.mxu0 %v2360_v10  ;;  %3671 = vmatprep.subr.mxu1 %v2221_v27  ;;  %v2320_v49 = vld [vmem:[%s15922_s3 + $0x830] sm:$0xff]  ;;  %v2309_v10 = vld [vmem:[%s15922_s3 + $0x7d8] sm:$0xff] }
 0x2e7   : > { %3744 = vmatprep.subr.mxu0 %v2357_v59  ;;  %3672 = vmatpush1.msra.mxu1 %v2220_v1  ;;  %v2317_v27 = vld [vmem:[%s15922_s3 + $0x818] sm:$0xff]  ;;  %v2308_v59 = vld [vmem:[%s15922_s3 + $0x7d0] sm:$0xff] }
 0x2e8   : > { %3745 = vmatpush1.msra.mxu0 %v2356_v30  ;;  %3673 = vmatprep.subr.mxu1 %v2217_v6  ;;  %v2316_v1 = vld [vmem:[%s15922_s3 + $0x810] sm:$0xff]  ;;  %v2305_v30 = vld [vmem:[%s15922_s3 + $0x7b8] sm:$0xff] }
 0x2e9   : > { %3746 = vmatprep.subr.mxu0 %v2353_v17  ;;  %3674 = vmatpush1.msra.mxu1 %v2216_v20  ;;  %v2441_v6 = vld [vmem:[%s15922_s3 + $0xbf8] sm:$0xff]  ;;  %v2304_v17 = vld [vmem:[%s15922_s3 + $0x7b0] sm:$0xff] }
 0x2ea   : > { %3747 = vmatpush1.msra.mxu0 %v2352_v38  ;;  %3675 = vmatprep.subr.mxu1 %v2213_v40  ;;  %v2440_v20 = vld [vmem:[%s15922_s3 + $0xbf0] sm:$0xff]  ;;  %v2301_v38 = vld [vmem:[%s15922_s3 + $0x798] sm:$0xff] }
 0x2eb   : > { %3748 = vmatprep.subr.mxu0 %v2349_v47  ;;  %3676 = vmatpush1.msra.mxu1 %v2212_v29  ;;  %v2437_v40 = vld [vmem:[%s15922_s3 + $0xbd8] sm:$0xff]  ;;  %v2300_v47 = vld [vmem:[%s15922_s3 + $0x790] sm:$0xff] }
 0x2ec   : > { %3749 = vmatpush1.msra.mxu0 %v2348_v33  ;;  %3677 = vmatprep.subr.mxu1 %v2209_v54  ;;  %v2436_v29 = vld [vmem:[%s15922_s3 + $0xbd0] sm:$0xff]  ;;  %v2297_v33 = vld [vmem:[%s15922_s3 + $0x778] sm:$0xff] }
 0x2ed   : > { %3750 = vmatprep.subr.mxu0 %v2345_v60  ;;  %3678 = vmatpush1.msra.mxu1 %v2208_v53  ;;  %v2433_v54 = vld [vmem:[%s15922_s3 + $0xbb8] sm:$0xff]  ;;  %v2296_v60 = vld [vmem:[%s15922_s3 + $0x770] sm:$0xff] }
 0x2ee   : > { %3751 = vmatpush1.msra.mxu0 %v2344_v62  ;;  %3679 = vmatprep.subr.mxu1 %v2205_v8  ;;  %v2432_v53 = vld [vmem:[%s15922_s3 + $0xbb0] sm:$0xff]  ;;  %v2293_v62 = vld [vmem:[%s15922_s3 + $0x758] sm:$0xff] }
 0x2ef   : > { %3752 = vmatprep.subr.mxu0 %v2341_v32  ;;  %3680 = vmatpush1.msra.mxu1 %v2204_v25  ;;  %v2429_v8 = vld [vmem:[%s15922_s3 + $0xb98] sm:$0xff]  ;;  %v2292_v32 = vld [vmem:[%s15922_s3 + $0x750] sm:$0xff] }
 0x2f0   : > { %3753 = vmatpush1.msra.mxu0 %v2340_v57  ;;  %3681 = vmatprep.subr.mxu1 %v2201_v24  ;;  %v2428_v25 = vld [vmem:[%s15922_s3 + $0xb90] sm:$0xff]  ;;  %v2289_v57 = vld [vmem:[%s15922_s3 + $0x738] sm:$0xff] }
 0x2f1   : > { %3754 = vmatprep.subr.mxu0 %v2337_v0  ;;  %3682 = vmatpush1.msra.mxu1 %v2200_v51  ;;  %v2425_v24 = vld [vmem:[%s15922_s3 + $0xb78] sm:$0xff]  ;;  %v2288_v0 = vld [vmem:[%s15922_s3 + $0x730] sm:$0xff] }
 0x2f2   : > { %3755 = vmatpush1.msra.mxu0 %v2336_v15  ;;  %3683 = vmatprep.subr.mxu1 %v2197_v23  ;;  %v2424_v51 = vld [vmem:[%s15922_s3 + $0xb70] sm:$0xff]  ;;  %v3184_v15 = vpop.f32.mrf.mxu0  ;;  %v2285_v23 = vld [vmem:[%s15922_s3 + $0x718] sm:$0xff] }
 0x2f3   : > { %3756 = vmatprep.subr.mxu0 %v2333_v7  ;;  %3684 = vmatpush1.msra.mxu1 %v2196_v58  ;;  %v2421_v7 = vld [vmem:[%s15922_s3 + $0xb58] sm:$0xff]  ;;  %v2284_v58 = vld [vmem:[%s15922_s3 + $0x710] sm:$0xff] }
 0x2f4   : > { %3757 = vmatpush1.msra.mxu0 %v2332_v26  ;;  %3685 = vmatprep.subr.mxu1 %v2193_v37  ;;  %v2420_v26 = vld [vmem:[%s15922_s3 + $0xb50] sm:$0xff]  ;;  %v2281_v37 = vld [vmem:[%s15922_s3 + $0x6f8] sm:$0xff] }
 0x2f5   : > { %3758 = vmatprep.subr.mxu0 %v2329_v50  ;;  %3686 = vmatpush1.msra.mxu1 %v2192_v2  ;;  %v2417_v50 = vld [vmem:[%s15922_s3 + $0xb38] sm:$0xff]  ;;  %v2280_v2 = vld [vmem:[%s15922_s3 + $0x6f0] sm:$0xff] }
 0x2f6   : > { %3759 = vmatpush1.msra.mxu0 %v2328_v39  ;;  %3687 = vmatprep.subr.mxu1 %v2189_v48  ;;  %v2416_v39 = vld [vmem:[%s15922_s3 + $0xb30] sm:$0xff]  ;;  %v3186_v48 = vpop.f32.mrf.mxu0 }
 0x2f7   : > { %3760 = vmatprep.subr.mxu0 %v2325_v56  ;;  %3688 = vmatpush1.msra.mxu1 %v2188_v14  ;;  %v2277_v56 = vld [vmem:[%s15922_s3 + $0x6d8] sm:$0xff] }
 0x2f8   : > { %3761 = vmatpush1.msra.mxu0 %v2324_v22  ;;  %3689 = vmatprep.subr.mxu1 %v2313_v13  ;;  %v2413_v14 = vld [vmem:[%s15922_s3 + $0xb18] sm:$0xff]  ;;  %v2276_v22 = vld [vmem:[%s15922_s3 + $0x6d0] sm:$0xff] }
 0x2f9   : > { %3762 = vmatprep.subr.mxu0 %v2321_v5  ;;  %3690 = vmatpush2.msra.mxu1 %v2312_v18  ;;  %v2412_v13 = vld [vmem:[%s15922_s3 + $0xb10] sm:$0xff]  ;;  %v2273_v5 = vld [vmem:[%s15922_s3 + $0x6b8] sm:$0xff] }
 0x2fa   : > { %3763 = vmatpush1.msra.mxu0 %v2320_v49  ;;  %3691 = vmatprep.subr.mxu1 %v2309_v10  ;;  %v2409_v18 = vld [vmem:[%s15922_s3 + $0xaf8] sm:$0xff]  ;;  %v2272_v49 = vld [vmem:[%s15922_s3 + $0x6b0] sm:$0xff] }
 0x2fb   : > { %3764 = vmatprep.subr.mxu0 %v2317_v27  ;;  %3692 = vmatpush2.msra.mxu1 %v2308_v59  ;;  %v2408_v10 = vld [vmem:[%s15922_s3 + $0xaf0] sm:$0xff]  ;;  %v3190_v27 = vpop.f32.mrf.mxu0  ;;  %v2269_v59 = vld [vmem:[%s15922_s3 + $0x698] sm:$0xff] }
 0x2fc   : > { %3765 = vmatpush1.msra.mxu0 %v2316_v1  ;;  %3693 = vmatprep.subr.mxu1 %v2305_v30  ;;  %v2405_v1 = vld [vmem:[%s15922_s3 + $0xad8] sm:$0xff]  ;;  %v2268_v30 = vld [vmem:[%s15922_s3 + $0x690] sm:$0xff] }
 0x2fd   : > { %3766 = vmatprep.subr.mxu0 %v2441_v6  ;;  %3694 = vmatpush2.msra.mxu1 %v2304_v17  ;;  %v2404_v6 = vld [vmem:[%s15922_s3 + $0xad0] sm:$0xff] }
 0x2fe   : > { %3767 = vmatpush2.msra.mxu0 %v2440_v20  ;;  %3695 = vmatprep.subr.mxu1 %v2301_v38  ;;  %v2265_v20 = vld [vmem:[%s15922_s3 + $0x678] sm:$0xff] }
 0x2ff   : > { %3768 = vmatprep.subr.mxu0 %v2437_v40  ;;  %3696 = vmatpush2.msra.mxu1 %v2300_v47  ;;  %v2401_v38 = vld [vmem:[%s15922_s3 + $0xab8] sm:$0xff]  ;;  %v2264_v47 = vld [vmem:[%s15922_s3 + $0x670] sm:$0xff] }
 0x300   : > { %3769 = vmatpush2.msra.mxu0 %v2436_v29  ;;  %3697 = vmatprep.subr.mxu1 %v2297_v33  ;;  %v2400_v29 = vld [vmem:[%s15922_s3 + $0xab0] sm:$0xff] }
 0x301   : > { %3770 = vmatprep.subr.mxu0 %v2433_v54  ;;  %3698 = vmatpush2.msra.mxu1 %v2296_v60  ;;  %v3192_v54 = vpop.f32.mrf.mxu0  ;;  %v2261_v60 = vld [vmem:[%s15922_s3 + $0x658] sm:$0xff] }
 0x302   : > { %3771 = vmatpush2.msra.mxu0 %v2432_v53  ;;  %3699 = vmatprep.subr.mxu1 %v2293_v62  ;;  %v2397_v53 = vld [vmem:[%s15922_s3 + $0xa98] sm:$0xff] }
 0x303   : > { %3772 = vmatprep.subr.mxu0 %v2429_v8  ;;  %3700 = vmatpush2.msra.mxu1 %v2292_v32  ;;  %v2260_v8 = vld [vmem:[%s15922_s3 + $0x650] sm:$0xff] }
 0x304   : > { %3773 = vmatpush2.msra.mxu0 %v2428_v25  ;;  %3701 = vmatprep.subr.mxu1 %v2289_v57  ;;  %v2396_v32 = vld [vmem:[%s15922_s3 + $0xa90] sm:$0xff]  ;;  %v2257_v25 = vld [vmem:[%s15922_s3 + $0x638] sm:$0xff] }
 0x305   : > { %3774 = vmatprep.subr.mxu0 %v2425_v24  ;;  %3702 = vmatpush2.msra.mxu1 %v2288_v0  ;;  %v2393_v57 = vld [vmem:[%s15922_s3 + $0xa78] sm:$0xff] }
 0x306   : > { %3775 = vmatpush2.msra.mxu0 %v2424_v51  ;;  %3703 = vmatprep.subr.mxu1 %v2285_v23  ;;  %v2256_v51 = vld [vmem:[%s15922_s3 + $0x630] sm:$0xff] }
 0x307   : > { %3776 = vmatprep.subr.mxu0 %v2421_v7  ;;  %3704 = vmatpush2.msra.mxu1 %v2284_v58  ;;  %v2253_v58 = vld [vmem:[%s15922_s3 + $0x618] sm:$0xff] }
 0x308   : > { %3777 = vmatpush2.msra.mxu0 %v2420_v26  ;;  %3705 = vmatprep.subr.mxu1 %v2281_v37  ;;  %v2389_v26 = vld [vmem:[%s15922_s3 + $0xa58] sm:$0xff] }
 0x309   : > { %3778 = vmatprep.subr.mxu0 %v2417_v50  ;;  %3706 = vmatpush2.msra.mxu1 %v2280_v2  ;;  %v2252_v2 = vld [vmem:[%s15922_s3 + $0x610] sm:$0xff] }
 0x30a   : > { %3779 = vmatpush2.msra.mxu0 %v2416_v39  ;;  %3707 = vmatprep.subr.mxu1 %v2277_v56  ;;  %v2388_v39 = vld [vmem:[%s15922_s3 + $0xa50] sm:$0xff] }
 0x30b   : > { %3780 = vmatprep.subr.mxu0 %v2413_v14  ;;  %3708 = vmatpush2.msra.mxu1 %v2276_v22  ;;  %v2385_v14 = vld [vmem:[%s15922_s3 + $0xa38] sm:$0xff]  ;;  %v7311_v22 = vld [vmem:[%s15922_s3 + $0x19e8] sm:$0xff] }
 0x30c   : > { %3781 = vmatpush2.msra.mxu0 %v2412_v13  ;;  %3709 = vmatprep.subr.mxu1 %v2273_v5  ;;  %v3261_v17 = vpop.f32.mrf.mxu1  ;;  %v2384_v13 = vld [vmem:[%s15922_s3 + $0xa30] sm:$0xff]  ;;  %v7310_v5 = vld [vmem:[%s15922_s3 + $0x19e0] sm:$0xff] }
 0x30d   : > { %3782 = vmatprep.subr.mxu0 %v2409_v18  ;;  %3710 = vmatpush2.msra.mxu1 %v2272_v49  ;;  %v3262_v40 = vadd.f32 %v3261_v17, %v3184_v15  ;;  %v2392_v15 = vld [vmem:[%s15922_s3 + $0xa70] sm:$0xff]  ;;  %v2381_v49 = vld [vmem:[%s15922_s3 + $0xa18] sm:$0xff]  ;;  %v7303_v17 = vld [vmem:[%s15922_s3 + $0x19a8] sm:$0xff] }
 0x30e   : > { %3783 = vmatpush2.msra.mxu0 %v2408_v10  ;;  %3711 = vmatprep.subr.mxu1 %v2269_v59  ;;  %v3263_v33 = vpop.f32.mrf.mxu1  ;;  %v7307_v10 = vld [vmem:[%s15922_s3 + $0x19c8] sm:$0xff]  ;;  %v2380_v59 = vld [vmem:[%s15922_s3 + $0xa10] sm:$0xff] }
 0x30f   : > { %3784 = vmatprep.subr.mxu0 %v2405_v1  ;;  %3712 = vmatpush2.msra.mxu1 %v2268_v30  ;;  %v3264_v62 = vadd.f32 %v3263_v33, %v3186_v48  ;;  %v7306_v1 = vld [vmem:[%s15922_s3 + $0x19c0] sm:$0xff]  ;;  %v7299_v33 = vld [vmem:[%s15922_s3 + $0x1988] sm:$0xff] }
 0x310   : > { %3785 = vmatpush2.msra.mxu0 %v2404_v6  ;;  %3713 = vmatprep.subr.mxu1 %v2265_v20  ;;  %v7439_v20 = vld [vmem:[%s15922_s3 + $0x1de8] sm:$0xff] }
 0x311   : > { %3786 = vmatprep.subr.mxu0 %v2401_v38  ;;  %3714 = vmatpush2.msra.mxu1 %v2264_v47  ;;  %v3338_v0 = vpop.f32.mrf.mxu0  ;;  %v4200_v38 = vrot.slane %v9916_v43, 4  ;;  %v4199_v47 = vrot.slane %v9901_v36, 4 }
 0x312   : > { %3787 = vmatpush2.msra.mxu0 %v2400_v29  ;;  %v3267_v24 = vpop.f32.mrf.mxu1  ;;  %3715 = vmatprep.subr.mxu1 %v2261_v60  ;;  %v12011_v7 = vadd.f32 %v3338_v0, %v3262_v40  ;;  %v7302_v40 = vld [vmem:[%s15922_s3 + $0x19a0] sm:$0xff]  ;;  %v4205_v0 = vrot.slane %v9938_v21, 4 }
 0x313   : > { %3788 = vmatprep.subr.mxu0 %v2397_v53  ;;  %v3268_v23 = vadd.f32 %v3267_v24, %v3190_v27  ;;  %3716 = vmatpush2.msra.mxu1 %v2260_v8  ;;  %v3340_v50 = vpop.f32.mrf.mxu0  ;;  %v7438_v29 = vld [vmem:[%s15922_s3 + $0x1de0] sm:$0xff]  ;;  %v12083_v60 = vsel %vm297_vm0, %v4199_v47, %v4200_v38  ;;  %v7295_v8 = vld [vmem:[%s15922_s3 + $0x1968] sm:$0xff] }
 0x314   : > { %3789 = vmatpush2.msra.mxu0 %v2396_v32  ;;  %v3269_v37 = vpop.f32.mrf.mxu1  ;;  %3717 = vmatprep.subr.mxu1 %v2257_v25  ;;  %v12025_v56 = vadd.f32 %v3340_v50, %v3264_v62  ;;  %v7298_v53 = vld [vmem:[%s15922_s3 + $0x1980] sm:$0xff]  ;;  %v4206_v32 = vrot.slane %v9941_v44, 4  ;;  %v7431_v25 = vld [vmem:[%s15922_s3 + $0x1da8] sm:$0xff] }
 0x315   : > { %3790 = vmatprep.subr.mxu0 %v2393_v57  ;;  %v3270_v48 = vadd.f32 %v3269_v37, %v3192_v54  ;;  %3718 = vmatpush2.msra.mxu1 %v2256_v51  ;;  %v7435_v54 = vld [vmem:[%s15922_s3 + $0x1dc8] sm:$0xff]  ;;  %v7434_v62 = vld [vmem:[%s15922_s3 + $0x1dc0] sm:$0xff] }
 0x316   : > { %3791 = vmatpush2.msra.mxu0 %v2392_v15  ;;  %3719 = vmatprep.subr.mxu1 %v2253_v58  ;;  %v7294_v57 = vld [vmem:[%s15922_s3 + $0x1960] sm:$0xff]  ;;  %v7291_v51 = vld [vmem:[%s15922_s3 + $0x1948] sm:$0xff] }
 0x317   : > { %3792 = vmatprep.subr.mxu0 %v2389_v26  ;;  %3720 = vmatpush2.msra.mxu1 %v2252_v2  ;;  %v7430_v24 = vld [vmem:[%s15922_s3 + $0x1da0] sm:$0xff]  ;;  %v7427_v15 = vld [vmem:[%s15922_s3 + $0x1d88] sm:$0xff] }
 0x318   : > { %3793 = vmatpush2.msra.mxu0 %v2388_v39  ;;  %v3344_v18 = vpop.f32.mrf.mxu0  ;;  %3722 = vmatmul.mubr.f32.vlgmr.msra.gmra.mxu1 %v9953_v12  ;;  %v7290_v58 = vld [vmem:[%s15922_s3 + $0x1940] sm:$0xff]  ;;  %v7287_v37 = vld [vmem:[%s15922_s3 + $0x1928] sm:$0xff] }
 0x319   : > { %3794 = vmatprep.subr.mxu0 %v2385_v14  ;;  %v12046_v27 = vadd.f32 %v3344_v18, %v3268_v23  ;;  %4238 = vmatprep.subr.mxu1 %v7311_v22  ;;  %v12116_v23 = vsel %vm297_vm0, %v4205_v0, %v4206_v32  ;;  %v7426_v26 = vld [vmem:[%s15922_s3 + $0x1d80] sm:$0xff]  ;;  %v7423_v50 = vld [vmem:[%s15922_s3 + $0x1d68] sm:$0xff] }
 0x31a   : > { %3727 = vmatprep.mubr.f32.mxu1 %v9941_v44  ;;  %v3346_v30 = vpop.f32.mrf.mxu0  ;;  %3795 = vmatpush2.msra.mxu0 %v2384_v13  ;;  %v7286_v2 = vld [vmem:[%s15922_s3 + $0x1920] sm:$0xff]  ;;  %v7419_v14 = vld [vmem:[%s15922_s3 + $0x1d48] sm:$0xff] }
 0x31b   : > { %4239 = vmatpush1.msra.mxu1 %v7310_v5  ;;  %v12055_v6 = vadd.f32 %v3346_v30, %v3270_v48  ;;  %3796 = vmatprep.subr.mxu0 %v2381_v49  ;;  %v7422_v39 = vld [vmem:[%s15922_s3 + $0x1d60] sm:$0xff]  ;;  %v7283_v48 = vld [vmem:[%s15922_s3 + $0x1908] sm:$0xff] }
 0x31c   : > { %4240 = vmatprep.subr.mxu1 %v7307_v10  ;;  %3797 = vmatpush2.msra.mxu0 %v2380_v59  ;;  %v7282_v22 = vld [vmem:[%s15922_s3 + $0x1900] sm:$0xff]  ;;  %v7279_v5 = vld [vmem:[%s15922_s3 + $0x18e8] sm:$0xff] }
 0x31d   : > { %4241 = vmatpush1.msra.mxu1 %v7306_v1  ;;  %3799 = vmatmul.mubr.f32.vlgmr.msra.gmra.mxu0 %v10385_v41  ;;  %v7418_v13 = vld [vmem:[%s15922_s3 + $0x1d40] sm:$0xff]  ;;  %v7415_v18 = vld [vmem:[%s15922_s3 + $0x1d28] sm:$0xff] }
 0x31e   : > { %3728 = vmatmul.mubr.f32.gmra.mxu1 %v9961_v42  ;;  %4242 = vmatprep.subr.mxu1 %v7303_v17  ;;  %v7278_v49 = vld [vmem:[%s15922_s3 + $0x18e0] sm:$0xff]  ;;  %v7275_v59 = vld [vmem:[%s15922_s3 + $0x18c8] sm:$0xff] }
 0x31f   : > { %4315 = vmatprep.subr.mxu0 %v7439_v20  ;;  %3804 = vmatprep.mubr.f32.mxu0 %v10018_v28  ;;  %v7414_v10 = vld [vmem:[%s15922_s3 + $0x1d20] sm:$0xff]  ;;  %v7411_v1 = vld [vmem:[%s15922_s3 + $0x1d08] sm:$0xff] }
 0x320   : > { %4243 = vmatpush1.msra.mxu1 %v7302_v40  ;;  %4302 = vmatprep.mubr.f32.mxu1 %v12083_v60  ;;  %v7274_v30 = vld [vmem:[%s15922_s3 + $0x18c0] sm:$0xff]  ;;  %v7271_v20 = vld [vmem:[%s15922_s3 + $0x18a8] sm:$0xff] }
 0x321   : > { %4316 = vmatpush1.msra.mxu0 %v7438_v29  ;;  %4244 = vmatprep.subr.mxu1 %v7299_v33  ;;  %v7410_v17 = vld [vmem:[%s15922_s3 + $0x1d00] sm:$0xff]  ;;  %v7407_v40 = vld [vmem:[%s15922_s3 + $0x1ce8] sm:$0xff] }
 0x322   : > { %4317 = vmatprep.subr.mxu0 %v7435_v54  ;;  %4245 = vmatpush1.msra.mxu1 %v7298_v53  ;;  %v7270_v47 = vld [vmem:[%s15922_s3 + $0x18a0] sm:$0xff]  ;;  %v7267_v33 = vld [vmem:[%s15922_s3 + $0x1888] sm:$0xff] }
 0x323   : > { %4318 = vmatpush1.msra.mxu0 %v7434_v62  ;;  %4246 = vmatprep.subr.mxu1 %v7295_v8  ;;  %v7406_v29 = vld [vmem:[%s15922_s3 + $0x1ce0] sm:$0xff]  ;;  %v7403_v54 = vld [vmem:[%s15922_s3 + $0x1cc8] sm:$0xff] }
 0x324   : > { %3805 = vmatmul.mubr.f32.gmra.mxu0 %v10370_v9  ;;  %4319 = vmatprep.subr.mxu0 %v7431_v25  ;;  %v7266_v53 = vld [vmem:[%s15922_s3 + $0x1880] sm:$0xff]  ;;  %v7263_v8 = vld [vmem:[%s15922_s3 + $0x1868] sm:$0xff] }
 0x325   : > { %4247 = vmatpush1.msra.mxu1 %v7294_v57  ;;  %4320 = vmatpush1.msra.mxu0 %v7430_v24  ;;  %v7402_v62 = vld [vmem:[%s15922_s3 + $0x1cc0] sm:$0xff]  ;;  %v7399_v25 = vld [vmem:[%s15922_s3 + $0x1ca8] sm:$0xff] }
 0x326   : > { %4379 = vmatprep.mubr.f32.mxu0 %v12116_v23  ;;  %4248 = vmatprep.subr.mxu1 %v7291_v51  ;;  %v7262_v57 = vld [vmem:[%s15922_s3 + $0x1860] sm:$0xff]  ;;  %v7259_v0 = vld [vmem:[%s15922_s3 + $0x1848] sm:$0xff] }
 0x327   : > { %4321 = vmatprep.subr.mxu0 %v7427_v15  ;;  %4249 = vmatpush1.msra.mxu1 %v7290_v58  ;;  %v7398_v24 = vld [vmem:[%s15922_s3 + $0x1ca0] sm:$0xff]  ;;  %v7395_v51 = vld [vmem:[%s15922_s3 + $0x1c88] sm:$0xff] }
 0x328   : > { %4322 = vmatpush1.msra.mxu0 %v7426_v26  ;;  %4250 = vmatprep.subr.mxu1 %v7287_v37  ;;  %v7258_v15 = vld [vmem:[%s15922_s3 + $0x1840] sm:$0xff]  ;;  %v7255_v26 = vld [vmem:[%s15922_s3 + $0x1828] sm:$0xff] }
 0x329   : > { %4323 = vmatprep.subr.mxu0 %v7423_v50  ;;  %4251 = vmatpush1.msra.mxu1 %v7286_v2  ;;  %v7394_v58 = vld [vmem:[%s15922_s3 + $0x1c80] sm:$0xff]  ;;  %v7391_v37 = vld [vmem:[%s15922_s3 + $0x1c68] sm:$0xff] }
 0x32a   : > { %4324 = vmatpush1.msra.mxu0 %v7422_v39  ;;  %4252 = vmatprep.subr.mxu1 %v7283_v48  ;;  %v7254_v50 = vld [vmem:[%s15922_s3 + $0x1820] sm:$0xff]  ;;  %v7251_v39 = vld [vmem:[%s15922_s3 + $0x1808] sm:$0xff] }
 0x32b   : > { %4325 = vmatprep.subr.mxu0 %v7419_v14  ;;  %4253 = vmatpush1.msra.mxu1 %v7282_v22  ;;  %v7390_v2 = vld [vmem:[%s15922_s3 + $0x1c60] sm:$0xff]  ;;  %v7387_v48 = vld [vmem:[%s15922_s3 + $0x1c48] sm:$0xff] }
 0x32c   : > { %4326 = vmatpush1.msra.mxu0 %v7418_v13  ;;  %4254 = vmatprep.subr.mxu1 %v7279_v5  ;;  %v7250_v14 = vld [vmem:[%s15922_s3 + $0x1800] sm:$0xff]  ;;  %v7375_v13 = vld [vmem:[%s15922_s3 + $0x1be8] sm:$0xff] }
 0x32d   : > { %4327 = vmatprep.subr.mxu0 %v7415_v18  ;;  %4255 = vmatpush1.msra.mxu1 %v7278_v49  ;;  %v7386_v22 = vld [vmem:[%s15922_s3 + $0x1c40] sm:$0xff]  ;;  %v7383_v5 = vld [vmem:[%s15922_s3 + $0x1c28] sm:$0xff] }
 0x32e   : > { %4328 = vmatpush1.msra.mxu0 %v7414_v10  ;;  %4256 = vmatprep.subr.mxu1 %v7275_v59  ;;  %v7374_v18 = vld [vmem:[%s15922_s3 + $0x1be0] sm:$0xff]  ;;  %v7371_v10 = vld [vmem:[%s15922_s3 + $0x1bc8] sm:$0xff] }
 0x32f   : > { %4329 = vmatprep.subr.mxu0 %v7411_v1  ;;  %4257 = vmatpush1.msra.mxu1 %v7274_v30  ;;  %v7382_v49 = vld [vmem:[%s15922_s3 + $0x1c20] sm:$0xff]  ;;  %v7379_v59 = vld [vmem:[%s15922_s3 + $0x1c08] sm:$0xff] }
 0x330   : > { %4330 = vmatpush1.msra.mxu0 %v7410_v17  ;;  %4258 = vmatprep.subr.mxu1 %v7271_v20  ;;  %v7370_v1 = vld [vmem:[%s15922_s3 + $0x1bc0] sm:$0xff]  ;;  %v7367_v17 = vld [vmem:[%s15922_s3 + $0x1ba8] sm:$0xff] }
 0x331   : > { %4331 = vmatprep.subr.mxu0 %v7407_v40  ;;  %4259 = vmatpush1.msra.mxu1 %v7270_v47  ;;  %v7378_v30 = vld [vmem:[%s15922_s3 + $0x1c00] sm:$0xff]  ;;  %v7503_v20 = vld [vmem:[%s15922_s3 + $0x1fe8] sm:$0xff] }
 0x332   : > { %4332 = vmatpush1.msra.mxu0 %v7406_v29  ;;  %4260 = vmatprep.subr.mxu1 %v7267_v33  ;;  %v7366_v40 = vld [vmem:[%s15922_s3 + $0x1ba0] sm:$0xff]  ;;  %v7363_v29 = vld [vmem:[%s15922_s3 + $0x1b88] sm:$0xff] }
 0x333   : > { %4333 = vmatprep.subr.mxu0 %v7403_v54  ;;  %4261 = vmatpush1.msra.mxu1 %v7266_v53  ;;  %v7502_v47 = vld [vmem:[%s15922_s3 + $0x1fe0] sm:$0xff]  ;;  %v7499_v33 = vld [vmem:[%s15922_s3 + $0x1fc8] sm:$0xff] }
 0x334   : > { %4334 = vmatpush1.msra.mxu0 %v7402_v62  ;;  %4262 = vmatprep.subr.mxu1 %v7263_v8  ;;  %v7362_v54 = vld [vmem:[%s15922_s3 + $0x1b80] sm:$0xff]  ;;  %v7359_v62 = vld [vmem:[%s15922_s3 + $0x1b68] sm:$0xff] }
 0x335   : > { %4335 = vmatprep.subr.mxu0 %v7399_v25  ;;  %4263 = vmatpush1.msra.mxu1 %v7262_v57  ;;  %v7498_v53 = vld [vmem:[%s15922_s3 + $0x1fc0] sm:$0xff]  ;;  %v7495_v8 = vld [vmem:[%s15922_s3 + $0x1fa8] sm:$0xff] }
 0x336   : > { %4336 = vmatpush1.msra.mxu0 %v7398_v24  ;;  %4264 = vmatprep.subr.mxu1 %v7259_v0  ;;  %v7358_v25 = vld [vmem:[%s15922_s3 + $0x1b60] sm:$0xff]  ;;  %v7355_v24 = vld [vmem:[%s15922_s3 + $0x1b48] sm:$0xff] }
 0x337   : > { %4337 = vmatprep.subr.mxu0 %v7395_v51  ;;  %4265 = vmatpush1.msra.mxu1 %v7258_v15  ;;  %v7494_v57 = vld [vmem:[%s15922_s3 + $0x1fa0] sm:$0xff]  ;;  %v7491_v0 = vld [vmem:[%s15922_s3 + $0x1f88] sm:$0xff] }
 0x338   : > { %4338 = vmatpush1.msra.mxu0 %v7394_v58  ;;  %4266 = vmatprep.subr.mxu1 %v7255_v26  ;;  %v7354_v51 = vld [vmem:[%s15922_s3 + $0x1b40] sm:$0xff]  ;;  %v7351_v58 = vld [vmem:[%s15922_s3 + $0x1b28] sm:$0xff] }
 0x339   : > { %4339 = vmatprep.subr.mxu0 %v7391_v37  ;;  %4267 = vmatpush1.msra.mxu1 %v7254_v50  ;;  %v7490_v15 = vld [vmem:[%s15922_s3 + $0x1f80] sm:$0xff]  ;;  %v7487_v26 = vld [vmem:[%s15922_s3 + $0x1f68] sm:$0xff] }
 0x33a   : > { %4340 = vmatpush1.msra.mxu0 %v7390_v2  ;;  %4268 = vmatprep.subr.mxu1 %v7251_v39  ;;  %v7350_v37 = vld [vmem:[%s15922_s3 + $0x1b20] sm:$0xff]  ;;  %v7347_v2 = vld [vmem:[%s15922_s3 + $0x1b08] sm:$0xff] }
 0x33b   : > { %4341 = vmatprep.subr.mxu0 %v7387_v48  ;;  %4269 = vmatpush1.msra.mxu1 %v7250_v14  ;;  %v7486_v50 = vld [vmem:[%s15922_s3 + $0x1f60] sm:$0xff]  ;;  %v7483_v39 = vld [vmem:[%s15922_s3 + $0x1f48] sm:$0xff] }
 0x33c   : > { %4342 = vmatpush1.msra.mxu0 %v7386_v22  ;;  %4270 = vmatprep.subr.mxu1 %v7375_v13  ;;  %v7346_v48 = vld [vmem:[%s15922_s3 + $0x1b00] sm:$0xff]  ;;  %v7343_v22 = vld [vmem:[%s15922_s3 + $0x1ae8] sm:$0xff] }
 0x33d   : > { %4343 = vmatprep.subr.mxu0 %v7383_v5  ;;  %4271 = vmatpush2.msra.mxu1 %v7374_v18  ;;  %v7482_v14 = vld [vmem:[%s15922_s3 + $0x1f40] sm:$0xff]  ;;  %v7479_v13 = vld [vmem:[%s15922_s3 + $0x1f28] sm:$0xff] }
 0x33e   : > { %4344 = vmatpush1.msra.mxu0 %v7382_v49  ;;  %4272 = vmatprep.subr.mxu1 %v7371_v10  ;;  %v7342_v5 = vld [vmem:[%s15922_s3 + $0x1ae0] sm:$0xff]  ;;  %v7339_v49 = vld [vmem:[%s15922_s3 + $0x1ac8] sm:$0xff] }
 0x33f   : > { %4345 = vmatprep.subr.mxu0 %v7379_v59  ;;  %4273 = vmatpush2.msra.mxu1 %v7370_v1  ;;  %v7478_v18 = vld [vmem:[%s15922_s3 + $0x1f20] sm:$0xff]  ;;  %v7475_v10 = vld [vmem:[%s15922_s3 + $0x1f08] sm:$0xff] }
 0x340   : > { %4346 = vmatpush1.msra.mxu0 %v7378_v30  ;;  %4274 = vmatprep.subr.mxu1 %v7367_v17  ;;  %v7338_v59 = vld [vmem:[%s15922_s3 + $0x1ac0] sm:$0xff]  ;;  %v7335_v30 = vld [vmem:[%s15922_s3 + $0x1aa8] sm:$0xff] }
 0x341   : > { %4347 = vmatprep.subr.mxu0 %v7503_v20  ;;  %4275 = vmatpush2.msra.mxu1 %v7366_v40  ;;  %v7474_v1 = vld [vmem:[%s15922_s3 + $0x1f00] sm:$0xff]  ;;  %v7471_v17 = vld [vmem:[%s15922_s3 + $0x1ee8] sm:$0xff] }
 0x342   : > { %4348 = vmatpush2.msra.mxu0 %v7502_v47  ;;  %4276 = vmatprep.subr.mxu1 %v7363_v29  ;;  %v7334_v20 = vld [vmem:[%s15922_s3 + $0x1aa0] sm:$0xff]  ;;  %v7331_v47 = vld [vmem:[%s15922_s3 + $0x1a88] sm:$0xff] }
 0x343   : > { %4349 = vmatprep.subr.mxu0 %v7499_v33  ;;  %4277 = vmatpush2.msra.mxu1 %v7362_v54  ;;  %v7470_v40 = vld [vmem:[%s15922_s3 + $0x1ee0] sm:$0xff]  ;;  %v7467_v29 = vld [vmem:[%s15922_s3 + $0x1ec8] sm:$0xff] }
 0x344   : > { %4350 = vmatpush2.msra.mxu0 %v7498_v53  ;;  %4278 = vmatprep.subr.mxu1 %v7359_v62  ;;  %v7330_v33 = vld [vmem:[%s15922_s3 + $0x1a80] sm:$0xff]  ;;  %v7327_v62 = vld [vmem:[%s15922_s3 + $0x1a68] sm:$0xff] }
 0x345   : > { %4351 = vmatprep.subr.mxu0 %v7495_v8  ;;  %4279 = vmatpush2.msra.mxu1 %v7358_v25  ;;  %v7466_v54 = vld [vmem:[%s15922_s3 + $0x1ec0] sm:$0xff]  ;;  %v7463_v8 = vld [vmem:[%s15922_s3 + $0x1ea8] sm:$0xff] }
 0x346   : > { %4352 = vmatpush2.msra.mxu0 %v7494_v57  ;;  %4280 = vmatprep.subr.mxu1 %v7355_v24  ;;  %v7326_v57 = vld [vmem:[%s15922_s3 + $0x1a60] sm:$0xff] }
 0x347   : > { %4353 = vmatprep.subr.mxu0 %v7491_v0  ;;  %4281 = vmatpush2.msra.mxu1 %v7354_v51  ;;  %v7462_v24 = vld [vmem:[%s15922_s3 + $0x1ea0] sm:$0xff]  ;;  %v7323_v51 = vld [vmem:[%s15922_s3 + $0x1a48] sm:$0xff] }
 0x348   : > { %4354 = vmatpush2.msra.mxu0 %v7490_v15  ;;  %4282 = vmatprep.subr.mxu1 %v7351_v58  ;;  %v7322_v58 = vld [vmem:[%s15922_s3 + $0x1a40] sm:$0xff] }
 0x349   : > { %4355 = vmatprep.subr.mxu0 %v7487_v26  ;;  %4283 = vmatpush2.msra.mxu1 %v7350_v37  ;;  %v7458_v26 = vld [vmem:[%s15922_s3 + $0x1e80] sm:$0xff]  ;;  %v7319_v37 = vld [vmem:[%s15922_s3 + $0x1a28] sm:$0xff] }
 0x34a   : > { %4356 = vmatpush2.msra.mxu0 %v7486_v50  ;;  %4284 = vmatprep.subr.mxu1 %v7347_v2 }
 0x34b   : > { %4357 = vmatprep.subr.mxu0 %v7483_v39  ;;  %4285 = vmatpush2.msra.mxu1 %v7346_v48  ;;  %v7318_v39 = vld [vmem:[%s15922_s3 + $0x1a20] sm:$0xff] }
 0x34c   : > { %4358 = vmatpush2.msra.mxu0 %v7482_v14  ;;  %4286 = vmatprep.subr.mxu1 %v7343_v22  ;;  %v7454_v48 = vld [vmem:[%s15922_s3 + $0x1e60] sm:$0xff] }
 0x34d   : > { %4359 = vmatprep.subr.mxu0 %v7479_v13  ;;  %4287 = vmatpush2.msra.mxu1 %v7342_v5  ;;  %v7315_v13 = vld [vmem:[%s15922_s3 + $0x1a08] sm:$0xff] }
 0x34e   : > { %4360 = vmatpush2.msra.mxu0 %v7478_v18  ;;  %4288 = vmatprep.subr.mxu1 %v7339_v49  ;;  %v7451_v5 = vld [vmem:[%s15922_s3 + $0x1e48] sm:$0xff]  ;;  %v4197_v18 = vrot.slane %v9913_v52, 4 }
 0x34f   : > { %4361 = vmatprep.subr.mxu0 %v7475_v10  ;;  %4289 = vmatpush2.msra.mxu1 %v7338_v59  ;;  %v7450_v59 = vld [vmem:[%s15922_s3 + $0x1e40] sm:$0xff] }
 0x350   : > { %4362 = vmatpush2.msra.mxu0 %v7474_v1  ;;  %4290 = vmatprep.subr.mxu1 %v7335_v30  ;;  %v3415_v53 = vpop.f32.mrf.mxu1  ;;  %v4216_v1 = vrot.slane %v9925_v16, 4 }
 0x351   : > { %4363 = vmatprep.subr.mxu0 %v7471_v17  ;;  %4291 = vmatpush2.msra.mxu1 %v7334_v20  ;;  %v3416_v25 = vadd.f32 %v3415_v53, %v11578_v35  ;;  %v7459_v35 = vld [vmem:[%s15922_s3 + $0x1e88] sm:$0xff]  ;;  %v4196_v20 = vrot.slane %v9904_v55, 4 }
 0x352   : > { %4364 = vmatpush2.msra.mxu0 %v7470_v40  ;;  %4292 = vmatprep.subr.mxu1 %v7331_v47  ;;  %v3417_v0 = vpop.f32.mrf.mxu1  ;;  %v7447_v40 = vld [vmem:[%s15922_s3 + $0x1e28] sm:$0xff]  ;;  %v12467_v53 = vsel %vm297_vm0, %v4200_v38, %v4216_v1  ;;  %v7442_v38 = vld [vmem:[%s15922_s3 + $0x1e00] sm:$0xff]  ;;  %v7305_v1 = vld [vmem:[%s15922_s3 + $0x19b8] sm:$0xff] }
 0x353   : > { %4365 = vmatprep.subr.mxu0 %v7467_v29  ;;  %4293 = vmatpush2.msra.mxu1 %v7330_v33  ;;  %v3418_v15 = vadd.f32 %v3417_v0, %v11593_v19  ;;  %v7455_v19 = vld [vmem:[%s15922_s3 + $0x1e68] sm:$0xff]  ;;  %v7446_v29 = vld [vmem:[%s15922_s3 + $0x1e20] sm:$0xff] }
 0x354   : > { %4366 = vmatpush2.msra.mxu0 %v7466_v54  ;;  %4294 = vmatprep.subr.mxu1 %v7327_v62  ;;  %v7567_v47 = vld [vmem:[%s15922_s3 + $0x21e8] sm:$0xff]  ;;  %v7566_v33 = vld [vmem:[%s15922_s3 + $0x21e0] sm:$0xff] }
 0x355   : > { %4367 = vmatprep.subr.mxu0 %v7463_v8  ;;  %4295 = vmatpush2.msra.mxu1 %v7326_v57  ;;  %v3492_v2 = vpop.f32.mrf.mxu0  ;;  %v7443_v62 = vld [vmem:[%s15922_s3 + $0x1e08] sm:$0xff]  ;;  %v4203_v57 = vrot.slane %v9961_v42, 4  ;;  %v7562_v0 = vld [vmem:[%s15922_s3 + $0x21c0] sm:$0xff] }
 0x356   : > { %4368 = vmatpush2.msra.mxu0 %v7462_v24  ;;  %v3421_v50 = vpop.f32.mrf.mxu1  ;;  %4296 = vmatprep.subr.mxu1 %v7323_v51  ;;  %v12428_v22 = vadd.f32 %v3492_v2, %v3416_v25  ;;  %v7563_v8 = vld [vmem:[%s15922_s3 + $0x21c8] sm:$0xff]  ;;  %v4214_v25 = vrot.slane %v9988_v34, 4 }
 0x357   : > { %4369 = vmatprep.subr.mxu0 %v7459_v35  ;;  %v3422_v14 = vadd.f32 %v3421_v50, %v11614_v63  ;;  %4297 = vmatpush2.msra.mxu1 %v7322_v58  ;;  %v3494_v10 = vpop.f32.mrf.mxu0  ;;  %v7314_v63 = vld [vmem:[%s15922_s3 + $0x1a00] sm:$0xff]  ;;  %v4202_v35 = vrot.slane %v9953_v12, 4 }
 0x358   : > { %4370 = vmatpush2.msra.mxu0 %v7458_v26  ;;  %v3423_v49 = vpop.f32.mrf.mxu1  ;;  %4298 = vmatprep.subr.mxu1 %v7319_v37  ;;  %v12445_v17 = vadd.f32 %v3494_v10, %v3418_v15  ;;  %v4220_v15 = vrot.slane %v9985_v31, 4  ;;  %v7559_v26 = vld [vmem:[%s15922_s3 + $0x21a8] sm:$0xff]  ;;  %v7313_v37 = vld [vmem:[%s15922_s3 + $0x19f8] sm:$0xff]  ;;  %v12498_v50 = vsel %vm297_vm0, %v4197_v18, %v4214_v25  ;;  %v7542_v25 = vld [vmem:[%s15922_s3 + $0x2120] sm:$0xff] }
 0x359   : > { %4371 = vmatprep.subr.mxu0 %v7455_v19  ;;  %v3424_v30 = vadd.f32 %v3423_v49, %v11629_v11  ;;  %4299 = vmatpush2.msra.mxu1 %v7318_v39  ;;  %v12455_v11 = vsel %vm297_vm0, %v4196_v20, %v4197_v18  ;;  %v4212_v19 = vrot.slane %v10018_v28, 4  ;;  %v12501_v2 = vsel %vm297_vm0, %v4202_v35, %v4203_v57  ;;  %v7558_v39 = vld [vmem:[%s15922_s3 + $0x21a0] sm:$0xff]  ;;  %v7309_v18 = vld [vmem:[%s15922_s3 + $0x19d8] sm:$0xff]  ;;  %v7535_v35 = vld [vmem:[%s15922_s3 + $0x20e8] sm:$0xff] }
 0x35a   : > { %4372 = vmatpush2.msra.mxu0 %v7454_v48  ;;  %4300 = vmatprep.subr.mxu1 %v7315_v13  ;;  %v4211_v48 = vrot.slane %v10004_v61, 4  ;;  %v12515_v13 = vsel %vm297_vm0, %v4206_v32, %v4220_v15  ;;  %v4218_v49 = vrot.slane %v9982_v46, 4  ;;  %v7554_v32 = vld [vmem:[%s15922_s3 + $0x2180] sm:$0xff]  ;;  %v7289_v15 = vld [vmem:[%s15922_s3 + $0x1938] sm:$0xff] }
 0x35b   : > { %4373 = vmatprep.subr.mxu0 %v7451_v5  ;;  %4301 = vmatpush2.msra.mxu1 %v7314_v63  ;;  %v7555_v5 = vld [vmem:[%s15922_s3 + $0x2188] sm:$0xff]  ;;  %v7308_v63 = vld [vmem:[%s15922_s3 + $0x19d0] sm:$0xff] }
 0x35c   : > { %4374 = vmatpush2.msra.mxu0 %v7450_v59  ;;  %v3498_v54 = vpop.f32.mrf.mxu0  ;;  %4303 = vmatmul.mubr.f32.vlgmr.msra.gmra.mxu1 %v12455_v11  ;;  %v12528_v10 = vsel %vm297_vm0, %v4211_v48, %v4212_v19  ;;  %v7551_v59 = vld [vmem:[%s15922_s3 + $0x2168] sm:$0xff]  ;;  %v12547_v20 = vsel %vm297_vm0, %v4203_v57, %v4218_v49  ;;  %v7296_v57 = vld [vmem:[%s15922_s3 + $0x1970] sm:$0xff]  ;;  %v7285_v48 = vld [vmem:[%s15922_s3 + $0x1918] sm:$0xff] }
 0x35d   : > { %4375 = vmatprep.subr.mxu0 %v7447_v40  ;;  %v12477_v24 = vadd.f32 %v3498_v54, %v3422_v14  ;;  %4392 = vmatprep.subr.mxu1 %v7567_v47  ;;  %v7312_v14 = vld [vmem:[%s15922_s3 + $0x19f0] sm:$0xff]  ;;  %v7547_v47 = vld [vmem:[%s15922_s3 + $0x2148] sm:$0xff]  ;;  %v7281_v49 = vld [vmem:[%s15922_s3 + $0x18f8] sm:$0xff] }
 0x35e   : > { %4308 = vmatprep.mubr.f32.mxu1 %v12467_v53  ;;  %v3500_v51 = vpop.f32.mrf.mxu0  ;;  %4376 = vmatpush2.msra.mxu0 %v7446_v29  ;;  %v7304_v40 = vld [vmem:[%s15922_s3 + $0x19b0] sm:$0xff]  ;;  %v7301_v29 = vld [vmem:[%s15922_s3 + $0x1998] sm:$0xff] }
 0x35f   : > { %4393 = vmatpush1.msra.mxu1 %v7566_v33  ;;  %v12488_v58 = vadd.f32 %v3500_v51, %v3424_v30  ;;  %4377 = vmatprep.subr.mxu0 %v7443_v62  ;;  %v7550_v30 = vld [vmem:[%s15922_s3 + $0x2160] sm:$0xff]  ;;  %v7300_v54 = vld [vmem:[%s15922_s3 + $0x1990] sm:$0xff]  ;;  %v7543_v62 = vld [vmem:[%s15922_s3 + $0x2128] sm:$0xff] }
 0x360   : > { %4394 = vmatprep.subr.mxu1 %v7563_v8  ;;  %4378 = vmatpush2.msra.mxu0 %v7442_v38  ;;  %v7546_v33 = vld [vmem:[%s15922_s3 + $0x2140] sm:$0xff]  ;;  %v7297_v8 = vld [vmem:[%s15922_s3 + $0x1978] sm:$0xff]  ;;  %v7292_v51 = vld [vmem:[%s15922_s3 + $0x1950] sm:$0xff] }
 0x361   : > { %4395 = vmatpush1.msra.mxu1 %v7562_v0  ;;  %4380 = vmatmul.mubr.f32.vlgmr.msra.gmra.mxu0 %v12501_v2  ;;  %v7293_v38 = vld [vmem:[%s15922_s3 + $0x1958] sm:$0xff]  ;;  %v7538_v0 = vld [vmem:[%s15922_s3 + $0x2100] sm:$0xff] }
 0x362   : > { %4309 = vmatmul.mubr.f32.gmra.mxu1 %v12498_v50  ;;  %4396 = vmatprep.subr.mxu1 %v7559_v26  ;;  %v7534_v26 = vld [vmem:[%s15922_s3 + $0x20e0] sm:$0xff] }
 0x363   : > { %4469 = vmatprep.subr.mxu0 %v7313_v37  ;;  %4385 = vmatprep.mubr.f32.mxu0 %v12515_v13  ;;  %v7288_v37 = vld [vmem:[%s15922_s3 + $0x1930] sm:$0xff] }
 0x364   : > { %4397 = vmatpush1.msra.mxu1 %v7558_v39  ;;  %4456 = vmatprep.mubr.f32.mxu1 %v12528_v10  ;;  %v7531_v39 = vld [vmem:[%s15922_s3 + $0x20c8] sm:$0xff] }
 0x365   : > { %4470 = vmatpush1.msra.mxu0 %v7312_v14  ;;  %4398 = vmatprep.subr.mxu1 %v7555_v5  ;;  %v7530_v14 = vld [vmem:[%s15922_s3 + $0x20c0] sm:$0xff]  ;;  %v7284_v5 = vld [vmem:[%s15922_s3 + $0x1910] sm:$0xff] }
 0x366   : > { %4471 = vmatprep.subr.mxu0 %v7309_v18  ;;  %4399 = vmatpush1.msra.mxu1 %v7554_v32  ;;  %v7527_v18 = vld [vmem:[%s15922_s3 + $0x20a8] sm:$0xff]  ;;  %v7526_v32 = vld [vmem:[%s15922_s3 + $0x20a0] sm:$0xff] }
 0x367   : > { %4472 = vmatpush1.msra.mxu0 %v7308_v63  ;;  %4400 = vmatprep.subr.mxu1 %v7551_v59  ;;  %v7280_v63 = vld [vmem:[%s15922_s3 + $0x18f0] sm:$0xff]  ;;  %v7523_v59 = vld [vmem:[%s15922_s3 + $0x2088] sm:$0xff] }
 0x368   : > { %4386 = vmatmul.mubr.f32.gmra.mxu0 %v12547_v20  ;;  %4473 = vmatprep.subr.mxu0 %v7305_v1  ;;  %v7277_v1 = vld [vmem:[%s15922_s3 + $0x18d8] sm:$0xff] }
 0x369   : > { %4401 = vmatpush1.msra.mxu1 %v7550_v30  ;;  %4474 = vmatpush1.msra.mxu0 %v7304_v40  ;;  %v7522_v30 = vld [vmem:[%s15922_s3 + $0x2080] sm:$0xff]  ;;  %v7276_v40 = vld [vmem:[%s15922_s3 + $0x18d0] sm:$0xff] }
 0x36a   : > { %4533 = vmatprep.mubr.f32.mxu0 %v12083_v60  ;;  %4402 = vmatprep.subr.mxu1 %v7547_v47  ;;  %v7539_v60 = vld [vmem:[%s15922_s3 + $0x2108] sm:$0xff] }
 0x36b   : > { %4475 = vmatprep.subr.mxu0 %v7301_v29  ;;  %4403 = vmatpush1.msra.mxu1 %v7546_v33  ;;  %v7519_v47 = vld [vmem:[%s15922_s3 + $0x2068] sm:$0xff]  ;;  %v7273_v29 = vld [vmem:[%s15922_s3 + $0x18b8] sm:$0xff]  ;;  %v7518_v33 = vld [vmem:[%s15922_s3 + $0x2060] sm:$0xff] }
 0x36c   : > { %4476 = vmatpush1.msra.mxu0 %v7300_v54  ;;  %4404 = vmatprep.subr.mxu1 %v7543_v62  ;;  %v7272_v54 = vld [vmem:[%s15922_s3 + $0x18b0] sm:$0xff]  ;;  %v7515_v62 = vld [vmem:[%s15922_s3 + $0x2048] sm:$0xff] }
 0x36d   : > { %4477 = vmatprep.subr.mxu0 %v7297_v8  ;;  %4405 = vmatpush1.msra.mxu1 %v7542_v25  ;;  %v7269_v8 = vld [vmem:[%s15922_s3 + $0x1898] sm:$0xff]  ;;  %v7514_v25 = vld [vmem:[%s15922_s3 + $0x2040] sm:$0xff] }
 0x36e   : > { %4478 = vmatpush1.msra.mxu0 %v7296_v57  ;;  %4406 = vmatprep.subr.mxu1 %v7539_v60  ;;  %v7268_v57 = vld [vmem:[%s15922_s3 + $0x1890] sm:$0xff]  ;;  %v7511_v60 = vld [vmem:[%s15922_s3 + $0x2028] sm:$0xff] }
 0x36f   : > { %4479 = vmatprep.subr.mxu0 %v7293_v38  ;;  %4407 = vmatpush1.msra.mxu1 %v7538_v0  ;;  %v7265_v38 = vld [vmem:[%s15922_s3 + $0x1878] sm:$0xff]  ;;  %v7510_v0 = vld [vmem:[%s15922_s3 + $0x2020] sm:$0xff] }
 0x370   : > { %4480 = vmatpush1.msra.mxu0 %v7292_v51  ;;  %4408 = vmatprep.subr.mxu1 %v7535_v35  ;;  %v7264_v51 = vld [vmem:[%s15922_s3 + $0x1870] sm:$0xff]  ;;  %v7507_v35 = vld [vmem:[%s15922_s3 + $0x2008] sm:$0xff] }
 0x371   : > { %4481 = vmatprep.subr.mxu0 %v7289_v15  ;;  %4409 = vmatpush1.msra.mxu1 %v7534_v26  ;;  %v7261_v15 = vld [vmem:[%s15922_s3 + $0x1858] sm:$0xff]  ;;  %v7506_v26 = vld [vmem:[%s15922_s3 + $0x2000] sm:$0xff] }
 0x372   : > { %4482 = vmatpush1.msra.mxu0 %v7288_v37  ;;  %4410 = vmatprep.subr.mxu1 %v7531_v39  ;;  %v7260_v37 = vld [vmem:[%s15922_s3 + $0x1850] sm:$0xff]  ;;  %v7631_v39 = vld [vmem:[%s15922_s3 + $0x23e8] sm:$0xff] }
 0x373   : > { %4483 = vmatprep.subr.mxu0 %v7285_v48  ;;  %4411 = vmatpush1.msra.mxu1 %v7530_v14  ;;  %v7257_v48 = vld [vmem:[%s15922_s3 + $0x1838] sm:$0xff]  ;;  %v7630_v14 = vld [vmem:[%s15922_s3 + $0x23e0] sm:$0xff] }
 0x374   : > { %4484 = vmatpush1.msra.mxu0 %v7284_v5  ;;  %4412 = vmatprep.subr.mxu1 %v7527_v18  ;;  %v7256_v5 = vld [vmem:[%s15922_s3 + $0x1830] sm:$0xff]  ;;  %v7627_v18 = vld [vmem:[%s15922_s3 + $0x23c8] sm:$0xff] }
 0x375   : > { %4485 = vmatprep.subr.mxu0 %v7281_v49  ;;  %4413 = vmatpush1.msra.mxu1 %v7526_v32  ;;  %v7253_v49 = vld [vmem:[%s15922_s3 + $0x1818] sm:$0xff]  ;;  %v7626_v32 = vld [vmem:[%s15922_s3 + $0x23c0] sm:$0xff] }
 0x376   : > { %4486 = vmatpush1.msra.mxu0 %v7280_v63  ;;  %4414 = vmatprep.subr.mxu1 %v7523_v59  ;;  %v7252_v63 = vld [vmem:[%s15922_s3 + $0x1810] sm:$0xff]  ;;  %v7623_v59 = vld [vmem:[%s15922_s3 + $0x23a8] sm:$0xff] }
 0x377   : > { %4487 = vmatprep.subr.mxu0 %v7277_v1  ;;  %4415 = vmatpush1.msra.mxu1 %v7522_v30  ;;  %v7377_v1 = vld [vmem:[%s15922_s3 + $0x1bf8] sm:$0xff]  ;;  %v7622_v30 = vld [vmem:[%s15922_s3 + $0x23a0] sm:$0xff] }
 0x378   : > { %4488 = vmatpush1.msra.mxu0 %v7276_v40  ;;  %4416 = vmatprep.subr.mxu1 %v7519_v47  ;;  %v7376_v40 = vld [vmem:[%s15922_s3 + $0x1bf0] sm:$0xff]  ;;  %v7619_v47 = vld [vmem:[%s15922_s3 + $0x2388] sm:$0xff] }
 0x379   : > { %4489 = vmatprep.subr.mxu0 %v7273_v29  ;;  %4417 = vmatpush1.msra.mxu1 %v7518_v33  ;;  %v7373_v29 = vld [vmem:[%s15922_s3 + $0x1bd8] sm:$0xff]  ;;  %v7618_v33 = vld [vmem:[%s15922_s3 + $0x2380] sm:$0xff] }
 0x37a   : > { %4490 = vmatpush1.msra.mxu0 %v7272_v54  ;;  %4418 = vmatprep.subr.mxu1 %v7515_v62  ;;  %v7372_v54 = vld [vmem:[%s15922_s3 + $0x1bd0] sm:$0xff]  ;;  %v7615_v62 = vld [vmem:[%s15922_s3 + $0x2368] sm:$0xff] }
 0x37b   : > { %4491 = vmatprep.subr.mxu0 %v7269_v8  ;;  %4419 = vmatpush1.msra.mxu1 %v7514_v25  ;;  %v7369_v8 = vld [vmem:[%s15922_s3 + $0x1bb8] sm:$0xff]  ;;  %v7614_v25 = vld [vmem:[%s15922_s3 + $0x2360] sm:$0xff] }
 0x37c   : > { %4492 = vmatpush1.msra.mxu0 %v7268_v57  ;;  %4420 = vmatprep.subr.mxu1 %v7511_v60  ;;  %v7368_v57 = vld [vmem:[%s15922_s3 + $0x1bb0] sm:$0xff]  ;;  %v7611_v60 = vld [vmem:[%s15922_s3 + $0x2348] sm:$0xff] }
 0x37d   : > { %4493 = vmatprep.subr.mxu0 %v7265_v38  ;;  %4421 = vmatpush1.msra.mxu1 %v7510_v0  ;;  %v7365_v38 = vld [vmem:[%s15922_s3 + $0x1b98] sm:$0xff]  ;;  %v7610_v0 = vld [vmem:[%s15922_s3 + $0x2340] sm:$0xff] }
 0x37e   : > { %4494 = vmatpush1.msra.mxu0 %v7264_v51  ;;  %4422 = vmatprep.subr.mxu1 %v7507_v35  ;;  %v7364_v51 = vld [vmem:[%s15922_s3 + $0x1b90] sm:$0xff]  ;;  %v7607_v35 = vld [vmem:[%s15922_s3 + $0x2328] sm:$0xff] }
 0x37f   : > { %4495 = vmatprep.subr.mxu0 %v7261_v15  ;;  %4423 = vmatpush1.msra.mxu1 %v7506_v26  ;;  %v7361_v15 = vld [vmem:[%s15922_s3 + $0x1b78] sm:$0xff]  ;;  %v7606_v26 = vld [vmem:[%s15922_s3 + $0x2320] sm:$0xff] }
 0x380   : > { %4496 = vmatpush1.msra.mxu0 %v7260_v37  ;;  %4424 = vmatprep.subr.mxu1 %v7631_v39  ;;  %v7360_v37 = vld [vmem:[%s15922_s3 + $0x1b70] sm:$0xff]  ;;  %v7603_v39 = vld [vmem:[%s15922_s3 + $0x2308] sm:$0xff] }
 0x381   : > { %4497 = vmatprep.subr.mxu0 %v7257_v48  ;;  %4425 = vmatpush2.msra.mxu1 %v7630_v14  ;;  %v7357_v48 = vld [vmem:[%s15922_s3 + $0x1b58] sm:$0xff]  ;;  %v7602_v14 = vld [vmem:[%s15922_s3 + $0x2300] sm:$0xff] }
 0x382   : > { %4498 = vmatpush1.msra.mxu0 %v7256_v5  ;;  %4426 = vmatprep.subr.mxu1 %v7627_v18  ;;  %v7356_v5 = vld [vmem:[%s15922_s3 + $0x1b50] sm:$0xff]  ;;  %v7599_v18 = vld [vmem:[%s15922_s3 + $0x22e8] sm:$0xff] }
 0x383   : > { %4499 = vmatprep.subr.mxu0 %v7253_v49  ;;  %4427 = vmatpush2.msra.mxu1 %v7626_v32  ;;  %v7353_v49 = vld [vmem:[%s15922_s3 + $0x1b38] sm:$0xff]  ;;  %v7598_v32 = vld [vmem:[%s15922_s3 + $0x22e0] sm:$0xff] }
 0x384   : > { %4500 = vmatpush1.msra.mxu0 %v7252_v63  ;;  %4428 = vmatprep.subr.mxu1 %v7623_v59  ;;  %v7352_v63 = vld [vmem:[%s15922_s3 + $0x1b30] sm:$0xff]  ;;  %v7595_v59 = vld [vmem:[%s15922_s3 + $0x22c8] sm:$0xff] }
 0x385   : > { %4501 = vmatprep.subr.mxu0 %v7377_v1  ;;  %4429 = vmatpush2.msra.mxu1 %v7622_v30  ;;  %v7349_v1 = vld [vmem:[%s15922_s3 + $0x1b18] sm:$0xff]  ;;  %v7594_v30 = vld [vmem:[%s15922_s3 + $0x22c0] sm:$0xff] }
 0x386   : > { %4502 = vmatpush2.msra.mxu0 %v7376_v40  ;;  %4430 = vmatprep.subr.mxu1 %v7619_v47  ;;  %v7348_v40 = vld [vmem:[%s15922_s3 + $0x1b10] sm:$0xff]  ;;  %v7591_v47 = vld [vmem:[%s15922_s3 + $0x22a8] sm:$0xff] }
 0x387   : > { %4503 = vmatprep.subr.mxu0 %v7373_v29  ;;  %4431 = vmatpush2.msra.mxu1 %v7618_v33  ;;  %v7345_v29 = vld [vmem:[%s15922_s3 + $0x1af8] sm:$0xff]  ;;  %v7590_v33 = vld [vmem:[%s15922_s3 + $0x22a0] sm:$0xff] }
 0x388   : > { %4504 = vmatpush2.msra.mxu0 %v7372_v54  ;;  %4432 = vmatprep.subr.mxu1 %v7615_v62  ;;  %v7344_v54 = vld [vmem:[%s15922_s3 + $0x1af0] sm:$0xff]  ;;  %v7587_v62 = vld [vmem:[%s15922_s3 + $0x2288] sm:$0xff] }
 0x389   : > { %4505 = vmatprep.subr.mxu0 %v7369_v8  ;;  %4433 = vmatpush2.msra.mxu1 %v7614_v25  ;;  %v7341_v8 = vld [vmem:[%s15922_s3 + $0x1ad8] sm:$0xff]  ;;  %v7586_v25 = vld [vmem:[%s15922_s3 + $0x2280] sm:$0xff] }
 0x38a   : > { %4506 = vmatpush2.msra.mxu0 %v7368_v57  ;;  %4434 = vmatprep.subr.mxu1 %v7611_v60  ;;  %v7340_v57 = vld [vmem:[%s15922_s3 + $0x1ad0] sm:$0xff] }
 0x38b   : > { %4507 = vmatprep.subr.mxu0 %v7365_v38  ;;  %4435 = vmatpush2.msra.mxu1 %v7610_v0  ;;  %v7583_v38 = vld [vmem:[%s15922_s3 + $0x2268] sm:$0xff]  ;;  %v7337_v0 = vld [vmem:[%s15922_s3 + $0x1ab8] sm:$0xff] }
 0x38c   : > { %4508 = vmatpush2.msra.mxu0 %v7364_v51  ;;  %4436 = vmatprep.subr.mxu1 %v7607_v35  ;;  %v7582_v35 = vld [vmem:[%s15922_s3 + $0x2260] sm:$0xff] }
 0x38d   : > { %4509 = vmatprep.subr.mxu0 %v7361_v15  ;;  %4437 = vmatpush2.msra.mxu1 %v7606_v26  ;;  %v7336_v15 = vld [vmem:[%s15922_s3 + $0x1ab0] sm:$0xff] }
 0x38e   : > { %4510 = vmatpush2.msra.mxu0 %v7360_v37  ;;  %4438 = vmatprep.subr.mxu1 %v7603_v39  ;;  %v7579_v37 = vld [vmem:[%s15922_s3 + $0x2248] sm:$0xff] }
 0x38f   : > { %4511 = vmatprep.subr.mxu0 %v7357_v48  ;;  %4439 = vmatpush2.msra.mxu1 %v7602_v14  ;;  %v7578_v48 = vld [vmem:[%s15922_s3 + $0x2240] sm:$0xff]  ;;  %v7332_v14 = vld [vmem:[%s15922_s3 + $0x1a90] sm:$0xff] }
 0x390   : > { %4512 = vmatpush2.msra.mxu0 %v7356_v5  ;;  %4440 = vmatprep.subr.mxu1 %v7599_v18  ;;  %v7575_v5 = vld [vmem:[%s15922_s3 + $0x2228] sm:$0xff] }
 0x391   : > { %4513 = vmatprep.subr.mxu0 %v7353_v49  ;;  %4441 = vmatpush2.msra.mxu1 %v7598_v32  ;;  %v7574_v32 = vld [vmem:[%s15922_s3 + $0x2220] sm:$0xff] }
 0x392   : > { %4514 = vmatpush2.msra.mxu0 %v7352_v63  ;;  %4442 = vmatprep.subr.mxu1 %v7595_v59  ;;  %v7328_v63 = vld [vmem:[%s15922_s3 + $0x1a70] sm:$0xff] }
 0x393   : > { %4515 = vmatprep.subr.mxu0 %v7349_v1  ;;  %4443 = vmatpush2.msra.mxu1 %v7594_v30  ;;  %v7571_v30 = vld [vmem:[%s15922_s3 + $0x2208] sm:$0xff] }
 0x394   : > { %4516 = vmatpush2.msra.mxu0 %v7348_v40  ;;  %4444 = vmatprep.subr.mxu1 %v7591_v47  ;;  %v3569_v60 = vpop.f32.mrf.mxu1  ;;  %v7325_v40 = vld [vmem:[%s15922_s3 + $0x1a58] sm:$0xff]  ;;  %v4209_v47 = vrot.slane %v10370_v9, 4 }
 0x395   : > { %4517 = vmatprep.subr.mxu0 %v7345_v29  ;;  %4445 = vmatpush2.msra.mxu1 %v7590_v33  ;;  %v12837_v51 = vadd.f32 %v3569_v60, %v12428_v22  ;;  %v7333_v22 = vld [vmem:[%s15922_s3 + $0x1a98] sm:$0xff]  ;;  %v7320_v60 = vld [vmem:[%s15922_s3 + $0x1a30] sm:$0xff] }
 0x396   : > { %4518 = vmatpush2.msra.mxu0 %v7344_v54  ;;  %4446 = vmatprep.subr.mxu1 %v7587_v62  ;;  %v3571_v26 = vpop.f32.mrf.mxu1 }
 0x397   : > { %4519 = vmatprep.subr.mxu0 %v7341_v8  ;;  %4447 = vmatpush2.msra.mxu1 %v7586_v25  ;;  %v12852_v39 = vadd.f32 %v3571_v26, %v12445_v17  ;;  %v7329_v17 = vld [vmem:[%s15922_s3 + $0x1a78] sm:$0xff]  ;;  %v4208_v8 = vrot.slane %v10385_v41, 4 }
 0x398   : > { %4520 = vmatpush2.msra.mxu0 %v7340_v57  ;;  %4448 = vmatprep.subr.mxu1 %v7583_v38  ;;  %v7321_v25 = vld [vmem:[%s15922_s3 + $0x1a38] sm:$0xff]  ;;  %v7440_v38 = vld [vmem:[%s15922_s3 + $0x1df0] sm:$0xff] }
 0x399   : > { %4521 = vmatprep.subr.mxu0 %v7337_v0  ;;  %4449 = vmatpush2.msra.mxu1 %v7582_v35  ;;  %v3646_v49 = vpop.f32.mrf.mxu0  ;;  %v7441_v57 = vld [vmem:[%s15922_s3 + $0x1df8] sm:$0xff] }
 0x39a   : > { %4522 = vmatpush2.msra.mxu0 %v7336_v15  ;;  %v3575_v18 = vpop.f32.mrf.mxu1  ;;  %4450 = vmatprep.subr.mxu1 %v7579_v37  ;;  %v12876_v1 = vadd.f32 %v3646_v49, %v12011_v7  ;;  %v7570_v7 = vld [vmem:[%s15922_s3 + $0x2200] sm:$0xff]  ;;  %v7317_v15 = vld [vmem:[%s15922_s3 + $0x1a18] sm:$0xff]  ;;  %v7568_v49 = vld [vmem:[%s15922_s3 + $0x21f0] sm:$0xff] }
 0x39b   : > { %4523 = vmatprep.subr.mxu0 %v7333_v22  ;;  %v12873_v59 = vadd.f32 %v3575_v18, %v12477_v24  ;;  %4451 = vmatpush2.msra.mxu1 %v7578_v48  ;;  %v3648_v33 = vpop.f32.mrf.mxu0  ;;  %v7324_v24 = vld [vmem:[%s15922_s3 + $0x1a50] sm:$0xff]  ;;  %v7437_v26 = vld [vmem:[%s15922_s3 + $0x1dd8] sm:$0xff] }
 0x39c   : > { %4524 = vmatpush2.msra.mxu0 %v7332_v14  ;;  %v3577_v29 = vpop.f32.mrf.mxu1  ;;  %4452 = vmatprep.subr.mxu1 %v7575_v5  ;;  %v12895_v62 = vadd.f32 %v3648_v33, %v12025_v56  ;;  %v12906_v56 = vsel %vm297_vm0, %v4208_v8, %v4209_v47  ;;  %v7316_v22 = vld [vmem:[%s15922_s3 + $0x1a10] sm:$0xff]  ;;  %v4222_v14 = vrot.slane %v10423_v3, 4  ;;  %v7557_v33 = vld [vmem:[%s15922_s3 + $0x2198] sm:$0xff] }
 0x39d   : > { %4525 = vmatprep.subr.mxu0 %v7329_v17  ;;  %v12892_v54 = vadd.f32 %v3577_v29, %v12488_v58  ;;  %4453 = vmatpush2.msra.mxu1 %v7574_v32  ;;  %v4224_v58 = vrot.slane %v10394_v4, 4  ;;  %v7569_v17 = vld [vmem:[%s15922_s3 + $0x21f8] sm:$0xff] }
 0x39e   : > { %4526 = vmatpush2.msra.mxu0 %v7328_v63  ;;  %4454 = vmatprep.subr.mxu1 %v7571_v30  ;;  %v12947_v18 = vsel %vm297_vm0, %v4209_v47, %v4222_v14  ;;  %v7429_v32 = vld [vmem:[%s15922_s3 + $0x1d98] sm:$0xff]  ;;  %v7564_v30 = vld [vmem:[%s15922_s3 + $0x21d0] sm:$0xff] }
 0x39f   : > { %4527 = vmatprep.subr.mxu0 %v7325_v40  ;;  %4455 = vmatpush2.msra.mxu1 %v7570_v7  ;;  %v12918_v35 = vsel %vm297_vm0, %v4212_v19, %v4224_v58  ;;  %v7436_v19 = vld [vmem:[%s15922_s3 + $0x1dd0] sm:$0xff]  ;;  %v7565_v63 = vld [vmem:[%s15922_s3 + $0x21d8] sm:$0xff] }
 0x3a0   : > { %4528 = vmatpush2.msra.mxu0 %v7324_v24  ;;  %v3652_v0 = vpop.f32.mrf.mxu0  ;;  %4457 = vmatmul.mubr.f32.vlgmr.msra.gmra.mxu1 %v12906_v56  ;;  %v7425_v40 = vld [vmem:[%s15922_s3 + $0x1d78] sm:$0xff]  ;;  %v7424_v47 = vld [vmem:[%s15922_s3 + $0x1d70] sm:$0xff] }
 0x3a1   : > { %4529 = vmatprep.subr.mxu0 %v7321_v25  ;;  %v12927_v37 = vadd.f32 %v3652_v0, %v12046_v27  ;;  %4546 = vmatprep.subr.mxu1 %v7441_v57  ;;  %v7433_v27 = vld [vmem:[%s15922_s3 + $0x1db8] sm:$0xff]  ;;  %v7420_v7 = vld [vmem:[%s15922_s3 + $0x1d50] sm:$0xff] }
 0x3a2   : > { %4462 = vmatprep.mubr.f32.mxu1 %v12918_v35  ;;  %v3654_v48 = vpop.f32.mrf.mxu0  ;;  %4530 = vmatpush2.msra.mxu0 %v7320_v60  ;;  %v7421_v29 = vld [vmem:[%s15922_s3 + $0x1d58] sm:$0xff]  ;;  %v7556_v24 = vld [vmem:[%s15922_s3 + $0x2190] sm:$0xff] }
 0x3a3   : > { %4547 = vmatpush1.msra.mxu1 %v7440_v38  ;;  %v12938_v5 = vadd.f32 %v3654_v48, %v12055_v6  ;;  %4531 = vmatprep.subr.mxu0 %v7317_v15  ;;  %v7432_v6 = vld [vmem:[%s15922_s3 + $0x1db0] sm:$0xff]  ;;  %v7553_v8 = vld [vmem:[%s15922_s3 + $0x2178] sm:$0xff] }
 0x3a4   : > { %4548 = vmatprep.subr.mxu1 %v7437_v26  ;;  %4532 = vmatpush2.msra.mxu0 %v7316_v22  ;;  %v7416_v25 = vld [vmem:[%s15922_s3 + $0x1d30] sm:$0xff]  ;;  %v7549_v58 = vld [vmem:[%s15922_s3 + $0x2158] sm:$0xff] }
 0x3a5   : > { %4549 = vmatpush1.msra.mxu1 %v7436_v19  ;;  %4534 = vmatmul.mubr.f32.vlgmr.msra.gmra.mxu0 %v12455_v11  ;;  %v7428_v11 = vld [vmem:[%s15922_s3 + $0x1d90] sm:$0xff]  ;;  %v7409_v0 = vld [vmem:[%s15922_s3 + $0x1cf8] sm:$0xff] }
 0x3a6   : > { %4463 = vmatmul.mubr.f32.gmra.mxu1 %v12947_v18  ;;  %4550 = vmatprep.subr.mxu1 %v7433_v27  ;;  %v7552_v57 = vld [vmem:[%s15922_s3 + $0x2170] sm:$0xff]  ;;  %v7545_v15 = vld [vmem:[%s15922_s3 + $0x2138] sm:$0xff] }
 0x3a7   : > { %4623 = vmatprep.subr.mxu0 %v7569_v17  ;;  %4539 = vmatprep.mubr.f32.mxu0 %v12467_v53  ;;  %v7561_v53 = vld [vmem:[%s15922_s3 + $0x21b8] sm:$0xff]  ;;  %v7412_v60 = vld [vmem:[%s15922_s3 + $0x1d10] sm:$0xff] }
 0x3a8   : > { %4551 = vmatpush1.msra.mxu1 %v7432_v6  ;;  %4610 = vmatprep.mubr.f32.mxu1 %v12116_v23  ;;  %v7560_v23 = vld [vmem:[%s15922_s3 + $0x21b0] sm:$0xff]  ;;  %v7405_v19 = vld [vmem:[%s15922_s3 + $0x1cd8] sm:$0xff] }
 0x3a9   : > { %4624 = vmatpush1.msra.mxu0 %v7568_v49  ;;  %4552 = vmatprep.subr.mxu1 %v7429_v32  ;;  %v7548_v38 = vld [vmem:[%s15922_s3 + $0x2150] sm:$0xff]  ;;  %v7541_v48 = vld [vmem:[%s15922_s3 + $0x2118] sm:$0xff] }
 0x3aa   : > { %4625 = vmatprep.subr.mxu0 %v7565_v63  ;;  %4553 = vmatpush1.msra.mxu1 %v7428_v11  ;;  %v7408_v26 = vld [vmem:[%s15922_s3 + $0x1cf0] sm:$0xff]  ;;  %v7401_v17 = vld [vmem:[%s15922_s3 + $0x1cb8] sm:$0xff] }
 0x3ab   : > { %4626 = vmatpush1.msra.mxu0 %v7564_v30  ;;  %4554 = vmatprep.subr.mxu1 %v7425_v40  ;;  %v7544_v22 = vld [vmem:[%s15922_s3 + $0x2130] sm:$0xff]  ;;  %v7537_v6 = vld [vmem:[%s15922_s3 + $0x20f8] sm:$0xff] }
 0x3ac   : > { %4540 = vmatmul.mubr.f32.gmra.mxu0 %v12498_v50  ;;  %4627 = vmatprep.subr.mxu0 %v7561_v53  ;;  %v7417_v50 = vld [vmem:[%s15922_s3 + $0x1d38] sm:$0xff]  ;;  %v7404_v14 = vld [vmem:[%s15922_s3 + $0x1cd0] sm:$0xff] }
 0x3ad   : > { %4555 = vmatpush1.msra.mxu1 %v7424_v47  ;;  %4628 = vmatpush1.msra.mxu0 %v7560_v23  ;;  %v7540_v27 = vld [vmem:[%s15922_s3 + $0x2110] sm:$0xff]  ;;  %v7397_v63 = vld [vmem:[%s15922_s3 + $0x1c98] sm:$0xff] }
 0x3ae   : > { %4687 = vmatprep.mubr.f32.mxu0 %v12528_v10  ;;  %4556 = vmatprep.subr.mxu1 %v7421_v29  ;;  %v7413_v10 = vld [vmem:[%s15922_s3 + $0x1d18] sm:$0xff]  ;;  %v7400_v49 = vld [vmem:[%s15922_s3 + $0x1cb0] sm:$0xff] }
 0x3af   : > { %4629 = vmatprep.subr.mxu0 %v7557_v33  ;;  %4557 = vmatpush1.msra.mxu1 %v7420_v7  ;;  %v7536_v32 = vld [vmem:[%s15922_s3 + $0x20f0] sm:$0xff]  ;;  %v7533_v11 = vld [vmem:[%s15922_s3 + $0x20d8] sm:$0xff] }
 0x3b0   : > { %4630 = vmatpush1.msra.mxu0 %v7556_v24  ;;  %4558 = vmatprep.subr.mxu1 %v7417_v50  ;;  %v7396_v30 = vld [vmem:[%s15922_s3 + $0x1c90] sm:$0xff]  ;;  %v7393_v53 = vld [vmem:[%s15922_s3 + $0x1c78] sm:$0xff] }
 0x3b1   : > { %4631 = vmatprep.subr.mxu0 %v7553_v8  ;;  %4559 = vmatpush1.msra.mxu1 %v7416_v25  ;;  %v7532_v40 = vld [vmem:[%s15922_s3 + $0x20d0] sm:$0xff]  ;;  %v7529_v47 = vld [vmem:[%s15922_s3 + $0x20b8] sm:$0xff] }
 0x3b2   : > { %4632 = vmatpush1.msra.mxu0 %v7552_v57  ;;  %4560 = vmatprep.subr.mxu1 %v7413_v10  ;;  %v7392_v23 = vld [vmem:[%s15922_s3 + $0x1c70] sm:$0xff]  ;;  %v7389_v33 = vld [vmem:[%s15922_s3 + $0x1c58] sm:$0xff] }
 0x3b3   : > { %4633 = vmatprep.subr.mxu0 %v7549_v58  ;;  %4561 = vmatpush1.msra.mxu1 %v7412_v60  ;;  %v7528_v29 = vld [vmem:[%s15922_s3 + $0x20b0] sm:$0xff]  ;;  %v7525_v7 = vld [vmem:[%s15922_s3 + $0x2098] sm:$0xff] }
 0x3b4   : > { %4634 = vmatpush1.msra.mxu0 %v7548_v38  ;;  %4562 = vmatprep.subr.mxu1 %v7409_v0  ;;  %v7388_v24 = vld [vmem:[%s15922_s3 + $0x1c50] sm:$0xff]  ;;  %v7385_v8 = vld [vmem:[%s15922_s3 + $0x1c38] sm:$0xff] }
 0x3b5   : > { %4635 = vmatprep.subr.mxu0 %v7545_v15  ;;  %4563 = vmatpush1.msra.mxu1 %v7408_v26  ;;  %v7524_v50 = vld [vmem:[%s15922_s3 + $0x2090] sm:$0xff]  ;;  %v7521_v25 = vld [vmem:[%s15922_s3 + $0x2078] sm:$0xff] }
 0x3b6   : > { %4636 = vmatpush1.msra.mxu0 %v7544_v22  ;;  %4564 = vmatprep.subr.mxu1 %v7405_v19  ;;  %v7384_v57 = vld [vmem:[%s15922_s3 + $0x1c30] sm:$0xff]  ;;  %v7381_v58 = vld [vmem:[%s15922_s3 + $0x1c18] sm:$0xff] }
 0x3b7   : > { %4637 = vmatprep.subr.mxu0 %v7541_v48  ;;  %4565 = vmatpush1.msra.mxu1 %v7404_v14  ;;  %v7520_v10 = vld [vmem:[%s15922_s3 + $0x2070] sm:$0xff]  ;;  %v7517_v60 = vld [vmem:[%s15922_s3 + $0x2058] sm:$0xff] }
 0x3b8   : > { %4638 = vmatpush1.msra.mxu0 %v7540_v27  ;;  %4566 = vmatprep.subr.mxu1 %v7401_v17  ;;  %v7380_v38 = vld [vmem:[%s15922_s3 + $0x1c10] sm:$0xff]  ;;  %v7505_v15 = vld [vmem:[%s15922_s3 + $0x1ff8] sm:$0xff] }
 0x3b9   : > { %4639 = vmatprep.subr.mxu0 %v7537_v6  ;;  %4567 = vmatpush1.msra.mxu1 %v7400_v49  ;;  %v7516_v0 = vld [vmem:[%s15922_s3 + $0x2050] sm:$0xff]  ;;  %v7513_v26 = vld [vmem:[%s15922_s3 + $0x2038] sm:$0xff] }
 0x3ba   : > { %4640 = vmatpush1.msra.mxu0 %v7536_v32  ;;  %4568 = vmatprep.subr.mxu1 %v7397_v63  ;;  %v7504_v22 = vld [vmem:[%s15922_s3 + $0x1ff0] sm:$0xff]  ;;  %v7501_v48 = vld [vmem:[%s15922_s3 + $0x1fd8] sm:$0xff] }
 0x3bb   : > { %4641 = vmatprep.subr.mxu0 %v7533_v11  ;;  %4569 = vmatpush1.msra.mxu1 %v7396_v30  ;;  %v7512_v19 = vld [vmem:[%s15922_s3 + $0x2030] sm:$0xff]  ;;  %v7509_v14 = vld [vmem:[%s15922_s3 + $0x2018] sm:$0xff] }
 0x3bc   : > { %4642 = vmatpush1.msra.mxu0 %v7532_v40  ;;  %4570 = vmatprep.subr.mxu1 %v7393_v53  ;;  %v7500_v27 = vld [vmem:[%s15922_s3 + $0x1fd0] sm:$0xff]  ;;  %v7497_v6 = vld [vmem:[%s15922_s3 + $0x1fb8] sm:$0xff] }
 0x3bd   : > { %4643 = vmatprep.subr.mxu0 %v7529_v47  ;;  %4571 = vmatpush1.msra.mxu1 %v7392_v23  ;;  %v7508_v17 = vld [vmem:[%s15922_s3 + $0x2010] sm:$0xff]  ;;  %v7633_v49 = vld [vmem:[%s15922_s3 + $0x23f8] sm:$0xff] }
 0x3be   : > { %4644 = vmatpush1.msra.mxu0 %v7528_v29  ;;  %4572 = vmatprep.subr.mxu1 %v7389_v33  ;;  %v7496_v32 = vld [vmem:[%s15922_s3 + $0x1fb0] sm:$0xff]  ;;  %v7493_v11 = vld [vmem:[%s15922_s3 + $0x1f98] sm:$0xff] }
 0x3bf   : > { %4645 = vmatprep.subr.mxu0 %v7525_v7  ;;  %4573 = vmatpush1.msra.mxu1 %v7388_v24  ;;  %v7632_v63 = vld [vmem:[%s15922_s3 + $0x23f0] sm:$0xff]  ;;  %v7629_v30 = vld [vmem:[%s15922_s3 + $0x23d8] sm:$0xff] }
 0x3c0   : > { %4646 = vmatpush1.msra.mxu0 %v7524_v50  ;;  %4574 = vmatprep.subr.mxu1 %v7385_v8  ;;  %v7492_v40 = vld [vmem:[%s15922_s3 + $0x1f90] sm:$0xff]  ;;  %v7489_v47 = vld [vmem:[%s15922_s3 + $0x1f78] sm:$0xff] }
 0x3c1   : > { %4647 = vmatprep.subr.mxu0 %v7521_v25  ;;  %4575 = vmatpush1.msra.mxu1 %v7384_v57  ;;  %v7628_v53 = vld [vmem:[%s15922_s3 + $0x23d0] sm:$0xff]  ;;  %v7625_v23 = vld [vmem:[%s15922_s3 + $0x23b8] sm:$0xff] }
 0x3c2   : > { %4648 = vmatpush1.msra.mxu0 %v7520_v10  ;;  %4576 = vmatprep.subr.mxu1 %v7381_v58  ;;  %v7488_v29 = vld [vmem:[%s15922_s3 + $0x1f70] sm:$0xff]  ;;  %v7485_v7 = vld [vmem:[%s15922_s3 + $0x1f58] sm:$0xff] }
 0x3c3   : > { %4649 = vmatprep.subr.mxu0 %v7517_v60  ;;  %4577 = vmatpush1.msra.mxu1 %v7380_v38  ;;  %v7624_v33 = vld [vmem:[%s15922_s3 + $0x23b0] sm:$0xff]  ;;  %v7621_v24 = vld [vmem:[%s15922_s3 + $0x2398] sm:$0xff] }
 0x3c4   : > { %4650 = vmatpush1.msra.mxu0 %v7516_v0  ;;  %4578 = vmatprep.subr.mxu1 %v7505_v15  ;;  %v7484_v50 = vld [vmem:[%s15922_s3 + $0x1f50] sm:$0xff]  ;;  %v7481_v25 = vld [vmem:[%s15922_s3 + $0x1f38] sm:$0xff] }
 0x3c5   : > { %4651 = vmatprep.subr.mxu0 %v7513_v26  ;;  %4579 = vmatpush2.msra.mxu1 %v7504_v22  ;;  %v7620_v8 = vld [vmem:[%s15922_s3 + $0x2390] sm:$0xff]  ;;  %v7617_v57 = vld [vmem:[%s15922_s3 + $0x2378] sm:$0xff] }
 0x3c6   : > { %4652 = vmatpush1.msra.mxu0 %v7512_v19  ;;  %4580 = vmatprep.subr.mxu1 %v7501_v48  ;;  %v7480_v10 = vld [vmem:[%s15922_s3 + $0x1f30] sm:$0xff]  ;;  %v7477_v60 = vld [vmem:[%s15922_s3 + $0x1f18] sm:$0xff] }
 0x3c7   : > { %4653 = vmatprep.subr.mxu0 %v7509_v14  ;;  %4581 = vmatpush2.msra.mxu1 %v7500_v27  ;;  %v7616_v58 = vld [vmem:[%s15922_s3 + $0x2370] sm:$0xff]  ;;  %v7613_v38 = vld [vmem:[%s15922_s3 + $0x2358] sm:$0xff] }
 0x3c8   : > { %4654 = vmatpush1.msra.mxu0 %v7508_v17  ;;  %4582 = vmatprep.subr.mxu1 %v7497_v6  ;;  %v7476_v0 = vld [vmem:[%s15922_s3 + $0x1f10] sm:$0xff]  ;;  %v7473_v26 = vld [vmem:[%s15922_s3 + $0x1ef8] sm:$0xff] }
 0x3c9   : > { %4655 = vmatprep.subr.mxu0 %v7633_v49  ;;  %4583 = vmatpush2.msra.mxu1 %v7496_v32  ;;  %v7612_v15 = vld [vmem:[%s15922_s3 + $0x2350] sm:$0xff]  ;;  %v7609_v22 = vld [vmem:[%s15922_s3 + $0x2338] sm:$0xff] }
 0x3ca   : > { %4656 = vmatpush2.msra.mxu0 %v7632_v63  ;;  %4584 = vmatprep.subr.mxu1 %v7493_v11  ;;  %v7472_v19 = vld [vmem:[%s15922_s3 + $0x1ef0] sm:$0xff]  ;;  %v7469_v14 = vld [vmem:[%s15922_s3 + $0x1ed8] sm:$0xff] }
 0x3cb   : > { %4657 = vmatprep.subr.mxu0 %v7629_v30  ;;  %4585 = vmatpush2.msra.mxu1 %v7492_v40  ;;  %v7608_v48 = vld [vmem:[%s15922_s3 + $0x2330] sm:$0xff]  ;;  %v7605_v27 = vld [vmem:[%s15922_s3 + $0x2318] sm:$0xff] }
 0x3cc   : > { %4658 = vmatpush2.msra.mxu0 %v7628_v53  ;;  %4586 = vmatprep.subr.mxu1 %v7489_v47  ;;  %v7468_v17 = vld [vmem:[%s15922_s3 + $0x1ed0] sm:$0xff]  ;;  %v7465_v49 = vld [vmem:[%s15922_s3 + $0x1eb8] sm:$0xff] }
 0x3cd   : > { %4659 = vmatprep.subr.mxu0 %v7625_v23  ;;  %4587 = vmatpush2.msra.mxu1 %v7488_v29  ;;  %v7604_v6 = vld [vmem:[%s15922_s3 + $0x2310] sm:$0xff]  ;;  %v7601_v32 = vld [vmem:[%s15922_s3 + $0x22f8] sm:$0xff] }
 0x3ce   : > { %4660 = vmatpush2.msra.mxu0 %v7624_v33  ;;  %4588 = vmatprep.subr.mxu1 %v7485_v7  ;;  %v7464_v63 = vld [vmem:[%s15922_s3 + $0x1eb0] sm:$0xff]  ;;  %v7461_v30 = vld [vmem:[%s15922_s3 + $0x1e98] sm:$0xff] }
 0x3cf   : > { %4661 = vmatprep.subr.mxu0 %v7621_v24  ;;  %4589 = vmatpush2.msra.mxu1 %v7484_v50  ;;  %v7600_v11 = vld [vmem:[%s15922_s3 + $0x22f0] sm:$0xff]  ;;  %v7597_v40 = vld [vmem:[%s15922_s3 + $0x22d8] sm:$0xff] }
 0x3d0   : > { %4662 = vmatpush2.msra.mxu0 %v7620_v8  ;;  %4590 = vmatprep.subr.mxu1 %v7481_v25  ;;  %v7460_v53 = vld [vmem:[%s15922_s3 + $0x1e90] sm:$0xff]  ;;  %v7457_v29 = vld [vmem:[%s15922_s3 + $0x1e78] sm:$0xff] }
 0x3d1   : > { %4663 = vmatprep.subr.mxu0 %v7617_v57  ;;  %4591 = vmatpush2.msra.mxu1 %v7480_v10  ;;  %v7596_v47 = vld [vmem:[%s15922_s3 + $0x22d0] sm:$0xff]  ;;  %v7593_v33 = vld [vmem:[%s15922_s3 + $0x22b8] sm:$0xff] }
 0x3d2   : > { %4664 = vmatpush2.msra.mxu0 %v7616_v58  ;;  %4592 = vmatprep.subr.mxu1 %v7477_v60  ;;  %v7456_v24 = vld [vmem:[%s15922_s3 + $0x1e70] sm:$0xff]  ;;  %v7453_v25 = vld [vmem:[%s15922_s3 + $0x1e58] sm:$0xff] }
 0x3d3   : > { %4665 = vmatprep.subr.mxu0 %v7613_v38  ;;  %4593 = vmatpush2.msra.mxu1 %v7476_v0  ;;  %v7592_v50 = vld [vmem:[%s15922_s3 + $0x22b0] sm:$0xff]  ;;  %v7449_v60 = vld [vmem:[%s15922_s3 + $0x1e38] sm:$0xff] }
 0x3d4   : > { %4666 = vmatpush2.msra.mxu0 %v7612_v15  ;;  %4594 = vmatprep.subr.mxu1 %v7473_v26  ;;  %v7452_v10 = vld [vmem:[%s15922_s3 + $0x1e50] sm:$0xff] }
 0x3d5   : > { %4667 = vmatprep.subr.mxu0 %v7609_v22  ;;  %4595 = vmatpush2.msra.mxu1 %v7472_v19  ;;  %v7588_v58 = vld [vmem:[%s15922_s3 + $0x2290] sm:$0xff] }
 0x3d6   : > { %4668 = vmatpush2.msra.mxu0 %v7608_v48  ;;  %4596 = vmatprep.subr.mxu1 %v7469_v14  ;;  %v7448_v15 = vld [vmem:[%s15922_s3 + $0x1e30] sm:$0xff]  ;;  %v7445_v48 = vld [vmem:[%s15922_s3 + $0x1e18] sm:$0xff] }
 0x3d7   : > { %4669 = vmatprep.subr.mxu0 %v7605_v27  ;;  %4597 = vmatpush2.msra.mxu1 %v7468_v17  ;;  %v7584_v26 = vld [vmem:[%s15922_s3 + $0x2270] sm:$0xff]  ;;  %v7581_v14 = vld [vmem:[%s15922_s3 + $0x2258] sm:$0xff] }
 0x3d8   : > { %4670 = vmatpush2.msra.mxu0 %v7604_v6  ;;  %4598 = vmatprep.subr.mxu1 %v7465_v49  ;;  %v3723_v23 = vpop.f32.mrf.mxu1  ;;  %v7580_v6 = vld [vmem:[%s15922_s3 + $0x2250] sm:$0xff] }
 0x3d9   : > { %4671 = vmatprep.subr.mxu0 %v7601_v32  ;;  %4599 = vmatpush2.msra.mxu1 %v7464_v63  ;;  %v3724_v7 = vadd.f32 %v3723_v23, %v12876_v1  ;;  %v7589_v1 = vld [vmem:[%s15922_s3 + $0x2298] sm:$0xff] }
 0x3da   : > { %4672 = vmatpush2.msra.mxu0 %v7600_v11  ;;  %4600 = vmatprep.subr.mxu1 %v7461_v30  ;;  %v3725_v8 = vpop.f32.mrf.mxu1  ;;  %v7577_v63 = vld [vmem:[%s15922_s3 + $0x2238] sm:$0xff]  ;;  %v7695_v11 = vld [vmem:[%s15922_s3 + $0x25e8] sm:$0xff]  ;;  %v7694_v30 = vld [vmem:[%s15922_s3 + $0x25e0] sm:$0xff] }
 0x3db   : > { %4673 = vmatprep.subr.mxu0 %v7597_v40  ;;  %4601 = vmatpush2.msra.mxu1 %v7460_v53  ;;  %v3726_v57 = vadd.f32 %v3725_v8, %v12895_v62  ;;  %v7585_v62 = vld [vmem:[%s15922_s3 + $0x2278] sm:$0xff]  ;;  %v7686_v8 = vld [vmem:[%s15922_s3 + $0x25a0] sm:$0xff] }
 0x3dc   : > { %4674 = vmatpush2.msra.mxu0 %v7596_v47  ;;  %4602 = vmatprep.subr.mxu1 %v7457_v29  ;;  %v7573_v53 = vld [vmem:[%s15922_s3 + $0x2218] sm:$0xff]  ;;  %v7691_v47 = vld [vmem:[%s15922_s3 + $0x25c8] sm:$0xff]  ;;  %v7572_v29 = vld [vmem:[%s15922_s3 + $0x2210] sm:$0xff] }
 0x3dd   : > { %4675 = vmatprep.subr.mxu0 %v7593_v33  ;;  %4603 = vmatpush2.msra.mxu1 %v7456_v24  ;;  %v3800_v0 = vpop.f32.mrf.mxu0  ;;  %v7687_v24 = vld [vmem:[%s15922_s3 + $0x25a8] sm:$0xff] }
 0x3de   : > { %4676 = vmatpush2.msra.mxu0 %v7592_v50  ;;  %v3729_v38 = vpop.f32.mrf.mxu1  ;;  %4604 = vmatprep.subr.mxu1 %v7453_v25  ;;  %v13300_v19 = vadd.f32 %v3800_v0, %v3724_v7  ;;  %v5098_v50 = vrot.slane %v9916_v43, 6  ;;  %v5097_v25 = vrot.slane %v9901_v36, 6  ;;  %v5103_v0 = vrot.slane %v9938_v21, 6  ;;  %v7674_v21 = vld [vmem:[%s15922_s3 + $0x2540] sm:$0xff] }
 0x3df   : > { %4677 = vmatprep.subr.mxu0 %v7589_v1  ;;  %v3730_v22 = vadd.f32 %v3729_v38, %v12927_v37  ;;  %4605 = vmatpush2.msra.mxu1 %v7452_v10  ;;  %v3802_v17 = vpop.f32.mrf.mxu0  ;;  %v7444_v37 = vld [vmem:[%s15922_s3 + $0x1e10] sm:$0xff]  ;;  %v7822_v1 = vld [vmem:[%s15922_s3 + $0x29e0] sm:$0xff]  ;;  %v7819_v10 = vld [vmem:[%s15922_s3 + $0x29c8] sm:$0xff] }
 0x3e0   : > { %4678 = vmatpush2.msra.mxu0 %v7588_v58  ;;  %v3731_v27 = vpop.f32.mrf.mxu1  ;;  %4606 = vmatprep.subr.mxu1 %v7449_v60  ;;  %v13315_v32 = vadd.f32 %v3802_v17, %v3726_v57  ;;  %v7683_v57 = vld [vmem:[%s15922_s3 + $0x2588] sm:$0xff]  ;;  %v13373_v36 = vsel %vm5093_vm6, %v5097_v25, %v5098_v50  ;;  %v5104_v58 = vrot.slane %v9941_v44, 6  ;;  %v7814_v38 = vld [vmem:[%s15922_s3 + $0x29a0] sm:$0xff] }
 0x3e1   : > { %4679 = vmatprep.subr.mxu0 %v7585_v62  ;;  %v3732_v49 = vadd.f32 %v3731_v27, %v12938_v5  ;;  %4607 = vmatpush2.msra.mxu1 %v7448_v15  ;;  %v7576_v5 = vld [vmem:[%s15922_s3 + $0x2230] sm:$0xff]  ;;  %v7815_v60 = vld [vmem:[%s15922_s3 + $0x29a8] sm:$0xff]  ;;  %v7678_v62 = vld [vmem:[%s15922_s3 + $0x2560] sm:$0xff] }
 0x3e2   : > { %4680 = vmatpush2.msra.mxu0 %v7584_v26  ;;  %4608 = vmatprep.subr.mxu1 %v7445_v48  ;;  %v7675_v15 = vld [vmem:[%s15922_s3 + $0x2548] sm:$0xff]  ;;  %v7670_v27 = vld [vmem:[%s15922_s3 + $0x2520] sm:$0xff] }
 0x3e3   : > { %4681 = vmatprep.subr.mxu0 %v7581_v14  ;;  %4609 = vmatpush2.msra.mxu1 %v7444_v37  ;;  %v7811_v26 = vld [vmem:[%s15922_s3 + $0x2988] sm:$0xff]  ;;  %v7806_v17 = vld [vmem:[%s15922_s3 + $0x2960] sm:$0xff] }
 0x3e4   : > { %4682 = vmatpush2.msra.mxu0 %v7580_v6  ;;  %v3806_v40 = vpop.f32.mrf.mxu0  ;;  %4611 = vmatmul.mubr.f32.vlgmr.msra.gmra.mxu1 %v12501_v2  ;;  %v7690_v2 = vld [vmem:[%s15922_s3 + $0x25c0] sm:$0xff]  ;;  %v7671_v48 = vld [vmem:[%s15922_s3 + $0x2528] sm:$0xff] }
 0x3e5   : > { %4683 = vmatprep.subr.mxu0 %v7577_v63  ;;  %v13336_v23 = vadd.f32 %v3806_v40, %v3730_v22  ;;  %5136 = vmatprep.subr.mxu1 %v7695_v11  ;;  %v13406_v22 = vsel %vm5093_vm6, %v5103_v0, %v5104_v58  ;;  %v7807_v14 = vld [vmem:[%s15922_s3 + $0x2968] sm:$0xff]  ;;  %v7802_v63 = vld [vmem:[%s15922_s3 + $0x2940] sm:$0xff] }
 0x3e6   : > { %4616 = vmatprep.mubr.f32.mxu1 %v12515_v13  ;;  %v3808_v33 = vpop.f32.mrf.mxu0  ;;  %4684 = vmatpush2.msra.mxu0 %v7576_v5  ;;  %v7823_v13 = vld [vmem:[%s15922_s3 + $0x29e8] sm:$0xff]  ;;  %v7798_v40 = vld [vmem:[%s15922_s3 + $0x2920] sm:$0xff] }
 0x3e7   : > { %5137 = vmatpush1.msra.mxu1 %v7694_v30  ;;  %v13345_v7 = vadd.f32 %v3808_v33, %v3732_v49  ;;  %4685 = vmatprep.subr.mxu0 %v7573_v53  ;;  %v7667_v37 = vld [vmem:[%s15922_s3 + $0x2508] sm:$0xff]  ;;  %v7666_v49 = vld [vmem:[%s15922_s3 + $0x2500] sm:$0xff] }
 0x3e8   : > { %5138 = vmatprep.subr.mxu1 %v7691_v47  ;;  %4686 = vmatpush2.msra.mxu0 %v7572_v29  ;;  %v7803_v6 = vld [vmem:[%s15922_s3 + $0x2948] sm:$0xff]  ;;  %v7662_v30 = vld [vmem:[%s15922_s3 + $0x24e0] sm:$0xff] }
 0x3e9   : > { %5139 = vmatpush1.msra.mxu1 %v7690_v2  ;;  %4688 = vmatmul.mubr.f32.vlgmr.msra.gmra.mxu0 %v12906_v56  ;;  %v7818_v56 = vld [vmem:[%s15922_s3 + $0x29c0] sm:$0xff]  ;;  %v7663_v11 = vld [vmem:[%s15922_s3 + $0x24e8] sm:$0xff] }
 0x3ea   : > { %4617 = vmatmul.mubr.f32.gmra.mxu1 %v12547_v20  ;;  %5140 = vmatprep.subr.mxu1 %v7687_v24  ;;  %v7682_v20 = vld [vmem:[%s15922_s3 + $0x2580] sm:$0xff]  ;;  %v7799_v5 = vld [vmem:[%s15922_s3 + $0x2928] sm:$0xff] }
 0x3eb   : > { %5213 = vmatprep.subr.mxu0 %v7823_v13  ;;  %4693 = vmatprep.mubr.f32.mxu0 %v12918_v35  ;;  %v7679_v35 = vld [vmem:[%s15922_s3 + $0x2568] sm:$0xff]  ;;  %v7658_v29 = vld [vmem:[%s15922_s3 + $0x24c0] sm:$0xff] }
 0x3ec   : > { %5141 = vmatpush1.msra.mxu1 %v7686_v8  ;;  %5200 = vmatprep.mubr.f32.mxu1 %v13373_v36  ;;  %v7659_v53 = vld [vmem:[%s15922_s3 + $0x24c8] sm:$0xff]  ;;  %v7794_v2 = vld [vmem:[%s15922_s3 + $0x2900] sm:$0xff] }
 0x3ed   : > { %5214 = vmatpush1.msra.mxu0 %v7822_v1  ;;  %5142 = vmatprep.subr.mxu1 %v7683_v57  ;;  %v7795_v47 = vld [vmem:[%s15922_s3 + $0x2908] sm:$0xff]  ;;  %v7654_v13 = vld [vmem:[%s15922_s3 + $0x24a0] sm:$0xff] }
 0x3ee   : > { %5215 = vmatprep.subr.mxu0 %v7819_v10  ;;  %5143 = vmatpush1.msra.mxu1 %v7682_v20  ;;  %v7655_v33 = vld [vmem:[%s15922_s3 + $0x24a8] sm:$0xff]  ;;  %v7790_v8 = vld [vmem:[%s15922_s3 + $0x28e0] sm:$0xff] }
 0x3ef   : > { %5216 = vmatpush1.msra.mxu0 %v7818_v56  ;;  %5144 = vmatprep.subr.mxu1 %v7679_v35  ;;  %v7791_v24 = vld [vmem:[%s15922_s3 + $0x28e8] sm:$0xff]  ;;  %v7650_v57 = vld [vmem:[%s15922_s3 + $0x2480] sm:$0xff] }
 0x3f0   : > { %4694 = vmatmul.mubr.f32.gmra.mxu0 %v12947_v18  ;;  %5217 = vmatprep.subr.mxu0 %v7815_v60  ;;  %v7810_v18 = vld [vmem:[%s15922_s3 + $0x2980] sm:$0xff]  ;;  %v7651_v25 = vld [vmem:[%s15922_s3 + $0x2488] sm:$0xff] }
 0x3f1   : > { %5145 = vmatpush1.msra.mxu1 %v7678_v62  ;;  %5218 = vmatpush1.msra.mxu0 %v7814_v38  ;;  %v7787_v1 = vld [vmem:[%s15922_s3 + $0x28c8] sm:$0xff]  ;;  %v7786_v10 = vld [vmem:[%s15922_s3 + $0x28c0] sm:$0xff] }
 0x3f2   : > { %5277 = vmatprep.mubr.f32.mxu0 %v13406_v22  ;;  %5146 = vmatprep.subr.mxu1 %v7675_v15  ;;  %v7647_v20 = vld [vmem:[%s15922_s3 + $0x2468] sm:$0xff]  ;;  %v7646_v35 = vld [vmem:[%s15922_s3 + $0x2460] sm:$0xff] }
 0x3f3   : > { %5219 = vmatprep.subr.mxu0 %v7811_v26  ;;  %5147 = vmatpush1.msra.mxu1 %v7674_v21  ;;  %v7783_v56 = vld [vmem:[%s15922_s3 + $0x28a8] sm:$0xff]  ;;  %v7782_v60 = vld [vmem:[%s15922_s3 + $0x28a0] sm:$0xff] }
 0x3f4   : > { %5220 = vmatpush1.msra.mxu0 %v7810_v18  ;;  %5148 = vmatprep.subr.mxu1 %v7671_v48  ;;  %v7643_v62 = vld [vmem:[%s15922_s3 + $0x2448] sm:$0xff]  ;;  %v7642_v0 = vld [vmem:[%s15922_s3 + $0x2440] sm:$0xff] }
 0x3f5   : > { %5221 = vmatprep.subr.mxu0 %v7807_v14  ;;  %5149 = vmatpush1.msra.mxu1 %v7670_v27  ;;  %v7779_v38 = vld [vmem:[%s15922_s3 + $0x2888] sm:$0xff]  ;;  %v7778_v15 = vld [vmem:[%s15922_s3 + $0x2880] sm:$0xff] }
 0x3f6   : > { %5222 = vmatpush1.msra.mxu0 %v7806_v17  ;;  %5150 = vmatprep.subr.mxu1 %v7667_v37  ;;  %v7639_v26 = vld [vmem:[%s15922_s3 + $0x2428] sm:$0xff]  ;;  %v7638_v18 = vld [vmem:[%s15922_s3 + $0x2420] sm:$0xff] }
 0x3f7   : > { %5223 = vmatprep.subr.mxu0 %v7803_v6  ;;  %5151 = vmatpush1.msra.mxu1 %v7666_v49  ;;  %v7775_v21 = vld [vmem:[%s15922_s3 + $0x2868] sm:$0xff]  ;;  %v7774_v48 = vld [vmem:[%s15922_s3 + $0x2860] sm:$0xff] }
 0x3f8   : > { %5224 = vmatpush1.msra.mxu0 %v7802_v63  ;;  %5152 = vmatprep.subr.mxu1 %v7663_v11  ;;  %v7635_v14 = vld [vmem:[%s15922_s3 + $0x2408] sm:$0xff]  ;;  %v7634_v17 = vld [vmem:[%s15922_s3 + $0x2400] sm:$0xff] }
 0x3f9   : > { %5225 = vmatprep.subr.mxu0 %v7799_v5  ;;  %5153 = vmatpush1.msra.mxu1 %v7662_v30  ;;  %v7771_v27 = vld [vmem:[%s15922_s3 + $0x2848] sm:$0xff]  ;;  %v7770_v37 = vld [vmem:[%s15922_s3 + $0x2840] sm:$0xff] }
 0x3fa   : > { %5226 = vmatpush1.msra.mxu0 %v7798_v40  ;;  %5154 = vmatprep.subr.mxu1 %v7659_v53  ;;  %v7759_v6 = vld [vmem:[%s15922_s3 + $0x27e8] sm:$0xff]  ;;  %v7758_v63 = vld [vmem:[%s15922_s3 + $0x27e0] sm:$0xff] }
 0x3fb   : > { %5227 = vmatprep.subr.mxu0 %v7795_v47  ;;  %5155 = vmatpush1.msra.mxu1 %v7658_v29  ;;  %v7767_v49 = vld [vmem:[%s15922_s3 + $0x2828] sm:$0xff]  ;;  %v7766_v11 = vld [vmem:[%s15922_s3 + $0x2820] sm:$0xff] }
 0x3fc   : > { %5228 = vmatpush1.msra.mxu0 %v7794_v2  ;;  %5156 = vmatprep.subr.mxu1 %v7655_v33  ;;  %v7755_v5 = vld [vmem:[%s15922_s3 + $0x27c8] sm:$0xff]  ;;  %v7754_v40 = vld [vmem:[%s15922_s3 + $0x27c0] sm:$0xff] }
 0x3fd   : > { %5229 = vmatprep.subr.mxu0 %v7791_v24  ;;  %5157 = vmatpush1.msra.mxu1 %v7654_v13  ;;  %v7763_v30 = vld [vmem:[%s15922_s3 + $0x2808] sm:$0xff]  ;;  %v7762_v53 = vld [vmem:[%s15922_s3 + $0x2800] sm:$0xff] }
 0x3fe   : > { %5230 = vmatpush1.msra.mxu0 %v7790_v8  ;;  %5158 = vmatprep.subr.mxu1 %v7651_v25  ;;  %v7751_v47 = vld [vmem:[%s15922_s3 + $0x27a8] sm:$0xff]  ;;  %v7750_v2 = vld [vmem:[%s15922_s3 + $0x27a0] sm:$0xff] }
 0x3ff   : > { %5231 = vmatprep.subr.mxu0 %v7787_v1  ;;  %5159 = vmatpush1.msra.mxu1 %v7650_v57  ;;  %v7887_v29 = vld [vmem:[%s15922_s3 + $0x2be8] sm:$0xff]  ;;  %v7886_v33 = vld [vmem:[%s15922_s3 + $0x2be0] sm:$0xff] }
 0x400   : > { %5232 = vmatpush1.msra.mxu0 %v7786_v10  ;;  %5160 = vmatprep.subr.mxu1 %v7647_v20  ;;  %v7747_v24 = vld [vmem:[%s15922_s3 + $0x2788] sm:$0xff]  ;;  %v7746_v8 = vld [vmem:[%s15922_s3 + $0x2780] sm:$0xff] }
 0x401   : > { %5233 = vmatprep.subr.mxu0 %v7783_v56  ;;  %5161 = vmatpush1.msra.mxu1 %v7646_v35  ;;  %v7883_v13 = vld [vmem:[%s15922_s3 + $0x2bc8] sm:$0xff]  ;;  %v7882_v25 = vld [vmem:[%s15922_s3 + $0x2bc0] sm:$0xff] }
 0x402   : > { %5234 = vmatpush1.msra.mxu0 %v7782_v60  ;;  %5162 = vmatprep.subr.mxu1 %v7643_v62  ;;  %v7743_v1 = vld [vmem:[%s15922_s3 + $0x2768] sm:$0xff]  ;;  %v7742_v10 = vld [vmem:[%s15922_s3 + $0x2760] sm:$0xff] }
 0x403   : > { %5235 = vmatprep.subr.mxu0 %v7779_v38  ;;  %5163 = vmatpush1.msra.mxu1 %v7642_v0  ;;  %v7879_v57 = vld [vmem:[%s15922_s3 + $0x2ba8] sm:$0xff]  ;;  %v7878_v20 = vld [vmem:[%s15922_s3 + $0x2ba0] sm:$0xff] }
 0x404   : > { %5236 = vmatpush1.msra.mxu0 %v7778_v15  ;;  %5164 = vmatprep.subr.mxu1 %v7639_v26  ;;  %v7739_v56 = vld [vmem:[%s15922_s3 + $0x2748] sm:$0xff]  ;;  %v7738_v60 = vld [vmem:[%s15922_s3 + $0x2740] sm:$0xff] }
 0x405   : > { %5237 = vmatprep.subr.mxu0 %v7775_v21  ;;  %5165 = vmatpush1.msra.mxu1 %v7638_v18  ;;  %v7875_v35 = vld [vmem:[%s15922_s3 + $0x2b88] sm:$0xff]  ;;  %v7874_v62 = vld [vmem:[%s15922_s3 + $0x2b80] sm:$0xff] }
 0x406   : > { %5238 = vmatpush1.msra.mxu0 %v7774_v48  ;;  %5166 = vmatprep.subr.mxu1 %v7635_v14  ;;  %v7735_v38 = vld [vmem:[%s15922_s3 + $0x2728] sm:$0xff]  ;;  %v7734_v15 = vld [vmem:[%s15922_s3 + $0x2720] sm:$0xff] }
 0x407   : > { %5239 = vmatprep.subr.mxu0 %v7771_v27  ;;  %5167 = vmatpush1.msra.mxu1 %v7634_v17  ;;  %v7871_v0 = vld [vmem:[%s15922_s3 + $0x2b68] sm:$0xff]  ;;  %v7870_v26 = vld [vmem:[%s15922_s3 + $0x2b60] sm:$0xff] }
 0x408   : > { %5240 = vmatpush1.msra.mxu0 %v7770_v37  ;;  %5168 = vmatprep.subr.mxu1 %v7759_v6  ;;  %v7731_v21 = vld [vmem:[%s15922_s3 + $0x2708] sm:$0xff]  ;;  %v7730_v48 = vld [vmem:[%s15922_s3 + $0x2700] sm:$0xff] }
 0x409   : > { %5241 = vmatprep.subr.mxu0 %v7767_v49  ;;  %5169 = vmatpush2.msra.mxu1 %v7758_v63  ;;  %v7867_v18 = vld [vmem:[%s15922_s3 + $0x2b48] sm:$0xff]  ;;  %v7866_v14 = vld [vmem:[%s15922_s3 + $0x2b40] sm:$0xff] }
 0x40a   : > { %5242 = vmatpush1.msra.mxu0 %v7766_v11  ;;  %5170 = vmatprep.subr.mxu1 %v7755_v5  ;;  %v7727_v27 = vld [vmem:[%s15922_s3 + $0x26e8] sm:$0xff]  ;;  %v7726_v37 = vld [vmem:[%s15922_s3 + $0x26e0] sm:$0xff] }
 0x40b   : > { %5243 = vmatprep.subr.mxu0 %v7763_v30  ;;  %5171 = vmatpush2.msra.mxu1 %v7754_v40  ;;  %v7863_v17 = vld [vmem:[%s15922_s3 + $0x2b28] sm:$0xff]  ;;  %v7862_v6 = vld [vmem:[%s15922_s3 + $0x2b20] sm:$0xff] }
 0x40c   : > { %5244 = vmatpush1.msra.mxu0 %v7762_v53  ;;  %5172 = vmatprep.subr.mxu1 %v7751_v47  ;;  %v7723_v49 = vld [vmem:[%s15922_s3 + $0x26c8] sm:$0xff]  ;;  %v7722_v11 = vld [vmem:[%s15922_s3 + $0x26c0] sm:$0xff] }
 0x40d   : > { %5245 = vmatprep.subr.mxu0 %v7887_v29  ;;  %5173 = vmatpush2.msra.mxu1 %v7750_v2  ;;  %v7859_v63 = vld [vmem:[%s15922_s3 + $0x2b08] sm:$0xff]  ;;  %v7858_v5 = vld [vmem:[%s15922_s3 + $0x2b00] sm:$0xff] }
 0x40e   : > { %5246 = vmatpush2.msra.mxu0 %v7886_v33  ;;  %5174 = vmatprep.subr.mxu1 %v7747_v24  ;;  %v7719_v30 = vld [vmem:[%s15922_s3 + $0x26a8] sm:$0xff]  ;;  %v7718_v53 = vld [vmem:[%s15922_s3 + $0x26a0] sm:$0xff] }
 0x40f   : > { %5247 = vmatprep.subr.mxu0 %v7883_v13  ;;  %5175 = vmatpush2.msra.mxu1 %v7746_v8  ;;  %v7855_v40 = vld [vmem:[%s15922_s3 + $0x2ae8] sm:$0xff]  ;;  %v7854_v47 = vld [vmem:[%s15922_s3 + $0x2ae0] sm:$0xff] }
 0x410   : > { %5248 = vmatpush2.msra.mxu0 %v7882_v25  ;;  %5176 = vmatprep.subr.mxu1 %v7743_v1  ;;  %v7715_v29 = vld [vmem:[%s15922_s3 + $0x2688] sm:$0xff]  ;;  %v7714_v33 = vld [vmem:[%s15922_s3 + $0x2680] sm:$0xff] }
 0x411   : > { %5249 = vmatprep.subr.mxu0 %v7879_v57  ;;  %5177 = vmatpush2.msra.mxu1 %v7742_v10  ;;  %v7851_v2 = vld [vmem:[%s15922_s3 + $0x2ac8] sm:$0xff]  ;;  %v7850_v24 = vld [vmem:[%s15922_s3 + $0x2ac0] sm:$0xff] }
 0x412   : > { %5250 = vmatpush2.msra.mxu0 %v7878_v20  ;;  %5178 = vmatprep.subr.mxu1 %v7739_v56  ;;  %v7711_v13 = vld [vmem:[%s15922_s3 + $0x2668] sm:$0xff]  ;;  %v7710_v25 = vld [vmem:[%s15922_s3 + $0x2660] sm:$0xff] }
 0x413   : > { %5251 = vmatprep.subr.mxu0 %v7875_v35  ;;  %5179 = vmatpush2.msra.mxu1 %v7738_v60  ;;  %v7847_v8 = vld [vmem:[%s15922_s3 + $0x2aa8] sm:$0xff]  ;;  %v7846_v1 = vld [vmem:[%s15922_s3 + $0x2aa0] sm:$0xff] }
 0x414   : > { %5252 = vmatpush2.msra.mxu0 %v7874_v62  ;;  %5180 = vmatprep.subr.mxu1 %v7735_v38  ;;  %v7707_v57 = vld [vmem:[%s15922_s3 + $0x2648] sm:$0xff]  ;;  %v7706_v20 = vld [vmem:[%s15922_s3 + $0x2640] sm:$0xff] }
 0x415   : > { %5253 = vmatprep.subr.mxu0 %v7871_v0  ;;  %5181 = vmatpush2.msra.mxu1 %v7734_v15  ;;  %v7843_v10 = vld [vmem:[%s15922_s3 + $0x2a88] sm:$0xff]  ;;  %v7842_v56 = vld [vmem:[%s15922_s3 + $0x2a80] sm:$0xff] }
 0x416   : > { %5254 = vmatpush2.msra.mxu0 %v7870_v26  ;;  %5182 = vmatprep.subr.mxu1 %v7731_v21  ;;  %v7703_v35 = vld [vmem:[%s15922_s3 + $0x2628] sm:$0xff]  ;;  %v7702_v62 = vld [vmem:[%s15922_s3 + $0x2620] sm:$0xff]  ;;  %v5095_v26 = vrot.slane %v9913_v52, 6 }
 0x417   : > { %5255 = vmatprep.subr.mxu0 %v7867_v18  ;;  %5183 = vmatpush2.msra.mxu1 %v7730_v48  ;;  %v7839_v60 = vld [vmem:[%s15922_s3 + $0x2a68] sm:$0xff]  ;;  %v7838_v38 = vld [vmem:[%s15922_s3 + $0x2a60] sm:$0xff]  ;;  %v5114_v48 = vrot.slane %v9925_v16, 6 }
 0x418   : > { %5256 = vmatpush2.msra.mxu0 %v7866_v14  ;;  %5184 = vmatprep.subr.mxu1 %v7727_v27  ;;  %v7699_v0 = vld [vmem:[%s15922_s3 + $0x2608] sm:$0xff]  ;;  %v7698_v21 = vld [vmem:[%s15922_s3 + $0x2600] sm:$0xff]  ;;  %v5094_v14 = vrot.slane %v9904_v55, 6 }
 0x419   : > { %5257 = vmatprep.subr.mxu0 %v7863_v17  ;;  %5185 = vmatpush2.msra.mxu1 %v7726_v37  ;;  %v7835_v15 = vld [vmem:[%s15922_s3 + $0x2a48] sm:$0xff]  ;;  %v7834_v18 = vld [vmem:[%s15922_s3 + $0x2a40] sm:$0xff] }
 0x41a   : > { %5258 = vmatpush2.msra.mxu0 %v7862_v6  ;;  %5186 = vmatprep.subr.mxu1 %v7723_v49  ;;  %v7831_v27 = vld [vmem:[%s15922_s3 + $0x2a28] sm:$0xff]  ;;  %v13737_v37 = vsel %vm5093_vm6, %v5094_v14, %v5095_v26  ;;  %v7830_v6 = vld [vmem:[%s15922_s3 + $0x2a20] sm:$0xff]  ;;  %v13749_v49 = vsel %vm5093_vm6, %v5098_v50, %v5114_v48  ;;  %v7681_v14 = vld [vmem:[%s15922_s3 + $0x2578] sm:$0xff] }
 0x41b   : > { %5259 = vmatprep.subr.mxu0 %v7859_v63  ;;  %5187 = vmatpush2.msra.mxu1 %v7722_v11  ;;  %v7951_v17 = vld [vmem:[%s15922_s3 + $0x2de8] sm:$0xff]  ;;  %v7950_v55 = vld [vmem:[%s15922_s3 + $0x2de0] sm:$0xff] }
 0x41c   : > { %5260 = vmatpush2.msra.mxu0 %v7858_v5  ;;  %5188 = vmatprep.subr.mxu1 %v7719_v30  ;;  %v7827_v63 = vld [vmem:[%s15922_s3 + $0x2a08] sm:$0xff]  ;;  %v5112_v5 = vrot.slane %v9988_v34, 6  ;;  %v5101_v30 = vrot.slane %v9961_v42, 6  ;;  %v7826_v50 = vld [vmem:[%s15922_s3 + $0x2a00] sm:$0xff] }
 0x41d   : > { %5261 = vmatprep.subr.mxu0 %v7855_v40  ;;  %5189 = vmatpush2.msra.mxu1 %v7718_v53  ;;  %v7947_v11 = vld [vmem:[%s15922_s3 + $0x2dc8] sm:$0xff]  ;;  %v7946_v40 = vld [vmem:[%s15922_s3 + $0x2dc0] sm:$0xff]  ;;  %v5100_v53 = vrot.slane %v9953_v12, 6 }
 0x41e   : > { %5262 = vmatpush2.msra.mxu0 %v7854_v47  ;;  %5190 = vmatprep.subr.mxu1 %v7715_v29  ;;  %v5118_v47 = vrot.slane %v9985_v31, 6  ;;  %v7943_v29 = vld [vmem:[%s15922_s3 + $0x2da8] sm:$0xff] }
 0x41f   : > { %5263 = vmatprep.subr.mxu0 %v7851_v2  ;;  %5191 = vmatpush2.msra.mxu1 %v7714_v33  ;;  %v7697_v2 = vld [vmem:[%s15922_s3 + $0x25f8] sm:$0xff]  ;;  %v5110_v33 = vrot.slane %v10018_v28, 6  ;;  %v13779_v12 = vsel %vm5093_vm6, %v5100_v53, %v5101_v30  ;;  %v7927_v48 = vld [vmem:[%s15922_s3 + $0x2d28] sm:$0xff] }
 0x420   : > { %5264 = vmatpush2.msra.mxu0 %v7850_v24  ;;  %5192 = vmatprep.subr.mxu1 %v7711_v13  ;;  %v13776_v24 = vsel %vm5093_vm6, %v5095_v26, %v5112_v5  ;;  %v7942_v13 = vld [vmem:[%s15922_s3 + $0x2da0] sm:$0xff]  ;;  %v7685_v26 = vld [vmem:[%s15922_s3 + $0x2598] sm:$0xff] }
 0x421   : > { %5265 = vmatprep.subr.mxu0 %v7847_v8  ;;  %5193 = vmatpush2.msra.mxu1 %v7710_v25  ;;  %v5109_v8 = vrot.slane %v10004_v61, 6  ;;  %v7696_v25 = vld [vmem:[%s15922_s3 + $0x25f0] sm:$0xff]  ;;  %v5116_v61 = vrot.slane %v9982_v46, 6  ;;  %v7673_v5 = vld [vmem:[%s15922_s3 + $0x2538] sm:$0xff] }
 0x422   : > { %5266 = vmatpush2.msra.mxu0 %v7846_v1  ;;  %5194 = vmatprep.subr.mxu1 %v7707_v57  ;;  %v13793_v1 = vsel %vm5093_vm6, %v5104_v58, %v5118_v47  ;;  %v7939_v57 = vld [vmem:[%s15922_s3 + $0x2d88] sm:$0xff]  ;;  %v7938_v58 = vld [vmem:[%s15922_s3 + $0x2d80] sm:$0xff]  ;;  %v7669_v53 = vld [vmem:[%s15922_s3 + $0x2518] sm:$0xff] }
 0x423   : > { %5267 = vmatprep.subr.mxu0 %v7843_v10  ;;  %5195 = vmatpush2.msra.mxu1 %v7706_v20  ;;  %v7693_v10 = vld [vmem:[%s15922_s3 + $0x25d8] sm:$0xff]  ;;  %v13806_v20 = vsel %vm5093_vm6, %v5109_v8, %v5110_v33  ;;  %v7914_v47 = vld [vmem:[%s15922_s3 + $0x2cc0] sm:$0xff] }
 0x424   : > { %5268 = vmatpush2.msra.mxu0 %v7842_v56  ;;  %5196 = vmatprep.subr.mxu1 %v7703_v35  ;;  %v7692_v56 = vld [vmem:[%s15922_s3 + $0x25d0] sm:$0xff]  ;;  %v7935_v35 = vld [vmem:[%s15922_s3 + $0x2d68] sm:$0xff]  ;;  %v7910_v8 = vld [vmem:[%s15922_s3 + $0x2ca0] sm:$0xff] }
 0x425   : > { %5269 = vmatprep.subr.mxu0 %v7839_v60  ;;  %5197 = vmatpush2.msra.mxu1 %v7702_v62  ;;  %v7689_v60 = vld [vmem:[%s15922_s3 + $0x25b8] sm:$0xff]  ;;  %v7934_v62 = vld [vmem:[%s15922_s3 + $0x2d60] sm:$0xff] }
 0x426   : > { %5270 = vmatpush2.msra.mxu0 %v7838_v38  ;;  %5198 = vmatprep.subr.mxu1 %v7699_v0  ;;  %v13825_v38 = vsel %vm5093_vm6, %v5101_v30, %v5116_v61  ;;  %v7688_v0 = vld [vmem:[%s15922_s3 + $0x25b0] sm:$0xff]  ;;  %v7918_v30 = vld [vmem:[%s15922_s3 + $0x2ce0] sm:$0xff] }
 0x427   : > { %5271 = vmatprep.subr.mxu0 %v7835_v15  ;;  %5199 = vmatpush2.msra.mxu1 %v7698_v21  ;;  %v7931_v15 = vld [vmem:[%s15922_s3 + $0x2d48] sm:$0xff]  ;;  %v7930_v21 = vld [vmem:[%s15922_s3 + $0x2d40] sm:$0xff] }
 0x428   : > { %5272 = vmatpush2.msra.mxu0 %v7834_v18  ;;  %5201 = vmatmul.mubr.f32.vlgmr.msra.gmra.mxu1 %v13737_v37  ;;  %v7684_v18 = vld [vmem:[%s15922_s3 + $0x2590] sm:$0xff]  ;;  %v7906_v61 = vld [vmem:[%s15922_s3 + $0x2c80] sm:$0xff] }
 0x429   : > { %5273 = vmatprep.subr.mxu0 %v7831_v27  ;;  %5290 = vmatprep.subr.mxu1 %v7951_v17  ;;  %v7926_v27 = vld [vmem:[%s15922_s3 + $0x2d20] sm:$0xff]  ;;  %v7680_v17 = vld [vmem:[%s15922_s3 + $0x2570] sm:$0xff] }
 0x42a   : > { %5206 = vmatprep.mubr.f32.mxu1 %v13749_v49  ;;  %5274 = vmatpush2.msra.mxu0 %v7830_v6  ;;  %v7677_v6 = vld [vmem:[%s15922_s3 + $0x2558] sm:$0xff] }
 0x42b   : > { %5291 = vmatpush1.msra.mxu1 %v7950_v55  ;;  %5275 = vmatprep.subr.mxu0 %v7827_v63  ;;  %v7922_v55 = vld [vmem:[%s15922_s3 + $0x2d00] sm:$0xff]  ;;  %v7676_v63 = vld [vmem:[%s15922_s3 + $0x2550] sm:$0xff] }
 0x42c   : > { %5292 = vmatprep.subr.mxu1 %v7947_v11  ;;  %5276 = vmatpush2.msra.mxu0 %v7826_v50  ;;  %v7919_v11 = vld [vmem:[%s15922_s3 + $0x2ce8] sm:$0xff]  ;;  %v7672_v50 = vld [vmem:[%s15922_s3 + $0x2530] sm:$0xff] }
 0x42d   : > { %5293 = vmatpush1.msra.mxu1 %v7946_v40  ;;  %5278 = vmatmul.mubr.f32.vlgmr.msra.gmra.mxu0 %v13779_v12  ;;  %v7915_v40 = vld [vmem:[%s15922_s3 + $0x2cc8] sm:$0xff] }
 0x42e   : > { %5207 = vmatmul.mubr.f32.gmra.mxu1 %v13776_v24  ;;  %5294 = vmatprep.subr.mxu1 %v7943_v29  ;;  %v7668_v29 = vld [vmem:[%s15922_s3 + $0x2510] sm:$0xff] }
 0x42f   : > { %5367 = vmatprep.subr.mxu0 %v7697_v2  ;;  %5283 = vmatprep.mubr.f32.mxu0 %v13793_v1  ;;  %v7911_v2 = vld [vmem:[%s15922_s3 + $0x2ca8] sm:$0xff] }
 0x430   : > { %5295 = vmatpush1.msra.mxu1 %v7942_v13  ;;  %5354 = vmatprep.mubr.f32.mxu1 %v13806_v20  ;;  %v7665_v13 = vld [vmem:[%s15922_s3 + $0x24f8] sm:$0xff] }
 0x431   : > { %5368 = vmatpush1.msra.mxu0 %v7696_v25  ;;  %5296 = vmatprep.subr.mxu1 %v7939_v57  ;;  %v7664_v25 = vld [vmem:[%s15922_s3 + $0x24f0] sm:$0xff]  ;;  %v7907_v57 = vld [vmem:[%s15922_s3 + $0x2c88] sm:$0xff] }
 0x432   : > { %5369 = vmatprep.subr.mxu0 %v7693_v10  ;;  %5297 = vmatpush1.msra.mxu1 %v7938_v58  ;;  %v7661_v10 = vld [vmem:[%s15922_s3 + $0x24d8] sm:$0xff]  ;;  %v7660_v58 = vld [vmem:[%s15922_s3 + $0x24d0] sm:$0xff] }
 0x433   : > { %5370 = vmatpush1.msra.mxu0 %v7692_v56  ;;  %5298 = vmatprep.subr.mxu1 %v7935_v35  ;;  %v7903_v56 = vld [vmem:[%s15922_s3 + $0x2c68] sm:$0xff]  ;;  %v7657_v35 = vld [vmem:[%s15922_s3 + $0x24b8] sm:$0xff] }
 0x434   : > { %5284 = vmatmul.mubr.f32.gmra.mxu0 %v13825_v38  ;;  %5371 = vmatprep.subr.mxu0 %v7689_v60  ;;  %v7902_v60 = vld [vmem:[%s15922_s3 + $0x2c60] sm:$0xff] }
 0x435   : > { %5299 = vmatpush1.msra.mxu1 %v7934_v62  ;;  %5372 = vmatpush1.msra.mxu0 %v7688_v0  ;;  %v7656_v62 = vld [vmem:[%s15922_s3 + $0x24b0] sm:$0xff]  ;;  %v7899_v0 = vld [vmem:[%s15922_s3 + $0x2c48] sm:$0xff] }
 0x436   : > { %5431 = vmatprep.mubr.f32.mxu0 %v13373_v36  ;;  %5300 = vmatprep.subr.mxu1 %v7931_v15  ;;  %v7923_v36 = vld [vmem:[%s15922_s3 + $0x2d08] sm:$0xff]  ;;  %v7653_v15 = vld [vmem:[%s15922_s3 + $0x2498] sm:$0xff] }
 0x437   : > { %5373 = vmatprep.subr.mxu0 %v7685_v26  ;;  %5301 = vmatpush1.msra.mxu1 %v7930_v21  ;;  %v7898_v26 = vld [vmem:[%s15922_s3 + $0x2c40] sm:$0xff]  ;;  %v7652_v21 = vld [vmem:[%s15922_s3 + $0x2490] sm:$0xff] }
 0x438   : > { %5374 = vmatpush1.msra.mxu0 %v7684_v18  ;;  %5302 = vmatprep.subr.mxu1 %v7927_v48  ;;  %v7895_v18 = vld [vmem:[%s15922_s3 + $0x2c28] sm:$0xff]  ;;  %v7649_v48 = vld [vmem:[%s15922_s3 + $0x2478] sm:$0xff] }
 0x439   : > { %5375 = vmatprep.subr.mxu0 %v7681_v14  ;;  %5303 = vmatpush1.msra.mxu1 %v7926_v27  ;;  %v7894_v14 = vld [vmem:[%s15922_s3 + $0x2c20] sm:$0xff]  ;;  %v7648_v27 = vld [vmem:[%s15922_s3 + $0x2470] sm:$0xff] }
 0x43a   : > { %5376 = vmatpush1.msra.mxu0 %v7680_v17  ;;  %5304 = vmatprep.subr.mxu1 %v7923_v36  ;;  %v7891_v17 = vld [vmem:[%s15922_s3 + $0x2c08] sm:$0xff]  ;;  %v7645_v36 = vld [vmem:[%s15922_s3 + $0x2458] sm:$0xff] }
 0x43b   : > { %5377 = vmatprep.subr.mxu0 %v7677_v6  ;;  %5305 = vmatpush1.msra.mxu1 %v7922_v55  ;;  %v7890_v6 = vld [vmem:[%s15922_s3 + $0x2c00] sm:$0xff]  ;;  %v7644_v55 = vld [vmem:[%s15922_s3 + $0x2450] sm:$0xff] }
 0x43c   : > { %5378 = vmatpush1.msra.mxu0 %v7676_v63  ;;  %5306 = vmatprep.subr.mxu1 %v7919_v11  ;;  %v8015_v63 = vld [vmem:[%s15922_s3 + $0x2fe8] sm:$0xff]  ;;  %v7641_v11 = vld [vmem:[%s15922_s3 + $0x2438] sm:$0xff] }
 0x43d   : > { %5379 = vmatprep.subr.mxu0 %v7673_v5  ;;  %5307 = vmatpush1.msra.mxu1 %v7918_v30  ;;  %v8014_v5 = vld [vmem:[%s15922_s3 + $0x2fe0] sm:$0xff]  ;;  %v7640_v30 = vld [vmem:[%s15922_s3 + $0x2430] sm:$0xff] }
 0x43e   : > { %5380 = vmatpush1.msra.mxu0 %v7672_v50  ;;  %5308 = vmatprep.subr.mxu1 %v7915_v40  ;;  %v8011_v50 = vld [vmem:[%s15922_s3 + $0x2fc8] sm:$0xff]  ;;  %v7637_v40 = vld [vmem:[%s15922_s3 + $0x2418] sm:$0xff] }
 0x43f   : > { %5381 = vmatprep.subr.mxu0 %v7669_v53  ;;  %5309 = vmatpush1.msra.mxu1 %v7914_v47  ;;  %v8010_v53 = vld [vmem:[%s15922_s3 + $0x2fc0] sm:$0xff]  ;;  %v7636_v47 = vld [vmem:[%s15922_s3 + $0x2410] sm:$0xff] }
 0x440   : > { %5382 = vmatpush1.msra.mxu0 %v7668_v29  ;;  %5310 = vmatprep.subr.mxu1 %v7911_v2  ;;  %v8007_v29 = vld [vmem:[%s15922_s3 + $0x2fa8] sm:$0xff]  ;;  %v7761_v2 = vld [vmem:[%s15922_s3 + $0x27f8] sm:$0xff] }
 0x441   : > { %5383 = vmatprep.subr.mxu0 %v7665_v13  ;;  %5311 = vmatpush1.msra.mxu1 %v7910_v8  ;;  %v8006_v13 = vld [vmem:[%s15922_s3 + $0x2fa0] sm:$0xff]  ;;  %v7760_v8 = vld [vmem:[%s15922_s3 + $0x27f0] sm:$0xff] }
 0x442   : > { %5384 = vmatpush1.msra.mxu0 %v7664_v25  ;;  %5312 = vmatprep.subr.mxu1 %v7907_v57  ;;  %v8003_v25 = vld [vmem:[%s15922_s3 + $0x2f88] sm:$0xff]  ;;  %v7757_v57 = vld [vmem:[%s15922_s3 + $0x27d8] sm:$0xff] }
 0x443   : > { %5385 = vmatprep.subr.mxu0 %v7661_v10  ;;  %5313 = vmatpush1.msra.mxu1 %v7906_v61  ;;  %v8002_v10 = vld [vmem:[%s15922_s3 + $0x2f80] sm:$0xff]  ;;  %v7756_v61 = vld [vmem:[%s15922_s3 + $0x27d0] sm:$0xff] }
 0x444   : > { %5386 = vmatpush1.msra.mxu0 %v7660_v58  ;;  %5314 = vmatprep.subr.mxu1 %v7903_v56  ;;  %v7999_v58 = vld [vmem:[%s15922_s3 + $0x2f68] sm:$0xff]  ;;  %v7753_v56 = vld [vmem:[%s15922_s3 + $0x27b8] sm:$0xff] }
 0x445   : > { %5387 = vmatprep.subr.mxu0 %v7657_v35  ;;  %5315 = vmatpush1.msra.mxu1 %v7902_v60  ;;  %v7998_v35 = vld [vmem:[%s15922_s3 + $0x2f60] sm:$0xff]  ;;  %v7752_v60 = vld [vmem:[%s15922_s3 + $0x27b0] sm:$0xff] }
 0x446   : > { %5388 = vmatpush1.msra.mxu0 %v7656_v62  ;;  %5316 = vmatprep.subr.mxu1 %v7899_v0  ;;  %v7995_v62 = vld [vmem:[%s15922_s3 + $0x2f48] sm:$0xff]  ;;  %v7749_v0 = vld [vmem:[%s15922_s3 + $0x2798] sm:$0xff] }
 0x447   : > { %5389 = vmatprep.subr.mxu0 %v7653_v15  ;;  %5317 = vmatpush1.msra.mxu1 %v7898_v26  ;;  %v7994_v15 = vld [vmem:[%s15922_s3 + $0x2f40] sm:$0xff]  ;;  %v7748_v26 = vld [vmem:[%s15922_s3 + $0x2790] sm:$0xff] }
 0x448   : > { %5390 = vmatpush1.msra.mxu0 %v7652_v21  ;;  %5318 = vmatprep.subr.mxu1 %v7895_v18  ;;  %v7991_v21 = vld [vmem:[%s15922_s3 + $0x2f28] sm:$0xff]  ;;  %v7745_v18 = vld [vmem:[%s15922_s3 + $0x2778] sm:$0xff] }
 0x449   : > { %5391 = vmatprep.subr.mxu0 %v7649_v48  ;;  %5319 = vmatpush1.msra.mxu1 %v7894_v14  ;;  %v7990_v48 = vld [vmem:[%s15922_s3 + $0x2f20] sm:$0xff]  ;;  %v7744_v14 = vld [vmem:[%s15922_s3 + $0x2770] sm:$0xff] }
 0x44a   : > { %5392 = vmatpush1.msra.mxu0 %v7648_v27  ;;  %5320 = vmatprep.subr.mxu1 %v7891_v17  ;;  %v7987_v27 = vld [vmem:[%s15922_s3 + $0x2f08] sm:$0xff]  ;;  %v7741_v17 = vld [vmem:[%s15922_s3 + $0x2758] sm:$0xff] }
 0x44b   : > { %5393 = vmatprep.subr.mxu0 %v7645_v36  ;;  %5321 = vmatpush1.msra.mxu1 %v7890_v6  ;;  %v7986_v36 = vld [vmem:[%s15922_s3 + $0x2f00] sm:$0xff]  ;;  %v7740_v6 = vld [vmem:[%s15922_s3 + $0x2750] sm:$0xff] }
 0x44c   : > { %5394 = vmatpush1.msra.mxu0 %v7644_v55  ;;  %5322 = vmatprep.subr.mxu1 %v8015_v63  ;;  %v7983_v55 = vld [vmem:[%s15922_s3 + $0x2ee8] sm:$0xff]  ;;  %v7737_v63 = vld [vmem:[%s15922_s3 + $0x2738] sm:$0xff] }
 0x44d   : > { %5395 = vmatprep.subr.mxu0 %v7641_v11  ;;  %5323 = vmatpush2.msra.mxu1 %v8014_v5  ;;  %v7982_v11 = vld [vmem:[%s15922_s3 + $0x2ee0] sm:$0xff]  ;;  %v7736_v5 = vld [vmem:[%s15922_s3 + $0x2730] sm:$0xff] }
 0x44e   : > { %5396 = vmatpush1.msra.mxu0 %v7640_v30  ;;  %5324 = vmatprep.subr.mxu1 %v8011_v50  ;;  %v7979_v30 = vld [vmem:[%s15922_s3 + $0x2ec8] sm:$0xff]  ;;  %v7733_v50 = vld [vmem:[%s15922_s3 + $0x2718] sm:$0xff] }
 0x44f   : > { %5397 = vmatprep.subr.mxu0 %v7637_v40  ;;  %5325 = vmatpush2.msra.mxu1 %v8010_v53  ;;  %v7978_v40 = vld [vmem:[%s15922_s3 + $0x2ec0] sm:$0xff]  ;;  %v7732_v53 = vld [vmem:[%s15922_s3 + $0x2710] sm:$0xff] }
 0x450   : > { %5398 = vmatpush1.msra.mxu0 %v7636_v47  ;;  %5326 = vmatprep.subr.mxu1 %v8007_v29  ;;  %v7975_v47 = vld [vmem:[%s15922_s3 + $0x2ea8] sm:$0xff]  ;;  %v7729_v29 = vld [vmem:[%s15922_s3 + $0x26f8] sm:$0xff] }
 0x451   : > { %5399 = vmatprep.subr.mxu0 %v7761_v2  ;;  %5327 = vmatpush2.msra.mxu1 %v8006_v13  ;;  %v7974_v2 = vld [vmem:[%s15922_s3 + $0x2ea0] sm:$0xff]  ;;  %v7728_v13 = vld [vmem:[%s15922_s3 + $0x26f0] sm:$0xff] }
 0x452   : > { %5400 = vmatpush2.msra.mxu0 %v7760_v8  ;;  %5328 = vmatprep.subr.mxu1 %v8003_v25  ;;  %v7971_v8 = vld [vmem:[%s15922_s3 + $0x2e88] sm:$0xff]  ;;  %v7725_v25 = vld [vmem:[%s15922_s3 + $0x26d8] sm:$0xff] }
 0x453   : > { %5401 = vmatprep.subr.mxu0 %v7757_v57  ;;  %5329 = vmatpush2.msra.mxu1 %v8002_v10  ;;  %v7970_v57 = vld [vmem:[%s15922_s3 + $0x2e80] sm:$0xff]  ;;  %v7724_v10 = vld [vmem:[%s15922_s3 + $0x26d0] sm:$0xff] }
 0x454   : > { %5402 = vmatpush2.msra.mxu0 %v7756_v61  ;;  %5330 = vmatprep.subr.mxu1 %v7999_v58  ;;  %v7967_v61 = vld [vmem:[%s15922_s3 + $0x2e68] sm:$0xff]  ;;  %v7721_v58 = vld [vmem:[%s15922_s3 + $0x26b8] sm:$0xff] }
 0x455   : > { %5403 = vmatprep.subr.mxu0 %v7753_v56  ;;  %5331 = vmatpush2.msra.mxu1 %v7998_v35  ;;  %v7966_v56 = vld [vmem:[%s15922_s3 + $0x2e60] sm:$0xff]  ;;  %v7720_v35 = vld [vmem:[%s15922_s3 + $0x26b0] sm:$0xff] }
 0x456   : > { %5404 = vmatpush2.msra.mxu0 %v7752_v60  ;;  %5332 = vmatprep.subr.mxu1 %v7995_v62  ;;  %v7963_v60 = vld [vmem:[%s15922_s3 + $0x2e48] sm:$0xff]  ;;  %v7717_v62 = vld [vmem:[%s15922_s3 + $0x2698] sm:$0xff] }
 0x457   : > { %5405 = vmatprep.subr.mxu0 %v7749_v0  ;;  %5333 = vmatpush2.msra.mxu1 %v7994_v15  ;;  %v7962_v0 = vld [vmem:[%s15922_s3 + $0x2e40] sm:$0xff]  ;;  %v7716_v15 = vld [vmem:[%s15922_s3 + $0x2690] sm:$0xff] }
 0x458   : > { %5406 = vmatpush2.msra.mxu0 %v7748_v26  ;;  %5334 = vmatprep.subr.mxu1 %v7991_v21  ;;  %v7959_v26 = vld [vmem:[%s15922_s3 + $0x2e28] sm:$0xff]  ;;  %v7713_v21 = vld [vmem:[%s15922_s3 + $0x2678] sm:$0xff] }
 0x459   : > { %5407 = vmatprep.subr.mxu0 %v7745_v18  ;;  %5335 = vmatpush2.msra.mxu1 %v7990_v48  ;;  %v7958_v18 = vld [vmem:[%s15922_s3 + $0x2e20] sm:$0xff]  ;;  %v7712_v48 = vld [vmem:[%s15922_s3 + $0x2670] sm:$0xff] }
 0x45a   : > { %5408 = vmatpush2.msra.mxu0 %v7744_v14  ;;  %5336 = vmatprep.subr.mxu1 %v7987_v27  ;;  %v7955_v14 = vld [vmem:[%s15922_s3 + $0x2e08] sm:$0xff]  ;;  %v7709_v27 = vld [vmem:[%s15922_s3 + $0x2658] sm:$0xff] }
 0x45b   : > { %5409 = vmatprep.subr.mxu0 %v7741_v17  ;;  %5337 = vmatpush2.msra.mxu1 %v7986_v36  ;;  %v5107_v17 = vrot.slane %v10370_v9, 6  ;;  %v7954_v36 = vld [vmem:[%s15922_s3 + $0x2e00] sm:$0xff] }
 0x45c   : > { %5410 = vmatpush2.msra.mxu0 %v7740_v6  ;;  %5338 = vmatprep.subr.mxu1 %v7983_v55  ;;  %v7708_v6 = vld [vmem:[%s15922_s3 + $0x2650] sm:$0xff]  ;;  %v5106_v55 = vrot.slane %v10385_v41, 6 }
 0x45d   : > { %5411 = vmatprep.subr.mxu0 %v7737_v63  ;;  %5339 = vmatpush2.msra.mxu1 %v7982_v11  ;;  %v7705_v63 = vld [vmem:[%s15922_s3 + $0x2638] sm:$0xff]  ;;  %v7704_v41 = vld [vmem:[%s15922_s3 + $0x2630] sm:$0xff] }
 0x45e   : > { %5412 = vmatpush2.msra.mxu0 %v7736_v5  ;;  %5340 = vmatprep.subr.mxu1 %v7979_v30  ;;  %v7825_v11 = vld [vmem:[%s15922_s3 + $0x29f8] sm:$0xff]  ;;  %v5122_v5 = vrot.slane %v10394_v4, 6  ;;  %v14166_v30 = vsel %vm5093_vm6, %v5106_v55, %v5107_v17  ;;  %v7792_v55 = vld [vmem:[%s15922_s3 + $0x28f0] sm:$0xff] }
 0x45f   : > { %5413 = vmatprep.subr.mxu0 %v7733_v50  ;;  %5341 = vmatpush2.msra.mxu1 %v7978_v40  ;;  %v7824_v50 = vld [vmem:[%s15922_s3 + $0x29f0] sm:$0xff] }
 0x460   : > { %5414 = vmatpush2.msra.mxu0 %v7732_v53  ;;  %5342 = vmatprep.subr.mxu1 %v7975_v47  ;;  %v14178_v40 = vsel %vm5093_vm6, %v5110_v33, %v5122_v5  ;;  %v7701_v53 = vld [vmem:[%s15922_s3 + $0x2618] sm:$0xff]  ;;  %v7820_v33 = vld [vmem:[%s15922_s3 + $0x29d0] sm:$0xff] }
 0x461   : > { %5415 = vmatprep.subr.mxu0 %v7729_v29  ;;  %5343 = vmatpush2.msra.mxu1 %v7974_v2  ;;  %v7821_v47 = vld [vmem:[%s15922_s3 + $0x29d8] sm:$0xff]  ;;  %v7700_v29 = vld [vmem:[%s15922_s3 + $0x2610] sm:$0xff]  ;;  %v5120_v2 = vrot.slane %v10423_v3, 6 }
 0x462   : > { %5416 = vmatpush2.msra.mxu0 %v7728_v13  ;;  %5344 = vmatprep.subr.mxu1 %v7971_v8  ;;  %v7817_v13 = vld [vmem:[%s15922_s3 + $0x29b8] sm:$0xff] }
 0x463   : > { %5417 = vmatprep.subr.mxu0 %v7725_v25  ;;  %5345 = vmatpush2.msra.mxu1 %v7970_v57  ;;  %v7953_v8 = vld [vmem:[%s15922_s3 + $0x2df8] sm:$0xff]  ;;  %v14201_v25 = vsel %vm5093_vm6, %v5107_v17, %v5120_v2  ;;  %v7816_v57 = vld [vmem:[%s15922_s3 + $0x29b0] sm:$0xff] }
 0x464   : > { %5418 = vmatpush2.msra.mxu0 %v7724_v10  ;;  %5346 = vmatprep.subr.mxu1 %v7967_v61  ;;  %v7952_v10 = vld [vmem:[%s15922_s3 + $0x2df0] sm:$0xff]  ;;  %v7813_v61 = vld [vmem:[%s15922_s3 + $0x2998] sm:$0xff] }
 0x465   : > { %5419 = vmatprep.subr.mxu0 %v7721_v58  ;;  %5347 = vmatpush2.msra.mxu1 %v7966_v56  ;;  %v7949_v58 = vld [vmem:[%s15922_s3 + $0x2dd8] sm:$0xff]  ;;  %v7948_v56 = vld [vmem:[%s15922_s3 + $0x2dd0] sm:$0xff] }
 0x466   : > { %5420 = vmatpush2.msra.mxu0 %v7720_v35  ;;  %5348 = vmatprep.subr.mxu1 %v7963_v60  ;;  %v7809_v35 = vld [vmem:[%s15922_s3 + $0x2978] sm:$0xff]  ;;  %v7808_v60 = vld [vmem:[%s15922_s3 + $0x2970] sm:$0xff] }
 0x467   : > { %5421 = vmatprep.subr.mxu0 %v7717_v62  ;;  %5349 = vmatpush2.msra.mxu1 %v7962_v0  ;;  %v7805_v62 = vld [vmem:[%s15922_s3 + $0x2958] sm:$0xff]  ;;  %v7932_v17 = vld [vmem:[%s15922_s3 + $0x2d50] sm:$0xff] }
 0x468   : > { %5422 = vmatpush2.msra.mxu0 %v7716_v15  ;;  %5350 = vmatprep.subr.mxu1 %v7959_v26  ;;  %v7941_v0 = vld [vmem:[%s15922_s3 + $0x2d98] sm:$0xff]  ;;  %v7804_v15 = vld [vmem:[%s15922_s3 + $0x2950] sm:$0xff] }
 0x469   : > { %5423 = vmatprep.subr.mxu0 %v7713_v21  ;;  %5351 = vmatpush2.msra.mxu1 %v7958_v18  ;;  %v7940_v26 = vld [vmem:[%s15922_s3 + $0x2d90] sm:$0xff]  ;;  %v7937_v21 = vld [vmem:[%s15922_s3 + $0x2d78] sm:$0xff] }
 0x46a   : > { %5424 = vmatpush2.msra.mxu0 %v7712_v48  ;;  %5352 = vmatprep.subr.mxu1 %v7955_v14  ;;  %v7800_v18 = vld [vmem:[%s15922_s3 + $0x2930] sm:$0xff]  ;;  %v7933_v14 = vld [vmem:[%s15922_s3 + $0x2d58] sm:$0xff] }
 0x46b   : > { %5425 = vmatprep.subr.mxu0 %v7709_v27  ;;  %5353 = vmatpush2.msra.mxu1 %v7954_v36  ;;  %v7936_v48 = vld [vmem:[%s15922_s3 + $0x2d70] sm:$0xff]  ;;  %v7793_v36 = vld [vmem:[%s15922_s3 + $0x28f8] sm:$0xff] }
 0x46c   : > { %5426 = vmatpush2.msra.mxu0 %v7708_v6  ;;  %5355 = vmatmul.mubr.f32.vlgmr.msra.gmra.mxu1 %v14166_v30  ;;  %v7796_v27 = vld [vmem:[%s15922_s3 + $0x2910] sm:$0xff]  ;;  %v7929_v6 = vld [vmem:[%s15922_s3 + $0x2d38] sm:$0xff] }
 0x46d   : > { %5427 = vmatprep.subr.mxu0 %v7705_v63  ;;  %5444 = vmatprep.subr.mxu1 %v7825_v11  ;;  %v7928_v63 = vld [vmem:[%s15922_s3 + $0x2d30] sm:$0xff]  ;;  %v7789_v11 = vld [vmem:[%s15922_s3 + $0x28d8] sm:$0xff] }
 0x46e   : > { %5360 = vmatprep.mubr.f32.mxu1 %v14178_v40  ;;  %5428 = vmatpush2.msra.mxu0 %v7704_v41  ;;  %v7925_v5 = vld [vmem:[%s15922_s3 + $0x2d18] sm:$0xff]  ;;  %v7788_v41 = vld [vmem:[%s15922_s3 + $0x28d0] sm:$0xff] }
 0x46f   : > { %5445 = vmatpush1.msra.mxu1 %v7824_v50  ;;  %5429 = vmatprep.subr.mxu0 %v7701_v53  ;;  %v7924_v50 = vld [vmem:[%s15922_s3 + $0x2d10] sm:$0xff]  ;;  %v7785_v53 = vld [vmem:[%s15922_s3 + $0x28b8] sm:$0xff] }
 0x470   : > { %5446 = vmatprep.subr.mxu1 %v7821_v47  ;;  %5430 = vmatpush2.msra.mxu0 %v7700_v29  ;;  %v7921_v47 = vld [vmem:[%s15922_s3 + $0x2cf8] sm:$0xff]  ;;  %v7784_v29 = vld [vmem:[%s15922_s3 + $0x28b0] sm:$0xff] }
 0x471   : > { %5447 = vmatpush1.msra.mxu1 %v7820_v33  ;;  %5432 = vmatmul.mubr.f32.vlgmr.msra.gmra.mxu0 %v13737_v37  ;;  %v7812_v37 = vld [vmem:[%s15922_s3 + $0x2990] sm:$0xff]  ;;  %v7781_v2 = vld [vmem:[%s15922_s3 + $0x2898] sm:$0xff] }
 0x472   : > { %5361 = vmatmul.mubr.f32.gmra.mxu1 %v14201_v25  ;;  %5448 = vmatprep.subr.mxu1 %v7817_v13  ;;  %v7920_v33 = vld [vmem:[%s15922_s3 + $0x2cf0] sm:$0xff]  ;;  %v7917_v13 = vld [vmem:[%s15922_s3 + $0x2cd8] sm:$0xff] }
 0x473   : > { %5521 = vmatprep.subr.mxu0 %v7953_v8  ;;  %5437 = vmatprep.mubr.f32.mxu0 %v13749_v49  ;;  %v7945_v49 = vld [vmem:[%s15922_s3 + $0x2db8] sm:$0xff]  ;;  %v7780_v8 = vld [vmem:[%s15922_s3 + $0x2890] sm:$0xff] }
 0x474   : > { %5449 = vmatpush1.msra.mxu1 %v7816_v57  ;;  %5508 = vmatprep.mubr.f32.mxu1 %v13406_v22  ;;  %v7944_v22 = vld [vmem:[%s15922_s3 + $0x2db0] sm:$0xff] }
 0x475   : > { %5522 = vmatpush1.msra.mxu0 %v7952_v10  ;;  %5450 = vmatprep.subr.mxu1 %v7813_v61  ;;  %v7916_v57 = vld [vmem:[%s15922_s3 + $0x2cd0] sm:$0xff]  ;;  %v7777_v10 = vld [vmem:[%s15922_s3 + $0x2878] sm:$0xff] }
 0x476   : > { %5523 = vmatprep.subr.mxu0 %v7949_v58  ;;  %5451 = vmatpush1.msra.mxu1 %v7812_v37  ;;  %v7913_v61 = vld [vmem:[%s15922_s3 + $0x2cb8] sm:$0xff]  ;;  %v7776_v58 = vld [vmem:[%s15922_s3 + $0x2870] sm:$0xff] }
 0x477   : > { %5524 = vmatpush1.msra.mxu0 %v7948_v56  ;;  %5452 = vmatprep.subr.mxu1 %v7809_v35  ;;  %v7912_v37 = vld [vmem:[%s15922_s3 + $0x2cb0] sm:$0xff]  ;;  %v7773_v56 = vld [vmem:[%s15922_s3 + $0x2858] sm:$0xff] }
 0x478   : > { %5438 = vmatmul.mubr.f32.gmra.mxu0 %v13776_v24  ;;  %5525 = vmatprep.subr.mxu0 %v7945_v49  ;;  %v7801_v24 = vld [vmem:[%s15922_s3 + $0x2938] sm:$0xff]  ;;  %v14341_v49 = vpop.f32.mrf.mxu1 }
 0x479   : > { %5453 = vmatpush1.msra.mxu1 %v7808_v60  ;;  %5526 = vmatpush1.msra.mxu0 %v7944_v22  ;;  %v7909_v35 = vld [vmem:[%s15922_s3 + $0x2c98] sm:$0xff]  ;;  %v7772_v60 = vld [vmem:[%s15922_s3 + $0x2850] sm:$0xff] }
 0x47a   : > { %5585 = vmatprep.mubr.f32.mxu0 %v13806_v20  ;;  %5454 = vmatprep.subr.mxu1 %v7805_v62  ;;  %v7797_v20 = vld [vmem:[%s15922_s3 + $0x2918] sm:$0xff]  ;;  %v7908_v22 = vld [vmem:[%s15922_s3 + $0x2c90] sm:$0xff] }
 0x47b   : > { %5527 = vmatprep.subr.mxu0 %v7941_v0  ;;  %5455 = vmatpush1.msra.mxu1 %v7804_v15  ;;  %v7769_v62 = vld [vmem:[%s15922_s3 + $0x2838] sm:$0xff]  ;;  %v7768_v15 = vld [vmem:[%s15922_s3 + $0x2830] sm:$0xff] }
 0x47c   : > { %5528 = vmatpush1.msra.mxu0 %v7940_v26  ;;  %5456 = vmatprep.subr.mxu1 %v7801_v24  ;;  %v7905_v0 = vld [vmem:[%s15922_s3 + $0x2c78] sm:$0xff]  ;;  %v7904_v26 = vld [vmem:[%s15922_s3 + $0x2c70] sm:$0xff] }
 0x47d   : > { %5529 = vmatprep.subr.mxu0 %v7937_v21  ;;  %5457 = vmatpush1.msra.mxu1 %v7800_v18  ;;  %v7765_v24 = vld [vmem:[%s15922_s3 + $0x2818] sm:$0xff]  ;;  %v14367_v18 = vpop.f32.mrf.mxu1 }
 0x47e   : > { %5530 = vmatpush1.msra.mxu0 %v7936_v48  ;;  %5458 = vmatprep.subr.mxu1 %v7797_v20  ;;  %v7901_v21 = vld [vmem:[%s15922_s3 + $0x2c58] sm:$0xff]  ;;  %v7764_v48 = vld [vmem:[%s15922_s3 + $0x2810] sm:$0xff] }
 0x47f   : > { %5531 = vmatprep.subr.mxu0 %v7933_v14  ;;  %5459 = vmatpush1.msra.mxu1 %v7796_v27  ;;  %v7900_v20 = vld [vmem:[%s15922_s3 + $0x2c50] sm:$0xff]  ;;  %v14375_v14 = vpop.f32.mrf.mxu0  ;;  %v7889_v27 = vld [vmem:[%s15922_s3 + $0x2bf8] sm:$0xff] }
 0x480   : > { %5532 = vmatpush1.msra.mxu0 %v7932_v17  ;;  %5460 = vmatprep.subr.mxu1 %v7793_v36  ;;  %v7897_v17 = vld [vmem:[%s15922_s3 + $0x2c38] sm:$0xff]  ;;  %v7888_v36 = vld [vmem:[%s15922_s3 + $0x2bf0] sm:$0xff] }
 0x481   : > { %5533 = vmatprep.subr.mxu0 %v7929_v6  ;;  %5461 = vmatpush1.msra.mxu1 %v7792_v55  ;;  %v7896_v6 = vld [vmem:[%s15922_s3 + $0x2c30] sm:$0xff]  ;;  %v7885_v55 = vld [vmem:[%s15922_s3 + $0x2bd8] sm:$0xff] }
 0x482   : > { %5534 = vmatpush1.msra.mxu0 %v7928_v63  ;;  %5462 = vmatprep.subr.mxu1 %v7789_v11  ;;  %v7893_v63 = vld [vmem:[%s15922_s3 + $0x2c18] sm:$0xff]  ;;  %v14395_v11 = vpop.f32.mrf.mxu1 }
 0x483   : > { %5535 = vmatprep.subr.mxu0 %v7925_v5  ;;  %5463 = vmatpush1.msra.mxu1 %v7788_v41  ;;  %v7884_v5 = vld [vmem:[%s15922_s3 + $0x2bd0] sm:$0xff] }
 0x484   : > { %5536 = vmatpush1.msra.mxu0 %v7924_v50  ;;  %5464 = vmatprep.subr.mxu1 %v7785_v53  ;;  %v7892_v41 = vld [vmem:[%s15922_s3 + $0x2c10] sm:$0xff]  ;;  %v14403_v50 = vpop.f32.mrf.mxu0  ;;  %v7881_v53 = vld [vmem:[%s15922_s3 + $0x2bb8] sm:$0xff] }
 0x485   : > { %5537 = vmatprep.subr.mxu0 %v7921_v47  ;;  %5465 = vmatpush1.msra.mxu1 %v7784_v29  ;;  %v8017_v47 = vld [vmem:[%s15922_s3 + $0x2ff8] sm:$0xff]  ;;  %v7880_v29 = vld [vmem:[%s15922_s3 + $0x2bb0] sm:$0xff] }
 0x486   : > { %5538 = vmatpush1.msra.mxu0 %v7920_v33  ;;  %5466 = vmatprep.subr.mxu1 %v7781_v2  ;;  %v8016_v33 = vld [vmem:[%s15922_s3 + $0x2ff0] sm:$0xff]  ;;  %v7877_v2 = vld [vmem:[%s15922_s3 + $0x2b98] sm:$0xff] }
 0x487   : > { %5539 = vmatprep.subr.mxu0 %v7917_v13  ;;  %5467 = vmatpush1.msra.mxu1 %v7780_v8  ;;  %v8013_v13 = vld [vmem:[%s15922_s3 + $0x2fd8] sm:$0xff]  ;;  %v14423_v8 = vpop.f32.mrf.mxu1 }
 0x488   : > { %5540 = vmatpush1.msra.mxu0 %v7916_v57  ;;  %5468 = vmatprep.subr.mxu1 %v7777_v10  ;;  %v7876_v57 = vld [vmem:[%s15922_s3 + $0x2b90] sm:$0xff] }
 0x489   : > { %5541 = vmatprep.subr.mxu0 %v7913_v61  ;;  %5469 = vmatpush1.msra.mxu1 %v7776_v58  ;;  %v8012_v10 = vld [vmem:[%s15922_s3 + $0x2fd0] sm:$0xff]  ;;  %v14431_v61 = vpop.f32.mrf.mxu0  ;;  %v7873_v58 = vld [vmem:[%s15922_s3 + $0x2b78] sm:$0xff] }
 0x48a   : > { %5542 = vmatpush1.msra.mxu0 %v7912_v37  ;;  %5470 = vmatprep.subr.mxu1 %v7773_v56  ;;  %v8009_v37 = vld [vmem:[%s15922_s3 + $0x2fb8] sm:$0xff]  ;;  %v14439_v56 = vpop.f32.mrf.mxu1 }
 0x48b   : > { %5543 = vmatprep.subr.mxu0 %v7909_v35  ;;  %5471 = vmatpush1.msra.mxu1 %v7772_v60  ;;  %v7872_v35 = vld [vmem:[%s15922_s3 + $0x2b70] sm:$0xff] }
 0x48c   : > { %5544 = vmatpush1.msra.mxu0 %v7908_v22  ;;  %5472 = vmatprep.subr.mxu1 %v7769_v62  ;;  %v8008_v60 = vld [vmem:[%s15922_s3 + $0x2fb0] sm:$0xff]  ;;  %v7869_v22 = vld [vmem:[%s15922_s3 + $0x2b58] sm:$0xff] }
 0x48d   : > { %5545 = vmatprep.subr.mxu0 %v7905_v0  ;;  %5473 = vmatpush1.msra.mxu1 %v7768_v15  ;;  %v8005_v62 = vld [vmem:[%s15922_s3 + $0x2f98] sm:$0xff]  ;;  %v7868_v0 = vld [vmem:[%s15922_s3 + $0x2b50] sm:$0xff] }
 0x48e   : > { %5546 = vmatpush1.msra.mxu0 %v7904_v26  ;;  %5474 = vmatprep.subr.mxu1 %v7765_v24  ;;  %v8004_v15 = vld [vmem:[%s15922_s3 + $0x2f90] sm:$0xff]  ;;  %v14459_v26 = vpop.f32.mrf.mxu0  ;;  %v7865_v24 = vld [vmem:[%s15922_s3 + $0x2b38] sm:$0xff] }
 0x48f   : > { %5547 = vmatprep.subr.mxu0 %v7901_v21  ;;  %5475 = vmatpush1.msra.mxu1 %v7764_v48  ;;  %v8001_v21 = vld [vmem:[%s15922_s3 + $0x2f78] sm:$0xff]  ;;  %v14467_v48 = vpop.f32.mrf.mxu1 }
 0x490   : > { %5548 = vmatpush1.msra.mxu0 %v7900_v20  ;;  %5476 = vmatprep.subr.mxu1 %v7889_v27  ;;  %v7864_v20 = vld [vmem:[%s15922_s3 + $0x2b30] sm:$0xff] }
 0x491   : > { %5549 = vmatprep.subr.mxu0 %v7897_v17  ;;  %5477 = vmatpush2.msra.mxu1 %v7888_v36  ;;  %v8000_v27 = vld [vmem:[%s15922_s3 + $0x2f70] sm:$0xff]  ;;  %v4535_v17 = vpop.f32.mrf.mxu0  ;;  %v7861_v36 = vld [vmem:[%s15922_s3 + $0x2b18] sm:$0xff] }
 0x492   : > { %5550 = vmatpush1.msra.mxu0 %v7896_v6  ;;  %5478 = vmatprep.subr.mxu1 %v7885_v55  ;;  %v7997_v6 = vld [vmem:[%s15922_s3 + $0x2f58] sm:$0xff]  ;;  %v7860_v55 = vld [vmem:[%s15922_s3 + $0x2b10] sm:$0xff] }
 0x493   : > { %5551 = vmatprep.subr.mxu0 %v7893_v63  ;;  %5479 = vmatpush2.msra.mxu1 %v7884_v5  ;;  %v7996_v63 = vld [vmem:[%s15922_s3 + $0x2f50] sm:$0xff]  ;;  %v7857_v5 = vld [vmem:[%s15922_s3 + $0x2af8] sm:$0xff] }
 0x494   : > { %5552 = vmatpush1.msra.mxu0 %v7892_v41  ;;  %5480 = vmatprep.subr.mxu1 %v7881_v53  ;;  %v7993_v41 = vld [vmem:[%s15922_s3 + $0x2f38] sm:$0xff]  ;;  %v14493_v53 = vpop.f32.mrf.mxu1 }
 0x495   : > { %5553 = vmatprep.subr.mxu0 %v8017_v47  ;;  %5481 = vmatpush2.msra.mxu1 %v7880_v29  ;;  %v7856_v47 = vld [vmem:[%s15922_s3 + $0x2af0] sm:$0xff] }
 0x496   : > { %5554 = vmatpush2.msra.mxu0 %v8016_v33  ;;  %5482 = vmatprep.subr.mxu1 %v7877_v2  ;;  %v7992_v29 = vld [vmem:[%s15922_s3 + $0x2f30] sm:$0xff]  ;;  %v4537_v33 = vpop.f32.mrf.mxu0  ;;  %v7853_v2 = vld [vmem:[%s15922_s3 + $0x2ad8] sm:$0xff] }
 0x497   : > { %5555 = vmatprep.subr.mxu0 %v8013_v13  ;;  %5483 = vmatpush2.msra.mxu1 %v7876_v57  ;;  %v7989_v13 = vld [vmem:[%s15922_s3 + $0x2f18] sm:$0xff]  ;;  %v7852_v57 = vld [vmem:[%s15922_s3 + $0x2ad0] sm:$0xff] }
 0x498   : > { %5556 = vmatpush2.msra.mxu0 %v8012_v10  ;;  %5484 = vmatprep.subr.mxu1 %v7873_v58  ;;  %v7988_v10 = vld [vmem:[%s15922_s3 + $0x2f10] sm:$0xff]  ;;  %v7849_v58 = vld [vmem:[%s15922_s3 + $0x2ab8] sm:$0xff] }
 0x499   : > { %5557 = vmatprep.subr.mxu0 %v8009_v37  ;;  %5485 = vmatpush2.msra.mxu1 %v7872_v35  ;;  %v7985_v37 = vld [vmem:[%s15922_s3 + $0x2ef8] sm:$0xff]  ;;  %v14519_v35 = vpop.f32.mrf.mxu1 }
 0x49a   : > { %5558 = vmatpush2.msra.mxu0 %v8008_v60  ;;  %5486 = vmatprep.subr.mxu1 %v7869_v22  ;;  %v7848_v60 = vld [vmem:[%s15922_s3 + $0x2ab0] sm:$0xff] }
 0x49b   : > { %5559 = vmatprep.subr.mxu0 %v8005_v62  ;;  %5487 = vmatpush2.msra.mxu1 %v7868_v0  ;;  %v7984_v22 = vld [vmem:[%s15922_s3 + $0x2ef0] sm:$0xff]  ;;  %v4541_v62 = vpop.f32.mrf.mxu0  ;;  %v7845_v0 = vld [vmem:[%s15922_s3 + $0x2a98] sm:$0xff] }
 0x49c   : > { %5560 = vmatpush2.msra.mxu0 %v8004_v15  ;;  %5488 = vmatprep.subr.mxu1 %v7865_v24  ;;  %v7981_v15 = vld [vmem:[%s15922_s3 + $0x2ed8] sm:$0xff]  ;;  %v7844_v24 = vld [vmem:[%s15922_s3 + $0x2a90] sm:$0xff] }
 0x49d   : > { %5561 = vmatprep.subr.mxu0 %v8001_v21  ;;  %5489 = vmatpush2.msra.mxu1 %v7864_v20  ;;  %v7980_v21 = vld [vmem:[%s15922_s3 + $0x2ed0] sm:$0xff] }
 0x49e   : > { %5562 = vmatpush2.msra.mxu0 %v8000_v27  ;;  %5490 = vmatprep.subr.mxu1 %v7861_v36  ;;  %v7841_v27 = vld [vmem:[%s15922_s3 + $0x2a78] sm:$0xff] }
 0x49f   : > { %5563 = vmatprep.subr.mxu0 %v7997_v6  ;;  %5491 = vmatpush2.msra.mxu1 %v7860_v55  ;;  %v7977_v36 = vld [vmem:[%s15922_s3 + $0x2eb8] sm:$0xff]  ;;  %v7840_v55 = vld [vmem:[%s15922_s3 + $0x2a70] sm:$0xff] }
 0x4a0   : > { %5564 = vmatpush2.msra.mxu0 %v7996_v63  ;;  %5492 = vmatprep.subr.mxu1 %v7857_v5  ;;  %v7976_v63 = vld [vmem:[%s15922_s3 + $0x2eb0] sm:$0xff] }
 0x4a1   : > { %5565 = vmatprep.subr.mxu0 %v7993_v41  ;;  %5493 = vmatpush2.msra.mxu1 %v7856_v47  ;;  %v4543_v41 = vpop.f32.mrf.mxu0  ;;  %v7837_v47 = vld [vmem:[%s15922_s3 + $0x2a58] sm:$0xff] }
 0x4a2   : > { %5566 = vmatpush2.msra.mxu0 %v7992_v29  ;;  %5494 = vmatprep.subr.mxu1 %v7853_v2  ;;  %v7836_v2 = vld [vmem:[%s15922_s3 + $0x2a50] sm:$0xff] }
 0x4a3   : > { %5567 = vmatprep.subr.mxu0 %v7989_v13  ;;  %5495 = vmatpush2.msra.mxu1 %v7852_v57  ;;  %v7972_v13 = vld [vmem:[%s15922_s3 + $0x2e90] sm:$0xff]  ;;  %v7833_v57 = vld [vmem:[%s15922_s3 + $0x2a38] sm:$0xff] }
 0x4a4   : > { %5568 = vmatpush2.msra.mxu0 %v7988_v10  ;;  %5496 = vmatprep.subr.mxu1 %v7849_v58  ;;  %v4612_v20 = vpop.f32.mrf.mxu1 }
 0x4a5   : > { %5569 = vmatprep.subr.mxu0 %v7985_v37  ;;  %5497 = vmatpush2.msra.mxu1 %v7848_v60  ;;  %v4613_v6 = vadd.f32 %v4612_v20, %v4535_v17  ;;  %v7973_v17 = vld [vmem:[%s15922_s3 + $0x2e98] sm:$0xff]  ;;  %v7832_v37 = vld [vmem:[%s15922_s3 + $0x2a30] sm:$0xff] }
 0x4a6   : > { %5570 = vmatpush2.msra.mxu0 %v7984_v22  ;;  %5498 = vmatprep.subr.mxu1 %v7845_v0  ;;  %v4614_v5 = vpop.f32.mrf.mxu1  ;;  %v7968_v60 = vld [vmem:[%s15922_s3 + $0x2e70] sm:$0xff] }
 0x4a7   : > { %5571 = vmatprep.subr.mxu0 %v7981_v15  ;;  %5499 = vmatpush2.msra.mxu1 %v7844_v24  ;;  %v4615_v29 = vadd.f32 %v4614_v5, %v4537_v33  ;;  %v7969_v33 = vld [vmem:[%s15922_s3 + $0x2e78] sm:$0xff]  ;;  %v8079_v5 = vld [vmem:[%s15922_s3 + $0x31e8] sm:$0xff] }
 0x4a8   : > { %5572 = vmatpush2.msra.mxu0 %v7980_v21  ;;  %5500 = vmatprep.subr.mxu1 %v7841_v27  ;;  %v7829_v15 = vld [vmem:[%s15922_s3 + $0x2a18] sm:$0xff]  ;;  %v7828_v27 = vld [vmem:[%s15922_s3 + $0x2a10] sm:$0xff] }
 0x4a9   : > { %5573 = vmatprep.subr.mxu0 %v7977_v36  ;;  %5501 = vmatpush2.msra.mxu1 %v7840_v55  ;;  %v4689_v58 = vpop.f32.mrf.mxu0  ;;  %v7965_v24 = vld [vmem:[%s15922_s3 + $0x2e58] sm:$0xff] }
 0x4aa   : > { %5574 = vmatpush2.msra.mxu0 %v7976_v63  ;;  %v4618_v10 = vpop.f32.mrf.mxu1  ;;  %5502 = vmatprep.subr.mxu1 %v7837_v47  ;;  %v4690_v0 = vadd.f32 %v4689_v58, %v4613_v6  ;;  %v7961_v63 = vld [vmem:[%s15922_s3 + $0x2e38] sm:$0xff]  ;;  %v8207_v58 = vld [vmem:[%s15922_s3 + $0x35e8] sm:$0xff] }
 0x4ab   : > { %5575 = vmatprep.subr.mxu0 %v7973_v17  ;;  %v4619_v22 = vadd.f32 %v4618_v10, %v4541_v62  ;;  %5503 = vmatpush2.msra.mxu1 %v7836_v2  ;;  %v4691_v20 = vpop.f32.mrf.mxu0  ;;  %v7964_v62 = vld [vmem:[%s15922_s3 + $0x2e50] sm:$0xff] }
 0x4ac   : > { %5576 = vmatpush2.msra.mxu0 %v7972_v13  ;;  %v4620_v21 = vpop.f32.mrf.mxu1  ;;  %5504 = vmatprep.subr.mxu1 %v7833_v57  ;;  %v14588_v36 = vadd.f32 %v4690_v0, %v13300_v19  ;;  %v4692_v55 = vadd.f32 %v4691_v20, %v4615_v29  ;;  %v7960_v19 = vld [vmem:[%s15922_s3 + $0x2e30] sm:$0xff]  ;;  %v7957_v29 = vld [vmem:[%s15922_s3 + $0x2e18] sm:$0xff]  ;;  %v8203_v0 = vld [vmem:[%s15922_s3 + $0x35c8] sm:$0xff] }
 0x4ad   : > { %5577 = vmatprep.subr.mxu0 %v7969_v33  ;;  %v4621_v6 = vadd.f32 %v4620_v21, %v4543_v41  ;;  %5505 = vmatpush2.msra.mxu1 %v7832_v37  ;;  %v8078_v41 = vld [vmem:[%s15922_s3 + $0x31e0] sm:$0xff]  ;;  %v7956_v13 = vld [vmem:[%s15922_s3 + $0x2e10] sm:$0xff]  ;;  %v8059_v21 = vld [vmem:[%s15922_s3 + $0x3148] sm:$0xff] }
 0x4ae   : > { %5578 = vmatpush2.msra.mxu0 %v7968_v60  ;;  %5506 = vmatprep.subr.mxu1 %v7829_v15  ;;  %v14597_v47 = vadd.f32 %v4692_v55, %v13315_v32  ;;  %v8075_v32 = vld [vmem:[%s15922_s3 + $0x31c8] sm:$0xff]  ;;  %v8070_v37 = vld [vmem:[%s15922_s3 + $0x31a0] sm:$0xff] }
 0x4af   : > { %5579 = vmatprep.subr.mxu0 %v7965_v24  ;;  %5507 = vmatpush2.msra.mxu1 %v7828_v27  ;;  %v8206_v60 = vld [vmem:[%s15922_s3 + $0x35e0] sm:$0xff]  ;;  %v8195_v20 = vld [vmem:[%s15922_s3 + $0x3588] sm:$0xff] }
 0x4b0   : > { %5580 = vmatpush2.msra.mxu0 %v7964_v62  ;;  %v4695_v17 = vpop.f32.mrf.mxu0  ;;  %5509 = vmatmul.mubr.f32.vlgmr.msra.gmra.mxu1 %v13779_v12  ;;  %v8074_v12 = vld [vmem:[%s15922_s3 + $0x31c0] sm:$0xff] }
 0x4b1   : > { %5581 = vmatprep.subr.mxu0 %v7961_v63  ;;  %v4696_v2 = vadd.f32 %v4695_v17, %v4619_v22  ;;  %5991 = vmatprep.subr.mxu1 %v8079_v5  ;;  %v8067_v22 = vld [vmem:[%s15922_s3 + $0x3188] sm:$0xff]  ;;  %v8062_v15 = vld [vmem:[%s15922_s3 + $0x3160] sm:$0xff] }
 0x4b2   : > { %5514 = vmatprep.mubr.f32.mxu1 %v13793_v1  ;;  %v4697_v57 = vpop.f32.mrf.mxu0  ;;  %5582 = vmatpush2.msra.mxu0 %v7960_v19  ;;  %v8071_v1 = vld [vmem:[%s15922_s3 + $0x31a8] sm:$0xff]  ;;  %v8198_v24 = vld [vmem:[%s15922_s3 + $0x35a0] sm:$0xff] }
 0x4b3   : > { %5992 = vmatpush1.msra.mxu1 %v8078_v41  ;;  %v14620_v33 = vadd.f32 %v4696_v2, %v13336_v23  ;;  %v4698_v10 = vadd.f32 %v4697_v57, %v4621_v6  ;;  %5583 = vmatprep.subr.mxu0 %v7957_v29  ;;  %v8058_v27 = vld [vmem:[%s15922_s3 + $0x3140] sm:$0xff]  ;;  %v8191_v6 = vld [vmem:[%s15922_s3 + $0x3568] sm:$0xff] }
 0x4b4   : > { %5993 = vmatprep.subr.mxu1 %v8075_v32  ;;  %5584 = vmatpush2.msra.mxu0 %v7956_v13  ;;  %v8194_v62 = vld [vmem:[%s15922_s3 + $0x3580] sm:$0xff]  ;;  %v8051_v5 = vld [vmem:[%s15922_s3 + $0x3108] sm:$0xff] }
 0x4b5   : > { %5994 = vmatpush1.msra.mxu1 %v8074_v12  ;;  %v14632_v23 = vadd.f32 %v4698_v10, %v13345_v7  ;;  %5586 = vmatmul.mubr.f32.vlgmr.msra.gmra.mxu0 %v14166_v30  ;;  %v8066_v7 = vld [vmem:[%s15922_s3 + $0x3180] sm:$0xff]  ;;  %v8063_v30 = vld [vmem:[%s15922_s3 + $0x3168] sm:$0xff] }
 0x4b6   : > { %5515 = vmatmul.mubr.f32.gmra.mxu1 %v13825_v38  ;;  %5995 = vmatprep.subr.mxu1 %v8071_v1  ;;  %v8202_v38 = vld [vmem:[%s15922_s3 + $0x35c0] sm:$0xff]  ;;  %v8187_v19 = vld [vmem:[%s15922_s3 + $0x3548] sm:$0xff] }
 0x4b7   : > { %6068 = vmatprep.subr.mxu0 %v8207_v58  ;;  %5591 = vmatprep.mubr.f32.mxu0 %v14178_v40  ;;  %v8199_v40 = vld [vmem:[%s15922_s3 + $0x35a8] sm:$0xff]  ;;  %v8054_v55 = vld [vmem:[%s15922_s3 + $0x3120] sm:$0xff] }
 0x4b8   : > { %5996 = vmatpush1.msra.mxu1 %v8070_v37  ;;  %6055 = vmatprep.mubr.f32.mxu1 %v9916_v43  ;;  %v8190_v63 = vld [vmem:[%s15922_s3 + $0x3560] sm:$0xff]  ;;  %v8047_v29 = vld [vmem:[%s15922_s3 + $0x30e8] sm:$0xff] }
 0x4b9   : > { %6069 = vmatpush1.msra.mxu0 %v8206_v60  ;;  %5997 = vmatprep.subr.mxu1 %v8067_v22  ;;  %v8050_v41 = vld [vmem:[%s15922_s3 + $0x3100] sm:$0xff]  ;;  %v8183_v32 = vld [vmem:[%s15922_s3 + $0x3528] sm:$0xff] }
 0x4ba   : > { %6070 = vmatprep.subr.mxu0 %v8203_v0  ;;  %5998 = vmatpush1.msra.mxu1 %v8066_v7  ;;  %v8186_v17 = vld [vmem:[%s15922_s3 + $0x3540] sm:$0xff]  ;;  %v8043_v12 = vld [vmem:[%s15922_s3 + $0x30c8] sm:$0xff] }
 0x4bb   : > { %6071 = vmatpush1.msra.mxu0 %v8202_v38  ;;  %5999 = vmatprep.subr.mxu1 %v8063_v30  ;;  %v8046_v2 = vld [vmem:[%s15922_s3 + $0x30e0] sm:$0xff]  ;;  %v8179_v57 = vld [vmem:[%s15922_s3 + $0x3508] sm:$0xff] }
 0x4bc   : > { %5592 = vmatmul.mubr.f32.gmra.mxu0 %v14201_v25  ;;  %6072 = vmatprep.subr.mxu0 %v8199_v40  ;;  %v8055_v25 = vld [vmem:[%s15922_s3 + $0x3128] sm:$0xff]  ;;  %v8182_v13 = vld [vmem:[%s15922_s3 + $0x3520] sm:$0xff] }
 0x4bd   : > { %6000 = vmatpush1.msra.mxu1 %v8062_v15  ;;  %6073 = vmatpush1.msra.mxu0 %v8198_v24  ;;  %v8042_v10 = vld [vmem:[%s15922_s3 + $0x30c0] sm:$0xff]  ;;  %v8039_v58 = vld [vmem:[%s15922_s3 + $0x30a8] sm:$0xff] }
 0x4be   : > { %6132 = vmatprep.mubr.f32.mxu0 %v9941_v44  ;;  %6001 = vmatprep.subr.mxu1 %v8059_v21  ;;  %v8178_v1 = vld [vmem:[%s15922_s3 + $0x3500] sm:$0xff]  ;;  %v8175_v37 = vld [vmem:[%s15922_s3 + $0x34e8] sm:$0xff] }
 0x4bf   : > { %6074 = vmatprep.subr.mxu0 %v8195_v20  ;;  %6002 = vmatpush1.msra.mxu1 %v8058_v27  ;;  %v8038_v60 = vld [vmem:[%s15922_s3 + $0x30a0] sm:$0xff]  ;;  %v8035_v0 = vld [vmem:[%s15922_s3 + $0x3088] sm:$0xff] }
 0x4c0   : > { %6075 = vmatpush1.msra.mxu0 %v8194_v62  ;;  %6003 = vmatprep.subr.mxu1 %v8055_v25  ;;  %v8174_v22 = vld [vmem:[%s15922_s3 + $0x34e0] sm:$0xff]  ;;  %v8171_v7 = vld [vmem:[%s15922_s3 + $0x34c8] sm:$0xff] }
 0x4c1   : > { %6076 = vmatprep.subr.mxu0 %v8191_v6  ;;  %6004 = vmatpush1.msra.mxu1 %v8054_v55  ;;  %v8034_v38 = vld [vmem:[%s15922_s3 + $0x3080] sm:$0xff]  ;;  %v8031_v40 = vld [vmem:[%s15922_s3 + $0x3068] sm:$0xff] }
 0x4c2   : > { %6077 = vmatpush1.msra.mxu0 %v8190_v63  ;;  %6005 = vmatprep.subr.mxu1 %v8051_v5  ;;  %v8170_v30 = vld [vmem:[%s15922_s3 + $0x34c0] sm:$0xff]  ;;  %v8167_v15 = vld [vmem:[%s15922_s3 + $0x34a8] sm:$0xff] }
 0x4c3   : > { %6078 = vmatprep.subr.mxu0 %v8187_v19  ;;  %6006 = vmatpush1.msra.mxu1 %v8050_v41  ;;  %v8030_v24 = vld [vmem:[%s15922_s3 + $0x3060] sm:$0xff]  ;;  %v8027_v20 = vld [vmem:[%s15922_s3 + $0x3048] sm:$0xff] }
 0x4c4   : > { %6079 = vmatpush1.msra.mxu0 %v8186_v17  ;;  %6007 = vmatprep.subr.mxu1 %v8047_v29  ;;  %v8166_v21 = vld [vmem:[%s15922_s3 + $0x34a0] sm:$0xff]  ;;  %v8163_v27 = vld [vmem:[%s15922_s3 + $0x3488] sm:$0xff] }
 0x4c5   : > { %6080 = vmatprep.subr.mxu0 %v8183_v32  ;;  %6008 = vmatpush1.msra.mxu1 %v8046_v2  ;;  %v8026_v62 = vld [vmem:[%s15922_s3 + $0x3040] sm:$0xff]  ;;  %v8023_v6 = vld [vmem:[%s15922_s3 + $0x3028] sm:$0xff] }
 0x4c6   : > { %6081 = vmatpush1.msra.mxu0 %v8182_v13  ;;  %6009 = vmatprep.subr.mxu1 %v8043_v12  ;;  %v8162_v25 = vld [vmem:[%s15922_s3 + $0x3480] sm:$0xff]  ;;  %v8159_v55 = vld [vmem:[%s15922_s3 + $0x3468] sm:$0xff] }
 0x4c7   : > { %6082 = vmatprep.subr.mxu0 %v8179_v57  ;;  %6010 = vmatpush1.msra.mxu1 %v8042_v10  ;;  %v8022_v63 = vld [vmem:[%s15922_s3 + $0x3020] sm:$0xff]  ;;  %v8019_v19 = vld [vmem:[%s15922_s3 + $0x3008] sm:$0xff] }
 0x4c8   : > { %6083 = vmatpush1.msra.mxu0 %v8178_v1  ;;  %6011 = vmatprep.subr.mxu1 %v8039_v58  ;;  %v8158_v5 = vld [vmem:[%s15922_s3 + $0x3460] sm:$0xff]  ;;  %v8155_v41 = vld [vmem:[%s15922_s3 + $0x3448] sm:$0xff] }
 0x4c9   : > { %6084 = vmatprep.subr.mxu0 %v8175_v37  ;;  %6012 = vmatpush1.msra.mxu1 %v8038_v60  ;;  %v8018_v17 = vld [vmem:[%s15922_s3 + $0x3000] sm:$0xff]  ;;  %v8143_v32 = vld [vmem:[%s15922_s3 + $0x33e8] sm:$0xff] }
 0x4ca   : > { %6085 = vmatpush1.msra.mxu0 %v8174_v22  ;;  %6013 = vmatprep.subr.mxu1 %v8035_v0  ;;  %v8154_v29 = vld [vmem:[%s15922_s3 + $0x3440] sm:$0xff]  ;;  %v8151_v2 = vld [vmem:[%s15922_s3 + $0x3428] sm:$0xff] }
 0x4cb   : > { %6086 = vmatprep.subr.mxu0 %v8171_v7  ;;  %6014 = vmatpush1.msra.mxu1 %v8034_v38  ;;  %v8142_v13 = vld [vmem:[%s15922_s3 + $0x33e0] sm:$0xff]  ;;  %v8139_v57 = vld [vmem:[%s15922_s3 + $0x33c8] sm:$0xff] }
 0x4cc   : > { %6087 = vmatpush1.msra.mxu0 %v8170_v30  ;;  %6015 = vmatprep.subr.mxu1 %v8031_v40  ;;  %v8150_v12 = vld [vmem:[%s15922_s3 + $0x3420] sm:$0xff]  ;;  %v8147_v10 = vld [vmem:[%s15922_s3 + $0x3408] sm:$0xff] }
 0x4cd   : > { %6088 = vmatprep.subr.mxu0 %v8167_v15  ;;  %6016 = vmatpush1.msra.mxu1 %v8030_v24  ;;  %v8138_v1 = vld [vmem:[%s15922_s3 + $0x33c0] sm:$0xff]  ;;  %v8135_v37 = vld [vmem:[%s15922_s3 + $0x33a8] sm:$0xff] }
 0x4ce   : > { %6089 = vmatpush1.msra.mxu0 %v8166_v21  ;;  %6017 = vmatprep.subr.mxu1 %v8027_v20  ;;  %v8146_v58 = vld [vmem:[%s15922_s3 + $0x3400] sm:$0xff]  ;;  %v8271_v60 = vld [vmem:[%s15922_s3 + $0x37e8] sm:$0xff] }
 0x4cf   : > { %6090 = vmatprep.subr.mxu0 %v8163_v27  ;;  %6018 = vmatpush1.msra.mxu1 %v8026_v62  ;;  %v8134_v22 = vld [vmem:[%s15922_s3 + $0x33a0] sm:$0xff]  ;;  %v8131_v7 = vld [vmem:[%s15922_s3 + $0x3388] sm:$0xff] }
 0x4d0   : > { %6091 = vmatpush1.msra.mxu0 %v8162_v25  ;;  %6019 = vmatprep.subr.mxu1 %v8023_v6  ;;  %v8270_v0 = vld [vmem:[%s15922_s3 + $0x37e0] sm:$0xff]  ;;  %v8267_v38 = vld [vmem:[%s15922_s3 + $0x37c8] sm:$0xff] }
 0x4d1   : > { %6092 = vmatprep.subr.mxu0 %v8159_v55  ;;  %6020 = vmatpush1.msra.mxu1 %v8022_v63  ;;  %v8130_v30 = vld [vmem:[%s15922_s3 + $0x3380] sm:$0xff]  ;;  %v8127_v15 = vld [vmem:[%s15922_s3 + $0x3368] sm:$0xff] }
 0x4d2   : > { %6093 = vmatpush1.msra.mxu0 %v8158_v5  ;;  %6021 = vmatprep.subr.mxu1 %v8019_v19  ;;  %v8266_v40 = vld [vmem:[%s15922_s3 + $0x37c0] sm:$0xff]  ;;  %v8263_v24 = vld [vmem:[%s15922_s3 + $0x37a8] sm:$0xff] }
 0x4d3   : > { %6094 = vmatprep.subr.mxu0 %v8155_v41  ;;  %6022 = vmatpush1.msra.mxu1 %v8018_v17  ;;  %v8126_v21 = vld [vmem:[%s15922_s3 + $0x3360] sm:$0xff]  ;;  %v8123_v27 = vld [vmem:[%s15922_s3 + $0x3348] sm:$0xff] }
 0x4d4   : > { %6095 = vmatpush1.msra.mxu0 %v8154_v29  ;;  %6023 = vmatprep.subr.mxu1 %v8143_v32  ;;  %v8262_v20 = vld [vmem:[%s15922_s3 + $0x37a0] sm:$0xff]  ;;  %v8259_v62 = vld [vmem:[%s15922_s3 + $0x3788] sm:$0xff] }
 0x4d5   : > { %6096 = vmatprep.subr.mxu0 %v8151_v2  ;;  %6024 = vmatpush2.msra.mxu1 %v8142_v13  ;;  %v8122_v25 = vld [vmem:[%s15922_s3 + $0x3340] sm:$0xff]  ;;  %v8119_v55 = vld [vmem:[%s15922_s3 + $0x3328] sm:$0xff] }
 0x4d6   : > { %6097 = vmatpush1.msra.mxu0 %v8150_v12  ;;  %6025 = vmatprep.subr.mxu1 %v8139_v57  ;;  %v8258_v6 = vld [vmem:[%s15922_s3 + $0x3780] sm:$0xff]  ;;  %v8255_v63 = vld [vmem:[%s15922_s3 + $0x3768] sm:$0xff] }
 0x4d7   : > { %6098 = vmatprep.subr.mxu0 %v8147_v10  ;;  %6026 = vmatpush2.msra.mxu1 %v8138_v1  ;;  %v8118_v5 = vld [vmem:[%s15922_s3 + $0x3320] sm:$0xff]  ;;  %v8115_v41 = vld [vmem:[%s15922_s3 + $0x3308] sm:$0xff] }
 0x4d8   : > { %6099 = vmatpush1.msra.mxu0 %v8146_v58  ;;  %6027 = vmatprep.subr.mxu1 %v8135_v37  ;;  %v8254_v19 = vld [vmem:[%s15922_s3 + $0x3760] sm:$0xff]  ;;  %v8251_v17 = vld [vmem:[%s15922_s3 + $0x3748] sm:$0xff] }
 0x4d9   : > { %6100 = vmatprep.subr.mxu0 %v8271_v60  ;;  %6028 = vmatpush2.msra.mxu1 %v8134_v22  ;;  %v8114_v29 = vld [vmem:[%s15922_s3 + $0x3300] sm:$0xff]  ;;  %v8111_v2 = vld [vmem:[%s15922_s3 + $0x32e8] sm:$0xff] }
 0x4da   : > { %6101 = vmatpush2.msra.mxu0 %v8270_v0  ;;  %6029 = vmatprep.subr.mxu1 %v8131_v7  ;;  %v8250_v32 = vld [vmem:[%s15922_s3 + $0x3740] sm:$0xff]  ;;  %v8247_v13 = vld [vmem:[%s15922_s3 + $0x3728] sm:$0xff] }
 0x4db   : > { %6102 = vmatprep.subr.mxu0 %v8267_v38  ;;  %6030 = vmatpush2.msra.mxu1 %v8130_v30  ;;  %v8110_v12 = vld [vmem:[%s15922_s3 + $0x32e0] sm:$0xff]  ;;  %v8107_v10 = vld [vmem:[%s15922_s3 + $0x32c8] sm:$0xff] }
 0x4dc   : > { %6103 = vmatpush2.msra.mxu0 %v8266_v40  ;;  %6031 = vmatprep.subr.mxu1 %v8127_v15  ;;  %v8246_v57 = vld [vmem:[%s15922_s3 + $0x3720] sm:$0xff]  ;;  %v8243_v1 = vld [vmem:[%s15922_s3 + $0x3708] sm:$0xff] }
 0x4dd   : > { %6104 = vmatprep.subr.mxu0 %v8263_v24  ;;  %6032 = vmatpush2.msra.mxu1 %v8126_v21  ;;  %v8106_v58 = vld [vmem:[%s15922_s3 + $0x32c0] sm:$0xff]  ;;  %v8103_v60 = vld [vmem:[%s15922_s3 + $0x32a8] sm:$0xff] }
 0x4de   : > { %6105 = vmatpush2.msra.mxu0 %v8262_v20  ;;  %6033 = vmatprep.subr.mxu1 %v8123_v27  ;;  %v8242_v37 = vld [vmem:[%s15922_s3 + $0x3700] sm:$0xff]  ;;  %v8239_v22 = vld [vmem:[%s15922_s3 + $0x36e8] sm:$0xff] }
 0x4df   : > { %6106 = vmatprep.subr.mxu0 %v8259_v62  ;;  %6034 = vmatpush2.msra.mxu1 %v8122_v25  ;;  %v8102_v0 = vld [vmem:[%s15922_s3 + $0x32a0] sm:$0xff]  ;;  %v8099_v38 = vld [vmem:[%s15922_s3 + $0x3288] sm:$0xff] }
 0x4e0   : > { %6107 = vmatpush2.msra.mxu0 %v8258_v6  ;;  %6035 = vmatprep.subr.mxu1 %v8119_v55  ;;  %v8238_v7 = vld [vmem:[%s15922_s3 + $0x36e0] sm:$0xff]  ;;  %v8235_v30 = vld [vmem:[%s15922_s3 + $0x36c8] sm:$0xff] }
 0x4e1   : > { %6108 = vmatprep.subr.mxu0 %v8255_v63  ;;  %6036 = vmatpush2.msra.mxu1 %v8118_v5  ;;  %v8098_v40 = vld [vmem:[%s15922_s3 + $0x3280] sm:$0xff]  ;;  %v8095_v24 = vld [vmem:[%s15922_s3 + $0x3268] sm:$0xff] }
 0x4e2   : > { %6109 = vmatpush2.msra.mxu0 %v8254_v19  ;;  %6037 = vmatprep.subr.mxu1 %v8115_v41  ;;  %v8234_v15 = vld [vmem:[%s15922_s3 + $0x36c0] sm:$0xff]  ;;  %v8231_v21 = vld [vmem:[%s15922_s3 + $0x36a8] sm:$0xff] }
 0x4e3   : > { %6110 = vmatprep.subr.mxu0 %v8251_v17  ;;  %6038 = vmatpush2.msra.mxu1 %v8114_v29  ;;  %v8094_v20 = vld [vmem:[%s15922_s3 + $0x3260] sm:$0xff]  ;;  %v8091_v62 = vld [vmem:[%s15922_s3 + $0x3248] sm:$0xff] }
 0x4e4   : > { %6111 = vmatpush2.msra.mxu0 %v8250_v32  ;;  %6039 = vmatprep.subr.mxu1 %v8111_v2  ;;  %v8230_v27 = vld [vmem:[%s15922_s3 + $0x36a0] sm:$0xff]  ;;  %v8227_v25 = vld [vmem:[%s15922_s3 + $0x3688] sm:$0xff] }
 0x4e5   : > { %6112 = vmatprep.subr.mxu0 %v8247_v13  ;;  %6040 = vmatpush2.msra.mxu1 %v8110_v12  ;;  %v8090_v6 = vld [vmem:[%s15922_s3 + $0x3240] sm:$0xff]  ;;  %v8087_v63 = vld [vmem:[%s15922_s3 + $0x3228] sm:$0xff] }
 0x4e6   : > { %6113 = vmatpush2.msra.mxu0 %v8246_v57  ;;  %6041 = vmatprep.subr.mxu1 %v8107_v10  ;;  %v8226_v55 = vld [vmem:[%s15922_s3 + $0x3680] sm:$0xff]  ;;  %v8223_v5 = vld [vmem:[%s15922_s3 + $0x3668] sm:$0xff] }
 0x4e7   : > { %6114 = vmatprep.subr.mxu0 %v8243_v1  ;;  %6042 = vmatpush2.msra.mxu1 %v8106_v58  ;;  %v8086_v19 = vld [vmem:[%s15922_s3 + $0x3220] sm:$0xff]  ;;  %v8083_v17 = vld [vmem:[%s15922_s3 + $0x3208] sm:$0xff] }
 0x4e8   : > { %6115 = vmatpush2.msra.mxu0 %v8242_v37  ;;  %6043 = vmatprep.subr.mxu1 %v8103_v60  ;;  %v8222_v41 = vld [vmem:[%s15922_s3 + $0x3660] sm:$0xff]  ;;  %v8219_v29 = vld [vmem:[%s15922_s3 + $0x3648] sm:$0xff] }
 0x4e9   : > { %6116 = vmatprep.subr.mxu0 %v8239_v22  ;;  %6044 = vmatpush2.msra.mxu1 %v8102_v0  ;;  %v8082_v32 = vld [vmem:[%s15922_s3 + $0x3200] sm:$0xff]  ;;  %v8215_v13 = vld [vmem:[%s15922_s3 + $0x3628] sm:$0xff]  ;;  %v8081_v0 = vld [vmem:[%s15922_s3 + $0x31f8] sm:$0xff] }
 0x4ea   : > { %6117 = vmatpush2.msra.mxu0 %v8238_v7  ;;  %6045 = vmatprep.subr.mxu1 %v8099_v38  ;;  %v8218_v2 = vld [vmem:[%s15922_s3 + $0x3640] sm:$0xff]  ;;  %v8335_v12 = vld [vmem:[%s15922_s3 + $0x39e8] sm:$0xff]  ;;  %v8080_v38 = vld [vmem:[%s15922_s3 + $0x31f0] sm:$0xff] }
 0x4eb   : > { %6118 = vmatprep.subr.mxu0 %v8235_v30  ;;  %6046 = vmatpush2.msra.mxu1 %v8098_v40  ;;  %v8214_v57 = vld [vmem:[%s15922_s3 + $0x3620] sm:$0xff]  ;;  %v8211_v1 = vld [vmem:[%s15922_s3 + $0x3608] sm:$0xff]  ;;  %v8077_v40 = vld [vmem:[%s15922_s3 + $0x31d8] sm:$0xff] }
 0x4ec   : > { %6119 = vmatpush2.msra.mxu0 %v8234_v15  ;;  %6047 = vmatprep.subr.mxu1 %v8095_v24  ;;  %v8334_v10 = vld [vmem:[%s15922_s3 + $0x39e0] sm:$0xff]  ;;  %v8331_v58 = vld [vmem:[%s15922_s3 + $0x39c8] sm:$0xff]  ;;  %v8076_v24 = vld [vmem:[%s15922_s3 + $0x31d0] sm:$0xff] }
 0x4ed   : > { %6120 = vmatprep.subr.mxu0 %v8231_v21  ;;  %6048 = vmatpush2.msra.mxu1 %v8094_v20  ;;  %v8210_v37 = vld [vmem:[%s15922_s3 + $0x3600] sm:$0xff]  ;;  %v8327_v22 = vld [vmem:[%s15922_s3 + $0x39a8] sm:$0xff]  ;;  %v8073_v20 = vld [vmem:[%s15922_s3 + $0x31b8] sm:$0xff] }
 0x4ee   : > { %6121 = vmatpush2.msra.mxu0 %v8230_v27  ;;  %6049 = vmatprep.subr.mxu1 %v8091_v62  ;;  %v8330_v60 = vld [vmem:[%s15922_s3 + $0x39c0] sm:$0xff]  ;;  %v8323_v30 = vld [vmem:[%s15922_s3 + $0x3988] sm:$0xff]  ;;  %v8072_v62 = vld [vmem:[%s15922_s3 + $0x31b0] sm:$0xff] }
 0x4ef   : > { %6122 = vmatprep.subr.mxu0 %v8227_v25  ;;  %6050 = vmatpush2.msra.mxu1 %v8090_v6  ;;  %v8326_v7 = vld [vmem:[%s15922_s3 + $0x39a0] sm:$0xff]  ;;  %v8319_v21 = vld [vmem:[%s15922_s3 + $0x3968] sm:$0xff]  ;;  %v8069_v6 = vld [vmem:[%s15922_s3 + $0x3198] sm:$0xff] }
 0x4f0   : > { %6123 = vmatpush2.msra.mxu0 %v8226_v55  ;;  %6051 = vmatprep.subr.mxu1 %v8087_v63  ;;  %v8322_v15 = vld [vmem:[%s15922_s3 + $0x3980] sm:$0xff]  ;;  %v8315_v25 = vld [vmem:[%s15922_s3 + $0x3948] sm:$0xff]  ;;  %v8068_v63 = vld [vmem:[%s15922_s3 + $0x3190] sm:$0xff] }
 0x4f1   : > { %6124 = vmatprep.subr.mxu0 %v8223_v5  ;;  %6052 = vmatpush2.msra.mxu1 %v8086_v19  ;;  %v8318_v27 = vld [vmem:[%s15922_s3 + $0x3960] sm:$0xff]  ;;  %v8311_v5 = vld [vmem:[%s15922_s3 + $0x3928] sm:$0xff]  ;;  %v8065_v19 = vld [vmem:[%s15922_s3 + $0x3178] sm:$0xff] }
 0x4f2   : > { %6125 = vmatpush2.msra.mxu0 %v8222_v41  ;;  %6053 = vmatprep.subr.mxu1 %v8083_v17  ;;  %v8314_v55 = vld [vmem:[%s15922_s3 + $0x3940] sm:$0xff]  ;;  %v8064_v17 = vld [vmem:[%s15922_s3 + $0x3170] sm:$0xff] }
 0x4f3   : > { %6126 = vmatprep.subr.mxu0 %v8219_v29  ;;  %6054 = vmatpush2.msra.mxu1 %v8082_v32  ;;  %v8310_v41 = vld [vmem:[%s15922_s3 + $0x3920] sm:$0xff]  ;;  %v8061_v29 = vld [vmem:[%s15922_s3 + $0x3158] sm:$0xff] }
 0x4f4   : > { %6127 = vmatpush2.msra.mxu0 %v8218_v2  ;;  %6056 = vmatmul.mubr.f32.vlgmr.msra.gmra.mxu1 %v9913_v52  ;;  %v8306_v32 = vld [vmem:[%s15922_s3 + $0x3900] sm:$0xff]  ;;  %v8060_v2 = vld [vmem:[%s15922_s3 + $0x3150] sm:$0xff] }
 0x4f5   : > { %6128 = vmatprep.subr.mxu0 %v8215_v13  ;;  %6145 = vmatprep.subr.mxu1 %v8335_v12  ;;  %v8303_v13 = vld [vmem:[%s15922_s3 + $0x38e8] sm:$0xff]  ;;  %v8057_v12 = vld [vmem:[%s15922_s3 + $0x3138] sm:$0xff] }
 0x4f6   : > { %6061 = vmatprep.mubr.f32.mxu1 %v9925_v16  ;;  %6129 = vmatpush2.msra.mxu0 %v8214_v57  ;;  %v8302_v57 = vld [vmem:[%s15922_s3 + $0x38e0] sm:$0xff] }
 0x4f7   : > { %6146 = vmatpush1.msra.mxu1 %v8334_v10  ;;  %6130 = vmatprep.subr.mxu0 %v8211_v1  ;;  %v8056_v10 = vld [vmem:[%s15922_s3 + $0x3130] sm:$0xff]  ;;  %v8299_v1 = vld [vmem:[%s15922_s3 + $0x38c8] sm:$0xff] }
 0x4f8   : > { %6147 = vmatprep.subr.mxu1 %v8331_v58  ;;  %6131 = vmatpush2.msra.mxu0 %v8210_v37  ;;  %v8053_v58 = vld [vmem:[%s15922_s3 + $0x3118] sm:$0xff]  ;;  %v8298_v37 = vld [vmem:[%s15922_s3 + $0x38c0] sm:$0xff] }
 0x4f9   : > { %6148 = vmatpush1.msra.mxu1 %v8330_v60  ;;  %6133 = vmatmul.mubr.f32.vlgmr.msra.gmra.mxu0 %v9961_v42  ;;  %v8052_v60 = vld [vmem:[%s15922_s3 + $0x3110] sm:$0xff] }
 0x4fa   : > { %6062 = vmatmul.mubr.f32.gmra.mxu1 %v9988_v34  ;;  %6149 = vmatprep.subr.mxu1 %v8327_v22  ;;  %v8295_v22 = vld [vmem:[%s15922_s3 + $0x38a8] sm:$0xff] }
 0x4fb   : > { %6222 = vmatprep.subr.mxu0 %v8081_v0  ;;  %6138 = vmatprep.mubr.f32.mxu0 %v9985_v31  ;;  %v8049_v0 = vld [vmem:[%s15922_s3 + $0x30f8] sm:$0xff] }
 0x4fc   : > { %6150 = vmatpush1.msra.mxu1 %v8326_v7  ;;  %6209 = vmatprep.mubr.f32.mxu1 %v10018_v28  ;;  %v8294_v7 = vld [vmem:[%s15922_s3 + $0x38a0] sm:$0xff] }
 0x4fd   : > { %6223 = vmatpush1.msra.mxu0 %v8080_v38  ;;  %6151 = vmatprep.subr.mxu1 %v8323_v30  ;;  %v8048_v38 = vld [vmem:[%s15922_s3 + $0x30f0] sm:$0xff]  ;;  %v8291_v30 = vld [vmem:[%s15922_s3 + $0x3888] sm:$0xff] }
 0x4fe   : > { %6224 = vmatprep.subr.mxu0 %v8077_v40  ;;  %6152 = vmatpush1.msra.mxu1 %v8322_v15  ;;  %v8045_v40 = vld [vmem:[%s15922_s3 + $0x30d8] sm:$0xff]  ;;  %v8290_v15 = vld [vmem:[%s15922_s3 + $0x3880] sm:$0xff] }
 0x4ff   : > { %6225 = vmatpush1.msra.mxu0 %v8076_v24  ;;  %6153 = vmatprep.subr.mxu1 %v8319_v21  ;;  %v8044_v24 = vld [vmem:[%s15922_s3 + $0x30d0] sm:$0xff]  ;;  %v8287_v21 = vld [vmem:[%s15922_s3 + $0x3868] sm:$0xff] }
 0x500   : > { %6139 = vmatmul.mubr.f32.gmra.mxu0 %v9982_v46  ;;  %6226 = vmatprep.subr.mxu0 %v8073_v20  ;;  %v8041_v20 = vld [vmem:[%s15922_s3 + $0x30b8] sm:$0xff] }
 0x501   : > { %6154 = vmatpush1.msra.mxu1 %v8318_v27  ;;  %6227 = vmatpush1.msra.mxu0 %v8072_v62  ;;  %v8286_v27 = vld [vmem:[%s15922_s3 + $0x3860] sm:$0xff]  ;;  %v8040_v62 = vld [vmem:[%s15922_s3 + $0x30b0] sm:$0xff] }
 0x502   : > { %6286 = vmatprep.mubr.f32.mxu0 %v9916_v43  ;;  %6155 = vmatprep.subr.mxu1 %v8315_v25  ;;  %v8307_v43 = vld [vmem:[%s15922_s3 + $0x3908] sm:$0xff] }
 0x503   : > { %6228 = vmatprep.subr.mxu0 %v8069_v6  ;;  %6156 = vmatpush1.msra.mxu1 %v8314_v55  ;;  %v8283_v25 = vld [vmem:[%s15922_s3 + $0x3848] sm:$0xff]  ;;  %v8037_v6 = vld [vmem:[%s15922_s3 + $0x3098] sm:$0xff]  ;;  %v8282_v55 = vld [vmem:[%s15922_s3 + $0x3840] sm:$0xff] }
 0x504   : > { %6229 = vmatpush1.msra.mxu0 %v8068_v63  ;;  %6157 = vmatprep.subr.mxu1 %v8311_v5  ;;  %v8036_v63 = vld [vmem:[%s15922_s3 + $0x3090] sm:$0xff]  ;;  %v8279_v5 = vld [vmem:[%s15922_s3 + $0x3828] sm:$0xff] }
 0x505   : > { %6230 = vmatprep.subr.mxu0 %v8065_v19  ;;  %6158 = vmatpush1.msra.mxu1 %v8310_v41  ;;  %v8033_v19 = vld [vmem:[%s15922_s3 + $0x3078] sm:$0xff]  ;;  %v8278_v41 = vld [vmem:[%s15922_s3 + $0x3820] sm:$0xff] }
 0x506   : > { %6231 = vmatpush1.msra.mxu0 %v8064_v17  ;;  %6159 = vmatprep.subr.mxu1 %v8307_v43  ;;  %v8032_v17 = vld [vmem:[%s15922_s3 + $0x3070] sm:$0xff]  ;;  %v8275_v43 = vld [vmem:[%s15922_s3 + $0x3808] sm:$0xff] }
 0x507   : > { %6232 = vmatprep.subr.mxu0 %v8061_v29  ;;  %6160 = vmatpush1.msra.mxu1 %v8306_v32  ;;  %v8029_v29 = vld [vmem:[%s15922_s3 + $0x3058] sm:$0xff]  ;;  %v8274_v32 = vld [vmem:[%s15922_s3 + $0x3800] sm:$0xff] }
 0x508   : > { %6233 = vmatpush1.msra.mxu0 %v8060_v2  ;;  %6161 = vmatprep.subr.mxu1 %v8303_v13  ;;  %v8028_v2 = vld [vmem:[%s15922_s3 + $0x3050] sm:$0xff]  ;;  %v8399_v13 = vld [vmem:[%s15922_s3 + $0x3be8] sm:$0xff] }
 0x509   : > { %6234 = vmatprep.subr.mxu0 %v8057_v12  ;;  %6162 = vmatpush1.msra.mxu1 %v8302_v57  ;;  %v8025_v12 = vld [vmem:[%s15922_s3 + $0x3038] sm:$0xff]  ;;  %v8398_v57 = vld [vmem:[%s15922_s3 + $0x3be0] sm:$0xff] }
 0x50a   : > { %6235 = vmatpush1.msra.mxu0 %v8056_v10  ;;  %6163 = vmatprep.subr.mxu1 %v8299_v1  ;;  %v8024_v10 = vld [vmem:[%s15922_s3 + $0x3030] sm:$0xff]  ;;  %v8395_v1 = vld [vmem:[%s15922_s3 + $0x3bc8] sm:$0xff] }
 0x50b   : > { %6236 = vmatprep.subr.mxu0 %v8053_v58  ;;  %6164 = vmatpush1.msra.mxu1 %v8298_v37  ;;  %v8021_v58 = vld [vmem:[%s15922_s3 + $0x3018] sm:$0xff]  ;;  %v8394_v37 = vld [vmem:[%s15922_s3 + $0x3bc0] sm:$0xff] }
 0x50c   : > { %6237 = vmatpush1.msra.mxu0 %v8052_v60  ;;  %6165 = vmatprep.subr.mxu1 %v8295_v22  ;;  %v8020_v60 = vld [vmem:[%s15922_s3 + $0x3010] sm:$0xff]  ;;  %v8391_v22 = vld [vmem:[%s15922_s3 + $0x3ba8] sm:$0xff] }
 0x50d   : > { %6238 = vmatprep.subr.mxu0 %v8049_v0  ;;  %6166 = vmatpush1.msra.mxu1 %v8294_v7  ;;  %v8145_v0 = vld [vmem:[%s15922_s3 + $0x33f8] sm:$0xff]  ;;  %v8390_v7 = vld [vmem:[%s15922_s3 + $0x3ba0] sm:$0xff] }
 0x50e   : > { %6239 = vmatpush1.msra.mxu0 %v8048_v38  ;;  %6167 = vmatprep.subr.mxu1 %v8291_v30  ;;  %v8144_v38 = vld [vmem:[%s15922_s3 + $0x33f0] sm:$0xff]  ;;  %v8387_v30 = vld [vmem:[%s15922_s3 + $0x3b88] sm:$0xff] }
 0x50f   : > { %6240 = vmatprep.subr.mxu0 %v8045_v40  ;;  %6168 = vmatpush1.msra.mxu1 %v8290_v15  ;;  %v8141_v40 = vld [vmem:[%s15922_s3 + $0x33d8] sm:$0xff]  ;;  %v8386_v15 = vld [vmem:[%s15922_s3 + $0x3b80] sm:$0xff] }
 0x510   : > { %6241 = vmatpush1.msra.mxu0 %v8044_v24  ;;  %6169 = vmatprep.subr.mxu1 %v8287_v21  ;;  %v8140_v24 = vld [vmem:[%s15922_s3 + $0x33d0] sm:$0xff]  ;;  %v8383_v21 = vld [vmem:[%s15922_s3 + $0x3b68] sm:$0xff] }
 0x511   : > { %6242 = vmatprep.subr.mxu0 %v8041_v20  ;;  %6170 = vmatpush1.msra.mxu1 %v8286_v27  ;;  %v8137_v20 = vld [vmem:[%s15922_s3 + $0x33b8] sm:$0xff]  ;;  %v8382_v27 = vld [vmem:[%s15922_s3 + $0x3b60] sm:$0xff] }
 0x512   : > { %6243 = vmatpush1.msra.mxu0 %v8040_v62  ;;  %6171 = vmatprep.subr.mxu1 %v8283_v25  ;;  %v8136_v62 = vld [vmem:[%s15922_s3 + $0x33b0] sm:$0xff]  ;;  %v8379_v25 = vld [vmem:[%s15922_s3 + $0x3b48] sm:$0xff] }
 0x513   : > { %6244 = vmatprep.subr.mxu0 %v8037_v6  ;;  %6172 = vmatpush1.msra.mxu1 %v8282_v55  ;;  %v8133_v6 = vld [vmem:[%s15922_s3 + $0x3398] sm:$0xff]  ;;  %v8378_v55 = vld [vmem:[%s15922_s3 + $0x3b40] sm:$0xff] }
 0x514   : > { %6245 = vmatpush1.msra.mxu0 %v8036_v63  ;;  %6173 = vmatprep.subr.mxu1 %v8279_v5  ;;  %v8132_v63 = vld [vmem:[%s15922_s3 + $0x3390] sm:$0xff]  ;;  %v8375_v5 = vld [vmem:[%s15922_s3 + $0x3b28] sm:$0xff] }
 0x515   : > { %6246 = vmatprep.subr.mxu0 %v8033_v19  ;;  %6174 = vmatpush1.msra.mxu1 %v8278_v41  ;;  %v8129_v19 = vld [vmem:[%s15922_s3 + $0x3378] sm:$0xff]  ;;  %v8374_v41 = vld [vmem:[%s15922_s3 + $0x3b20] sm:$0xff] }
 0x516   : > { %6247 = vmatpush1.msra.mxu0 %v8032_v17  ;;  %6175 = vmatprep.subr.mxu1 %v8275_v43  ;;  %v8128_v17 = vld [vmem:[%s15922_s3 + $0x3370] sm:$0xff]  ;;  %v8371_v43 = vld [vmem:[%s15922_s3 + $0x3b08] sm:$0xff] }
 0x517   : > { %6248 = vmatprep.subr.mxu0 %v8029_v29  ;;  %6176 = vmatpush1.msra.mxu1 %v8274_v32  ;;  %v8125_v29 = vld [vmem:[%s15922_s3 + $0x3358] sm:$0xff]  ;;  %v8370_v32 = vld [vmem:[%s15922_s3 + $0x3b00] sm:$0xff] }
 0x518   : > { %6249 = vmatpush1.msra.mxu0 %v8028_v2  ;;  %6177 = vmatprep.subr.mxu1 %v8399_v13  ;;  %v8124_v2 = vld [vmem:[%s15922_s3 + $0x3350] sm:$0xff]  ;;  %v8367_v13 = vld [vmem:[%s15922_s3 + $0x3ae8] sm:$0xff] }
 0x519   : > { %6250 = vmatprep.subr.mxu0 %v8025_v12  ;;  %6178 = vmatpush2.msra.mxu1 %v8398_v57  ;;  %v8121_v12 = vld [vmem:[%s15922_s3 + $0x3338] sm:$0xff]  ;;  %v8366_v57 = vld [vmem:[%s15922_s3 + $0x3ae0] sm:$0xff] }
 0x51a   : > { %6251 = vmatpush1.msra.mxu0 %v8024_v10  ;;  %6179 = vmatprep.subr.mxu1 %v8395_v1  ;;  %v8120_v10 = vld [vmem:[%s15922_s3 + $0x3330] sm:$0xff]  ;;  %v8363_v1 = vld [vmem:[%s15922_s3 + $0x3ac8] sm:$0xff] }
 0x51b   : > { %6252 = vmatprep.subr.mxu0 %v8021_v58  ;;  %6180 = vmatpush2.msra.mxu1 %v8394_v37  ;;  %v8117_v58 = vld [vmem:[%s15922_s3 + $0x3318] sm:$0xff]  ;;  %v8362_v37 = vld [vmem:[%s15922_s3 + $0x3ac0] sm:$0xff] }
 0x51c   : > { %6253 = vmatpush1.msra.mxu0 %v8020_v60  ;;  %6181 = vmatprep.subr.mxu1 %v8391_v22  ;;  %v8116_v60 = vld [vmem:[%s15922_s3 + $0x3310] sm:$0xff]  ;;  %v8359_v22 = vld [vmem:[%s15922_s3 + $0x3aa8] sm:$0xff] }
 0x51d   : > { %6254 = vmatprep.subr.mxu0 %v8145_v0  ;;  %6182 = vmatpush2.msra.mxu1 %v8390_v7  ;;  %v8113_v0 = vld [vmem:[%s15922_s3 + $0x32f8] sm:$0xff]  ;;  %v8358_v7 = vld [vmem:[%s15922_s3 + $0x3aa0] sm:$0xff] }
 0x51e   : > { %6255 = vmatpush2.msra.mxu0 %v8144_v38  ;;  %6183 = vmatprep.subr.mxu1 %v8387_v30  ;;  %v8112_v38 = vld [vmem:[%s15922_s3 + $0x32f0] sm:$0xff]  ;;  %v8355_v30 = vld [vmem:[%s15922_s3 + $0x3a88] sm:$0xff] }
 0x51f   : > { %6256 = vmatprep.subr.mxu0 %v8141_v40  ;;  %6184 = vmatpush2.msra.mxu1 %v8386_v15  ;;  %v8109_v40 = vld [vmem:[%s15922_s3 + $0x32d8] sm:$0xff]  ;;  %v8354_v15 = vld [vmem:[%s15922_s3 + $0x3a80] sm:$0xff] }
 0x520   : > { %6257 = vmatpush2.msra.mxu0 %v8140_v24  ;;  %6185 = vmatprep.subr.mxu1 %v8383_v21  ;;  %v8108_v24 = vld [vmem:[%s15922_s3 + $0x32d0] sm:$0xff]  ;;  %v8351_v21 = vld [vmem:[%s15922_s3 + $0x3a68] sm:$0xff] }
 0x521   : > { %6258 = vmatprep.subr.mxu0 %v8137_v20  ;;  %6186 = vmatpush2.msra.mxu1 %v8382_v27  ;;  %v8105_v20 = vld [vmem:[%s15922_s3 + $0x32b8] sm:$0xff]  ;;  %v8350_v27 = vld [vmem:[%s15922_s3 + $0x3a60] sm:$0xff] }
 0x522   : > { %6259 = vmatpush2.msra.mxu0 %v8136_v62  ;;  %6187 = vmatprep.subr.mxu1 %v8379_v25  ;;  %v8104_v62 = vld [vmem:[%s15922_s3 + $0x32b0] sm:$0xff]  ;;  %v8347_v25 = vld [vmem:[%s15922_s3 + $0x3a48] sm:$0xff] }
 0x523   : > { %6260 = vmatprep.subr.mxu0 %v8133_v6  ;;  %6188 = vmatpush2.msra.mxu1 %v8378_v55  ;;  %v8101_v6 = vld [vmem:[%s15922_s3 + $0x3298] sm:$0xff]  ;;  %v8346_v55 = vld [vmem:[%s15922_s3 + $0x3a40] sm:$0xff] }
 0x524   : > { %6261 = vmatpush2.msra.mxu0 %v8132_v63  ;;  %6189 = vmatprep.subr.mxu1 %v8375_v5  ;;  %v8100_v63 = vld [vmem:[%s15922_s3 + $0x3290] sm:$0xff]  ;;  %v8343_v5 = vld [vmem:[%s15922_s3 + $0x3a28] sm:$0xff] }
 0x525   : > { %6262 = vmatprep.subr.mxu0 %v8129_v19  ;;  %6190 = vmatpush2.msra.mxu1 %v8374_v41  ;;  %v8097_v19 = vld [vmem:[%s15922_s3 + $0x3278] sm:$0xff]  ;;  %v8342_v41 = vld [vmem:[%s15922_s3 + $0x3a20] sm:$0xff] }
 0x526   : > { %6263 = vmatpush2.msra.mxu0 %v8128_v17  ;;  %6191 = vmatprep.subr.mxu1 %v8371_v43  ;;  %v8096_v17 = vld [vmem:[%s15922_s3 + $0x3270] sm:$0xff]  ;;  %v8339_v43 = vld [vmem:[%s15922_s3 + $0x3a08] sm:$0xff] }
 0x527   : > { %6264 = vmatprep.subr.mxu0 %v8125_v29  ;;  %6192 = vmatpush2.msra.mxu1 %v8370_v32  ;;  %v8093_v29 = vld [vmem:[%s15922_s3 + $0x3258] sm:$0xff]  ;;  %v8338_v32 = vld [vmem:[%s15922_s3 + $0x3a00] sm:$0xff] }
 0x528   : > { %6265 = vmatpush2.msra.mxu0 %v8124_v2  ;;  %6193 = vmatprep.subr.mxu1 %v8367_v13  ;;  %v8092_v2 = vld [vmem:[%s15922_s3 + $0x3250] sm:$0xff]  ;;  %v8089_v13 = vld [vmem:[%s15922_s3 + $0x3238] sm:$0xff] }
 0x529   : > { %6266 = vmatprep.subr.mxu0 %v8121_v12  ;;  %6194 = vmatpush2.msra.mxu1 %v8366_v57  ;;  %v8209_v12 = vld [vmem:[%s15922_s3 + $0x35f8] sm:$0xff]  ;;  %v8088_v57 = vld [vmem:[%s15922_s3 + $0x3230] sm:$0xff] }
 0x52a   : > { %6267 = vmatpush2.msra.mxu0 %v8120_v10  ;;  %6195 = vmatprep.subr.mxu1 %v8363_v1  ;;  %v8208_v10 = vld [vmem:[%s15922_s3 + $0x35f0] sm:$0xff]  ;;  %v8085_v1 = vld [vmem:[%s15922_s3 + $0x3218] sm:$0xff] }
 0x52b   : > { %6268 = vmatprep.subr.mxu0 %v8117_v58  ;;  %6196 = vmatpush2.msra.mxu1 %v8362_v37  ;;  %v8205_v58 = vld [vmem:[%s15922_s3 + $0x35d8] sm:$0xff]  ;;  %v8084_v37 = vld [vmem:[%s15922_s3 + $0x3210] sm:$0xff] }
 0x52c   : > { %6269 = vmatpush2.msra.mxu0 %v8116_v60  ;;  %6197 = vmatprep.subr.mxu1 %v8359_v22  ;;  %v8204_v60 = vld [vmem:[%s15922_s3 + $0x35d0] sm:$0xff]  ;;  %v8201_v22 = vld [vmem:[%s15922_s3 + $0x35b8] sm:$0xff] }
 0x52d   : > { %6270 = vmatprep.subr.mxu0 %v8113_v0  ;;  %6198 = vmatpush2.msra.mxu1 %v8358_v7  ;;  %v8337_v0 = vld [vmem:[%s15922_s3 + $0x39f8] sm:$0xff]  ;;  %v8200_v7 = vld [vmem:[%s15922_s3 + $0x35b0] sm:$0xff] }
 0x52e   : > { %6271 = vmatpush2.msra.mxu0 %v8112_v38  ;;  %6199 = vmatprep.subr.mxu1 %v8355_v30  ;;  %v8336_v38 = vld [vmem:[%s15922_s3 + $0x39f0] sm:$0xff]  ;;  %v8197_v30 = vld [vmem:[%s15922_s3 + $0x3598] sm:$0xff] }
 0x52f   : > { %6272 = vmatprep.subr.mxu0 %v8109_v40  ;;  %6200 = vmatpush2.msra.mxu1 %v8354_v15  ;;  %v8333_v40 = vld [vmem:[%s15922_s3 + $0x39d8] sm:$0xff]  ;;  %v8332_v15 = vld [vmem:[%s15922_s3 + $0x39d0] sm:$0xff] }
 0x530   : > { %6273 = vmatpush2.msra.mxu0 %v8108_v24  ;;  %6201 = vmatprep.subr.mxu1 %v8351_v21  ;;  %v8193_v24 = vld [vmem:[%s15922_s3 + $0x3578] sm:$0xff]  ;;  %v8192_v21 = vld [vmem:[%s15922_s3 + $0x3570] sm:$0xff] }
 0x531   : > { %6274 = vmatprep.subr.mxu0 %v8105_v20  ;;  %6202 = vmatpush2.msra.mxu1 %v8350_v27  ;;  %v8189_v20 = vld [vmem:[%s15922_s3 + $0x3558] sm:$0xff] }
 0x532   : > { %6275 = vmatpush2.msra.mxu0 %v8104_v62  ;;  %6203 = vmatprep.subr.mxu1 %v8347_v25  ;;  %v8325_v27 = vld [vmem:[%s15922_s3 + $0x3998] sm:$0xff]  ;;  %v8188_v62 = vld [vmem:[%s15922_s3 + $0x3550] sm:$0xff] }
 0x533   : > { %6276 = vmatprep.subr.mxu0 %v8101_v6  ;;  %6204 = vmatpush2.msra.mxu1 %v8346_v55  ;;  %v8324_v25 = vld [vmem:[%s15922_s3 + $0x3990] sm:$0xff]  ;;  %v8321_v6 = vld [vmem:[%s15922_s3 + $0x3978] sm:$0xff] }
 0x534   : > { %6277 = vmatpush2.msra.mxu0 %v8100_v63  ;;  %6205 = vmatprep.subr.mxu1 %v8343_v5  ;;  %v8184_v55 = vld [vmem:[%s15922_s3 + $0x3530] sm:$0xff]  ;;  %v8317_v5 = vld [vmem:[%s15922_s3 + $0x3958] sm:$0xff] }
 0x535   : > { %6278 = vmatprep.subr.mxu0 %v8097_v19  ;;  %6206 = vmatpush2.msra.mxu1 %v8342_v41  ;;  %v8320_v63 = vld [vmem:[%s15922_s3 + $0x3970] sm:$0xff] }
 0x536   : > { %6279 = vmatpush2.msra.mxu0 %v8096_v17  ;;  %6207 = vmatprep.subr.mxu1 %v8339_v43  ;;  %v8180_v19 = vld [vmem:[%s15922_s3 + $0x3510] sm:$0xff]  ;;  %v8177_v17 = vld [vmem:[%s15922_s3 + $0x34f8] sm:$0xff] }
 0x537   : > { %6280 = vmatprep.subr.mxu0 %v8093_v29  ;;  %6208 = vmatpush2.msra.mxu1 %v8338_v32  ;;  %v8316_v41 = vld [vmem:[%s15922_s3 + $0x3950] sm:$0xff]  ;;  %v8313_v43 = vld [vmem:[%s15922_s3 + $0x3938] sm:$0xff] }
 0x538   : > { %6281 = vmatpush2.msra.mxu0 %v8092_v2  ;;  %6210 = vmatmul.mubr.f32.vlgmr.msra.gmra.mxu1 %v10370_v9  ;;  %v8176_v29 = vld [vmem:[%s15922_s3 + $0x34f0] sm:$0xff]  ;;  %v8173_v2 = vld [vmem:[%s15922_s3 + $0x34d8] sm:$0xff] }
 0x539   : > { %6282 = vmatprep.subr.mxu0 %v8089_v13  ;;  %6299 = vmatprep.subr.mxu1 %v8209_v12  ;;  %v8312_v32 = vld [vmem:[%s15922_s3 + $0x3930] sm:$0xff]  ;;  %v8309_v13 = vld [vmem:[%s15922_s3 + $0x3918] sm:$0xff] }
 0x53a   : > { %6215 = vmatprep.mubr.f32.mxu1 %v10394_v4  ;;  %6283 = vmatpush2.msra.mxu0 %v8088_v57  ;;  %v8172_v12 = vld [vmem:[%s15922_s3 + $0x34d0] sm:$0xff] }
 0x53b   : > { %6300 = vmatpush1.msra.mxu1 %v8208_v10  ;;  %6284 = vmatprep.subr.mxu0 %v8085_v1  ;;  %v8308_v57 = vld [vmem:[%s15922_s3 + $0x3910] sm:$0xff]  ;;  %v8169_v10 = vld [vmem:[%s15922_s3 + $0x34b8] sm:$0xff] }
 0x53c   : > { %6301 = vmatprep.subr.mxu1 %v8205_v58  ;;  %6285 = vmatpush2.msra.mxu0 %v8084_v37  ;;  %v8305_v1 = vld [vmem:[%s15922_s3 + $0x38f8] sm:$0xff]  ;;  %v8168_v58 = vld [vmem:[%s15922_s3 + $0x34b0] sm:$0xff] }
 0x53d   : > { %6302 = vmatpush1.msra.mxu1 %v8204_v60  ;;  %6287 = vmatmul.mubr.f32.vlgmr.msra.gmra.mxu0 %v9913_v52  ;;  %v8196_v52 = vld [vmem:[%s15922_s3 + $0x3590] sm:$0xff]  ;;  %v8165_v60 = vld [vmem:[%s15922_s3 + $0x3498] sm:$0xff] }
 0x53e   : > { %6216 = vmatmul.mubr.f32.gmra.mxu1 %v10423_v3  ;;  %6303 = vmatprep.subr.mxu1 %v8201_v22  ;;  %v8304_v37 = vld [vmem:[%s15922_s3 + $0x38f0] sm:$0xff]  ;;  %v8301_v22 = vld [vmem:[%s15922_s3 + $0x38d8] sm:$0xff] }
 0x53f   : > { %6376 = vmatprep.subr.mxu0 %v8337_v0  ;;  %6292 = vmatprep.mubr.f32.mxu0 %v9925_v16  ;;  %v8329_v16 = vld [vmem:[%s15922_s3 + $0x39b8] sm:$0xff]  ;;  %v8164_v0 = vld [vmem:[%s15922_s3 + $0x3490] sm:$0xff] }
 0x540   : > { %6304 = vmatpush1.msra.mxu1 %v8200_v7  ;;  %6363 = vmatprep.mubr.f32.mxu1 %v9941_v44  ;;  %v8328_v44 = vld [vmem:[%s15922_s3 + $0x39b0] sm:$0xff] }
 0x541   : > { %6377 = vmatpush1.msra.mxu0 %v8336_v38  ;;  %6305 = vmatprep.subr.mxu1 %v8197_v30  ;;  %v8300_v7 = vld [vmem:[%s15922_s3 + $0x38d0] sm:$0xff]  ;;  %v8161_v38 = vld [vmem:[%s15922_s3 + $0x3478] sm:$0xff] }
 0x542   : > { %6378 = vmatprep.subr.mxu0 %v8333_v40  ;;  %6306 = vmatpush1.msra.mxu1 %v8196_v52  ;;  %v8297_v30 = vld [vmem:[%s15922_s3 + $0x38b8] sm:$0xff]  ;;  %v8160_v40 = vld [vmem:[%s15922_s3 + $0x3470] sm:$0xff] }
 0x543   : > { %6379 = vmatpush1.msra.mxu0 %v8332_v15  ;;  %6307 = vmatprep.subr.mxu1 %v8193_v24  ;;  %v8296_v52 = vld [vmem:[%s15922_s3 + $0x38b0] sm:$0xff]  ;;  %v8157_v15 = vld [vmem:[%s15922_s3 + $0x3458] sm:$0xff] }
 0x544   : > { %6293 = vmatmul.mubr.f32.gmra.mxu0 %v9988_v34  ;;  %6380 = vmatprep.subr.mxu0 %v8329_v16  ;;  %v8185_v34 = vld [vmem:[%s15922_s3 + $0x3538] sm:$0xff]  ;;  %v15553_v16 = vpop.f32.mrf.mxu1 }
 0x545   : > { %6308 = vmatpush1.msra.mxu1 %v8192_v21  ;;  %6381 = vmatpush1.msra.mxu0 %v8328_v44  ;;  %v8293_v24 = vld [vmem:[%s15922_s3 + $0x3898] sm:$0xff]  ;;  %v8156_v21 = vld [vmem:[%s15922_s3 + $0x3450] sm:$0xff] }
 0x546   : > { %6440 = vmatprep.mubr.f32.mxu0 %v10018_v28  ;;  %6309 = vmatprep.subr.mxu1 %v8189_v20  ;;  %v8181_v28 = vld [vmem:[%s15922_s3 + $0x3518] sm:$0xff]  ;;  %v8292_v44 = vld [vmem:[%s15922_s3 + $0x3890] sm:$0xff] }
 0x547   : > { %6382 = vmatprep.subr.mxu0 %v8325_v27  ;;  %6310 = vmatpush1.msra.mxu1 %v8188_v62  ;;  %v8153_v20 = vld [vmem:[%s15922_s3 + $0x3438] sm:$0xff]  ;;  %v8152_v62 = vld [vmem:[%s15922_s3 + $0x3430] sm:$0xff] }
 0x548   : > { %6383 = vmatpush1.msra.mxu0 %v8324_v25  ;;  %6311 = vmatprep.subr.mxu1 %v8185_v34  ;;  %v8289_v27 = vld [vmem:[%s15922_s3 + $0x3878] sm:$0xff]  ;;  %v8288_v25 = vld [vmem:[%s15922_s3 + $0x3870] sm:$0xff] }
 0x549   : > { %6384 = vmatprep.subr.mxu0 %v8321_v6  ;;  %6312 = vmatpush1.msra.mxu1 %v8184_v55  ;;  %v8149_v34 = vld [vmem:[%s15922_s3 + $0x3418] sm:$0xff]  ;;  %v15579_v55 = vpop.f32.mrf.mxu1 }
 0x54a   : > { %6385 = vmatpush1.msra.mxu0 %v8320_v63  ;;  %6313 = vmatprep.subr.mxu1 %v8181_v28  ;;  %v8285_v6 = vld [vmem:[%s15922_s3 + $0x3858] sm:$0xff]  ;;  %v8148_v63 = vld [vmem:[%s15922_s3 + $0x3410] sm:$0xff] }
 0x54b   : > { %6386 = vmatprep.subr.mxu0 %v8317_v5  ;;  %6314 = vmatpush1.msra.mxu1 %v8180_v19  ;;  %v8284_v28 = vld [vmem:[%s15922_s3 + $0x3850] sm:$0xff]  ;;  %v15587_v5 = vpop.f32.mrf.mxu0  ;;  %v8273_v19 = vld [vmem:[%s15922_s3 + $0x37f8] sm:$0xff] }
 0x54c   : > { %6387 = vmatpush1.msra.mxu0 %v8316_v41  ;;  %6315 = vmatprep.subr.mxu1 %v8177_v17  ;;  %v8281_v41 = vld [vmem:[%s15922_s3 + $0x3838] sm:$0xff]  ;;  %v8272_v17 = vld [vmem:[%s15922_s3 + $0x37f0] sm:$0xff] }
 0x54d   : > { %6388 = vmatprep.subr.mxu0 %v8313_v43  ;;  %6316 = vmatpush1.msra.mxu1 %v8176_v29  ;;  %v8280_v43 = vld [vmem:[%s15922_s3 + $0x3830] sm:$0xff]  ;;  %v8269_v29 = vld [vmem:[%s15922_s3 + $0x37d8] sm:$0xff] }
 0x54e   : > { %6389 = vmatpush1.msra.mxu0 %v8312_v32  ;;  %6317 = vmatprep.subr.mxu1 %v8173_v2  ;;  %v8277_v32 = vld [vmem:[%s15922_s3 + $0x3818] sm:$0xff]  ;;  %v15607_v2 = vpop.f32.mrf.mxu1 }
 0x54f   : > { %6390 = vmatprep.subr.mxu0 %v8309_v13  ;;  %6318 = vmatpush1.msra.mxu1 %v8172_v12  ;;  %v8268_v13 = vld [vmem:[%s15922_s3 + $0x37d0] sm:$0xff] }
 0x550   : > { %6391 = vmatpush1.msra.mxu0 %v8308_v57  ;;  %6319 = vmatprep.subr.mxu1 %v8169_v10  ;;  %v8276_v12 = vld [vmem:[%s15922_s3 + $0x3810] sm:$0xff]  ;;  %v15615_v57 = vpop.f32.mrf.mxu0  ;;  %v8265_v10 = vld [vmem:[%s15922_s3 + $0x37b8] sm:$0xff] }
 0x551   : > { %6392 = vmatprep.subr.mxu0 %v8305_v1  ;;  %6320 = vmatpush1.msra.mxu1 %v8168_v58  ;;  %v8401_v1 = vld [vmem:[%s15922_s3 + $0x3bf8] sm:$0xff]  ;;  %v8264_v58 = vld [vmem:[%s15922_s3 + $0x37b0] sm:$0xff] }
 0x552   : > { %6393 = vmatpush1.msra.mxu0 %v8304_v37  ;;  %6321 = vmatprep.subr.mxu1 %v8165_v60  ;;  %v8400_v37 = vld [vmem:[%s15922_s3 + $0x3bf0] sm:$0xff]  ;;  %v8261_v60 = vld [vmem:[%s15922_s3 + $0x3798] sm:$0xff] }
 0x553   : > { %6394 = vmatprep.subr.mxu0 %v8301_v22  ;;  %6322 = vmatpush1.msra.mxu1 %v8164_v0  ;;  %v8397_v22 = vld [vmem:[%s15922_s3 + $0x3bd8] sm:$0xff]  ;;  %v15635_v0 = vpop.f32.mrf.mxu1 }
 0x554   : > { %6395 = vmatpush1.msra.mxu0 %v8300_v7  ;;  %6323 = vmatprep.subr.mxu1 %v8161_v38  ;;  %v8260_v7 = vld [vmem:[%s15922_s3 + $0x3790] sm:$0xff] }
 0x555   : > { %6396 = vmatprep.subr.mxu0 %v8297_v30  ;;  %6324 = vmatpush1.msra.mxu1 %v8160_v40  ;;  %v8396_v38 = vld [vmem:[%s15922_s3 + $0x3bd0] sm:$0xff]  ;;  %v15643_v30 = vpop.f32.mrf.mxu0  ;;  %v8257_v40 = vld [vmem:[%s15922_s3 + $0x3778] sm:$0xff] }
 0x556   : > { %6397 = vmatpush1.msra.mxu0 %v8296_v52  ;;  %6325 = vmatprep.subr.mxu1 %v8157_v15  ;;  %v8393_v52 = vld [vmem:[%s15922_s3 + $0x3bb8] sm:$0xff]  ;;  %v15651_v15 = vpop.f32.mrf.mxu1 }
 0x557   : > { %6398 = vmatprep.subr.mxu0 %v8293_v24  ;;  %6326 = vmatpush1.msra.mxu1 %v8156_v21  ;;  %v8256_v24 = vld [vmem:[%s15922_s3 + $0x3770] sm:$0xff] }
 0x558   : > { %6399 = vmatpush1.msra.mxu0 %v8292_v44  ;;  %6327 = vmatprep.subr.mxu1 %v8153_v20  ;;  %v8392_v21 = vld [vmem:[%s15922_s3 + $0x3bb0] sm:$0xff]  ;;  %v8253_v44 = vld [vmem:[%s15922_s3 + $0x3758] sm:$0xff] }
 0x559   : > { %6400 = vmatprep.subr.mxu0 %v8289_v27  ;;  %6328 = vmatpush1.msra.mxu1 %v8152_v62  ;;  %v8389_v20 = vld [vmem:[%s15922_s3 + $0x3b98] sm:$0xff]  ;;  %v8252_v27 = vld [vmem:[%s15922_s3 + $0x3750] sm:$0xff] }
 0x55a   : > { %6401 = vmatpush1.msra.mxu0 %v8288_v25  ;;  %6329 = vmatprep.subr.mxu1 %v8149_v34  ;;  %v8388_v62 = vld [vmem:[%s15922_s3 + $0x3b90] sm:$0xff]  ;;  %v15671_v25 = vpop.f32.mrf.mxu0  ;;  %v8249_v34 = vld [vmem:[%s15922_s3 + $0x3738] sm:$0xff] }
 0x55b   : > { %6402 = vmatprep.subr.mxu0 %v8285_v6  ;;  %6330 = vmatpush1.msra.mxu1 %v8148_v63  ;;  %v8385_v6 = vld [vmem:[%s15922_s3 + $0x3b78] sm:$0xff]  ;;  %v15679_v63 = vpop.f32.mrf.mxu1 }
 0x55c   : > { %6403 = vmatpush1.msra.mxu0 %v8284_v28  ;;  %6331 = vmatprep.subr.mxu1 %v8273_v19  ;;  %v8248_v28 = vld [vmem:[%s15922_s3 + $0x3730] sm:$0xff] }
 0x55d   : > { %6404 = vmatprep.subr.mxu0 %v8281_v41  ;;  %6332 = vmatpush2.msra.mxu1 %v8272_v17  ;;  %v8384_v19 = vld [vmem:[%s15922_s3 + $0x3b70] sm:$0xff]  ;;  %v5433_v41 = vpop.f32.mrf.mxu0  ;;  %v8245_v17 = vld [vmem:[%s15922_s3 + $0x3718] sm:$0xff] }
 0x55e   : > { %6405 = vmatpush1.msra.mxu0 %v8280_v43  ;;  %6333 = vmatprep.subr.mxu1 %v8269_v29  ;;  %v8381_v43 = vld [vmem:[%s15922_s3 + $0x3b58] sm:$0xff]  ;;  %v8244_v29 = vld [vmem:[%s15922_s3 + $0x3710] sm:$0xff] }
 0x55f   : > { %6406 = vmatprep.subr.mxu0 %v8277_v32  ;;  %6334 = vmatpush2.msra.mxu1 %v8268_v13  ;;  %v8380_v32 = vld [vmem:[%s15922_s3 + $0x3b50] sm:$0xff]  ;;  %v8241_v13 = vld [vmem:[%s15922_s3 + $0x36f8] sm:$0xff] }
 0x560   : > { %6407 = vmatpush1.msra.mxu0 %v8276_v12  ;;  %6335 = vmatprep.subr.mxu1 %v8265_v10  ;;  %v8377_v12 = vld [vmem:[%s15922_s3 + $0x3b38] sm:$0xff]  ;;  %v15705_v10 = vpop.f32.mrf.mxu1 }
 0x561   : > { %6408 = vmatprep.subr.mxu0 %v8401_v1  ;;  %6336 = vmatpush2.msra.mxu1 %v8264_v58  ;;  %v8240_v1 = vld [vmem:[%s15922_s3 + $0x36f0] sm:$0xff] }
 0x562   : > { %6409 = vmatpush2.msra.mxu0 %v8400_v37  ;;  %6337 = vmatprep.subr.mxu1 %v8261_v60  ;;  %v8376_v58 = vld [vmem:[%s15922_s3 + $0x3b30] sm:$0xff]  ;;  %v5435_v37 = vpop.f32.mrf.mxu0  ;;  %v8237_v60 = vld [vmem:[%s15922_s3 + $0x36d8] sm:$0xff] }
 0x563   : > { %6410 = vmatprep.subr.mxu0 %v8397_v22  ;;  %6338 = vmatpush2.msra.mxu1 %v8260_v7  ;;  %v8373_v22 = vld [vmem:[%s15922_s3 + $0x3b18] sm:$0xff]  ;;  %v8236_v7 = vld [vmem:[%s15922_s3 + $0x36d0] sm:$0xff] }
 0x564   : > { %6411 = vmatpush2.msra.mxu0 %v8396_v38  ;;  %6339 = vmatprep.subr.mxu1 %v8257_v40  ;;  %v8372_v38 = vld [vmem:[%s15922_s3 + $0x3b10] sm:$0xff]  ;;  %v8233_v40 = vld [vmem:[%s15922_s3 + $0x36b8] sm:$0xff] }
 0x565   : > { %6412 = vmatprep.subr.mxu0 %v8393_v52  ;;  %6340 = vmatpush2.msra.mxu1 %v8256_v24  ;;  %v8369_v52 = vld [vmem:[%s15922_s3 + $0x3af8] sm:$0xff]  ;;  %v15731_v24 = vpop.f32.mrf.mxu1 }
 0x566   : > { %6413 = vmatpush2.msra.mxu0 %v8392_v21  ;;  %6341 = vmatprep.subr.mxu1 %v8253_v44  ;;  %v8232_v21 = vld [vmem:[%s15922_s3 + $0x36b0] sm:$0xff] }
 0x567   : > { %6414 = vmatprep.subr.mxu0 %v8389_v20  ;;  %6342 = vmatpush2.msra.mxu1 %v8252_v27  ;;  %v8368_v44 = vld [vmem:[%s15922_s3 + $0x3af0] sm:$0xff]  ;;  %v5439_v20 = vpop.f32.mrf.mxu0  ;;  %v8229_v27 = vld [vmem:[%s15922_s3 + $0x3698] sm:$0xff] }
 0x568   : > { %6415 = vmatpush2.msra.mxu0 %v8388_v62  ;;  %6343 = vmatprep.subr.mxu1 %v8249_v34  ;;  %v8365_v62 = vld [vmem:[%s15922_s3 + $0x3ad8] sm:$0xff]  ;;  %v8228_v34 = vld [vmem:[%s15922_s3 + $0x3690] sm:$0xff] }
 0x569   : > { %6416 = vmatprep.subr.mxu0 %v8385_v6  ;;  %6344 = vmatpush2.msra.mxu1 %v8248_v28  ;;  %v8364_v6 = vld [vmem:[%s15922_s3 + $0x3ad0] sm:$0xff] }
 0x56a   : > { %6417 = vmatpush2.msra.mxu0 %v8384_v19  ;;  %6345 = vmatprep.subr.mxu1 %v8245_v17  ;;  %v8225_v19 = vld [vmem:[%s15922_s3 + $0x3678] sm:$0xff] }
 0x56b   : > { %6418 = vmatprep.subr.mxu0 %v8381_v43  ;;  %6346 = vmatpush2.msra.mxu1 %v8244_v29  ;;  %v8361_v17 = vld [vmem:[%s15922_s3 + $0x3ab8] sm:$0xff]  ;;  %v8224_v29 = vld [vmem:[%s15922_s3 + $0x3670] sm:$0xff] }
 0x56c   : > { %6419 = vmatpush2.msra.mxu0 %v8380_v32  ;;  %6347 = vmatprep.subr.mxu1 %v8241_v13  ;;  %v8360_v32 = vld [vmem:[%s15922_s3 + $0x3ab0] sm:$0xff] }
 0x56d   : > { %6420 = vmatprep.subr.mxu0 %v8377_v12  ;;  %6348 = vmatpush2.msra.mxu1 %v8240_v1  ;;  %v5441_v12 = vpop.f32.mrf.mxu0  ;;  %v8221_v1 = vld [vmem:[%s15922_s3 + $0x3658] sm:$0xff] }
 0x56e   : > { %6421 = vmatpush2.msra.mxu0 %v8376_v58  ;;  %6349 = vmatprep.subr.mxu1 %v8237_v60  ;;  %v8220_v60 = vld [vmem:[%s15922_s3 + $0x3650] sm:$0xff] }
 0x56f   : > { %6422 = vmatprep.subr.mxu0 %v8373_v22  ;;  %6350 = vmatpush2.msra.mxu1 %v8236_v7  ;;  %v8356_v22 = vld [vmem:[%s15922_s3 + $0x3a90] sm:$0xff]  ;;  %v8217_v7 = vld [vmem:[%s15922_s3 + $0x3638] sm:$0xff] }
 0x570   : > { %6423 = vmatpush2.msra.mxu0 %v8372_v38  ;;  %6351 = vmatprep.subr.mxu1 %v8233_v40  ;;  %v5510_v28 = vpop.f32.mrf.mxu1 }
 0x571   : > { %6424 = vmatprep.subr.mxu0 %v8369_v52  ;;  %6352 = vmatpush2.msra.mxu1 %v8232_v21  ;;  %v5511_v43 = vadd.f32 %v5510_v28, %v5433_v41  ;;  %v8357_v41 = vld [vmem:[%s15922_s3 + $0x3a98] sm:$0xff]  ;;  %v8216_v52 = vld [vmem:[%s15922_s3 + $0x3630] sm:$0xff] }
 0x572   : > { %6425 = vmatpush2.msra.mxu0 %v8368_v44  ;;  %6353 = vmatprep.subr.mxu1 %v8229_v27  ;;  %v5512_v13 = vpop.f32.mrf.mxu1  ;;  %v8352_v21 = vld [vmem:[%s15922_s3 + $0x3a70] sm:$0xff] }
 0x573   : > { %6426 = vmatprep.subr.mxu0 %v8365_v62  ;;  %6354 = vmatpush2.msra.mxu1 %v8228_v34  ;;  %v5513_v58 = vadd.f32 %v5512_v13, %v5435_v37  ;;  %v8353_v37 = vld [vmem:[%s15922_s3 + $0x3a78] sm:$0xff]  ;;  %v8344_v13 = vld [vmem:[%s15922_s3 + $0x3a30] sm:$0xff] }
 0x574   : > { %6427 = vmatpush2.msra.mxu0 %v8364_v6  ;;  %6355 = vmatprep.subr.mxu1 %v8225_v19  ;;  %v8213_v62 = vld [vmem:[%s15922_s3 + $0x3618] sm:$0xff]  ;;  %v8212_v19 = vld [vmem:[%s15922_s3 + $0x3610] sm:$0xff] }
 0x575   : > { %6428 = vmatprep.subr.mxu0 %v8361_v17  ;;  %6356 = vmatpush2.msra.mxu1 %v8224_v29  ;;  %v5587_v40 = vpop.f32.mrf.mxu0  ;;  %v8349_v34 = vld [vmem:[%s15922_s3 + $0x3a58] sm:$0xff] }
 0x576   : > { %6429 = vmatpush2.msra.mxu0 %v8360_v32  ;;  %v5516_v38 = vpop.f32.mrf.mxu1  ;;  %6357 = vmatprep.subr.mxu1 %v8221_v1  ;;  %v5588_v27 = vadd.f32 %v5587_v40, %v5511_v43  ;;  %v8345_v32 = vld [vmem:[%s15922_s3 + $0x3a38] sm:$0xff] }
 0x577   : > { %6430 = vmatprep.subr.mxu0 %v8357_v41  ;;  %v5517_v44 = vadd.f32 %v5516_v38, %v5439_v20  ;;  %6358 = vmatpush2.msra.mxu1 %v8220_v60  ;;  %v5589_v28 = vpop.f32.mrf.mxu0  ;;  %v8348_v20 = vld [vmem:[%s15922_s3 + $0x3a50] sm:$0xff]  ;;  %v4384_v38 = vadd.f32 %v14403_v50, %v14367_v18 }
 0x578   : > { %6431 = vmatpush2.msra.mxu0 %v8356_v22  ;;  %v5518_v6 = vpop.f32.mrf.mxu1  ;;  %6359 = vmatprep.subr.mxu1 %v8217_v7  ;;  %v15800_v17 = vadd.f32 %v5588_v27, %v14588_v36  ;;  %v5590_v29 = vadd.f32 %v5589_v28, %v5513_v58  ;;  %v8341_v36 = vld [vmem:[%s15922_s3 + $0x3a18] sm:$0xff]  ;;  %v8340_v41 = vld [vmem:[%s15922_s3 + $0x3a10] sm:$0xff] }
 0x579   : > { %6432 = vmatprep.subr.mxu0 %v8353_v37  ;;  %v5519_v43 = vadd.f32 %v5518_v6, %v5441_v12  ;;  %6360 = vmatpush2.msra.mxu1 %v8216_v52  ;;  %v5282_v52 = vadd.f32 %v15615_v57, %v15579_v55 }
 0x57a   : > { %6433 = vmatpush2.msra.mxu0 %v8352_v21  ;;  %6361 = vmatprep.subr.mxu1 %v8213_v62  ;;  %v15809_v1 = vadd.f32 %v5590_v29, %v14597_v47  ;;  %v15962_v62 = vsub.s32 0, %v9448_v45 }
 0x57b   : > { %6434 = vmatprep.subr.mxu0 %v8349_v34  ;;  %6362 = vmatpush2.msra.mxu1 %v8212_v19 }
 0x57c   : > { %6435 = vmatpush2.msra.mxu0 %v8348_v20  ;;  %v5593_v12 = vpop.f32.mrf.mxu0  ;;  %6364 = vmatmul.mubr.f32.vlgmr.msra.gmra.mxu1 %v9961_v42 }
 0x57d   : > { %6436 = vmatprep.subr.mxu0 %v8345_v32  ;;  %v5594_v58 = vadd.f32 %v5593_v12, %v5517_v44  ;;  %6369 = vmatprep.mubr.f32.mxu1 %v9985_v31 }
 0x57e   : > { %6437 = vmatpush2.msra.mxu0 %v8344_v13  ;;  %v5595_v47 = vpop.f32.mrf.mxu0 }
 0x57f   : > { %6438 = vmatprep.subr.mxu0 %v8341_v36  ;;  %v15820_v60 = vadd.f32 %v5594_v58, %v14620_v33  ;;  %v5596_v22 = vadd.f32 %v5595_v47, %v5519_v43  ;;  %v4382_v33 = vadd.f32 %v14375_v14, %v14341_v49  ;;  %v4390_v49 = vadd.f32 %v14459_v26, %v14423_v8 }
 0x580   : > { %6439 = vmatpush2.msra.mxu0 %v8340_v41  ;;  %6370 = vmatmul.mubr.f32.gmra.mxu1 %v9982_v46 }
 0x581   : > { %6441 = vmatmul.mubr.f32.vlgmr.msra.gmra.mxu0 %v10370_v9  ;;  %v15825_v42 = vadd.f32 %v5596_v22, %v14632_v23  ;;  %v4459_v9 = vadd.f32 %v14439_v56, %v4382_v33  ;;  %v4461_v23 = vadd.f32 %v14467_v48, %v4384_v38  ;;  %v5286_v56 = vadd.f32 %v15643_v30, %v15607_v2 }
 0x582   : > { %6446 = vmatprep.mubr.f32.mxu0 %v10394_v4  ;;  %v5280_v4 = vadd.f32 %v15587_v5, %v15553_v16  ;;  %v5359_v48 = vadd.f32 %v15679_v63, %v5282_v52  ;;  %v4467_v57 = vadd.f32 %v14519_v35, %v4390_v49  ;;  %v5288_v2 = vadd.f32 %v15671_v25, %v15635_v0 }
 0x583   : > { %v5363_v8 = vadd.f32 %v15705_v10, %v5286_v56  ;;  %v15963_v25 = vsub.s32 1, %v9448_v45 }
 0x584   : > { %v5357_v18 = vadd.f32 %v15651_v15, %v5280_v4  ;;  %v5365_v35 = vadd.f32 %v15731_v24, %v5288_v2  ;;  %v4705_v6 = vadd.f32 %v4467_v57, %v12892_v54  ;;  %v15964_v57 = vsub.s32 2, %v9448_v45 }
 0x585   : > { %6447 = vmatmul.mubr.f32.gmra.mxu0 %v10423_v3  ;;  %v4388_v3 = vadd.f32 %v14431_v61, %v14395_v11  ;;  %v4700_v11 = vadd.f32 %v4459_v9, %v12837_v51  ;;  %v4701_v61 = vadd.f32 %v4461_v23, %v12852_v39 }
 0x586   : > { %v5603_v32 = vadd.f32 %v5365_v35, %v4705_v6 }
 0x587   : > { %v4465_v50 = vadd.f32 %v14493_v53, %v4388_v3  ;;  %v6461_v53 = vld [vmem:[%s15923_s4] sm:$0xf]  ;;  %v5598_v30 = vadd.f32 %v5357_v18, %v4700_v11  ;;  %v5599_v21 = vadd.f32 %v5359_v48, %v4701_v61 }
 0x588   : > { %v6466_v34 = vrot.slane %v6461_v53, %v15962_v62  ;;  %v6470_v43 = vrot.slane %v6461_v53, %v15963_v25 }
 0x589   : > { %v4704_v51 = vadd.f32 %v4465_v50, %v12873_v59 }
 0x58b   : > { %v5602_v28 = vadd.f32 %v5363_v8, %v4704_v51  ;;  %v6474_v8 = vrot.slane %v6461_v53, %v15964_v57 }
 0x5b4   : > { %v6057_v31 = vpop.f32.mrf.mxu1 }
 0x5b6   : > { %v6059_v7 = vpop.f32.mrf.mxu1 }
 0x5b9   : > { %v6134_v37 = vpop.f32.mrf.mxu0 }
 0x5ba   : > { %v6063_v40 = vpop.f32.mrf.mxu1  ;;  %v6135_v16 = vadd.f32 %v6134_v37, %v6057_v31 }
 0x5bb   : > { %v6136_v46 = vpop.f32.mrf.mxu0 }
 0x5bc   : > { %v6065_v14 = vpop.f32.mrf.mxu1  ;;  %v6137_v26 = vadd.f32 %v6136_v46, %v6059_v7 }
 0x5c0   : > { %v6140_v5 = vpop.f32.mrf.mxu0 }
 0x5c1   : > { %v6141_v27 = vadd.f32 %v6140_v5, %v6063_v40 }
 0x5c2   : > { %v6142_v39 = vpop.f32.mrf.mxu0 }
 0x5c3   : > { %v6143_v20 = vadd.f32 %v6142_v39, %v6065_v14 }
 0x5f8   : > { %v6211_v55 = vpop.f32.mrf.mxu1 }
 0x5f9   : > { %v6212_v15 = vadd.f32 %v6211_v55, %v6135_v16 }
 0x5fa   : > { %v6213_v63 = vpop.f32.mrf.mxu1 }
 0x5fb   : > { %v6214_v44 = vadd.f32 %v6213_v63, %v6137_v26  ;;  %v6453_v10 = vadd.f32 %v6212_v15, %v5598_v30  ;;  %v15965_v63 = vsub.s32 3, %v9448_v45 }
 0x5fd   : > { %v6454_v0 = vadd.f32 %v6214_v44, %v5599_v21  ;;  %v6483_v13 = vadd.f32 %v6466_v34, %v6453_v10  ;;  %v6288_v23 = vpop.f32.mrf.mxu0  ;;  %v6478_v51 = vrot.slane %v6461_v53, %v15965_v63 }
 0x5fe   : > { %v6217_v19 = vpop.f32.mrf.mxu1 }
 0x5ff   : > { %v6218_v59 = vadd.f32 %v6217_v19, %v6141_v27  ;;  %v6484_v12 = vadd.f32 %v6470_v43, %v6454_v0  ;;  %v6499_v47 = vrot.slane %v6483_v13, 2  ;;  %v6290_v4 = vpop.f32.mrf.mxu0 }
 0x600   : > { %v6219_v29 = vpop.f32.mrf.mxu1 }
 0x601   : > { %v6457_v36 = vadd.f32 %v6218_v59, %v5602_v28  ;;  %v6220_v24 = vadd.f32 %v6219_v29, %v6143_v20  ;;  %v6502_v54 = vrot.slane %v6484_v12, 2 }
 0x603   : > { %v6487_v41 = vadd.f32 %v6466_v34, %v6457_v36  ;;  %v6458_v58 = vadd.f32 %v6220_v24, %v5603_v32 }
 0x604   : > { %v6294_v3 = vpop.f32.mrf.mxu0 }
 0x605   : > { %v6488_v22 = vadd.f32 %v6470_v43, %v6458_v58  ;;  %v6500_v31 = vrot.slane %v6487_v41, 2 }
 0x606   : > { %v6296_v49 = vpop.f32.mrf.mxu0 }
 0x607   : > { %v15864_v7 = vmax.f32 %v6487_v41, %v6500_v31  ;;  %v6503_v37 = vrot.slane %v6488_v22, 2  ;;  %v6501_v33 = vsel %vm863_vm4, %v6499_v47, %v6500_v31 }
 0x608   : > { %v6519_v38 = vmax.f32 %v6483_v13, %v6501_v33 }
 0x609   : > { %6543 = vrot.lane.b32.xlu0 %v15864_v7, %s8473_s16  ;;  %v15869_v40 = vmax.f32 %v6488_v22, %v6503_v37  ;;  %v6504_v46 = vsel %vm863_vm4, %v6502_v54, %v6503_v37 }
 0x60a   : > { %v6520_v9 = vmax.f32 %v6484_v12, %v6504_v46 }
 0x60b   : > { %6545 = vrot.lane.b32.xlu1 %v15869_v40, %s8473_s16 }
 0x60d   : > { %6535 = vrot.lane.b32.xlu0 %v6519_v38, %s8473_s16 }
 0x60f   : > { %6537 = vrot.lane.b32.xlu1 %v6520_v9, %s8473_s16 }
 0x63c   : > { %v6365_v52 = vpop.f32.mrf.mxu1 }
 0x63d   : > { %v6366_v14 = vadd.f32 %v6365_v52, %v6288_v23 }
 0x63e   : > { %v6367_v18 = vpop.f32.mrf.mxu1 }
 0x63f   : > { %v6368_v48 = vadd.f32 %v6367_v18, %v6290_v4 }
 0x640   : > { %v6371_v50 = vpop.f32.mrf.mxu1 }
 0x641   : > { %v6442_v56 = vpop.f32.mrf.mxu0  ;;  %v6372_v61 = vadd.f32 %v6371_v50, %v6294_v3 }
 0x642   : > { %v6443_v16 = vadd.f32 %v6442_v56, %v6366_v14  ;;  %v6373_v5 = vpop.f32.mrf.mxu1 }
 0x643   : > { %v6444_v11 = vpop.f32.mrf.mxu0  ;;  %v6374_v2 = vadd.f32 %v6373_v5, %v6296_v49 }
 0x644   : > { %v6455_v55 = vadd.f32 %v6443_v16, %v15800_v17  ;;  %v6445_v26 = vadd.f32 %v6444_v11, %v6368_v48 }
 0x645   : > { %v6448_v15 = vpop.f32.mrf.mxu0 }
 0x646   : > { %v6456_v30 = vadd.f32 %v6445_v26, %v15809_v1  ;;  %v6449_v21 = vadd.f32 %v6448_v15, %v6372_v61  ;;  %v6485_v44 = vadd.f32 %v6474_v8, %v6455_v55 }
 0x647   : > { %v6450_v39 = vpop.f32.mrf.mxu0 }
 0x648   : > { %v6459_v35 = vadd.f32 %v6449_v21, %v15820_v60  ;;  %v6451_v27 = vadd.f32 %v6450_v39, %v6374_v2  ;;  %v6486_v10 = vadd.f32 %v6478_v51, %v6456_v30  ;;  %v6505_v34 = vrot.slane %v6485_v44, 2 }
 0x64a   : > { %v6489_v62 = vadd.f32 %v6474_v8, %v6459_v35  ;;  %v6460_v17 = vadd.f32 %v6451_v27, %v15825_v42  ;;  %v6508_v19 = vrot.slane %v6486_v10, 2 }
 0x64c   : > { %v6506_v6 = vrot.slane %v6489_v62, 2  ;;  %v6490_v28 = vadd.f32 %v6478_v51, %v6460_v17 }
 0x64e   : > { %v6509_v20 = vrot.slane %v6490_v28, 2  ;;  %v6507_v1 = vsel %vm863_vm4, %v6505_v34, %v6506_v6  ;;  %v6525_v60 = vmax.f32 %v6489_v62, %v6506_v6 }
 0x64f   : > { %v6521_v0 = vmax.f32 %v6485_v44, %v6507_v1 }
 0x650   : > { %v6510_v45 = vsel %vm863_vm4, %v6508_v19, %v6509_v20  ;;  %v6526_v25 = vmax.f32 %v6490_v28, %v6509_v20 }
 0x651   : > { %6539 = vrot.lane.b32.xlu0 %v6521_v0, %s8473_s16  ;;  %v6522_v53 = vmax.f32 %v6486_v10, %v6510_v45 }
 0x653   : > { %6541 = vrot.lane.b32.xlu1 %v6522_v53, %s8473_s16 }
 0x655   : > { %6547 = vrot.lane.b32.xlu0 %v6525_v60, %s8473_s16 }
 0x657   : > { %6549 = vrot.lane.b32.xlu1 %v6526_v25, %s8473_s16  ;;  %s8405_s16 = sshll.u32 %s15967_s19, 4 }
 0x658   : > { %s224_s21 = scalar_lea.vmem %s15924_s5, %s8405_s16 }
 0x67b   : > { %v6544_v43 = vpop.permute.xlu0 %6543 }
 0x67d   : > { %v6546_v42 = vpop.permute.xlu1 %6545 }
 0x67e   : > { %v6554_v36 = vsel %vm2003_vm5, %v6544_v43, %v6546_v42 }
 0x67f   : > { %v6536_v29 = vpop.permute.xlu0 %6535  ;;  %v6571_v41 = vmax.f32 %v15864_v7, %v6554_v36 }
 0x681   : > { %v6538_v59 = vpop.permute.xlu1 %6537  ;;  %v6591_v23 = vrot.slane %v6571_v41, 6 }
 0x682   : > { %v6551_v32 = vsel %vm2003_vm5, %v6536_v29, %v6538_v59 }
 0x683   : > { %v6567_v13 = vmax.f32 %v6519_v38, %v6551_v32 }
 0x685   : > { %v6579_v24 = vrot.slane %v6567_v13, 3 }
 0x687   : > { %v6608_v37 = vsel %vm6607_vm7, %v6567_v13, %v6579_v24 }
 0x688   : > { %v6612_v49 = vsel %vm5093_vm6, %v6608_v37, %v6591_v23 }
 0x6c3   : > { %v6540_v12 = vpop.permute.xlu0 %6539 }
 0x6c4   : > { %v6552_v58 = vsel %vm2003_vm5, %v6538_v59, %v6540_v12 }
 0x6c5   : > { %v6568_v47 = vmax.f32 %v6520_v9, %v6552_v58  ;;  %v6542_v22 = vpop.permute.xlu1 %6541  ;;  %v6599_v9 = vrot.slane %v6571_v41, 1 }
 0x6c6   : > { %v6553_v31 = vsel %vm2003_vm5, %v6540_v12, %v6542_v22  ;;  %v6565_v54 = vsel %vm2003_vm5, %v6542_v22, %v6522_v53 }
 0x6c7   : > { %v6569_v33 = vmax.f32 %v6521_v0, %v6553_v31  ;;  %v6570_v38 = vmax.f32 %v6522_v53, %v6565_v54  ;;  %v6548_v46 = vpop.permute.xlu0 %6547  ;;  %v6580_v4 = vrot.slane %v6568_v47, 3 }
 0x6c8   : > { %v6555_v3 = vsel %vm2003_vm5, %v6546_v42, %v6548_v46 }
 0x6c9   : > { %v6572_v7 = vmax.f32 %v15869_v40, %v6555_v3  ;;  %v6550_v52 = vpop.permute.xlu1 %6549  ;;  %v6581_v50 = vrot.slane %v6569_v33, 3  ;;  %v6582_v56 = vrot.slane %v6570_v38, 3  ;;  %v6609_v5 = vsel %vm6607_vm7, %v6568_v47, %v6580_v4 }
 0x6ca   : > { %v6556_v18 = vsel %vm2003_vm5, %v6548_v46, %v6550_v52  ;;  %v6566_v14 = vsel %vm2003_vm5, %v6550_v52, %v6526_v25  ;;  %v6617_v40 = vsel %vm6616_vm8, %v6612_v49, %v6599_v9 }
 0x6cb   : > { %v6592_v48 = vrot.slane %v6572_v7, 6  ;;  %v6600_v16 = vrot.slane %v6572_v7, 1  ;;  %v6573_v11 = vmax.f32 %v6525_v60, %v6556_v18  ;;  %v6574_v61 = vmax.f32 %v6526_v25, %v6566_v14 }
 0x6cc   : > { %v6610_v2 = vsel %vm6607_vm7, %v6569_v33, %v6581_v50  ;;  %v6611_v30 = vsel %vm6607_vm7, %v6570_v38, %v6582_v56 }
 0x6cd   : > { %v6613_v55 = vsel %vm5093_vm6, %v6609_v5, %v6592_v48  ;;  %v6593_v8 = vrot.slane %v6573_v11, 6  ;;  %v6594_v26 = vrot.slane %v6574_v61, 6  ;;  %v6601_v15 = vrot.slane %v6573_v11, 1 }
 0x6ce   : > { %v6618_v57 = vsel %vm6616_vm8, %v6613_v55, %v6600_v16  ;;  %v6602_v51 = vrot.slane %v6574_v61, 1 }
 0x6cf   : > { %v6625_v63 = vcombine.low %v6617_v40, %v6618_v57  ;;  %v6614_v21 = vsel %vm5093_vm6, %v6610_v2, %v6593_v8  ;;  %v6615_v39 = vsel %vm5093_vm6, %v6611_v30, %v6594_v26 }
 0x6d0   : > { %v6619_v44 = vsel %vm6616_vm8, %v6614_v21, %v6601_v15  ;;  %v6620_v35 = vsel %vm6616_vm8, %v6615_v39, %v6602_v51 }
 0x6d1   : > { %6629 = vst [vmem:[%s224_s21] sm:$0xff] %v6625_v63  ;;  %v6626_v27 = vcombine.low %v6619_v44, %v6620_v35 }
 0x6d3   : > { %6630 = vst [vmem:[%s224_s21 + $0x8] sm:$0xff] %v6626_v27 }
 0x6d4 PF: > { %s15_s18 = sadd.s32 1, %s8470_s18  }
 0x6d5   : > { %p12_p4 = scmp.ge.s32.totalorder %s15_s18, 4  }
 0x6d7   :  { %14 = sbr.rel (!%p12_p4) target bundleno = 1 (0x1), region = 78 }

</bundles_post_ra>
